<compile_context>
chip_gen: v6e
topology: v6e:2x2x1
jax: 0.10.0
libtpu: 0.0.40
codegen_flags: <defaults>
</compile_context>

<pallas_src>
import functools

import jax
import jax.numpy as jnp
from jax.experimental import pallas as pl
from jax.experimental.pallas import tpu as pltpu


# Column at which the "real" image starts inside the zero-padded VMEM scratch.
# Using 8 (instead of 1) keeps the interior store sublane-aligned; the 3x3 taps
# read at offsets _PAD_COL-1 .. _PAD_COL+1 (cheap shifted loads).
_PAD_COL = 8


def _fused_midas_kernel(x_ref, w1_ref, b1_ref, w2_ref, b2_ref, w3_ref, b3_ref,
                        wh_ref, bh_ref, pool_ref, up_ref,
                        o_ref,
                        pad1, col1, pad2, col2, pad3, col3,
                        *, H, W):
    """Whole reduced-MidasNet forward for one batch element.

    All intermediates stay in VMEM; HBM traffic per grid step is one bf16
    input image and one f32 output map.
    """
    Hh, Wh = H // 2, W // 2
    f32 = jnp.float32
    bf16 = jnp.bfloat16

    def conv3x3(pad_ref, col_ref, w_ref, b_ref, hh, ww, cin):
        # im2col: 9 shifted (hh*ww, cin) patches laid side-by-side along lanes,
        # then a single MXU matmul with K = 9*cin.
        for t in range(9):
            kh, kw = divmod(t, 3)
            c0 = _PAD_COL - 1 + kw
            patch = pad_ref[kh:kh + hh, c0:c0 + ww, :]
            col_ref[:, t * cin:(t + 1) * cin] = patch.reshape(hh * ww, cin)
        acc = jnp.dot(col_ref[...], w_ref[...], preferred_element_type=f32)
        return jnp.maximum(acc + b_ref[...], 0.0)          # f32 epilogue

    # ---- stem: (5->)8 -> 32 channels, 3x3 + ReLU ---------------------------
    pad1[...] = jnp.zeros(pad1.shape, pad1.dtype)
    pad1[1:H + 1, _PAD_COL:_PAD_COL + W, :] = x_ref[0]
    h1 = conv3x3(pad1, col1, w1_ref, b1_ref, H, W, x_ref.shape[-1])   # (H*W, 32)

    # ---- 2x2 average pool: one matmul against a constant 0.25 matrix -------
    h1d = jnp.dot(pool_ref[...], h1.astype(bf16),
                  preferred_element_type=f32)                         # (H/2*W/2, 32)

    # ---- encoder: 32 -> 64 channels, 3x3 + ReLU at half resolution ---------
    pad2[...] = jnp.zeros(pad2.shape, pad2.dtype)
    pad2[1:Hh + 1, _PAD_COL:_PAD_COL + Wh, :] = (
        h1d.astype(bf16).reshape(Hh, Wh, h1d.shape[-1]))
    h2 = conv3x3(pad2, col2, w2_ref, b2_ref, Hh, Wh, pad2.shape[-1])  # (H/2*W/2, 64)

    # ---- nearest 2x upsample: one matmul against a constant 0/1 matrix -----
    h2u = jnp.dot(up_ref[...], h2.astype(bf16),
                  preferred_element_type=f32)                         # (H*W, 64)

    # ---- decoder fusion: 64 -> 32 channels, 3x3 + ReLU ----------------------
    pad3[...] = jnp.zeros(pad3.shape, pad3.dtype)
    pad3[1:H + 1, _PAD_COL:_PAD_COL + W, :] = (
        h2u.astype(bf16).reshape(H, W, h2u.shape[-1]))
    f = conv3x3(pad3, col3, w3_ref, b3_ref, H, W, pad3.shape[-1])     # (H*W, 32)

    # ---- output head folded into the epilogue: 1x1 conv 32 -> 1 + ReLU -----
    # VPU broadcast-multiply + XLU lane reduction (no N=1 MXU matmul).
    proj = jnp.sum(f * wh_ref[...], axis=-1, keepdims=True)           # (H*W, 1)
    out = jnp.maximum(proj + bh_ref[...], 0.0)
    o_ref[...] = out.reshape(1, H * W, 1).astype(o_ref.dtype)


def _pool_and_upsample_matrices(H, W):
    """Constant matrices that turn 2x2 avg-pool / nearest 2x upsample into matmuls."""
    Hh, Wh = H // 2, W // 2
    src = jnp.arange(H * W)
    si, sj = src // W, src % W
    dst = jnp.arange(Hh * Wh)
    di, dj = dst // Wh, dst % Wh
    match = (si[:, None] // 2 == di[None, :]) & (sj[:, None] // 2 == dj[None, :])
    up_mat = match.astype(jnp.bfloat16)                                   # (H*W, Hh*Wh)
    pool_mat = (match.T.astype(jnp.float32) * 0.25).astype(jnp.bfloat16)  # (Hh*Wh, H*W)
    return pool_mat, up_mat


def init_params(key, in_ch=5, feat=32):
    """Deterministic synthetic weights (the real checkpoint is unavailable)."""
    def conv_init(k, cin, cout):
        w = jax.random.normal(k, (3, 3, cin, cout), jnp.float32) * (1.0 / jnp.sqrt(9.0 * cin))
        b = jnp.zeros((cout,), jnp.float32)
        return w, b

    k1, k2, k3, k4 = jax.random.split(key, 4)
    head_w = jax.random.normal(k4, (feat,), jnp.float32) * (1.0 / jnp.sqrt(float(feat)))
    head_b = jnp.zeros((1,), jnp.float32)
    return {
        "enc1": conv_init(k1, in_ch, feat),        # stem: 5 -> 32
        "enc2": conv_init(k2, feat, 2 * feat),     # encoder: 32 -> 64 (half res)
        "fuse": conv_init(k3, 2 * feat, feat),     # decoder fusion: 64 -> 32
        "head": (head_w, head_b),                  # output head: 1x1, 32 -> 1, ReLU
    }


def ordinal_forward(params, img_nchw):
    """(B, 5, H, W) NCHW float input -> (B, H, W) non-negative map."""
    B, Cin, H, W = img_nchw.shape
    assert H % 2 == 0 and W % 2 == 0
    Hh, Wh = H // 2, W // 2
    C0 = 8            # stem channels padded 5 -> 8 (sublane/MXU friendly, esp. v5e)
    C1, C2 = 32, 64

    # Boundary layout plumbing only: NCHW -> NHWC, pad stem channels to 8,
    # bf16 activations into the kernel.  No spatial halo pad here -- the halo
    # is built inside the kernel in VMEM.
    x = jnp.transpose(img_nchw, (0, 2, 3, 1)).astype(jnp.float32)
    x = jnp.pad(x, ((0, 0), (0, 0), (0, 0), (0, C0 - Cin))).astype(jnp.bfloat16)

    def conv_w(w, cin_pad=None):
        if cin_pad is not None and w.shape[2] < cin_pad:
            w = jnp.pad(w, ((0, 0), (0, 0), (0, cin_pad - w.shape[2]), (0, 0)))
        kh, kw, ci, co = w.shape
        return w.reshape(kh * kw * ci, co).astype(jnp.bfloat16)

    w1 = conv_w(params["enc1"][0], cin_pad=C0)                        # (72, 32)
    b1 = params["enc1"][1].reshape(1, C1).astype(jnp.float32)
    w2 = conv_w(params["enc2"][0])                                    # (288, 64)
    b2 = params["enc2"][1].reshape(1, C2).astype(jnp.float32)
    w3 = conv_w(params["fuse"][0])                                    # (576, 32)
    b3 = params["fuse"][1].reshape(1, C1).astype(jnp.float32)
    wh = params["head"][0].reshape(1, C1).astype(jnp.float32)
    bh = params["head"][1].reshape(1, 1).astype(jnp.float32)

    pool_mat, up_mat = _pool_and_upsample_matrices(H, W)

    def rep2(shape):
        return pl.BlockSpec(shape, lambda b: (0, 0))

    kernel = functools.partial(_fused_midas_kernel, H=H, W=W)
    out = pl.pallas_call(
        kernel,
        out_shape=jax.ShapeDtypeStruct((B, H * W, 1), jnp.float32),
        grid_spec=pltpu.PrefetchScalarGridSpec(
            num_scalar_prefetch=0,
            grid=(B,),
            in_specs=[
                pl.BlockSpec((1, H, W, C0), lambda b: (b, 0, 0, 0)),  # image
                rep2((9 * C0, C1)), rep2((1, C1)),                    # stem w / b
                rep2((9 * C1, C2)), rep2((1, C2)),                    # encoder w / b
                rep2((9 * C2, C1)), rep2((1, C1)),                    # fusion w / b
                rep2((1, C1)), rep2((1, 1)),                          # head w / b
                rep2((Hh * Wh, H * W)),                               # avg-pool matrix
                rep2((H * W, Hh * Wh)),                               # upsample matrix
            ],
            out_specs=pl.BlockSpec((1, H * W, 1), lambda b: (b, 0, 0)),
            scratch_shapes=[
                pltpu.VMEM((H + 2, W + 16, C0), jnp.bfloat16),        # pad1 (halo)
                pltpu.VMEM((H * W, 9 * C0), jnp.bfloat16),            # im2col stem
                pltpu.VMEM((Hh + 2, Wh + 16, C1), jnp.bfloat16),      # pad2 (halo)
                pltpu.VMEM((Hh * Wh, 9 * C1), jnp.bfloat16),          # im2col encoder
                pltpu.VMEM((H + 2, W + 16, C2), jnp.bfloat16),        # pad3 (halo)
                pltpu.VMEM((H * W, 9 * C2), jnp.bfloat16),            # im2col fusion
            ],
        ),
        compiler_params=pltpu.CompilerParams(
            dimension_semantics=("parallel",),      # batch across TCs (v7x megacore)
            vmem_limit_bytes=32 * 1024 * 1024,      # explicit budget (v7x: 64 MiB phys)
        ),
    )(x, w1, b1, w2, b2, w3, b3, wh, bh, pool_mat, up_mat)

    return out.reshape(B, H, W)


if __name__ == "__main__":
    key = jax.random.PRNGKey(0)
    k_param, k_input = jax.random.split(key)

    params = init_params(k_param)

    # Input matches PyTorch NCHW convention: batch=2, channels=5, 16x16 spatial.
    img = jax.random.normal(k_input, (2, 5, 16, 16), jnp.float32)

    out = jax.block_until_ready(ordinal_forward(params, img))

    assert out.shape == (2, 16, 16), out.shape
    assert out.dtype == jnp.float32
    assert bool(jnp.all(jnp.isfinite(out)))
    assert bool(jnp.all(out >= 0.0))   # non_negative=True final ReLU
    print("KERNEL_OK")
</pallas_src>

<mosaic_0001>
module attributes {stable_mosaic.version = 11 : i64} {
  func.func @_fused_midas_kernel(%arg0: i32, %arg1: memref<1x16x16x8xbf16, #tpu.memory_space<vmem>>, %arg2: memref<72x32xbf16, #tpu.memory_space<vmem>>, %arg3: memref<1x32xf32, #tpu.memory_space<vmem>>, %arg4: memref<288x64xbf16, #tpu.memory_space<vmem>>, %arg5: memref<1x64xf32, #tpu.memory_space<vmem>>, %arg6: memref<576x32xbf16, #tpu.memory_space<vmem>>, %arg7: memref<1x32xf32, #tpu.memory_space<vmem>>, %arg8: memref<1x32xf32, #tpu.memory_space<vmem>>, %arg9: memref<1x1xf32, #tpu.memory_space<vmem>>, %arg10: memref<64x256xbf16, #tpu.memory_space<vmem>>, %arg11: memref<256x64xbf16, #tpu.memory_space<vmem>>, %arg12: memref<1x256x1xf32, #tpu.memory_space<vmem>>, %arg13: memref<18x32x8xbf16, #tpu.memory_space<vmem>>, %arg14: memref<256x72xbf16, #tpu.memory_space<vmem>>, %arg15: memref<10x24x32xbf16, #tpu.memory_space<vmem>>, %arg16: memref<64x288xbf16, #tpu.memory_space<vmem>>, %arg17: memref<18x32x64xbf16, #tpu.memory_space<vmem>>, %arg18: memref<256x576xbf16, #tpu.memory_space<vmem>>) attributes {dimension_semantics = [#tpu.dimension_semantics<parallel>], iteration_bounds = array<i64: 2>, scalar_prefetch = 0 : i64, scratch_operands = 6 : i64, tpu.core_type = #tpu.core_type<tc>, window_params = [{transform_indices = @transform_0, window_bounds = array<i64: 1, 16, 16, 8>}, {pipeline_mode = #tpu.pipeline_mode<synchronous>, transform_indices = @transform_1, window_bounds = array<i64: 72, 32>}, {pipeline_mode = #tpu.pipeline_mode<synchronous>, transform_indices = @transform_2, window_bounds = array<i64: 1, 32>}, {pipeline_mode = #tpu.pipeline_mode<synchronous>, transform_indices = @transform_3, window_bounds = array<i64: 288, 64>}, {pipeline_mode = #tpu.pipeline_mode<synchronous>, transform_indices = @transform_4, window_bounds = array<i64: 1, 64>}, {pipeline_mode = #tpu.pipeline_mode<synchronous>, transform_indices = @transform_5, window_bounds = array<i64: 576, 32>}, {pipeline_mode = #tpu.pipeline_mode<synchronous>, transform_indices = @transform_6, window_bounds = array<i64: 1, 32>}, {pipeline_mode = #tpu.pipeline_mode<synchronous>, transform_indices = @transform_7, window_bounds = array<i64: 1, 32>}, {pipeline_mode = #tpu.pipeline_mode<synchronous>, transform_indices = @transform_8, window_bounds = array<i64: 1, 1>}, {pipeline_mode = #tpu.pipeline_mode<synchronous>, transform_indices = @transform_9, window_bounds = array<i64: 64, 256>}, {pipeline_mode = #tpu.pipeline_mode<synchronous>, transform_indices = @transform_10, window_bounds = array<i64: 256, 64>}, {transform_indices = @transform_11, window_bounds = array<i64: 1, 256, 1>}]} {
    %cst = arith.constant 0.000000e+00 : bf16
    %0 = vector.broadcast %cst : bf16 to vector<18x32x8xbf16>
    %c0 = arith.constant 0 : index
    %c0_0 = arith.constant 0 : index
    %c0_1 = arith.constant 0 : index
    %1 = vector.load %arg13[%c0, %c0_0, %c0_1] : memref<18x32x8xbf16, #tpu.memory_space<vmem>>, vector<18x32x8xbf16>
    tpu.vector_store %arg13[%c0, %c0_0, %c0_1], %0 {strides = array<i32>} : memref<18x32x8xbf16, #tpu.memory_space<vmem>>, vector<18x32x8xbf16>,
    %c0_2 = arith.constant 0 : index
    %c0_3 = arith.constant 0 : index
    %c0_4 = arith.constant 0 : index
    %c0_5 = arith.constant 0 : index
    %2 = vector.load %arg1[%c0_2, %c0_3, %c0_4, %c0_5] : memref<1x16x16x8xbf16, #tpu.memory_space<vmem>>, vector<1x16x16x8xbf16>
    %3 = vector.shape_cast %2 : vector<1x16x16x8xbf16> to vector<16x16x8xbf16>
    %c1 = arith.constant 1 : index
    %c8 = arith.constant 8 : index
    %c0_6 = arith.constant 0 : index
    %4 = vector.load %arg13[%c1, %c8, %c0_6] : memref<18x32x8xbf16, #tpu.memory_space<vmem>>, vector<16x16x8xbf16>
    tpu.vector_store %arg13[%c1, %c8, %c0_6], %3 {strides = array<i32>} : memref<18x32x8xbf16, #tpu.memory_space<vmem>>, vector<16x16x8xbf16>,
    %c0_7 = arith.constant 0 : index
    %c7 = arith.constant 7 : index
    %c0_8 = arith.constant 0 : index
    %5 = vector.load %arg13[%c0_7, %c7, %c0_8] : memref<18x32x8xbf16, #tpu.memory_space<vmem>>, vector<16x16x8xbf16>
    %6 = vector.shape_cast %5 : vector<16x16x8xbf16> to vector<256x8xbf16>
    %c0_9 = arith.constant 0 : index
    %c0_10 = arith.constant 0 : index
    %7 = vector.load %arg14[%c0_9, %c0_10] : memref<256x72xbf16, #tpu.memory_space<vmem>>, vector<256x8xbf16>
    tpu.vector_store %arg14[%c0_9, %c0_10], %6 {strides = array<i32>} : memref<256x72xbf16, #tpu.memory_space<vmem>>, vector<256x8xbf16>,
    %c0_11 = arith.constant 0 : index
    %c8_12 = arith.constant 8 : index
    %c0_13 = arith.constant 0 : index
    %8 = vector.load %arg13[%c0_11, %c8_12, %c0_13] : memref<18x32x8xbf16, #tpu.memory_space<vmem>>, vector<16x16x8xbf16>
    %9 = vector.shape_cast %8 : vector<16x16x8xbf16> to vector<256x8xbf16>
    %c0_14 = arith.constant 0 : index
    %c8_15 = arith.constant 8 : index
    %10 = vector.load %arg14[%c0_14, %c8_15] : memref<256x72xbf16, #tpu.memory_space<vmem>>, vector<256x8xbf16>
    tpu.vector_store %arg14[%c0_14, %c8_15], %9 {strides = array<i32>} : memref<256x72xbf16, #tpu.memory_space<vmem>>, vector<256x8xbf16>,
    %c0_16 = arith.constant 0 : index
    %c9 = arith.constant 9 : index
    %c0_17 = arith.constant 0 : index
    %11 = vector.load %arg13[%c0_16, %c9, %c0_17] : memref<18x32x8xbf16, #tpu.memory_space<vmem>>, vector<16x16x8xbf16>
    %12 = vector.shape_cast %11 : vector<16x16x8xbf16> to vector<256x8xbf16>
    %c0_18 = arith.constant 0 : index
    %c16 = arith.constant 16 : index
    %13 = vector.load %arg14[%c0_18, %c16] : memref<256x72xbf16, #tpu.memory_space<vmem>>, vector<256x8xbf16>
    tpu.vector_store %arg14[%c0_18, %c16], %12 {strides = array<i32>} : memref<256x72xbf16, #tpu.memory_space<vmem>>, vector<256x8xbf16>,
    %c1_19 = arith.constant 1 : index
    %c7_20 = arith.constant 7 : index
    %c0_21 = arith.constant 0 : index
    %14 = vector.load %arg13[%c1_19, %c7_20, %c0_21] : memref<18x32x8xbf16, #tpu.memory_space<vmem>>, vector<16x16x8xbf16>
    %15 = vector.shape_cast %14 : vector<16x16x8xbf16> to vector<256x8xbf16>
    %c0_22 = arith.constant 0 : index
    %c24 = arith.constant 24 : index
    %16 = vector.load %arg14[%c0_22, %c24] : memref<256x72xbf16, #tpu.memory_space<vmem>>, vector<256x8xbf16>
    tpu.vector_store %arg14[%c0_22, %c24], %15 {strides = array<i32>} : memref<256x72xbf16, #tpu.memory_space<vmem>>, vector<256x8xbf16>,
    %c1_23 = arith.constant 1 : index
    %c8_24 = arith.constant 8 : index
    %c0_25 = arith.constant 0 : index
    %17 = vector.load %arg13[%c1_23, %c8_24, %c0_25] : memref<18x32x8xbf16, #tpu.memory_space<vmem>>, vector<16x16x8xbf16>
    %18 = vector.shape_cast %17 : vector<16x16x8xbf16> to vector<256x8xbf16>
    %c0_26 = arith.constant 0 : index
    %c32 = arith.constant 32 : index
    %19 = vector.load %arg14[%c0_26, %c32] : memref<256x72xbf16, #tpu.memory_space<vmem>>, vector<256x8xbf16>
    tpu.vector_store %arg14[%c0_26, %c32], %18 {strides = array<i32>} : memref<256x72xbf16, #tpu.memory_space<vmem>>, vector<256x8xbf16>,
    %c1_27 = arith.constant 1 : index
    %c9_28 = arith.constant 9 : index
    %c0_29 = arith.constant 0 : index
    %20 = vector.load %arg13[%c1_27, %c9_28, %c0_29] : memref<18x32x8xbf16, #tpu.memory_space<vmem>>, vector<16x16x8xbf16>
    %21 = vector.shape_cast %20 : vector<16x16x8xbf16> to vector<256x8xbf16>
    %c0_30 = arith.constant 0 : index
    %c40 = arith.constant 40 : index
    %22 = vector.load %arg14[%c0_30, %c40] : memref<256x72xbf16, #tpu.memory_space<vmem>>, vector<256x8xbf16>
    tpu.vector_store %arg14[%c0_30, %c40], %21 {strides = array<i32>} : memref<256x72xbf16, #tpu.memory_space<vmem>>, vector<256x8xbf16>,
    %c2 = arith.constant 2 : index
    %c7_31 = arith.constant 7 : index
    %c0_32 = arith.constant 0 : index
    %23 = vector.load %arg13[%c2, %c7_31, %c0_32] : memref<18x32x8xbf16, #tpu.memory_space<vmem>>, vector<16x16x8xbf16>
    %24 = vector.shape_cast %23 : vector<16x16x8xbf16> to vector<256x8xbf16>
    %c0_33 = arith.constant 0 : index
    %c48 = arith.constant 48 : index
    %25 = vector.load %arg14[%c0_33, %c48] : memref<256x72xbf16, #tpu.memory_space<vmem>>, vector<256x8xbf16>
    tpu.vector_store %arg14[%c0_33, %c48], %24 {strides = array<i32>} : memref<256x72xbf16, #tpu.memory_space<vmem>>, vector<256x8xbf16>,
    %c2_34 = arith.constant 2 : index
    %c8_35 = arith.constant 8 : index
    %c0_36 = arith.constant 0 : index
    %26 = vector.load %arg13[%c2_34, %c8_35, %c0_36] : memref<18x32x8xbf16, #tpu.memory_space<vmem>>, vector<16x16x8xbf16>
    %27 = vector.shape_cast %26 : vector<16x16x8xbf16> to vector<256x8xbf16>
    %c0_37 = arith.constant 0 : index
    %c56 = arith.constant 56 : index
    %28 = vector.load %arg14[%c0_37, %c56] : memref<256x72xbf16, #tpu.memory_space<vmem>>, vector<256x8xbf16>
    tpu.vector_store %arg14[%c0_37, %c56], %27 {strides = array<i32>} : memref<256x72xbf16, #tpu.memory_space<vmem>>, vector<256x8xbf16>,
    %c2_38 = arith.constant 2 : index
    %c9_39 = arith.constant 9 : index
    %c0_40 = arith.constant 0 : index
    %29 = vector.load %arg13[%c2_38, %c9_39, %c0_40] : memref<18x32x8xbf16, #tpu.memory_space<vmem>>, vector<16x16x8xbf16>
    %30 = vector.shape_cast %29 : vector<16x16x8xbf16> to vector<256x8xbf16>
    %c0_41 = arith.constant 0 : index
    %c64 = arith.constant 64 : index
    %31 = vector.load %arg14[%c0_41, %c64] : memref<256x72xbf16, #tpu.memory_space<vmem>>, vector<256x8xbf16>
    tpu.vector_store %arg14[%c0_41, %c64], %30 {strides = array<i32>} : memref<256x72xbf16, #tpu.memory_space<vmem>>, vector<256x8xbf16>,
    %c0_42 = arith.constant 0 : index
    %c0_43 = arith.constant 0 : index
    %32 = vector.load %arg14[%c0_42, %c0_43] : memref<256x72xbf16, #tpu.memory_space<vmem>>, vector<256x72xbf16>
    %c0_44 = arith.constant 0 : index
    %c0_45 = arith.constant 0 : index
    %33 = vector.load %arg2[%c0_44, %c0_45] : memref<72x32xbf16, #tpu.memory_space<vmem>>, vector<72x32xbf16>
    %cst_46 = arith.constant dense<0.000000e+00> : vector<256x32xf32>
    %34 = tpu.matmul %32, %33, %cst_46 {dimension_numbers = #tpu.dot_dimension_numbers<[1], [0], [0], [1], [0, 0, 1, 1], [], []>} : vector<256x72xbf16>, vector<72x32xbf16>, vector<256x32xf32> -> vector<256x32xf32>
    %c0_47 = arith.constant 0 : index
    %c0_48 = arith.constant 0 : index
    %35 = vector.load %arg3[%c0_47, %c0_48] : memref<1x32xf32, #tpu.memory_space<vmem>>, vector<1x32xf32>
    %36 = vector.broadcast %35 : vector<1x32xf32> to vector<256x32xf32>
    %37 = arith.addf %34, %36 : vector<256x32xf32>
    %cst_49 = arith.constant 0.000000e+00 : f32
    %38 = vector.broadcast %cst_49 : f32 to vector<256x32xf32>
    %39 = arith.maximumf %37, %38 : vector<256x32xf32>
    %c0_50 = arith.constant 0 : index
    %c0_51 = arith.constant 0 : index
    %40 = vector.load %arg10[%c0_50, %c0_51] : memref<64x256xbf16, #tpu.memory_space<vmem>>, vector<64x256xbf16>
    %41 = arith.truncf %39 : vector<256x32xf32> to vector<256x32xbf16>
    %cst_52 = arith.constant dense<0.000000e+00> : vector<64x32xf32>
    %42 = tpu.matmul %40, %41, %cst_52 {dimension_numbers = #tpu.dot_dimension_numbers<[1], [0], [0], [1], [0, 0, 1, 1], [], []>} : vector<64x256xbf16>, vector<256x32xbf16>, vector<64x32xf32> -> vector<64x32xf32>
    %cst_53 = arith.constant 0.000000e+00 : bf16
    %43 = vector.broadcast %cst_53 : bf16 to vector<10x24x32xbf16>
    %c0_54 = arith.constant 0 : index
    %c0_55 = arith.constant 0 : index
    %c0_56 = arith.constant 0 : index
    %44 = vector.load %arg15[%c0_54, %c0_55, %c0_56] : memref<10x24x32xbf16, #tpu.memory_space<vmem>>, vector<10x24x32xbf16>
    tpu.vector_store %arg15[%c0_54, %c0_55, %c0_56], %43 {strides = array<i32>} : memref<10x24x32xbf16, #tpu.memory_space<vmem>>, vector<10x24x32xbf16>,
    %45 = arith.truncf %42 : vector<64x32xf32> to vector<64x32xbf16>
    %46 = vector.shape_cast %45 : vector<64x32xbf16> to vector<8x8x32xbf16>
    %c1_57 = arith.constant 1 : index
    %c8_58 = arith.constant 8 : index
    %c0_59 = arith.constant 0 : index
    %47 = vector.load %arg15[%c1_57, %c8_58, %c0_59] : memref<10x24x32xbf16, #tpu.memory_space<vmem>>, vector<8x8x32xbf16>
    tpu.vector_store %arg15[%c1_57, %c8_58, %c0_59], %46 {strides = array<i32>} : memref<10x24x32xbf16, #tpu.memory_space<vmem>>, vector<8x8x32xbf16>,
    %c0_60 = arith.constant 0 : index
    %c7_61 = arith.constant 7 : index
    %c0_62 = arith.constant 0 : index
    %48 = vector.load %arg15[%c0_60, %c7_61, %c0_62] : memref<10x24x32xbf16, #tpu.memory_space<vmem>>, vector<8x8x32xbf16>
    %49 = vector.shape_cast %48 : vector<8x8x32xbf16> to vector<64x32xbf16>
    %c0_63 = arith.constant 0 : index
    %c0_64 = arith.constant 0 : index
    %50 = vector.load %arg16[%c0_63, %c0_64] : memref<64x288xbf16, #tpu.memory_space<vmem>>, vector<64x32xbf16>
    tpu.vector_store %arg16[%c0_63, %c0_64], %49 {strides = array<i32>} : memref<64x288xbf16, #tpu.memory_space<vmem>>, vector<64x32xbf16>,
    %c0_65 = arith.constant 0 : index
    %c8_66 = arith.constant 8 : index
    %c0_67 = arith.constant 0 : index
    %51 = vector.load %arg15[%c0_65, %c8_66, %c0_67] : memref<10x24x32xbf16, #tpu.memory_space<vmem>>, vector<8x8x32xbf16>
    %52 = vector.shape_cast %51 : vector<8x8x32xbf16> to vector<64x32xbf16>
    %c0_68 = arith.constant 0 : index
    %c32_69 = arith.constant 32 : index
    %53 = vector.load %arg16[%c0_68, %c32_69] : memref<64x288xbf16, #tpu.memory_space<vmem>>, vector<64x32xbf16>
    tpu.vector_store %arg16[%c0_68, %c32_69], %52 {strides = array<i32>} : memref<64x288xbf16, #tpu.memory_space<vmem>>, vector<64x32xbf16>,
    %c0_70 = arith.constant 0 : index
    %c9_71 = arith.constant 9 : index
    %c0_72 = arith.constant 0 : index
    %54 = vector.load %arg15[%c0_70, %c9_71, %c0_72] : memref<10x24x32xbf16, #tpu.memory_space<vmem>>, vector<8x8x32xbf16>
    %55 = vector.shape_cast %54 : vector<8x8x32xbf16> to vector<64x32xbf16>
    %c0_73 = arith.constant 0 : index
    %c64_74 = arith.constant 64 : index
    %56 = vector.load %arg16[%c0_73, %c64_74] : memref<64x288xbf16, #tpu.memory_space<vmem>>, vector<64x32xbf16>
    tpu.vector_store %arg16[%c0_73, %c64_74], %55 {strides = array<i32>} : memref<64x288xbf16, #tpu.memory_space<vmem>>, vector<64x32xbf16>,
    %c1_75 = arith.constant 1 : index
    %c7_76 = arith.constant 7 : index
    %c0_77 = arith.constant 0 : index
    %57 = vector.load %arg15[%c1_75, %c7_76, %c0_77] : memref<10x24x32xbf16, #tpu.memory_space<vmem>>, vector<8x8x32xbf16>
    %58 = vector.shape_cast %57 : vector<8x8x32xbf16> to vector<64x32xbf16>
    %c0_78 = arith.constant 0 : index
    %c96 = arith.constant 96 : index
    %59 = vector.load %arg16[%c0_78, %c96] : memref<64x288xbf16, #tpu.memory_space<vmem>>, vector<64x32xbf16>
    tpu.vector_store %arg16[%c0_78, %c96], %58 {strides = array<i32>} : memref<64x288xbf16, #tpu.memory_space<vmem>>, vector<64x32xbf16>,
    %c1_79 = arith.constant 1 : index
    %c8_80 = arith.constant 8 : index
    %c0_81 = arith.constant 0 : index
    %60 = vector.load %arg15[%c1_79, %c8_80, %c0_81] : memref<10x24x32xbf16, #tpu.memory_space<vmem>>, vector<8x8x32xbf16>
    %61 = vector.shape_cast %60 : vector<8x8x32xbf16> to vector<64x32xbf16>
    %c0_82 = arith.constant 0 : index
    %c128 = arith.constant 128 : index
    %62 = vector.load %arg16[%c0_82, %c128] : memref<64x288xbf16, #tpu.memory_space<vmem>>, vector<64x32xbf16>
    tpu.vector_store %arg16[%c0_82, %c128], %61 {strides = array<i32>} : memref<64x288xbf16, #tpu.memory_space<vmem>>, vector<64x32xbf16>,
    %c1_83 = arith.constant 1 : index
    %c9_84 = arith.constant 9 : index
    %c0_85 = arith.constant 0 : index
    %63 = vector.load %arg15[%c1_83, %c9_84, %c0_85] : memref<10x24x32xbf16, #tpu.memory_space<vmem>>, vector<8x8x32xbf16>
    %64 = vector.shape_cast %63 : vector<8x8x32xbf16> to vector<64x32xbf16>
    %c0_86 = arith.constant 0 : index
    %c160 = arith.constant 160 : index
    %65 = vector.load %arg16[%c0_86, %c160] : memref<64x288xbf16, #tpu.memory_space<vmem>>, vector<64x32xbf16>
    tpu.vector_store %arg16[%c0_86, %c160], %64 {strides = array<i32>} : memref<64x288xbf16, #tpu.memory_space<vmem>>, vector<64x32xbf16>,
    %c2_87 = arith.constant 2 : index
    %c7_88 = arith.constant 7 : index
    %c0_89 = arith.constant 0 : index
    %66 = vector.load %arg15[%c2_87, %c7_88, %c0_89] : memref<10x24x32xbf16, #tpu.memory_space<vmem>>, vector<8x8x32xbf16>
    %67 = vector.shape_cast %66 : vector<8x8x32xbf16> to vector<64x32xbf16>
    %c0_90 = arith.constant 0 : index
    %c192 = arith.constant 192 : index
    %68 = vector.load %arg16[%c0_90, %c192] : memref<64x288xbf16, #tpu.memory_space<vmem>>, vector<64x32xbf16>
    tpu.vector_store %arg16[%c0_90, %c192], %67 {strides = array<i32>} : memref<64x288xbf16, #tpu.memory_space<vmem>>, vector<64x32xbf16>,
    %c2_91 = arith.constant 2 : index
    %c8_92 = arith.constant 8 : index
    %c0_93 = arith.constant 0 : index
    %69 = vector.load %arg15[%c2_91, %c8_92, %c0_93] : memref<10x24x32xbf16, #tpu.memory_space<vmem>>, vector<8x8x32xbf16>
    %70 = vector.shape_cast %69 : vector<8x8x32xbf16> to vector<64x32xbf16>
    %c0_94 = arith.constant 0 : index
    %c224 = arith.constant 224 : index
    %71 = vector.load %arg16[%c0_94, %c224] : memref<64x288xbf16, #tpu.memory_space<vmem>>, vector<64x32xbf16>
    tpu.vector_store %arg16[%c0_94, %c224], %70 {strides = array<i32>} : memref<64x288xbf16, #tpu.memory_space<vmem>>, vector<64x32xbf16>,
    %c2_95 = arith.constant 2 : index
    %c9_96 = arith.constant 9 : index
    %c0_97 = arith.constant 0 : index
    %72 = vector.load %arg15[%c2_95, %c9_96, %c0_97] : memref<10x24x32xbf16, #tpu.memory_space<vmem>>, vector<8x8x32xbf16>
    %73 = vector.shape_cast %72 : vector<8x8x32xbf16> to vector<64x32xbf16>
    %c0_98 = arith.constant 0 : index
    %c256 = arith.constant 256 : index
    %74 = vector.load %arg16[%c0_98, %c256] : memref<64x288xbf16, #tpu.memory_space<vmem>>, vector<64x32xbf16>
    tpu.vector_store %arg16[%c0_98, %c256], %73 {strides = array<i32>} : memref<64x288xbf16, #tpu.memory_space<vmem>>, vector<64x32xbf16>,
    %c0_99 = arith.constant 0 : index
    %c0_100 = arith.constant 0 : index
    %75 = vector.load %arg16[%c0_99, %c0_100] : memref<64x288xbf16, #tpu.memory_space<vmem>>, vector<64x288xbf16>
    %c0_101 = arith.constant 0 : index
    %c0_102 = arith.constant 0 : index
    %76 = vector.load %arg4[%c0_101, %c0_102] : memref<288x64xbf16, #tpu.memory_space<vmem>>, vector<288x64xbf16>
    %cst_103 = arith.constant dense<0.000000e+00> : vector<64x64xf32>
    %77 = tpu.matmul %75, %76, %cst_103 {dimension_numbers = #tpu.dot_dimension_numbers<[1], [0], [0], [1], [0, 0, 1, 1], [], []>} : vector<64x288xbf16>, vector<288x64xbf16>, vector<64x64xf32> -> vector<64x64xf32>
    %c0_104 = arith.constant 0 : index
    %c0_105 = arith.constant 0 : index
    %78 = vector.load %arg5[%c0_104, %c0_105] : memref<1x64xf32, #tpu.memory_space<vmem>>, vector<1x64xf32>
    %79 = vector.broadcast %78 : vector<1x64xf32> to vector<64x64xf32>
    %80 = arith.addf %77, %79 : vector<64x64xf32>
    %cst_106 = arith.constant 0.000000e+00 : f32
    %81 = vector.broadcast %cst_106 : f32 to vector<64x64xf32>
    %82 = arith.maximumf %80, %81 : vector<64x64xf32>
    %c0_107 = arith.constant 0 : index
    %c0_108 = arith.constant 0 : index
    %83 = vector.load %arg11[%c0_107, %c0_108] : memref<256x64xbf16, #tpu.memory_space<vmem>>, vector<256x64xbf16>
    %84 = arith.truncf %82 : vector<64x64xf32> to vector<64x64xbf16>
    %cst_109 = arith.constant dense<0.000000e+00> : vector<256x64xf32>
    %85 = tpu.matmul %83, %84, %cst_109 {dimension_numbers = #tpu.dot_dimension_numbers<[1], [0], [0], [1], [0, 0, 1, 1], [], []>} : vector<256x64xbf16>, vector<64x64xbf16>, vector<256x64xf32> -> vector<256x64xf32>
    %cst_110 = arith.constant 0.000000e+00 : bf16
    %86 = vector.broadcast %cst_110 : bf16 to vector<18x32x64xbf16>
    %c0_111 = arith.constant 0 : index
    %c0_112 = arith.constant 0 : index
    %c0_113 = arith.constant 0 : index
    %87 = vector.load %arg17[%c0_111, %c0_112, %c0_113] : memref<18x32x64xbf16, #tpu.memory_space<vmem>>, vector<18x32x64xbf16>
    tpu.vector_store %arg17[%c0_111, %c0_112, %c0_113], %86 {strides = array<i32>} : memref<18x32x64xbf16, #tpu.memory_space<vmem>>, vector<18x32x64xbf16>,
    %88 = arith.truncf %85 : vector<256x64xf32> to vector<256x64xbf16>
    %89 = vector.shape_cast %88 : vector<256x64xbf16> to vector<16x16x64xbf16>
    %c1_114 = arith.constant 1 : index
    %c8_115 = arith.constant 8 : index
    %c0_116 = arith.constant 0 : index
    %90 = vector.load %arg17[%c1_114, %c8_115, %c0_116] : memref<18x32x64xbf16, #tpu.memory_space<vmem>>, vector<16x16x64xbf16>
    tpu.vector_store %arg17[%c1_114, %c8_115, %c0_116], %89 {strides = array<i32>} : memref<18x32x64xbf16, #tpu.memory_space<vmem>>, vector<16x16x64xbf16>,
    %c0_117 = arith.constant 0 : index
    %c7_118 = arith.constant 7 : index
    %c0_119 = arith.constant 0 : index
    %91 = vector.load %arg17[%c0_117, %c7_118, %c0_119] : memref<18x32x64xbf16, #tpu.memory_space<vmem>>, vector<16x16x64xbf16>
    %92 = vector.shape_cast %91 : vector<16x16x64xbf16> to vector<256x64xbf16>
    %c0_120 = arith.constant 0 : index
    %c0_121 = arith.constant 0 : index
    %93 = vector.load %arg18[%c0_120, %c0_121] : memref<256x576xbf16, #tpu.memory_space<vmem>>, vector<256x64xbf16>
    tpu.vector_store %arg18[%c0_120, %c0_121], %92 {strides = array<i32>} : memref<256x576xbf16, #tpu.memory_space<vmem>>, vector<256x64xbf16>,
    %c0_122 = arith.constant 0 : index
    %c8_123 = arith.constant 8 : index
    %c0_124 = arith.constant 0 : index
    %94 = vector.load %arg17[%c0_122, %c8_123, %c0_124] : memref<18x32x64xbf16, #tpu.memory_space<vmem>>, vector<16x16x64xbf16>
    %95 = vector.shape_cast %94 : vector<16x16x64xbf16> to vector<256x64xbf16>
    %c0_125 = arith.constant 0 : index
    %c64_126 = arith.constant 64 : index
    %96 = vector.load %arg18[%c0_125, %c64_126] : memref<256x576xbf16, #tpu.memory_space<vmem>>, vector<256x64xbf16>
    tpu.vector_store %arg18[%c0_125, %c64_126], %95 {strides = array<i32>} : memref<256x576xbf16, #tpu.memory_space<vmem>>, vector<256x64xbf16>,
    %c0_127 = arith.constant 0 : index
    %c9_128 = arith.constant 9 : index
    %c0_129 = arith.constant 0 : index
    %97 = vector.load %arg17[%c0_127, %c9_128, %c0_129] : memref<18x32x64xbf16, #tpu.memory_space<vmem>>, vector<16x16x64xbf16>
    %98 = vector.shape_cast %97 : vector<16x16x64xbf16> to vector<256x64xbf16>
    %c0_130 = arith.constant 0 : index
    %c128_131 = arith.constant 128 : index
    %99 = vector.load %arg18[%c0_130, %c128_131] : memref<256x576xbf16, #tpu.memory_space<vmem>>, vector<256x64xbf16>
    tpu.vector_store %arg18[%c0_130, %c128_131], %98 {strides = array<i32>} : memref<256x576xbf16, #tpu.memory_space<vmem>>, vector<256x64xbf16>,
    %c1_132 = arith.constant 1 : index
    %c7_133 = arith.constant 7 : index
    %c0_134 = arith.constant 0 : index
    %100 = vector.load %arg17[%c1_132, %c7_133, %c0_134] : memref<18x32x64xbf16, #tpu.memory_space<vmem>>, vector<16x16x64xbf16>
    %101 = vector.shape_cast %100 : vector<16x16x64xbf16> to vector<256x64xbf16>
    %c0_135 = arith.constant 0 : index
    %c192_136 = arith.constant 192 : index
    %102 = vector.load %arg18[%c0_135, %c192_136] : memref<256x576xbf16, #tpu.memory_space<vmem>>, vector<256x64xbf16>
    tpu.vector_store %arg18[%c0_135, %c192_136], %101 {strides = array<i32>} : memref<256x576xbf16, #tpu.memory_space<vmem>>, vector<256x64xbf16>,
    %c1_137 = arith.constant 1 : index
    %c8_138 = arith.constant 8 : index
    %c0_139 = arith.constant 0 : index
    %103 = vector.load %arg17[%c1_137, %c8_138, %c0_139] : memref<18x32x64xbf16, #tpu.memory_space<vmem>>, vector<16x16x64xbf16>
    %104 = vector.shape_cast %103 : vector<16x16x64xbf16> to vector<256x64xbf16>
    %c0_140 = arith.constant 0 : index
    %c256_141 = arith.constant 256 : index
    %105 = vector.load %arg18[%c0_140, %c256_141] : memref<256x576xbf16, #tpu.memory_space<vmem>>, vector<256x64xbf16>
    tpu.vector_store %arg18[%c0_140, %c256_141], %104 {strides = array<i32>} : memref<256x576xbf16, #tpu.memory_space<vmem>>, vector<256x64xbf16>,
    %c1_142 = arith.constant 1 : index
    %c9_143 = arith.constant 9 : index
    %c0_144 = arith.constant 0 : index
    %106 = vector.load %arg17[%c1_142, %c9_143, %c0_144] : memref<18x32x64xbf16, #tpu.memory_space<vmem>>, vector<16x16x64xbf16>
    %107 = vector.shape_cast %106 : vector<16x16x64xbf16> to vector<256x64xbf16>
    %c0_145 = arith.constant 0 : index
    %c320 = arith.constant 320 : index
    %108 = vector.load %arg18[%c0_145, %c320] : memref<256x576xbf16, #tpu.memory_space<vmem>>, vector<256x64xbf16>
    tpu.vector_store %arg18[%c0_145, %c320], %107 {strides = array<i32>} : memref<256x576xbf16, #tpu.memory_space<vmem>>, vector<256x64xbf16>,
    %c2_146 = arith.constant 2 : index
    %c7_147 = arith.constant 7 : index
    %c0_148 = arith.constant 0 : index
    %109 = vector.load %arg17[%c2_146, %c7_147, %c0_148] : memref<18x32x64xbf16, #tpu.memory_space<vmem>>, vector<16x16x64xbf16>
    %110 = vector.shape_cast %109 : vector<16x16x64xbf16> to vector<256x64xbf16>
    %c0_149 = arith.constant 0 : index
    %c384 = arith.constant 384 : index
    %111 = vector.load %arg18[%c0_149, %c384] : memref<256x576xbf16, #tpu.memory_space<vmem>>, vector<256x64xbf16>
    tpu.vector_store %arg18[%c0_149, %c384], %110 {strides = array<i32>} : memref<256x576xbf16, #tpu.memory_space<vmem>>, vector<256x64xbf16>,
    %c2_150 = arith.constant 2 : index
    %c8_151 = arith.constant 8 : index
    %c0_152 = arith.constant 0 : index
    %112 = vector.load %arg17[%c2_150, %c8_151, %c0_152] : memref<18x32x64xbf16, #tpu.memory_space<vmem>>, vector<16x16x64xbf16>
    %113 = vector.shape_cast %112 : vector<16x16x64xbf16> to vector<256x64xbf16>
    %c0_153 = arith.constant 0 : index
    %c448 = arith.constant 448 : index
    %114 = vector.load %arg18[%c0_153, %c448] : memref<256x576xbf16, #tpu.memory_space<vmem>>, vector<256x64xbf16>
    tpu.vector_store %arg18[%c0_153, %c448], %113 {strides = array<i32>} : memref<256x576xbf16, #tpu.memory_space<vmem>>, vector<256x64xbf16>,
    %c2_154 = arith.constant 2 : index
    %c9_155 = arith.constant 9 : index
    %c0_156 = arith.constant 0 : index
    %115 = vector.load %arg17[%c2_154, %c9_155, %c0_156] : memref<18x32x64xbf16, #tpu.memory_space<vmem>>, vector<16x16x64xbf16>
    %116 = vector.shape_cast %115 : vector<16x16x64xbf16> to vector<256x64xbf16>
    %c0_157 = arith.constant 0 : index
    %c512 = arith.constant 512 : index
    %117 = vector.load %arg18[%c0_157, %c512] : memref<256x576xbf16, #tpu.memory_space<vmem>>, vector<256x64xbf16>
    tpu.vector_store %arg18[%c0_157, %c512], %116 {strides = array<i32>} : memref<256x576xbf16, #tpu.memory_space<vmem>>, vector<256x64xbf16>,
    %c0_158 = arith.constant 0 : index
    %c0_159 = arith.constant 0 : index
    %118 = vector.load %arg18[%c0_158, %c0_159] : memref<256x576xbf16, #tpu.memory_space<vmem>>, vector<256x576xbf16>
    %c0_160 = arith.constant 0 : index
    %c0_161 = arith.constant 0 : index
    %119 = vector.load %arg6[%c0_160, %c0_161] : memref<576x32xbf16, #tpu.memory_space<vmem>>, vector<576x32xbf16>
    %cst_162 = arith.constant dense<0.000000e+00> : vector<256x32xf32>
    %120 = tpu.matmul %118, %119, %cst_162 {dimension_numbers = #tpu.dot_dimension_numbers<[1], [0], [0], [1], [0, 0, 1, 1], [], []>} : vector<256x576xbf16>, vector<576x32xbf16>, vector<256x32xf32> -> vector<256x32xf32>
    %c0_163 = arith.constant 0 : index
    %c0_164 = arith.constant 0 : index
    %121 = vector.load %arg7[%c0_163, %c0_164] : memref<1x32xf32, #tpu.memory_space<vmem>>, vector<1x32xf32>
    %122 = vector.broadcast %121 : vector<1x32xf32> to vector<256x32xf32>
    %123 = arith.addf %120, %122 : vector<256x32xf32>
    %cst_165 = arith.constant 0.000000e+00 : f32
    %124 = vector.broadcast %cst_165 : f32 to vector<256x32xf32>
    %125 = arith.maximumf %123, %124 : vector<256x32xf32>
    %c0_166 = arith.constant 0 : index
    %c0_167 = arith.constant 0 : index
    %126 = vector.load %arg8[%c0_166, %c0_167] : memref<1x32xf32, #tpu.memory_space<vmem>>, vector<1x32xf32>
    %127 = vector.broadcast %126 : vector<1x32xf32> to vector<256x32xf32>
    %128 = arith.mulf %125, %127 : vector<256x32xf32>
    %cst_168 = arith.constant dense<0.000000e+00> : vector<256xf32>
    %129 = vector.multi_reduction <add>, %128, %cst_168 [1] : vector<256x32xf32> to vector<256xf32>
    %130 = vector.shape_cast %129 : vector<256xf32> to vector<256x1xf32>
    %c0_169 = arith.constant 0 : index
    %c0_170 = arith.constant 0 : index
    %131 = vector.load %arg9[%c0_169, %c0_170] : memref<1x1xf32, #tpu.memory_space<vmem>>, vector<1x1xf32>
    %132 = vector.broadcast %131 : vector<1x1xf32> to vector<256x1xf32>
    %133 = arith.addf %130, %132 : vector<256x1xf32>
    %cst_171 = arith.constant 0.000000e+00 : f32
    %134 = vector.broadcast %cst_171 : f32 to vector<256x1xf32>
    %135 = arith.maximumf %133, %134 : vector<256x1xf32>
    %136 = vector.shape_cast %135 : vector<256x1xf32> to vector<1x256x1xf32>
    %c0_172 = arith.constant 0 : index
    %c0_173 = arith.constant 0 : index
    %c0_174 = arith.constant 0 : index
    %137 = vector.load %arg12[%c0_172, %c0_173, %c0_174] : memref<1x256x1xf32, #tpu.memory_space<vmem>>, vector<1x256x1xf32>
    tpu.vector_store %arg12[%c0_172, %c0_173, %c0_174], %136 {strides = array<i32>} : memref<1x256x1xf32, #tpu.memory_space<vmem>>, vector<1x256x1xf32>,
    return
  }
  func.func @transform_0(%arg0: i32) -> (i32, i32, i32, i32) {
    %c0_i32 = arith.constant 0 : i32
    %c0_i32_0 = arith.constant 0 : i32
    %c0_i32_1 = arith.constant 0 : i32
    %c0_i32_2 = arith.constant 0 : i32
    return %arg0, %c0_i32, %c0_i32_0, %c0_i32_1 : i32, i32, i32, i32
  }
  func.func @transform_1(%arg0: i32) -> (i32, i32) {
    %c0_i32 = arith.constant 0 : i32
    %c0_i32_0 = arith.constant 0 : i32
    %c0_i32_1 = arith.constant 0 : i32
    return %c0_i32, %c0_i32_0 : i32, i32
  }
  func.func @transform_2(%arg0: i32) -> (i32, i32) {
    %c0_i32 = arith.constant 0 : i32
    %c0_i32_0 = arith.constant 0 : i32
    %c0_i32_1 = arith.constant 0 : i32
    return %c0_i32, %c0_i32_0 : i32, i32
  }
  func.func @transform_3(%arg0: i32) -> (i32, i32) {
    %c0_i32 = arith.constant 0 : i32
    %c0_i32_0 = arith.constant 0 : i32
    %c0_i32_1 = arith.constant 0 : i32
    return %c0_i32, %c0_i32_0 : i32, i32
  }
  func.func @transform_4(%arg0: i32) -> (i32, i32) {
    %c0_i32 = arith.constant 0 : i32
    %c0_i32_0 = arith.constant 0 : i32
    %c0_i32_1 = arith.constant 0 : i32
    return %c0_i32, %c0_i32_0 : i32, i32
  }
  func.func @transform_5(%arg0: i32) -> (i32, i32) {
    %c0_i32 = arith.constant 0 : i32
    %c0_i32_0 = arith.constant 0 : i32
    %c0_i32_1 = arith.constant 0 : i32
    return %c0_i32, %c0_i32_0 : i32, i32
  }
  func.func @transform_6(%arg0: i32) -> (i32, i32) {
    %c0_i32 = arith.constant 0 : i32
    %c0_i32_0 = arith.constant 0 : i32
    %c0_i32_1 = arith.constant 0 : i32
    return %c0_i32, %c0_i32_0 : i32, i32
  }
  func.func @transform_7(%arg0: i32) -> (i32, i32) {
    %c0_i32 = arith.constant 0 : i32
    %c0_i32_0 = arith.constant 0 : i32
    %c0_i32_1 = arith.constant 0 : i32
    return %c0_i32, %c0_i32_0 : i32, i32
  }
  func.func @transform_8(%arg0: i32) -> (i32, i32) {
    %c0_i32 = arith.constant 0 : i32
    %c0_i32_0 = arith.constant 0 : i32
    %c0_i32_1 = arith.constant 0 : i32
    return %c0_i32, %c0_i32_0 : i32, i32
  }
  func.func @transform_9(%arg0: i32) -> (i32, i32) {
    %c0_i32 = arith.constant 0 : i32
    %c0_i32_0 = arith.constant 0 : i32
    %c0_i32_1 = arith.constant 0 : i32
    return %c0_i32, %c0_i32_0 : i32, i32
  }
  func.func @transform_10(%arg0: i32) -> (i32, i32) {
    %c0_i32 = arith.constant 0 : i32
    %c0_i32_0 = arith.constant 0 : i32
    %c0_i32_1 = arith.constant 0 : i32
    return %c0_i32, %c0_i32_0 : i32, i32
  }
  func.func @transform_11(%arg0: i32) -> (i32, i32, i32) {
    %c0_i32 = arith.constant 0 : i32
    %c0_i32_0 = arith.constant 0 : i32
    %c0_i32_1 = arith.constant 0 : i32
    return %arg0, %c0_i32, %c0_i32_0 : i32, i32, i32
  }
}

</mosaic_0001>

<bundles_post_ra>
// kernel: tpu_custom_call.1
= control target key start
LH: loop header
LB: loop body
LE: loop exit
PB: predicated region body
PF: predicated region fallthrough
CT: control target
= control target key end

     0   :  { %s13271_s19 = smov 0   ;;  %s18039_s0 = inlined_call_operand.vmem [shape: bf16[2,16,16,8], index: 0, kind: input, shape index: {}]   ;;  %s18040_s1 = inlined_call_operand.vmem [shape: bf16[72,32], index: 1, kind: input, shape index: {}]   ;;  %s18041_s2 = inlined_call_operand.vmem [shape: f32[1,32], index: 2, kind: input, shape index: {}]   ;;  %s18042_s3 = inlined_call_operand.vmem [shape: bf16[288,64], index: 3, kind: input, shape index: {}]   ;;  %s18043_s4 = inlined_call_operand.vmem [shape: f32[1,64], index: 4, kind: input, shape index: {}]   ;;  %s18044_s5 = inlined_call_operand.vmem [shape: bf16[576,32], index: 5, kind: input, shape index: {}]   ;;  %s18045_s6 = inlined_call_operand.vmem [shape: f32[1,32], index: 6, kind: input, shape index: {}]   ;;  %s18046_s7 = inlined_call_operand.vmem [shape: f32[1,32], index: 7, kind: input, shape index: {}]   ;;  %s18047_s8 = inlined_call_operand.<no memory space> [shape: f32[1,1], index: 8, kind: input, shape index: {}]   ;;  %s18048_s9 = inlined_call_operand.vmem [shape: bf16[64,256], index: 9, kind: input, shape index: {}]   ;;  %s18049_s10 = inlined_call_operand.vmem [shape: bf16[256,64], index: 10, kind: input, shape index: {}]   ;;  %s18050_s11 = inlined_call_operand.vmem [shape: f32[2,256,1], index: 11, kind: output, shape index: {}]  }
   0x1   :  { %v16_v0 = vstv %s18047_s8 }
   0x2   :  { %17 = vst [vmem:[#allocation8] sm:$0x1] %v16_v0 }
   0x3 LB: > { %s11985_s20 = sadd.s32 4294967295, %s13196_s19   ;;  %p11989_p0 = scmp.ge.s32.totalorder %s13196_s19, 1  ;;  %s13196_s19 = sphi %s13271_s19, %s23_s19  }
   0x4   : > { %p339_p1 = scmp.lt.s32.totalorder %s13196_s19, 3 }
   0x6   : > { %p340_p2 = pnand %p11989_p0, %p339_p1 }
   0x8   : > { %343 = sbr.rel (%p340_p2) target bundleno = 2637 (0xa4d), region = 64 }
   0xd   : > { %vm390_vm0 = vcmask 60416   ;;  %p13281_p3 = scmp.lt.s32.totalorder %s11985_s20, 1  ;;  %v18051_v1 = vmov 0   ;;  %s13199_s25 = smov 8   ;;  %vm1236_vm1 = vsmask.f32 3328 }
   0xe   : > { %392 = vst.msk [vmem:[#allocation2 + $0x4] sm:$0xf] %vm390_vm0, %v18051_v1  ;;  %391 = vst.msk [vmem:[#allocation2] sm:$0xf] %vm390_vm0, %v18051_v1  ;;  %vm1237_vm2 = vsmask.f32 7440 }
   0xf   : > { %393 = vst.msk [vmem:[#allocation2 + $0x8] sm:$0xf] %vm390_vm0, %v18051_v1  ;;  %394 = vst.msk [vmem:[#allocation2 + $0xc] sm:$0xf] %vm390_vm0, %v18051_v1  ;;  %s18101_s20 = smov (!%p13281_p3, %s11985_s20), 1  ;;  %s13200_s26 = smov 32  }
  0x10   : > { %395 = vst.msk [vmem:[#allocation2 + $0x10] sm:$0xf] %vm390_vm0, %v18051_v1  ;;  %396 = vst.msk [vmem:[#allocation2 + $0x14] sm:$0xf] %vm390_vm0, %v18051_v1  ;;  %s12404_s21 = sshll.u32 %s18101_s20, 7  ;;  %s13201_s27 = smov 16  }
  0x11   : > { %397 = vst.msk [vmem:[#allocation2 + $0x18] sm:$0xf] %vm390_vm0, %v18051_v1  ;;  %398 = vst.msk [vmem:[#allocation2 + $0x1c] sm:$0xf] %vm390_vm0, %v18051_v1  ;;  %s13439_s24 = scalar_lea.vmem %s18039_s0, %s12404_s21  ;;  %vm576_vm3 = vsmask.f32 256 }
  0x12   : > { %399 = vst.msk [vmem:[#allocation2 + $0x20] sm:$0xf] %vm390_vm0, %v18051_v1  ;;  %400 = vst.msk [vmem:[#allocation2 + $0x24] sm:$0xf] %vm390_vm0, %v18051_v1  ;;  %v463_v2 = vld [vmem:[%s13439_s24] sm:$0xf] }
  0x13   : > { %401 = vst.msk [vmem:[#allocation2 + $0x28] sm:$0xf] %vm390_vm0, %v18051_v1  ;;  %402 = vst.msk [vmem:[#allocation2 + $0x2c] sm:$0xf] %vm390_vm0, %v18051_v1  ;;  %v464_v3 = vld [vmem:[%s13439_s24 + $0x4] sm:$0xf] }
  0x14   : > { %403 = vst.msk [vmem:[#allocation2 + $0x30] sm:$0xf] %vm390_vm0, %v18051_v1  ;;  %404 = vst.msk [vmem:[#allocation2 + $0x34] sm:$0xf] %vm390_vm0, %v18051_v1  ;;  %v465_v4 = vld [vmem:[%s13439_s24 + $0x8] sm:$0xf] }
  0x15   : > { %405 = vst.msk [vmem:[#allocation2 + $0x38] sm:$0xf] %vm390_vm0, %v18051_v1  ;;  %406 = vst.msk [vmem:[#allocation2 + $0x3c] sm:$0xf] %vm390_vm0, %v18051_v1  ;;  %v466_v5 = vld [vmem:[%s13439_s24 + $0xc] sm:$0xf] }
  0x16   : > { %407 = vst.msk [vmem:[#allocation2 + $0x40] sm:$0xf] %vm390_vm0, %v18051_v1  ;;  %408 = vst.msk [vmem:[#allocation2 + $0x44] sm:$0xf] %vm390_vm0, %v18051_v1  ;;  %v467_v6 = vld [vmem:[%s13439_s24 + $0x10] sm:$0xf] }
  0x17   : > { %409 = vst.msk [vmem:[#allocation2 + $0x48] sm:$0xf] %vm390_vm0, %v18051_v1  ;;  %410 = vst.msk [vmem:[#allocation2 + $0x4c] sm:$0xf] %vm390_vm0, %v18051_v1  ;;  %v468_v7 = vld [vmem:[%s13439_s24 + $0x14] sm:$0xf] }
  0x18   : > { %411 = vst.msk [vmem:[#allocation2 + $0x50] sm:$0xf] %vm390_vm0, %v18051_v1  ;;  %412 = vst.msk [vmem:[#allocation2 + $0x54] sm:$0xf] %vm390_vm0, %v18051_v1  ;;  %v995_v8 = vld [vmem:[#allocation2 + $0x4] sm:$0xf] }
  0x19   : > { %413 = vst.msk [vmem:[#allocation2 + $0x58] sm:$0xf] %vm390_vm0, %v18051_v1  ;;  %414 = vst.msk [vmem:[#allocation2 + $0x5c] sm:$0xf] %vm390_vm0, %v18051_v1  ;;  %v996_v9 = vld [vmem:[#allocation2 + $0x8] sm:$0xf]  ;;  %1059 = vrot.lane.b32.xlu0 %v995_v8, %s13199_s25 }
  0x1a   : > { %415 = vst.msk [vmem:[#allocation2 + $0x60] sm:$0xf] %vm390_vm0, %v18051_v1  ;;  %416 = vst.msk [vmem:[#allocation2 + $0x64] sm:$0xf] %vm390_vm0, %v18051_v1  ;;  %v1188_v10 = vld [vmem:[#allocation2 + $0x4] sm:$0xf] }
  0x1b   : > { %417 = vst.msk [vmem:[#allocation2 + $0x68] sm:$0xf] %vm390_vm0, %v18051_v1  ;;  %418 = vst.msk [vmem:[#allocation2 + $0x6c] sm:$0xf] %vm390_vm0, %v18051_v1  ;;  %v1189_v11 = vld [vmem:[#allocation2 + $0x8] sm:$0xf] }
  0x1c   : > { %419 = vst.msk [vmem:[#allocation2 + $0x70] sm:$0xf] %vm390_vm0, %v18051_v1  ;;  %420 = vst.msk [vmem:[#allocation2 + $0x74] sm:$0xf] %vm390_vm0, %v18051_v1  ;;  %v1240_v12 = vshrl.u32 %v1188_v10, 16  ;;  %v1243_v13 = vshll.u32 %v1188_v10, 16 }
  0x1d   : > { %421 = vst.msk [vmem:[#allocation2 + $0x78] sm:$0xf] %vm390_vm0, %v18051_v1  ;;  %422 = vst.msk [vmem:[#allocation2 + $0x7c] sm:$0xf] %vm390_vm0, %v18051_v1  ;;  %v1752_v14 = vld [vmem:[#allocation2 + $0x10] sm:$0x8]  ;;  %1061 = vrot.lane.b32.xlu0 %v996_v9, %s13199_s25 }
  0x1e   : > { %423 = vst.msk [vmem:[#allocation2 + $0x80] sm:$0xf] %vm390_vm0, %v18051_v1  ;;  %424 = vst.msk [vmem:[#allocation2 + $0x84] sm:$0xf] %vm390_vm0, %v18051_v1  ;;  %v1249_v15 = vshll.u32 %v1189_v11, 16  ;;  %v1253_v16 = vshrl.u32 %v1189_v11, 16 }
  0x1f   : > { %425 = vst.msk [vmem:[#allocation2 + $0x88] sm:$0xf] %vm390_vm0, %v18051_v1  ;;  %426 = vst.msk [vmem:[#allocation2 + $0x8c] sm:$0xf] %vm390_vm0, %v18051_v1  ;;  %v1801_v17 = vshrl.u32 %v1752_v14, 16  ;;  %v1242_v19 = vrot.slane %v1240_v12, 4 }
  0x20   : > { %427 = vst.msk [vmem:[#allocation2 + $0x90] sm:$0xf] %vm390_vm0, %v18051_v1  ;;  %428 = vst.msk [vmem:[#allocation2 + $0x94] sm:$0xf] %vm390_vm0, %v18051_v1  ;;  %v1190_v18 = vld [vmem:[#allocation2 + $0xc] sm:$0x1] }
  0x21   : > { %429 = vst.msk [vmem:[#allocation2 + $0x98] sm:$0xf] %vm390_vm0, %v18051_v1  ;;  %430 = vst.msk [vmem:[#allocation2 + $0x9c] sm:$0xf] %vm390_vm0, %v18051_v1  ;;  %v1245_v20 = vrot.slane %v1243_v13, 5  ;;  %v1251_v21 = vrot.slane %v1249_v15, 5 }
  0x22   : > { %431 = vst.msk [vmem:[#allocation2 + $0xa0] sm:$0xf] %vm390_vm0, %v18051_v1  ;;  %432 = vst.msk [vmem:[#allocation2 + $0xa4] sm:$0xf] %vm390_vm0, %v18051_v1  ;;  %v1255_v22 = vrot.slane %v1253_v16, 4  ;;  %v1259_v23 = vshll.u32 %v1190_v18, 16 }
  0x23   : > { %433 = vst.msk [vmem:[#allocation2 + $0xa8] sm:$0xf] %vm390_vm0, %v18051_v1  ;;  %434 = vst.msk [vmem:[#allocation2 + $0xac] sm:$0xf] %vm390_vm0, %v18051_v1  ;;  %v1755_v24 = vld [vmem:[#allocation2 + $0x20] sm:$0x8]  ;;  %v1246_v25 = vor.u32 %v1245_v20, %v1242_v19 }
  0x24   : > { %435 = vst.msk [vmem:[#allocation2 + $0xb0] sm:$0xf] %vm390_vm0, %v18051_v1  ;;  %436 = vst.msk [vmem:[#allocation2 + $0xb4] sm:$0xf] %vm390_vm0, %v18051_v1  ;;  %vm577_vm4 = vsmask.f32 4368  ;;  %v1256_v29 = vor.u32 %v1255_v22, %v1251_v21 }
  0x25   : > { %437 = vst.msk [vmem:[#allocation2 + $0xb8] sm:$0xf] %vm390_vm0, %v18051_v1  ;;  %438 = vst.msk [vmem:[#allocation2 + $0xbc] sm:$0xf] %vm390_vm0, %v18051_v1  ;;  %v12010_v28 = vrot.slane %v1801_v17, 11  ;;  %v1247_v32 = vrot.slane %v1246_v25, 4 }
  0x26   : > { %439 = vst.msk [vmem:[#allocation2 + $0xc0] sm:$0xf] %vm390_vm0, %v18051_v1  ;;  %440 = vst.msk [vmem:[#allocation2 + $0xc4] sm:$0xf] %vm390_vm0, %v18051_v1  ;;  %v1823_v34 = vshrl.u32 %v1755_v24, 16  ;;  %v1257_v37 = vrot.slane %v1256_v29, 4 }
  0x27   : > { %441 = vst.msk [vmem:[#allocation2 + $0xc8] sm:$0xf] %vm390_vm0, %v18051_v1  ;;  %442 = vst.msk [vmem:[#allocation2 + $0xcc] sm:$0xf] %vm390_vm0, %v18051_v1  ;;  %v1261_v38 = vrot.slane %v1259_v23, 5  ;;  %s13202_s28 = smov 24  }
  0x28   : > { %443 = vst.msk [vmem:[#allocation2 + $0xd0] sm:$0xf] %vm390_vm0, %v18051_v1  ;;  %444 = vst.msk [vmem:[#allocation2 + $0xd4] sm:$0xf] %vm390_vm0, %v18051_v1  ;;  %v12011_v60 = vrot.slane %v1823_v34, 11  ;;  %s13203_s29 = smov 40  }
  0x29   : > { %445 = vst.msk [vmem:[#allocation2 + $0xd8] sm:$0xf] %vm390_vm0, %v18051_v1  ;;  %446 = vst.msk [vmem:[#allocation2 + $0xdc] sm:$0xf] %vm390_vm0, %v18051_v1  ;;  %v1193_v9 = vld [vmem:[#allocation2 + $0x1c] sm:$0x1] }
  0x2a   : > { %447 = vst.msk [vmem:[#allocation2 + $0xe0] sm:$0xf] %vm390_vm0, %v18051_v1  ;;  %448 = vst.msk [vmem:[#allocation2 + $0xe4] sm:$0xf] %vm390_vm0, %v18051_v1  ;;  %s13204_s30 = smov 48   ;;  %s13205_s12 = smov 56  }
  0x2b   : > { %449 = vst.msk [vmem:[#allocation2 + $0xe8] sm:$0xf] %vm390_vm0, %v18051_v1  ;;  %450 = vst.msk [vmem:[#allocation2 + $0xec] sm:$0xf] %vm390_vm0, %v18051_v1  ;;  %s13206_s13 = smov 64   ;;  %vm4523_vm7 = vcmask 1043456  }
  0x2c   : > { %451 = vst.msk [vmem:[#allocation2 + $0xf0] sm:$0xf] %vm390_vm0, %v18051_v1  ;;  %452 = vst.msk [vmem:[#allocation2 + $0xf4] sm:$0xf] %vm390_vm0, %v18051_v1  ;;  %vm1155_vm8 = vcmask 126016   ;;  %vm1719_vm9 = vcmask 191616  }
  0x2d   : > { %453 = vst.msk [vmem:[#allocation2 + $0xf8] sm:$0xf] %vm390_vm0, %v18051_v1  ;;  %454 = vst.msk [vmem:[#allocation2 + $0xfc] sm:$0xf] %vm390_vm0, %v18051_v1  ;;  %vm2248_vm10 = vcmask 257216   ;;  %vm2441_vm11 = vcmask 322816  }
  0x2e   : > { %455 = vst.msk [vmem:[#allocation2 + $0x100] sm:$0xf] %vm390_vm0, %v18051_v1  ;;  %456 = vst.msk [vmem:[#allocation2 + $0x104] sm:$0xf] %vm390_vm0, %v18051_v1  ;;  %vm3002_vm12 = vcmask 388416   ;;  %vm3532_vm13 = vcmask 454016  }
  0x2f   : > { %457 = vst.msk [vmem:[#allocation2 + $0x108] sm:$0xf] %vm390_vm0, %v18051_v1  ;;  %458 = vst.msk [vmem:[#allocation2 + $0x10c] sm:$0xf] %vm390_vm0, %v18051_v1  ;;  %vm3725_vm14 = vcmask 519616   ;;  %vm4286_vm15 = vcmask 585216  }
  0x30   : > { %459 = vst.msk [vmem:[#allocation2 + $0x110] sm:$0xf] %vm390_vm0, %v18051_v1  ;;  %460 = vst.msk [vmem:[#allocation2 + $0x114] sm:$0xf] %vm390_vm0, %v18051_v1  ;;  %s12405_s14 = sshll.u32 %s18101_s20, 8 }
  0x31   : > { %461 = vst.msk [vmem:[#allocation2 + $0x118] sm:$0xf] %vm390_vm0, %v18051_v1  ;;  %462 = vst.msk [vmem:[#allocation2 + $0x11c] sm:$0xf] %vm390_vm0, %v18051_v1 }
  0x32   : > { %496 = vst.msk [vmem:[#allocation2 + $0x14] sm:$0xf] %vm390_vm0, %v463_v2  ;;  %497 = vst.msk [vmem:[#allocation2 + $0x18] sm:$0xf] %vm390_vm0, %v464_v3 }
  0x33   : > { %498 = vst.msk [vmem:[#allocation2 + $0x24] sm:$0xf] %vm390_vm0, %v465_v4  ;;  %499 = vst.msk [vmem:[#allocation2 + $0x28] sm:$0xf] %vm390_vm0, %v466_v5 }
  0x34   : > { %500 = vst.msk [vmem:[#allocation2 + $0x34] sm:$0xf] %vm390_vm0, %v467_v6  ;;  %501 = vst.msk [vmem:[#allocation2 + $0x38] sm:$0xf] %vm390_vm0, %v468_v7 }
  0x35   : > { %vm13458_vm5 = vmor %vm1236_vm1, %vm1237_vm2  ;;  %vm4474_vm1 = vcmask 588800   ;;  %vm5097_vm2 = vcmask 519424  }
  0x36   : > { %v1252_v44 = vsel %vm13458_vm5, %v1247_v32, %v1251_v21  ;;  %vm13468_vm6 = vmor %vm576_vm3, %vm577_vm4  ;;  %v1262_v59 = vsel %vm13458_vm5, %v1257_v37, %v1261_v38  ;;  %v1283_v21 = vshll.u32 %v1193_v9, 16  ;;  %vm5258_vm3 = vcmask 781824  }
  0x37   : > { %vm6168_vm4 = vcmask 261120  }
  0x38   : > { %v1285_v34 = vrot.slane %v1283_v21, 5 }
  0x39   : > { %v997_v26 = vld [vmem:[#allocation2 + $0x14] sm:$0xf]  ;;  %v998_v30 = vld [vmem:[#allocation2 + $0x18] sm:$0xf] }
  0x3a   : > { %v2281_v27 = vld [vmem:[#allocation2 + $0x14] sm:$0xf]  ;;  %1063 = vrot.lane.b32.xlu1 %v997_v26, %s13199_s25  ;;  %v1756_v39 = vld [vmem:[#allocation2 + $0x24] sm:$0xf]  ;;  %v1754_v42 = vld [vmem:[#allocation2 + $0x18] sm:$0xf] }
  0x3b   : > { %v1753_v33 = vld [vmem:[#allocation2 + $0x14] sm:$0xf]  ;;  %2345 = vrot.lane.b32.xlu0 %v2281_v27, %s13200_s26  ;;  %v1828_v40 = vshrl.u32 %v1756_v39, 16  ;;  %v1831_v41 = vshll.u32 %v1756_v39, 16  ;;  %v1815_v46 = vshrl.u32 %v1754_v42, 16  ;;  %v1818_v47 = vshll.u32 %v1754_v42, 16 }
  0x3c   : > { %v1806_v35 = vshrl.u32 %v1753_v33, 16  ;;  %v1809_v36 = vshll.u32 %v1753_v33, 16  ;;  %v1191_v43 = vld [vmem:[#allocation2 + $0x14] sm:$0xf]  ;;  %v1192_v48 = vld [vmem:[#allocation2 + $0x18] sm:$0xf] }
  0x3d   : > { %v1830_v50 = vrot.slane %v1828_v40, 7  ;;  %v1264_v51 = vshrl.u32 %v1191_v43, 16  ;;  %v1267_v52 = vshll.u32 %v1191_v43, 16  ;;  %v1273_v53 = vshll.u32 %v1192_v48, 16  ;;  %v1757_v54 = vld [vmem:[#allocation2 + $0x28] sm:$0xf] }
  0x3e   : > { %v1808_v45 = vrot.slane %v1806_v35, 7  ;;  %1065 = vrot.lane.b32.xlu1 %v998_v30, %s13199_s25  ;;  %v2282_v55 = vld [vmem:[#allocation2 + $0x18] sm:$0xf]  ;;  %v1817_v57 = vrot.slane %v1815_v46, 7  ;;  %v1277_v58 = vshrl.u32 %v1192_v48, 16  ;;  %v1837_v3 = vshrl.u32 %v1757_v54, 16 }
  0x3f   : > { %1623 = vrot.lane.b32.xlu0 %v1252_v44, %s13201_s27  ;;  %v1266_v61 = vrot.slane %v1264_v51, 4  ;;  %v1269_v62 = vrot.slane %v1267_v52, 5  ;;  %v1833_v0 = vor.u32 %v1831_v41, %v1830_v50  ;;  %v2474_v4 = vld [vmem:[#allocation2 + $0x14] sm:$0xf]  ;;  %v1275_v7 = vrot.slane %v1273_v53, 5 }
  0x40   : > { %v1811_v56 = vor.u32 %v1809_v36, %v1808_v45  ;;  %v1813_v2 = vrot.slane %v1808_v45, 4  ;;  %v1820_v5 = vor.u32 %v1818_v47, %v1817_v57  ;;  %v1840_v8 = vshll.u32 %v1757_v54, 16  ;;  %v2475_v10 = vld [vmem:[#allocation2 + $0x18] sm:$0xf]  ;;  %v2477_v15 = vld [vmem:[#allocation2 + $0x24] sm:$0xf] }
  0x41   : > { %v1270_v6 = vor.u32 %v1269_v62, %v1266_v61  ;;  %v1839_v11 = vrot.slane %v1837_v3, 7  ;;  %v1279_v12 = vrot.slane %v1277_v58, 4  ;;  %v2523_v13 = vshrl.u32 %v2474_v4, 16  ;;  %v2478_v29 = vld [vmem:[#allocation2 + $0x28] sm:$0xf] }
  0x42   : > { %v1812_v63 = vsel %vm13468_vm6, %v12010_v28, %v1811_v56  ;;  %2347 = vrot.lane.b32.xlu1 %v2282_v55, %s13200_s26  ;;  %v2526_v14 = vshll.u32 %v2474_v4, 16  ;;  %v1834_v16 = vsel %vm13468_vm6, %v12011_v60, %v1833_v0  ;;  %v1835_v20 = vrot.slane %v1830_v50, 4  ;;  %v3037_v38 = vld [vmem:[#allocation2 + $0x24] sm:$0xf]  ;;  %v2476_v41 = vld [vmem:[#allocation2 + $0x1c] sm:$0x1] }
  0x43   : > { %2152 = vrot.lane.b32.xlu0 %v1812_v63, %s13202_s28  ;;  %v1271_v17 = vrot.slane %v1270_v6, 4  ;;  %v2525_v18 = vrot.slane %v2523_v13, 4  ;;  %v2532_v22 = vshll.u32 %v2475_v10, 16  ;;  %v2536_v23 = vshrl.u32 %v2475_v10, 16  ;;  %v2283_v45 = vld [vmem:[#allocation2 + $0x24] sm:$0xf] }
  0x44   : > { %v2528_v19 = vrot.slane %v2526_v14, 5  ;;  %v1821_v24 = vsel %vm13468_vm6, %v1813_v2, %v1820_v5  ;;  %v1842_v25 = vor.u32 %v1840_v8, %v1839_v11  ;;  %v1280_v26 = vor.u32 %v1279_v12, %v1275_v7  ;;  %v3036_v47 = vld [vmem:[#allocation2 + $0x20] sm:$0x8]  ;;  %v3040_v52 = vld [vmem:[#allocation2 + $0x34] sm:$0xf] }
  0x45   : > { %v2547_v27 = vshrl.u32 %v2477_v15, 16  ;;  %v2550_v30 = vshll.u32 %v2477_v15, 16  ;;  %v1276_v32 = vsel %vm13458_vm5, %v1271_v17, %v1275_v7  ;;  %v2534_v35 = vrot.slane %v2532_v22, 5  ;;  %v2479_v55 = vld [vmem:[#allocation2 + $0x2c] sm:$0x1] }
  0x46   : > { %1625 = vrot.lane.b32.xlu1 %v1262_v59, %s13201_s27  ;;  %v2529_v28 = vor.u32 %v2528_v19, %v2525_v18  ;;  %v2538_v36 = vrot.slane %v2536_v23, 4  ;;  %v1843_v39 = vsel %vm13468_vm6, %v1835_v20, %v1842_v25  ;;  %v1281_v40 = vrot.slane %v1280_v26, 4  ;;  %v3038_v59 = vld [vmem:[#allocation2 + $0x28] sm:$0xf]  ;;  %v3039_v63 = vld [vmem:[#allocation2 + $0x30] sm:$0x8] }
  0x47   : > { %2156 = vrot.lane.b32.xlu0 %v1834_v16, %s13202_s28  ;;  %v2549_v33 = vrot.slane %v2547_v27, 4  ;;  %v2552_v37 = vrot.slane %v2550_v30, 5  ;;  %v2556_v42 = vshll.u32 %v2478_v29, 16  ;;  %v2560_v43 = vshrl.u32 %v2478_v29, 16  ;;  %v2284_v5 = vld [vmem:[#allocation2 + $0x28] sm:$0xf] }
  0x48   : > { %v2530_v44 = vrot.slane %v2529_v28, 4  ;;  %v3090_v48 = vshrl.u32 %v3037_v38, 16  ;;  %v2539_v50 = vor.u32 %v2538_v36, %v2534_v35  ;;  %v2542_v51 = vshll.u32 %v2476_v41, 16  ;;  %v3041_v10 = vld [vmem:[#allocation2 + $0x38] sm:$0xf] }
  0x49   : > { %v2553_v46 = vor.u32 %v2552_v37, %v2549_v33  ;;  %v1286_v53 = vsel %vm13458_vm5, %v1281_v40, %v1285_v34  ;;  %v2558_v54 = vrot.slane %v2556_v42, 5  ;;  %v2562_v56 = vrot.slane %v2560_v43, 4  ;;  %v3758_v17 = vld [vmem:[#allocation2 + $0x24] sm:$0xf]  ;;  %v469_v28 = vld [vmem:[%s13439_s24 + $0x18] sm:$0xf] }
  0x4a   : > { %2154 = vrot.lane.b32.xlu1 %v1821_v24, %s13202_s28  ;;  %v2535_v57 = vsel %vm13458_vm5, %v2530_v44, %v2534_v35  ;;  %v3085_v58 = vshrl.u32 %v3036_v47, 16  ;;  %v3092_v61 = vrot.slane %v3090_v48, 7  ;;  %v3093_v62 = vshll.u32 %v3037_v38, 16  ;;  %502 = vst.msk [vmem:[#allocation2 + $0x44] sm:$0xf] %vm390_vm0, %v469_v28 }
  0x4b   : > { %1627 = vrot.lane.b32.xlu0 %v1276_v32, %s13201_s27  ;;  %v2554_v60 = vrot.slane %v2553_v46, 4  ;;  %v3112_v0 = vshrl.u32 %v3040_v52, 16  ;;  %v2540_v2 = vrot.slane %v2539_v50, 4  ;;  %v2544_v3 = vrot.slane %v2542_v51, 5  ;;  %v470_v34 = vld [vmem:[%s13439_s24 + $0x1c] sm:$0xf] }
  0x4c   : > { %v2566_v4 = vshll.u32 %v2479_v55, 16  ;;  %v2563_v6 = vor.u32 %v2562_v56, %v2558_v54  ;;  %v3099_v7 = vshrl.u32 %v3038_v59, 16  ;;  %v12026_v8 = vrot.slane %v3085_v58, 11  ;;  %v3759_v35 = vld [vmem:[#allocation2 + $0x28] sm:$0xf] }
  0x4d   : > { %v3107_v9 = vshrl.u32 %v3039_v63, 16  ;;  %v2559_v11 = vsel %vm13458_vm5, %v2554_v60, %v2558_v54  ;;  %v3095_v12 = vor.u32 %v3093_v62, %v3092_v61  ;;  %v3114_v13 = vrot.slane %v3112_v0, 7  ;;  %503 = vst.msk [vmem:[#allocation2 + $0x48] sm:$0xf] %vm390_vm0, %v470_v34  ;;  %v3761_v40 = vld [vmem:[#allocation2 + $0x34] sm:$0xf] }
  0x4e   : > { %2158 = vrot.lane.b32.xlu1 %v1843_v39, %s13202_s28  ;;  %v3115_v14 = vshll.u32 %v3040_v52, 16  ;;  %v2545_v15 = vsel %vm13458_vm5, %v2540_v2, %v2544_v3  ;;  %v2568_v16 = vrot.slane %v2566_v4, 5  ;;  %v2564_v18 = vrot.slane %v2563_v6, 4  ;;  %v3567_v54 = vld [vmem:[#allocation2 + $0x34] sm:$0xf] }
  0x4f   : > { %2349 = vrot.lane.b32.xlu0 %v2283_v45, %s13200_s26  ;;  %v3101_v19 = vrot.slane %v3099_v7, 7  ;;  %v3102_v20 = vshll.u32 %v3038_v59, 16  ;;  %v3121_v21 = vshrl.u32 %v3041_v10, 16  ;;  %v12027_v22 = vrot.slane %v3107_v9, 11  ;;  %v3565_v45 = vld [vmem:[#allocation2 + $0x24] sm:$0xf] }
  0x50   : > { %v3096_v23 = vsel %vm13468_vm6, %v12026_v8, %v3095_v12  ;;  %v3117_v24 = vor.u32 %v3115_v14, %v3114_v13  ;;  %v3807_v25 = vshrl.u32 %v3758_v17, 16  ;;  %v3810_v26 = vshll.u32 %v3758_v17, 16  ;;  %v3760_v55 = vld [vmem:[#allocation2 + $0x2c] sm:$0x1]  ;;  %v1194_v59 = vld [vmem:[#allocation2 + $0x24] sm:$0xf] }
  0x51   : > { %v3097_v27 = vrot.slane %v3092_v61, 4  ;;  %v2569_v29 = vsel %vm13458_vm5, %v2564_v18, %v2568_v16  ;;  %v3104_v30 = vor.u32 %v3102_v20, %v3101_v19  ;;  %v3123_v32 = vrot.slane %v3121_v21, 7  ;;  %v1195_v62 = vld [vmem:[#allocation2 + $0x28] sm:$0xf]  ;;  %v1197_v3 = vld [vmem:[#allocation2 + $0x34] sm:$0xf] }
  0x52   : > { %1629 = vrot.lane.b32.xlu1 %v1286_v53, %s13201_s27  ;;  %v3124_v33 = vshll.u32 %v3041_v10, 16  ;;  %v3118_v36 = vsel %vm13468_vm6, %v12027_v22, %v3117_v24  ;;  %v3809_v37 = vrot.slane %v3807_v25, 4  ;;  %v3812_v38 = vrot.slane %v3810_v26, 5  ;;  %v3762_v53 = vld [vmem:[#allocation2 + $0x38] sm:$0xf] }
  0x53   : > { %2906 = vrot.lane.b32.xlu0 %v2535_v57, %s13203_s29  ;;  %v3119_v39 = vrot.slane %v3114_v13, 4  ;;  %v3105_v41 = vsel %vm13468_vm6, %v3097_v27, %v3104_v30  ;;  %v3816_v43 = vshll.u32 %v3759_v35, 16  ;;  %v3820_v44 = vshrl.u32 %v3759_v35, 16  ;;  %v3566_v63 = vld [vmem:[#allocation2 + $0x28] sm:$0xf] }
  0x54   : > { %v3126_v42 = vor.u32 %v3124_v33, %v3123_v32  ;;  %v3813_v46 = vor.u32 %v3812_v38, %v3809_v37  ;;  %v3831_v47 = vshrl.u32 %v3761_v40, 16  ;;  %v3834_v48 = vshll.u32 %v3761_v40, 16  ;;  %v471_v10 = vld [vmem:[%s13439_s24 + $0x20] sm:$0xf]  ;;  %v3763_v12 = vld [vmem:[#allocation2 + $0x3c] sm:$0x1] }
  0x55   : > { %v3818_v51 = vrot.slane %v3816_v43, 5  ;;  %v3822_v52 = vrot.slane %v3820_v44, 4  ;;  %v3840_v60 = vshll.u32 %v3762_v53, 16  ;;  %v3844_v61 = vshrl.u32 %v3762_v53, 16  ;;  %504 = vst.msk [vmem:[#allocation2 + $0x54] sm:$0xf] %vm390_vm0, %v471_v10 }
  0x56   : > { %2351 = vrot.lane.b32.xlu1 %v2284_v5, %s13200_s26  ;;  %v3127_v50 = vsel %vm13468_vm6, %v3119_v39, %v3126_v42  ;;  %v3814_v56 = vrot.slane %v3813_v46, 4  ;;  %v3833_v57 = vrot.slane %v3831_v47, 4  ;;  %v3836_v58 = vrot.slane %v3834_v48, 5  ;;  %v3568_v16 = vld [vmem:[#allocation2 + $0x38] sm:$0xf] }
  0x57   : > { %2910 = vrot.lane.b32.xlu0 %v2559_v11, %s13203_s29  ;;  %v3823_v0 = vor.u32 %v3822_v52, %v3818_v51  ;;  %v3826_v2 = vshll.u32 %v3760_v55, 16  ;;  %v1288_v4 = vshrl.u32 %v1194_v59, 16  ;;  %v1291_v5 = vshll.u32 %v1194_v59, 16  ;;  %v472_v19 = vld [vmem:[%s13439_s24 + $0x24] sm:$0xf] }
  0x58   : > { %v3819_v6 = vsel %vm13458_vm5, %v3814_v56, %v3818_v51  ;;  %v3837_v7 = vor.u32 %v3836_v58, %v3833_v57  ;;  %v1297_v8 = vshll.u32 %v1195_v62, 16  ;;  %v1301_v9 = vshrl.u32 %v1195_v62, 16  ;;  %v999_v20 = vld [vmem:[#allocation2 + $0x24] sm:$0xf]  ;;  %505 = vst.msk [vmem:[#allocation2 + $0x58] sm:$0xf] %vm390_vm0, %v472_v19 }
  0x59   : > { %v3842_v11 = vrot.slane %v3840_v60, 5  ;;  %v3846_v13 = vrot.slane %v3844_v61, 4  ;;  %v1312_v14 = vshrl.u32 %v1197_v3, 16  ;;  %v3824_v17 = vrot.slane %v3823_v0, 4  ;;  %v1198_v28 = vld [vmem:[#allocation2 + $0x38] sm:$0xf] }
  0x5a   : > { %2908 = vrot.lane.b32.xlu1 %v2545_v15, %s13203_s29  ;;  %v1315_v15 = vshll.u32 %v1197_v3, 16  ;;  %v3828_v18 = vrot.slane %v3826_v2, 5  ;;  %v1290_v21 = vrot.slane %v1288_v4, 4  ;;  %v1293_v22 = vrot.slane %v1291_v5, 5  ;;  %v1199_v34 = vld [vmem:[#allocation2 + $0x3c] sm:$0x1] }
  0x5b   : > { %3436 = vrot.lane.b32.xlu0 %v3096_v23, %s13204_s30  ;;  %v1196_v23 = vld [vmem:[#allocation2 + $0x2c] sm:$0x1]  ;;  %v3838_v24 = vrot.slane %v3837_v7, 4  ;;  %v3850_v25 = vshll.u32 %v3763_v12, 16  ;;  %v13535_v26 = vrot.slane %v1297_v8, 5  ;;  %v1303_v27 = vrot.slane %v1301_v9, 4 }
  0x5c   : > { %v1314_v30 = vrot.slane %v1312_v14, 4  ;;  %v1317_v32 = vrot.slane %v1315_v15, 5  ;;  %v3829_v33 = vsel %vm13458_vm5, %v3824_v17, %v3828_v18  ;;  %v1758_v35 = vld [vmem:[#allocation2 + $0x30] sm:$0x8]  ;;  %v1294_v37 = vor.u32 %v1293_v22, %v1290_v21  ;;  %v528_v40 = vld [vmem:[#allocation2] sm:$0x8] }
  0x5d   : > { %v1307_v38 = vshll.u32 %v1196_v23, 16  ;;  %v1321_v39 = vshll.u32 %v1198_v28, 16  ;;  %v3843_v42 = vsel %vm13458_vm5, %v3838_v24, %v3842_v11  ;;  %v3852_v43 = vrot.slane %v3850_v25, 5  ;;  %v1000_v46 = vld [vmem:[#allocation2 + $0x28] sm:$0xf] }
  0x5e   : > { %2912 = vrot.lane.b32.xlu1 %v2569_v29, %s13203_s29  ;;  %v3847_v29 = vor.u32 %v3846_v13, %v3842_v11  ;;  %v1304_v44 = vor.u32 %v1303_v27, %v13535_v26  ;;  %v1318_v48 = vor.u32 %v1317_v32, %v1314_v30  ;;  %v1845_v51 = vshrl.u32 %v1758_v35, 16  ;;  %v1001_v52 = vld [vmem:[#allocation2 + $0x34] sm:$0xf]  ;;  %v13551_v60 = vld [vmem:[#allocation2 + $0x38] sm:$0xf] }
  0x5f   : > { %3440 = vrot.lane.b32.xlu0 %v3118_v36, %s13204_s30  ;;  %v13540_v36 = vld [vmem:[#allocation2 + $0x34] sm:$0xf]  ;;  %v1295_v57 = vrot.slane %v1294_v37, 4  ;;  %v13549_v58 = vrot.slane %v1307_v38, 5  ;;  %v1323_v59 = vrot.slane %v1321_v39, 5  ;;  %v1859_v11 = vshrl.u32 %v13551_v60, 16 }
  0x60   : > { %v3848_v47 = vrot.slane %v3847_v29, 4  ;;  %v1850_v53 = vshrl.u32 %v13540_v36, 16  ;;  %v13553_v61 = vrot.slane %v1304_v44, 4  ;;  %v530_v3 = vld [vmem:[#allocation2 + $0x8] sm:$0xf]  ;;  %v1319_v5 = vrot.slane %v1318_v48, 4 }
  0x61   : > { %v1853_v7 = vshll.u32 %v13540_v36, 16  ;;  %v1762_v8 = vld [vmem:[#allocation2 + $0x44] sm:$0xf]  ;;  %v13561_v9 = vrot.slane %v1845_v51, 11  ;;  %v531_v13 = vld [vmem:[#allocation2 + $0x10] sm:$0x8]  ;;  %v1300_v14 = vsel %vm13458_vm5, %v1295_v57, %v13535_v26 }
  0x62   : > { %3438 = vrot.lane.b32.xlu1 %v3105_v41, %s13204_s30  ;;  %v529_v41 = vld [vmem:[#allocation2 + $0x4] sm:$0xf]  ;;  %v3853_v4 = vsel %vm13458_vm5, %v3848_v47, %v3852_v43  ;;  %v13563_v10 = vrot.slane %v1850_v53, 7  ;;  %v594_v15 = vshrl.u32 %v530_v3, 16  ;;  %v532_v17 = vld [vmem:[#allocation2 + $0x14] sm:$0xf]  ;;  %v1310_v19 = vsel %vm13458_vm5, %v13553_v61, %v13549_v58 }
  0x63   : > { %3629 = vrot.lane.b32.xlu0 %v3565_v45, %s13205_s12  ;;  %v1325_v45 = vshrl.u32 %v1198_v28, 16  ;;  %v585_v55 = vshrl.u32 %v529_v41, 16  ;;  %v588_v56 = vshll.u32 %v529_v41, 16  ;;  %v533_v18 = vld [vmem:[#allocation2 + $0x18] sm:$0xf]  ;;  %v1872_v21 = vshrl.u32 %v1762_v8, 16 }
  0x64   : > { %v596_v24 = vrot.slane %v594_v15, 7  ;;  %v602_v26 = vshrl.u32 %v531_v13, 16  ;;  %v1002_v27 = vld [vmem:[#allocation2 + $0x38] sm:$0xf]  ;;  %v1324_v28 = vsel %vm13458_vm5, %v1319_v5, %v1323_v59  ;;  %v607_v29 = vshrl.u32 %v532_v17, 16 }
  0x65   : > { %v1327_v62 = vrot.slane %v1325_v45, 4  ;;  %v587_v2 = vrot.slane %v585_v55, 7  ;;  %v610_v30 = vshll.u32 %v532_v17, 16  ;;  %v616_v32 = vshrl.u32 %v533_v18, 16  ;;  %v1763_v35 = vld [vmem:[#allocation2 + $0x48] sm:$0xf] }
  0x66   : > { %3442 = vrot.lane.b32.xlu1 %v3127_v50, %s13204_s30  ;;  %v1331_v50 = vshll.u32 %v1199_v34, 16  ;;  %v1875_v34 = vshll.u32 %v1762_v8, 16  ;;  %v619_v37 = vshll.u32 %v533_v18, 16  ;;  %v1874_v38 = vrot.slane %v1872_v21, 7  ;;  %v2480_v39 = vld [vmem:[#allocation2 + $0x34] sm:$0xf] }
  0x67   : > { %3633 = vrot.lane.b32.xlu0 %v3567_v54, %s13205_s12  ;;  %v580_v54 = vshrl.u32 %v528_v40, 16  ;;  %v590_v12 = vor.u32 %v588_v56, %v587_v2  ;;  %v592_v25 = vrot.slane %v587_v2, 4  ;;  %v11995_v40 = vrot.slane %v602_v26, 11  ;;  %v473_v55 = vld [vmem:[%s13439_s24 + $0x28] sm:$0xf] }
  0x68   : > { %v609_v41 = vrot.slane %v607_v29, 7  ;;  %v1861_v44 = vrot.slane %v1859_v11, 7  ;;  %v1862_v45 = vshll.u32 %v13551_v60, 16  ;;  %v1881_v47 = vshrl.u32 %v1763_v35, 16  ;;  %v2483_v58 = vld [vmem:[#allocation2 + $0x44] sm:$0xf] }
  0x69   : > { %v11994_v0 = vrot.slane %v580_v54, 11  ;;  %v2571_v54 = vshrl.u32 %v2480_v39, 16  ;;  %v1877_v56 = vor.u32 %v1875_v34, %v1874_v38  ;;  %v2574_v57 = vshll.u32 %v2480_v39, 16  ;;  %506 = vst.msk [vmem:[#allocation2 + $0x64] sm:$0xf] %vm390_vm0, %v473_v55 }
  0x6a   : > { %3631 = vrot.lane.b32.xlu1 %v3566_v63, %s13205_s12  ;;  %v1761_v63 = vld [vmem:[#allocation2 + $0x40] sm:$0x8]  ;;  %v612_v48 = vor.u32 %v610_v30, %v609_v41  ;;  %v614_v51 = vrot.slane %v609_v41, 4  ;;  %v474_v61 = vld [vmem:[%s13439_s24 + $0x2c] sm:$0xf]  ;;  %v1883_v2 = vrot.slane %v1881_v47, 7 }
  0x6b   : > { %4190 = vrot.lane.b32.xlu0 %v3819_v6, %s13206_s13  ;;  %v13558_v6 = vrot.slane %v1331_v50, 5  ;;  %v591_v22 = vsel %vm13468_vm6, %v11994_v0, %v590_v12  ;;  %v1867_v23 = vshrl.u32 %v1761_v63, 16  ;;  %507 = vst.msk [vmem:[#allocation2 + $0x68] sm:$0xf] %vm390_vm0, %v474_v61  ;;  %v1864_v0 = vor.u32 %v1862_v45, %v1861_v44  ;;  %v2484_v15 = vld [vmem:[#allocation2 + $0x48] sm:$0xf] }
  0x6c   : > { %963 = vst.msk [vmem:[#allocation3] sm:$0xf] %vm390_vm0, %v591_v22  ;;  %v2595_v5 = vshrl.u32 %v2483_v58, 16  ;;  %v1879_v13 = vrot.slane %v1874_v38, 4  ;;  %v2285_v18 = vld [vmem:[#allocation2 + $0x34] sm:$0xf] }
  0x6d   : > { %v12013_v53 = vrot.slane %v1867_v23, 11  ;;  %v3043_v22 = vld [vmem:[#allocation2 + $0x44] sm:$0xf]  ;;  %v2608_v26 = vshrl.u32 %v2484_v15, 16  ;;  %v3042_v30 = vld [vmem:[#allocation2 + $0x40] sm:$0x8] }
  0x6e   : > { %3635 = vrot.lane.b32.xlu1 %v3568_v16, %s13205_s12  ;;  %v597_v16 = vshll.u32 %v530_v3, 16  ;;  %v1884_v3 = vshll.u32 %v1763_v35, 16  ;;  %v2485_v38 = vld [vmem:[#allocation2 + $0x4c] sm:$0x1]  ;;  %v476_v44 = vld [vmem:[%s13439_s24 + $0x34] sm:$0xf] }
  0x6f   : > { %1067 = vrot.lane.b32.xlu0 %v999_v20, %s13199_s25  ;;  %v1328_v20 = vor.u32 %v1327_v62, %v1323_v59  ;;  %v613_v59 = vsel %vm13468_vm6, %v11995_v40, %v612_v48  ;;  %v1857_v62 = vrot.slane %v13563_v10, 4  ;;  %v1878_v8 = vsel %vm13468_vm6, %v12013_v53, %v1877_v56  ;;  %v475_v40 = vld [vmem:[%s13439_s24 + $0x30] sm:$0xf]  ;;  %509 = vst.msk [vmem:[#allocation2 + $0x78] sm:$0xf] %vm390_vm0, %v476_v44 }
  0x70   : > { %v599_v36 = vor.u32 %v597_v16, %v596_v24  ;;  %965 = vst.msk [vmem:[#allocation3 + $0x8] sm:$0xf] %vm390_vm0, %v613_v59  ;;  %v2597_v16 = vrot.slane %v2595_v5, 4  ;;  %v2482_v24 = vld [vmem:[#allocation2 + $0x3c] sm:$0x1]  ;;  %v2610_v39 = vrot.slane %v2608_v26, 4 }
  0x71   : > { %v1329_v43 = vrot.slane %v1328_v20, 4  ;;  %v2590_v35 = vshll.u32 %v2482_v24, 16  ;;  %508 = vst.msk [vmem:[#allocation2 + $0x74] sm:$0xf] %vm390_vm0, %v475_v40  ;;  %v3137_v47 = vshll.u32 %v3043_v22, 16 }
  0x72   : > { %4192 = vrot.lane.b32.xlu1 %v3829_v33, %s13206_s13  ;;  %v1855_v33 = vor.u32 %v1853_v7, %v13563_v10  ;;  %v2598_v7 = vshll.u32 %v2483_v58, 16  ;;  %v2576_v10 = vrot.slane %v2574_v57, 5  ;;  %v3045_v53 = vld [vmem:[#allocation2 + $0x50] sm:$0x8]  ;;  %v3047_v59 = vld [vmem:[#allocation2 + $0x58] sm:$0xf] }
  0x73   : > { %4194 = vrot.lane.b32.xlu0 %v3843_v42, %s13206_s13  ;;  %v618_v42 = vrot.slane %v616_v32, 7  ;;  %v1334_v63 = vsel %vm13458_vm5, %v1329_v43, %v13558_v6  ;;  %v1865_v6 = vsel %vm13468_vm6, %v1857_v62, %v1864_v0  ;;  %v3134_v32 = vshrl.u32 %v3043_v22, 16  ;;  %v3044_v43 = vld [vmem:[#allocation2 + $0x48] sm:$0xf]  ;;  %v3764_v0 = vld [vmem:[#allocation2 + $0x44] sm:$0xf] }
  0x74   : > { %v2600_v17 = vrot.slane %v2598_v7, 5  ;;  %v3143_v56 = vshrl.u32 %v3044_v43, 16  ;;  %v3151_v61 = vshrl.u32 %v3045_v53, 16  ;;  %v3146_v7 = vshll.u32 %v3044_v43, 16  ;;  %v12978_v26 = vld [vmem:[%s18040_s1 + $0x20] ss:$0 sps:$4 sm:$0xff]  }
  0x75   : > { %v621_v50 = vor.u32 %v619_v37, %v618_v42  ;;  %v3129_v42 = vshrl.u32 %v3042_v30, 16  ;;  %12959 = vmatprep.subr.msk.bf16.mxu0 %vm4523_vm7, %v12978_v26  ;;  %v535_v40 = vld [vmem:[#allocation2 + $0x24] sm:$0xf]  ;;  %v4525_v43 = vsel %vm4523_vm7, %v12978_v26, 0  ;;  %v536_v44 = vld [vmem:[#allocation2 + $0x28] sm:$0xf] }
  0x76   : > { %1069 = vrot.lane.b32.xlu1 %v1000_v46, %s13199_s25  ;;  %v600_v46 = vsel %vm13468_vm6, %v592_v25, %v599_v36  ;;  %v2604_v25 = vshll.u32 %v2484_v15, 16  ;;  %v3046_v36 = vld [vmem:[#allocation2 + $0x54] sm:$0xf]  ;;  %v3145_v5 = vrot.slane %v3143_v56, 7  ;;  %12818 = vmatpush3.bf16.msra.mxu0 %v4525_v43  ;;  %vm5411_vm7 = vcmask 1044224  }
  0x77   : > { %1071 = vrot.lane.b32.xlu0 %v1001_v52, %s13199_s25  ;;  %964 = vst.msk [vmem:[#allocation3 + $0x4] sm:$0xf] %vm390_vm0, %v600_v46  ;;  %v1856_v52 = vsel %vm13468_vm6, %v13561_v9, %v1855_v33  ;;  %v622_v60 = vsel %vm13468_vm6, %v614_v51, %v621_v50  ;;  %v2573_v9 = vrot.slane %v2571_v54, 4  ;;  %v2286_v33 = vld [vmem:[#allocation2 + $0x38] sm:$0xf]  ;;  %v3136_v46 = vrot.slane %v3134_v32, 7 }
  0x78   : > { %966 = vst.msk [vmem:[#allocation3 + $0xc] sm:$0xf] %vm390_vm0, %v622_v60  ;;  %v2606_v37 = vrot.slane %v2604_v25, 5  ;;  %v3156_v48 = vshrl.u32 %v3046_v36, 16  ;;  %v2592_v51 = vrot.slane %v2590_v35, 5  ;;  %v12028_v58 = vrot.slane %v3129_v42, 11 }
  0x79   : > { %v2288_v54 = vld [vmem:[#allocation2 + $0x48] sm:$0xf]  ;;  %v3139_v60 = vor.u32 %v3137_v47, %v3136_v46  ;;  %v3767_v25 = vld [vmem:[#allocation2 + $0x54] sm:$0xf]  ;;  %v3768_v42 = vld [vmem:[#allocation2 + $0x58] sm:$0xf] }
  0x7a   : > { %4196 = vrot.lane.b32.xlu1 %v3853_v4, %s13206_s13  ;;  %v2481_v4 = vld [vmem:[#allocation2 + $0x38] sm:$0xf]  ;;  %v2611_v55 = vor.u32 %v2610_v39, %v2606_v37  ;;  %v3158_v62 = vrot.slane %v3156_v48, 7  ;;  %v534_v39 = vld [vmem:[#allocation2 + $0x20] sm:$0x8]  ;;  %v12980_v48 = vld [vmem:[%s18040_s1 + $0x10] sm:$0xff]  }
  0x7b   : > { %1631 = vrot.lane.b32.xlu0 %v1300_v14, %s13201_s27  ;;  %v2580_v11 = vshll.u32 %v2481_v4, 16  ;;  %v2584_v12 = vshrl.u32 %v2481_v4, 16  ;;  %v1886_v14 = vor.u32 %v1884_v3, %v1883_v2  ;;  %v624_v53 = vshrl.u32 %v534_v39, 16 }
  0x7c   : > { %v2612_v4 = vrot.slane %v2611_v55, 4  ;;  %v3163_v30 = vrot.slane %v3158_v62, 4  ;;  %v3570_v55 = vld [vmem:[#allocation2 + $0x48] sm:$0xf] }
  0x7d   : > { %v2582_v20 = vrot.slane %v2580_v11, 5  ;;  %v2586_v21 = vrot.slane %v2584_v12, 4  ;;  %v1887_v23 = vsel %vm13468_vm6, %v1879_v13, %v1886_v14  ;;  %v3858_v11 = vshll.u32 %v3764_v0, 16 }
  0x7e   : > { %1073 = vrot.lane.b32.xlu1 %v1002_v27, %s13199_s25  ;;  %v2601_v27 = vor.u32 %v2600_v17, %v2597_v16  ;;  %v3140_v12 = vsel %vm13468_vm6, %v12028_v58, %v3139_v60  ;;  %v3141_v14 = vrot.slane %v3136_v46, 4  ;;  %v3571_v46 = vld [vmem:[#allocation2 + $0x54] sm:$0xf]  ;;  %v632_v58 = vshll.u32 %v535_v40, 16  ;;  %v537_v60 = vld [vmem:[#allocation2 + $0x30] sm:$0x8] }
  0x7f   : > { %1635 = vrot.lane.b32.xlu0 %v1324_v28, %s13201_s27  ;;  %v2287_v28 = vld [vmem:[#allocation2 + $0x44] sm:$0xf]  ;;  %v2587_v34 = vor.u32 %v2586_v21, %v2582_v20  ;;  %v3860_v22 = vrot.slane %v3858_v11, 5 }
  0x80   : > { %v2602_v41 = vrot.slane %v2601_v27, 4 }
  0x81   : > { %v2588_v50 = vrot.slane %v2587_v34, 4  ;;  %v3569_v34 = vld [vmem:[#allocation2 + $0x44] sm:$0xf] }
  0x82   : > { %1633 = vrot.lane.b32.xlu1 %v1310_v19, %s13201_s27  ;;  %v2577_v19 = vor.u32 %v2576_v10, %v2573_v9  ;;  %v2607_v57 = vsel %vm13458_vm5, %v2602_v41, %v2606_v37  ;;  %v3765_v9 = vld [vmem:[#allocation2 + $0x48] sm:$0xf]  ;;  %v3855_v10 = vshrl.u32 %v3764_v0, 16  ;;  %v12979_v37 = vld [vmem:[%s18040_s1 + $0x18] sm:$0xff]   ;;  %v11996_v0 = vrot.slane %v624_v53, 11 }
  0x83   : > { %2160 = vrot.lane.b32.xlu0 %v1856_v52, %s13202_s28  ;;  %v2614_v52 = vshll.u32 %v2485_v38, 16  ;;  %v2593_v2 = vsel %vm13458_vm5, %v2588_v50, %v2592_v51  ;;  %v3864_v15 = vshll.u32 %v3765_v9, 16  ;;  %v3868_v16 = vshrl.u32 %v3765_v9, 16  ;;  %12819 = vmatprep.subr.bf16.mxu0 %v12979_v37  ;;  %v539_v9 = vld [vmem:[#allocation2 + $0x38] sm:$0xf] }
  0x84   : > { %v2578_v29 = vrot.slane %v2577_v19, 4  ;;  %v3857_v21 = vrot.slane %v3855_v10, 4  ;;  %v3882_v38 = vshll.u32 %v3767_v25, 16  ;;  %12820 = vmatpush3.bf16.msra.mxu0 %v12979_v37  ;;  %v663_v26 = vshll.u32 %v539_v9, 16 }
  0x85   : > { %v2616_v3 = vrot.slane %v2614_v52, 5  ;;  %v13645_v27 = vrot.slane %v3864_v15, 5  ;;  %v13665_v52 = vld [vmem:[#allocation2 + $0x44] sm:$0xf]  ;;  %12821 = vmatprep.subr.bf16.mxu0 %v12980_v48 }
  0x86   : > { %1637 = vrot.lane.b32.xlu1 %v1334_v63, %s13201_s27  ;;  %v2583_v45 = vsel %vm13458_vm5, %v2578_v29, %v2582_v20  ;;  %v3159_v63 = vshll.u32 %v3046_v36, 16  ;;  %v3168_v20 = vshll.u32 %v3047_v59, 16  ;;  %v3861_v35 = vor.u32 %v3860_v22, %v3857_v21 }
  0x87   : > { %2164 = vrot.lane.b32.xlu0 %v1878_v8, %s13202_s28  ;;  %v3165_v8 = vshrl.u32 %v3047_v59, 16  ;;  %v2617_v17 = vsel %vm13458_vm5, %v2612_v4, %v2616_v3  ;;  %v3879_v36 = vshrl.u32 %v3767_v25, 16  ;;  %v3884_v56 = vrot.slane %v3882_v38, 5  ;;  %v538_v3 = vld [vmem:[#allocation2 + $0x34] sm:$0xf] }
  0x88   : > { %v3161_v13 = vor.u32 %v3159_v63, %v3158_v62  ;;  %v3862_v50 = vrot.slane %v3861_v35, 4  ;;  %v638_v59 = vshrl.u32 %v536_v44, 16  ;;  %v3892_v63 = vshrl.u32 %v3768_v42, 16  ;;  %12822 = vmatpush3.bf16.msra.mxu0 %v12980_v48  ;;  %v1201_v35 = vld [vmem:[#allocation2 + $0x48] sm:$0xf] }
  0x89   : > { %v3167_v19 = vrot.slane %v3165_v8, 7  ;;  %v13663_v51 = vrot.slane %v3879_v36, 4  ;;  %v1336_v4 = vshrl.u32 %v13665_v52, 16  ;;  %v641_v8 = vshll.u32 %v536_v44, 16 }
  0x8a   : > { %2162 = vrot.lane.b32.xlu1 %v1865_v6, %s13202_s28  ;;  %v12029_v6 = vrot.slane %v3151_v61, 11  ;;  %v3867_v10 = vsel %vm13458_vm5, %v3862_v50, %v13645_v27  ;;  %v660_v25 = vshrl.u32 %v539_v9, 16  ;;  %v1349_v53 = vshrl.u32 %v1201_v35, 16  ;;  %v1005_v9 = vld [vmem:[#allocation2 + $0x54] sm:$0xf] }
  0x8b   : > { %2353 = vrot.lane.b32.xlu0 %v2285_v18, %s13200_s26  ;;  %v3148_v18 = vor.u32 %v3146_v7, %v3145_v5  ;;  %v3170_v32 = vor.u32 %v3168_v20, %v3167_v19  ;;  %v1060_v61 = vpop.permute.xlu0 %1059  ;;  %v1339_v5 = vshll.u32 %v13665_v52, 16  ;;  %v640_v7 = vrot.slane %v638_v59, 7  ;;  %v477_v20 = vld [vmem:[%s13439_s24 + $0x38] sm:$0xf] }
  0x8c   : > { %v3162_v24 = vsel %vm13468_vm6, %v12029_v6, %v3161_v13  ;;  %1156 = vst.msk [vmem:[#allocation3] sm:$0xf] %vm1155_vm8, %v1060_v61  ;;  %v12981_v6 = vld [vmem:[%s18040_s1 + $0x8] sm:$0xff]   ;;  %v646_v13 = vshrl.u32 %v537_v60, 16  ;;  %v3885_v15 = vor.u32 %v3884_v56, %v13663_v51  ;;  %v654_v19 = vshll.u32 %v538_v3, 16 }
  0x8d   : > { %v3149_v29 = vsel %vm13468_vm6, %v3141_v14, %v3148_v18  ;;  %v3572_v14 = vld [vmem:[#allocation2 + $0x58] sm:$0xf]  ;;  %v651_v18 = vshrl.u32 %v538_v3, 16  ;;  %510 = vst.msk [vmem:[#allocation2 + $0x84] sm:$0xf] %vm390_vm0, %v477_v20  ;;  %v1338_v36 = vrot.slane %v1336_v4, 4  ;;  %12823 = vmatprep.subr.bf16.mxu0 %v12981_v6 }
  0x8e   : > { %2166 = vrot.lane.b32.xlu1 %v1887_v23, %s13202_s28  ;;  %v3766_v23 = vld [vmem:[#allocation2 + $0x4c] sm:$0x1]  ;;  %v662_v39 = vrot.slane %v660_v25, 7  ;;  %v1345_v52 = vshll.u32 %v1201_v35, 16  ;;  %12824 = vmatpush3.bf16.msra.mxu0 %v12981_v6  ;;  %v1764_v6 = vld [vmem:[#allocation2 + $0x50] sm:$0x8] }
  0x8f   : > { %2357 = vrot.lane.b32.xlu0 %v2287_v28, %s13200_s26  ;;  %v3870_v28 = vrot.slane %v3868_v16, 4  ;;  %v1203_v16 = vld [vmem:[#allocation2 + $0x54] sm:$0xf]  ;;  %v1062_v21 = vpop.permute.xlu0 %1061 }
  0x90   : > { %1157 = vst.msk [vmem:[#allocation3 + $0x4] sm:$0xf] %vm1155_vm8, %v1062_v21  ;;  %v1360_v37 = vshrl.u32 %v1203_v16, 16  ;;  %v1363_v38 = vshll.u32 %v1203_v16, 16  ;;  %v665_v50 = vor.u32 %v663_v26, %v662_v39  ;;  %v1205_v16 = vld [vmem:[#allocation2 + $0x5c] sm:$0x1] }
  0x91   : > { %v3871_v41 = vor.u32 %v3870_v28, %v13645_v27  ;;  %v3894_v27 = vrot.slane %v3892_v63, 4  ;;  %v1889_v26 = vshrl.u32 %v1764_v6, 16  ;;  %v1379_v35 = vshll.u32 %v1205_v16, 16 }
  0x92   : > { %2355 = vrot.lane.b32.xlu1 %v2286_v33, %s13200_s26  ;;  %v3874_v33 = vshll.u32 %v3766_v23, 16  ;;  %v3769_v23 = vld [vmem:[#allocation2 + $0x5c] sm:$0x1] }
  0x93   : > { %2914 = vrot.lane.b32.xlu0 %v2583_v45, %s13203_s29  ;;  %v3171_v45 = vsel %vm13468_vm6, %v3163_v30, %v3170_v32  ;;  %v13668_v62 = vrot.slane %v3871_v41, 4  ;;  %v653_v30 = vrot.slane %v651_v18, 7  ;;  %v12983_v32 = vld [vmem:[%s18040_s1] sm:$0xff]   ;;  %v3886_v41 = vrot.slane %v3885_v15, 4 }
  0x94   : > { %v13657_v47 = vrot.slane %v3874_v33, 5  ;;  %v478_v33 = vld [vmem:[%s13439_s24 + $0x3c] sm:$0xf]  ;;  %v3898_v48 = vshll.u32 %v3769_v23, 16  ;;  %12825 = vmatprep.subr.bf16.mxu0 %v12983_v32  ;;  %v13721_v18 = vld [vmem:[#allocation2 + $0x64] sm:$0xf] }
  0x95   : > { %511 = vst.msk [vmem:[#allocation2 + $0x88] sm:$0xf] %vm390_vm0, %v478_v33  ;;  %v656_v43 = vor.u32 %v654_v19, %v653_v30  ;;  %v658_v44 = vrot.slane %v653_v30, 4  ;;  %12826 = vmatpush3.bf16.msra.mxu0 %v12983_v32  ;;  %v479_v23 = vld [vmem:[%s13439_s24 + $0x40] sm:$0xf]  ;;  %v1916_v32 = vshrl.u32 %v13721_v18, 16 }
  0x96   : > { %2359 = vrot.lane.b32.xlu1 %v2288_v54, %s13200_s26  ;;  %v629_v54 = vshrl.u32 %v535_v40, 16  ;;  %v1003_v40 = vld [vmem:[#allocation2 + $0x44] sm:$0xf]  ;;  %v3900_v4 = vrot.slane %v3898_v48, 5  ;;  %512 = vst.msk [vmem:[#allocation2 + $0x94] sm:$0xf] %vm390_vm0, %v479_v23 }
  0x97   : > { %2918 = vrot.lane.b32.xlu0 %v2607_v57, %s13203_s29  ;;  %v3888_v57 = vshll.u32 %v3768_v42, 16  ;;  %v1341_v42 = vrot.slane %v1339_v5, 5  ;;  %v1347_v5 = vrot.slane %v1345_v52, 5  ;;  %v2487_v52 = vld [vmem:[#allocation2 + $0x58] sm:$0xf] }
  0x99   : > { %v13683_v22 = vrot.slane %v3888_v57, 5  ;;  %v1362_v57 = vrot.slane %v1360_v37, 4  ;;  %v1342_v60 = vor.u32 %v1341_v42, %v1338_v36  ;;  %v1767_v37 = vld [vmem:[#allocation2 + $0x60] sm:$0x8] }
  0x9a   : > { %2916 = vrot.lane.b32.xlu1 %v2593_v2, %s13203_s29  ;;  %v631_v2 = vrot.slane %v629_v54, 7  ;;  %v1204_v54 = vld [vmem:[#allocation2 + $0x58] sm:$0xf]  ;;  %v1911_v48 = vshrl.u32 %v1767_v37, 16  ;;  %v2289_v37 = vld [vmem:[#allocation2 + $0x54] sm:$0xf] }
  0x9b   : > { %3444 = vrot.lane.b32.xlu0 %v3140_v12, %s13204_s30  ;;  %v3895_v51 = vor.u32 %v3894_v27, %v13683_v22  ;;  %v3891_v59 = vsel %vm13458_vm5, %v3886_v41, %v13683_v22  ;;  %v1373_v63 = vshrl.u32 %v1204_v54, 16  ;;  %v1766_v22 = vld [vmem:[#allocation2 + $0x58] sm:$0xf]  ;;  %v480_v27 = vld [vmem:[%s13439_s24 + $0x44] sm:$0xf] }
  0x9c   : > { %v634_v11 = vor.u32 %v632_v58, %v631_v2  ;;  %v636_v12 = vrot.slane %v631_v2, 4  ;;  %v1365_v58 = vrot.slane %v1363_v38, 5  ;;  %v1004_v2 = vld [vmem:[#allocation2 + $0x48] sm:$0xf]  ;;  %513 = vst.msk [vmem:[#allocation2 + $0x98] sm:$0xf] %vm390_vm0, %v480_v27 }
  0x9d   : > { %v3896_v3 = vrot.slane %v3895_v51, 4  ;;  %v1903_v36 = vshrl.u32 %v1766_v22, 16  ;;  %v1006_v38 = vld [vmem:[#allocation2 + $0x58] sm:$0xf]  ;;  %v1919_v51 = vshll.u32 %v13721_v18, 16 }
  0x9e   : > { %2920 = vrot.lane.b32.xlu1 %v2617_v17, %s13203_s29  ;;  %v643_v17 = vor.u32 %v641_v8, %v640_v7  ;;  %v1351_v7 = vrot.slane %v1349_v53, 4 }
  0x9f   : > { %3448 = vrot.lane.b32.xlu0 %v3162_v24, %s13204_s30  ;;  %v635_v24 = vsel %vm13468_vm6, %v11996_v0, %v634_v11  ;;  %v1765_v0 = vld [vmem:[#allocation2 + $0x54] sm:$0xf]  ;;  %v1366_v11 = vor.u32 %v1365_v58, %v1362_v57  ;;  %v3901_v19 = vsel %vm13458_vm5, %v3896_v3, %v3900_v4  ;;  %v1906_v57 = vshll.u32 %v1766_v22, 16 }
  0xa0   : > { %967 = vst.msk [vmem:[#allocation3 + $0x10] sm:$0xf] %vm390_vm0, %v635_v24  ;;  %v644_v28 = vsel %vm13468_vm6, %v636_v12, %v643_v17  ;;  %v1343_v12 = vrot.slane %v1342_v60, 4  ;;  %v1375_v17 = vrot.slane %v1373_v63, 4  ;;  %v1352_v20 = vor.u32 %v1351_v7, %v1347_v5 }
  0xa1   : > { %968 = vst.msk [vmem:[#allocation3 + $0x14] sm:$0xf] %vm390_vm0, %v644_v28  ;;  %v1367_v25 = vrot.slane %v1366_v11, 4  ;;  %v1897_v30 = vshll.u32 %v1765_v0, 16  ;;  %v2628_v63 = vshll.u32 %v2487_v52, 16  ;;  %v12015_v4 = vrot.slane %v1911_v48, 11 }
  0xa2   : > { %3446 = vrot.lane.b32.xlu1 %v3149_v29, %s13204_s30  ;;  %v11997_v29 = vrot.slane %v646_v13, 11  ;;  %v1894_v13 = vshrl.u32 %v1765_v0, 16  ;;  %v1348_v28 = vsel %vm13458_vm5, %v1343_v12, %v1347_v5  ;;  %v1353_v39 = vrot.slane %v1352_v20, 4  ;;  %v2490_v20 = vld [vmem:[#allocation2 + $0x68] sm:$0xf] }
  0xa3   : > { %3637 = vrot.lane.b32.xlu0 %v3569_v34, %s13205_s12  ;;  %v2632_v0 = vshrl.u32 %v2487_v52, 16  ;;  %v13763_v16 = vrot.slane %v2628_v63, 5  ;;  %v13786_v48 = vld [vmem:[#allocation2 + $0x70] sm:$0x8]  ;;  %v541_v63 = vld [vmem:[#allocation2 + $0x44] sm:$0xf] }
  0xa6   : > { %3450 = vrot.lane.b32.xlu1 %v3171_v45, %s13204_s30 }
  0xa7   : > { %3641 = vrot.lane.b32.xlu0 %v3571_v46, %s13205_s12  ;;  %v3877_v46 = vsel %vm13458_vm5, %v13668_v62, %v13657_v47  ;;  %v666_v47 = vsel %vm13468_vm6, %v658_v44, %v665_v50  ;;  %v1369_v62 = vshll.u32 %v1204_v54, 16  ;;  %v1769_v44 = vld [vmem:[#allocation2 + $0x68] sm:$0xf]  ;;  %v13744_v50 = vrot.slane %v1916_v32, 7 }
  0xa8   : > { %970 = vst.msk [vmem:[#allocation3 + $0x1c] sm:$0xf] %vm390_vm0, %v666_v47  ;;  %v1925_v47 = vshrl.u32 %v1769_v44, 16  ;;  %v1928_v6 = vshll.u32 %v1769_v44, 16  ;;  %v2291_v44 = vld [vmem:[#allocation2 + $0x64] sm:$0xf] }
  0xa9   : > { %v1371_v15 = vrot.slane %v1369_v62, 5  ;;  %v1921_v5 = vor.u32 %v1919_v51, %v13744_v50  ;;  %v1923_v27 = vrot.slane %v13744_v50, 4 }
  0xaa   : > { %3639 = vrot.lane.b32.xlu1 %v3570_v55, %s13205_s12  ;;  %v657_v55 = vsel %vm13468_vm6, %v11997_v29, %v656_v43  ;;  %v13734_v29 = vrot.slane %v1894_v13, 7  ;;  %v12014_v43 = vrot.slane %v1889_v26, 11  ;;  %v1927_v12 = vrot.slane %v1925_v47, 7 }
  0xab   : > { %4198 = vrot.lane.b32.xlu0 %v3867_v10, %s13206_s13  ;;  %969 = vst.msk [vmem:[#allocation3 + $0x18] sm:$0xf] %vm390_vm0, %v657_v55  ;;  %v1202_v10 = vld [vmem:[#allocation2 + $0x4c] sm:$0x1]  ;;  %v1372_v42 = vsel %vm13458_vm5, %v1367_v25, %v1371_v15  ;;  %v1381_v55 = vrot.slane %v1379_v35, 5  ;;  %v1922_v18 = vsel %vm13468_vm6, %v12015_v4, %v1921_v5  ;;  %v2652_v35 = vshll.u32 %v2490_v20, 16 }
  0xac   : > { %v1064_v34 = vpop.permute.xlu1 %1063  ;;  %v1355_v21 = vshll.u32 %v1202_v10, 16  ;;  %v1901_v3 = vrot.slane %v13734_v29, 4  ;;  %v3048_v25 = vld [vmem:[#allocation2 + $0x60] sm:$0x8]  ;;  %v543_v5 = vld [vmem:[#allocation2 + $0x50] sm:$0x8] }
  0xad   : > { %1158 = vst.msk [vmem:[#allocation3 + $0x8] sm:$0xf] %vm1155_vm8, %v1064_v34  ;;  %v2346_v45 = vpop.permute.xlu0 %2345  ;;  %v1376_v34 = vor.u32 %v1375_v17, %v1371_v15  ;;  %v2634_v17 = vrot.slane %v2632_v0, 4  ;;  %v542_v0 = vld [vmem:[#allocation2 + $0x48] sm:$0xf] }
  0xae   : > { %3643 = vrot.lane.b32.xlu1 %v3572_v14, %s13205_s12 }
  0xaf   : > { %1075 = vrot.lane.b32.xlu0 %v1003_v40, %s13199_s25  ;;  %v1357_v40 = vrot.slane %v1355_v21, 5  ;;  %v1377_v54 = vrot.slane %v1376_v34, 4 }
  0xb0   : > { %v1066_v56 = vpop.permute.xlu1 %1065 }
  0xb1   : > { %1159 = vst.msk [vmem:[#allocation3 + $0xc] sm:$0xf] %vm1155_vm8, %v1066_v56  ;;  %v1624_v61 = vpop.permute.xlu0 %1623  ;;  %v1905_v56 = vrot.slane %v1903_v36, 7  ;;  %v1358_v58 = vsel %vm13458_vm5, %v1353_v39, %v1357_v40  ;;  %v1382_v7 = vsel %vm13458_vm5, %v1377_v54, %v1381_v55  ;;  %v2656_v36 = vshrl.u32 %v2490_v20, 16  ;;  %v13797_v55 = vld [vmem:[#allocation2 + $0x74] sm:$0xf] }
  0xb2   : > { %4200 = vrot.lane.b32.xlu1 %v3877_v46, %s13206_s13  ;;  %1720 = vst.msk [vmem:[#allocation3] sm:$0xf] %vm1719_vm9, %v1624_v61  ;;  %v1899_v46 = vor.u32 %v1897_v30, %v13734_v29  ;;  %v2489_v61 = vld [vmem:[#allocation2 + $0x64] sm:$0xf]  ;;  %v3173_v39 = vshrl.u32 %v3048_v25, 16 }
  0xb3   : > { %4202 = vrot.lane.b32.xlu0 %v3891_v59, %s13206_s13  ;;  %v2643_v10 = vshrl.u32 %v2489_v61, 16  ;;  %v2646_v11 = vshll.u32 %v2489_v61, 16  ;;  %v13774_v30 = vld [vmem:[#allocation2 + $0x64] sm:$0xf]  ;;  %v13795_v54 = vrot.slane %v2656_v36, 4 }
  0xb4   : > { %v2348_v8 = vpop.permute.xlu1 %2347  ;;  %v3181_v47 = vshll.u32 %v13774_v30, 16 }
  0xb5   : > { %v2153_v14 = vpop.permute.xlu0 %2152  ;;  %v2645_v22 = vrot.slane %v2643_v10, 4  ;;  %v2648_v23 = vrot.slane %v2646_v11, 5  ;;  %v3195_v11 = vshrl.u32 %v13786_v48, 16  ;;  %v483_v48 = vld [vmem:[%s13439_s24 + $0x50] sm:$0xf] }
  0xb6   : > { %1077 = vrot.lane.b32.xlu1 %v1004_v2, %s13199_s25  ;;  %2249 = vst.msk [vmem:[#allocation3] sm:$0xf] %vm2248_vm10, %v2153_v14  ;;  %v1900_v2 = vsel %vm13468_vm6, %v12014_v43, %v1899_v46  ;;  %v13784_v46 = vld [vmem:[#allocation2 + $0x68] sm:$0xf] }
  0xb7   : > { %1079 = vrot.lane.b32.xlu0 %v1005_v9, %s13199_s25  ;;  %2442 = vst.msk [vmem:[#allocation3] sm:$0xf] %vm2441_vm11, %v2346_v45  ;;  %v2486_v45 = vld [vmem:[#allocation2 + $0x54] sm:$0xf]  ;;  %v1908_v9 = vor.u32 %v1906_v57, %v1905_v56  ;;  %v2290_v56 = vld [vmem:[#allocation2 + $0x58] sm:$0xf] }
  0xb8   : > { %v1626_v24 = vpop.permute.xlu1 %1625  ;;  %v2619_v59 = vshrl.u32 %v2486_v45, 16  ;;  %v2622_v60 = vshll.u32 %v2486_v45, 16  ;;  %v3190_v4 = vshll.u32 %v13784_v46, 16  ;;  %516 = vst.msk [vmem:[#allocation2 + $0xb4] sm:$0xf] %vm390_vm0, %v483_v48 }
  0xb9   : > { %1721 = vst.msk [vmem:[#allocation3 + $0x4] sm:$0xf] %vm1719_vm9, %v1626_v24  ;;  %v2157_v33 = vpop.permute.xlu0 %2156  ;;  %v2491_v24 = vld [vmem:[#allocation2 + $0x6c] sm:$0x1]  ;;  %v1909_v26 = vsel %vm13468_vm6, %v1901_v3, %v1908_v9  ;;  %v3187_v3 = vshrl.u32 %v13784_v46, 16 }
  0xba   : > { %4204 = vrot.lane.b32.xlu1 %v3901_v19, %s13206_s13  ;;  %v2621_v13 = vrot.slane %v2619_v59, 4  ;;  %v2624_v14 = vrot.slane %v2622_v60, 5  ;;  %v2488_v19 = vld [vmem:[#allocation2 + $0x5c] sm:$0x1]  ;;  %v540_v59 = vld [vmem:[#allocation2 + $0x40] sm:$0x8] }
  0xbb   : > { %1639 = vrot.lane.b32.xlu0 %v1348_v28, %s13201_s27  ;;  %v1930_v28 = vor.u32 %v1928_v6, %v1927_v12  ;;  %v2638_v34 = vshll.u32 %v2488_v19, 16  ;;  %v668_v12 = vshrl.u32 %v540_v59, 16  ;;  %v545_v6 = vld [vmem:[#allocation2 + $0x58] sm:$0xf]  ;;  %v12031_v59 = vrot.slane %v3195_v11, 11 }
  0xbc   : > { %v2155_v41 = vpop.permute.xlu1 %2154  ;;  %v2625_v29 = vor.u32 %v2624_v14, %v2621_v13  ;;  %v481_v13 = vld [vmem:[%s13439_s24 + $0x48] sm:$0xf]  ;;  %v3200_v14 = vshrl.u32 %v13797_v55, 16  ;;  %v3576_v48 = vld [vmem:[#allocation2 + $0x78] sm:$0xf] }
  0xbd   : > { %2250 = vst.msk [vmem:[#allocation3 + $0x4] sm:$0xf] %vm2248_vm10, %v2155_v41  ;;  %v1628_v53 = vpop.permute.xlu0 %1627  ;;  %v2649_v41 = vor.u32 %v2648_v23, %v2645_v22  ;;  %v1931_v43 = vsel %vm13468_vm6, %v1923_v27, %v1930_v28  ;;  %v13791_v52 = vrot.slane %v2638_v34, 5  ;;  %v3203_v22 = vshll.u32 %v13797_v55, 16 }
  0xbe   : > { %1081 = vrot.lane.b32.xlu1 %v1006_v38, %s13199_s25  ;;  %2443 = vst.msk [vmem:[#allocation3 + $0x4] sm:$0xf] %vm2441_vm11, %v2348_v8  ;;  %v2662_v38 = vshll.u32 %v2491_v24, 16  ;;  %v2626_v45 = vrot.slane %v2625_v29, 4  ;;  %v685_v23 = vshll.u32 %v542_v0, 16  ;;  %v11998_v25 = vrot.slane %v668_v12, 11 }
  0xbf   : > { %1722 = vst.msk [vmem:[#allocation3 + $0x8] sm:$0xf] %vm1719_vm9, %v1628_v53  ;;  %1643 = vrot.lane.b32.xlu0 %v1372_v42, %s13201_s27  ;;  %v3178_v42 = vshrl.u32 %v13774_v30, 16  ;;  %v13793_v53 = vrot.slane %v2652_v35, 5  ;;  %v13806_v61 = vrot.slane %v2649_v41, 4  ;;  %v690_v28 = vshrl.u32 %v543_v5, 16 }
  0xc0   : > { %2251 = vst.msk [vmem:[#allocation3 + $0x8] sm:$0xf] %vm2248_vm10, %v2157_v33  ;;  %v2159_v62 = vpop.permute.xlu1 %2158  ;;  %v2635_v33 = vor.u32 %v2634_v17, %v13763_v16  ;;  %v13800_v57 = vrot.slane %v2662_v38, 5  ;;  %v682_v17 = vshrl.u32 %v542_v0, 16  ;;  %v2292_v24 = vld [vmem:[#allocation2 + $0x68] sm:$0xf] }
  0xc1   : > { %v2350_v8 = vpop.permute.xlu0 %2349  ;;  %v2659_v10 = vor.u32 %v13795_v54, %v13793_v53  ;;  %514 = vst.msk [vmem:[#allocation2 + $0xa4] sm:$0xf] %vm390_vm0, %v481_v13  ;;  %v2655_v20 = vsel %vm13458_vm5, %v13806_v61, %v13793_v53  ;;  %v13841_v30 = vld [vmem:[#allocation2 + $0x78] sm:$0xf]  ;;  %v704_v34 = vshrl.u32 %v545_v6, 16  ;;  %v707_v35 = vshll.u32 %v545_v6, 16 }
  0xc2   : > { %1641 = vrot.lane.b32.xlu1 %v1358_v58, %s13201_s27  ;;  %2444 = vst.msk [vmem:[#allocation3 + $0x8] sm:$0xf] %vm2441_vm11, %v2350_v8  ;;  %v13789_v51 = vrot.slane %v2635_v33, 4  ;;  %v13802_v58 = vrot.slane %v3173_v39, 11  ;;  %v684_v27 = vrot.slane %v682_v17, 7  ;;  %v13844_v36 = vrot.slane %v3200_v14, 7 }
  0xc3   : > { %2168 = vrot.lane.b32.xlu0 %v1900_v2, %s13202_s28  ;;  %v2631_v2 = vsel %vm13458_vm5, %v2626_v45, %v13763_v16  ;;  %v676_v16 = vshll.u32 %v541_v63, 16  ;;  %v706_v45 = vrot.slane %v704_v34, 7  ;;  %v3209_v53 = vshrl.u32 %v13841_v30, 16  ;;  %v3773_v14 = vld [vmem:[#allocation2 + $0x74] sm:$0xf] }
  0xc4   : > { %v1630_v15 = vpop.permute.xlu1 %1629  ;;  %v2641_v9 = vsel %vm13458_vm5, %v13789_v51, %v13791_v52  ;;  %v3212_v52 = vshll.u32 %v13841_v30, 16  ;;  %v3575_v30 = vld [vmem:[#allocation2 + $0x74] sm:$0xf] }
  0xc5   : > { %1723 = vst.msk [vmem:[#allocation3 + $0xc] sm:$0xf] %vm1719_vm9, %v1630_v15  ;;  %v2907_v21 = vpop.permute.xlu0 %2906  ;;  %v673_v15 = vshrl.u32 %v541_v63, 16  ;;  %v709_v63 = vor.u32 %v707_v35, %v706_v45  ;;  %v3211_v51 = vrot.slane %v3209_v53, 7  ;;  %v1209_v45 = vld [vmem:[#allocation2 + $0x74] sm:$0xf] }
  0xc6   : > { %2252 = vst.msk [vmem:[#allocation3 + $0xc] sm:$0xf] %vm2248_vm10, %v2159_v62  ;;  %1645 = vrot.lane.b32.xlu1 %v1382_v7, %s13201_s27  ;;  %v13808_v62 = vrot.slane %v3178_v42, 7  ;;  %v544_v7 = vld [vmem:[#allocation2 + $0x54] sm:$0xf]  ;;  %v3189_v42 = vrot.slane %v3187_v3, 7 }
  0xc7   : > { %3003 = vst.msk [vmem:[#allocation3] sm:$0xf] %vm3002_vm12, %v2907_v21  ;;  %2172 = vrot.lane.b32.xlu0 %v1922_v18, %s13202_s28  ;;  %v482_v18 = vld [vmem:[%s13439_s24 + $0x4c] sm:$0xf]  ;;  %v698_v33 = vshll.u32 %v544_v7, 16 }
  0xc8   : > { %v2352_v32 = vpop.permute.xlu1 %2351  ;;  %v13835_v21 = vor.u32 %v3181_v47, %v13808_v62  ;;  %515 = vst.msk [vmem:[#allocation2 + $0xa8] sm:$0xf] %vm390_vm0, %v482_v18 }
  0xc9   : > { %2445 = vst.msk [vmem:[#allocation3 + $0xc] sm:$0xf] %vm2441_vm11, %v2352_v32  ;;  %v2911_v40 = vpop.permute.xlu0 %2910  ;;  %v695_v32 = vshrl.u32 %v544_v7, 16 }
  0xca   : > { %2170 = vrot.lane.b32.xlu1 %v1909_v26, %s13202_s28  ;;  %3005 = vst.msk [vmem:[#allocation3 + $0x8] sm:$0xf] %vm3002_vm12, %v2911_v40  ;;  %v675_v26 = vrot.slane %v673_v15, 7  ;;  %v687_v40 = vor.u32 %v685_v23, %v684_v27  ;;  %v3184_v0 = vsel %vm13468_vm6, %v13802_v58, %v13835_v21  ;;  %v3207_v15 = vrot.slane %v13844_v36, 4 }
  0xcb   : > { %2361 = vrot.lane.b32.xlu0 %v2289_v37, %s13200_s26  ;;  %v3770_v37 = vld [vmem:[#allocation2 + $0x64] sm:$0xf]  ;;  %v3930_v23 = vshll.u32 %v3773_v14, 16 }
  0xcc   : > { %v2909_v50 = vpop.permute.xlu1 %2908  ;;  %v678_v38 = vor.u32 %v676_v16, %v675_v26  ;;  %v680_v39 = vrot.slane %v675_v26, 4  ;;  %v3903_v3 = vshrl.u32 %v3770_v37, 16  ;;  %v3906_v5 = vshll.u32 %v3770_v37, 16 }
  0xcd   : > { %3004 = vst.msk [vmem:[#allocation3 + $0x4] sm:$0xf] %vm3002_vm12, %v2909_v50  ;;  %v3437_v60 = vpop.permute.xlu0 %3436  ;;  %v2660_v50 = vrot.slane %v2659_v10, 4  ;;  %v3192_v10 = vor.u32 %v3190_v4, %v3189_v42  ;;  %v3214_v16 = vor.u32 %v3212_v52, %v3211_v51 }
  0xce   : > { %2174 = vrot.lane.b32.xlu1 %v1931_v43, %s13202_s28  ;;  %3533 = vst.msk [vmem:[#allocation3] sm:$0xf] %vm3532_vm13, %v3437_v60  ;;  %v11999_v43 = vrot.slane %v690_v28, 11  ;;  %v679_v54 = vsel %vm13468_vm6, %v11998_v25, %v678_v38  ;;  %v688_v55 = vsel %vm13468_vm6, %v680_v39, %v687_v40  ;;  %v3774_v28 = vld [vmem:[#allocation2 + $0x78] sm:$0xf] }
  0xcf   : > { %2365 = vrot.lane.b32.xlu0 %v2291_v44, %s13200_s26  ;;  %v697_v44 = vrot.slane %v695_v32, 7  ;;  %971 = vst.msk [vmem:[#allocation3 + $0x20] sm:$0xf] %vm390_vm0, %v679_v54  ;;  %972 = vst.msk [vmem:[#allocation3 + $0x24] sm:$0xf] %vm390_vm0, %v688_v55  ;;  %v2665_v12 = vsel %vm13458_vm5, %v2660_v50, %v13800_v57  ;;  %v3905_v57 = vrot.slane %v3903_v3, 4  ;;  %v3215_v25 = vsel %vm13468_vm6, %v3207_v15, %v3214_v16 }
  0xd0   : > { %v2913_v8 = vpop.permute.xlu1 %2912  ;;  %v3772_v32 = vld [vmem:[#allocation2 + $0x6c] sm:$0x1]  ;;  %v3936_v38 = vshll.u32 %v3774_v28, 16  ;;  %v3940_v39 = vshrl.u32 %v3774_v28, 16  ;;  %v1206_v40 = vld [vmem:[#allocation2 + $0x64] sm:$0xf] }
  0xd1   : > { %3006 = vst.msk [vmem:[#allocation3 + $0xc] sm:$0xf] %vm3002_vm12, %v2913_v8  ;;  %v3441_v19 = vpop.permute.xlu0 %3440  ;;  %v700_v60 = vor.u32 %v698_v33, %v697_v44  ;;  %v702_v61 = vrot.slane %v697_v44, 4  ;;  %v3185_v8 = vrot.slane %v13808_v62, 4  ;;  %v3771_v62 = vld [vmem:[#allocation2 + $0x68] sm:$0xf] }
  0xd2   : > { %2363 = vrot.lane.b32.xlu1 %v2290_v56, %s13200_s26  ;;  %3535 = vst.msk [vmem:[#allocation3 + $0x8] sm:$0xf] %vm3532_vm13, %v3441_v19  ;;  %v484_v56 = vld [vmem:[%s13439_s24 + $0x54] sm:$0xf]  ;;  %v3912_v17 = vshll.u32 %v3771_v62, 16  ;;  %v3916_v18 = vshrl.u32 %v3771_v62, 16 }
  0xd3   : > { %2922 = vrot.lane.b32.xlu0 %v2631_v2, %s13203_s29  ;;  %517 = vst.msk [vmem:[#allocation2 + $0xb8] sm:$0xf] %vm390_vm0, %v484_v56  ;;  %v3205_v2 = vor.u32 %v3203_v22, %v13844_v36  ;;  %v701_v58 = vsel %vm13468_vm6, %v11999_v43, %v700_v60  ;;  %v710_v11 = vsel %vm13468_vm6, %v702_v61, %v709_v63  ;;  %v3927_v22 = vshrl.u32 %v3773_v14, 16  ;;  %v3574_v33 = vld [vmem:[#allocation2 + $0x68] sm:$0xf] }
  0xd4   : > { %v3439_v29 = vpop.permute.xlu1 %3438  ;;  %973 = vst.msk [vmem:[#allocation3 + $0x28] sm:$0xf] %vm390_vm0, %v701_v58  ;;  %974 = vst.msk [vmem:[#allocation3 + $0x2c] sm:$0xf] %vm390_vm0, %v710_v11  ;;  %v3193_v6 = vsel %vm13468_vm6, %v3185_v8, %v3192_v10  ;;  %v3914_v26 = vrot.slane %v3912_v17, 5  ;;  %v3918_v27 = vrot.slane %v3916_v18, 4 }
  0xd5   : > { %3534 = vst.msk [vmem:[#allocation3 + $0x4] sm:$0xf] %vm3532_vm13, %v3439_v29  ;;  %v3630_v41 = vpop.permute.xlu0 %3629  ;;  %v3206_v4 = vsel %vm13468_vm6, %v12031_v59, %v3205_v2  ;;  %v3929_v35 = vrot.slane %v3927_v22, 4  ;;  %v3932_v36 = vrot.slane %v3930_v23, 5  ;;  %v3922_v42 = vshll.u32 %v3772_v32, 16 }
  0xd6   : > { %2367 = vrot.lane.b32.xlu1 %v2292_v24, %s13200_s26  ;;  %3726 = vst.msk [vmem:[#allocation3] sm:$0xf] %vm3725_vm14, %v3630_v41  ;;  %v3919_v41 = vor.u32 %v3918_v27, %v3914_v26  ;;  %v1207_v43 = vld [vmem:[#allocation2 + $0x68] sm:$0xf]  ;;  %v1384_v54 = vshrl.u32 %v1206_v40, 16  ;;  %v1387_v55 = vshll.u32 %v1206_v40, 16 }
  0xd7   : > { %2926 = vrot.lane.b32.xlu0 %v2655_v20, %s13203_s29  ;;  %v3573_v20 = vld [vmem:[#allocation2 + $0x64] sm:$0xf]  ;;  %v3933_v53 = vor.u32 %v3932_v36, %v3929_v35  ;;  %v1210_v56 = vld [vmem:[#allocation2 + $0x78] sm:$0xf]  ;;  %v3938_v59 = vrot.slane %v3936_v38, 5  ;;  %v3942_v61 = vrot.slane %v3940_v39, 4 }
  0xd8   : > { %v3443_v47 = vpop.permute.xlu1 %3442  ;;  %v3775_v60 = vld [vmem:[#allocation2 + $0x7c] sm:$0x1]  ;;  %v1393_v63 = vshll.u32 %v1207_v43, 16  ;;  %v3920_v2 = vrot.slane %v3919_v41, 4  ;;  %v3924_v3 = vrot.slane %v3922_v42, 5  ;;  %v1411_v8 = vshll.u32 %v1209_v45, 16 }
  0xd9   : > { %3536 = vst.msk [vmem:[#allocation3 + $0xc] sm:$0xf] %vm3532_vm13, %v3443_v47  ;;  %v3634_v7 = vpop.permute.xlu0 %3633  ;;  %v13911_v10 = vld [vmem:[#allocation2 + $0x74] sm:$0xf]  ;;  %v1421_v51 = vshrl.u32 %v1210_v56, 16  ;;  %v3934_v52 = vrot.slane %v3933_v53, 4 }
  0xda   : > { %2924 = vrot.lane.b32.xlu1 %v2641_v9, %s13203_s29  ;;  %3728 = vst.msk [vmem:[#allocation3 + $0x8] sm:$0xf] %vm3725_vm14, %v3634_v7  ;;  %v3908_v9 = vrot.slane %v3906_v5, 5  ;;  %v1007_v5 = vld [vmem:[#allocation2 + $0x64] sm:$0xf]  ;;  %v1408_v7 = vshrl.u32 %v1209_v45, 16  ;;  %v3925_v15 = vsel %vm13458_vm5, %v3920_v2, %v3924_v3 }
  0xdb   : > { %3452 = vrot.lane.b32.xlu0 %v3184_v0, %s13204_s30  ;;  %v1397_v0 = vshrl.u32 %v1207_v43, 16  ;;  %v1389_v62 = vrot.slane %v1387_v55, 5  ;;  %v1413_v17 = vrot.slane %v1411_v8, 5  ;;  %v1211_v18 = vld [vmem:[#allocation2 + $0x7c] sm:$0x1]  ;;  %v1423_v22 = vrot.slane %v1421_v51, 4 }
  0xdc   : > { %v3632_v46 = vpop.permute.xlu1 %3631  ;;  %v3909_v21 = vor.u32 %v3908_v9, %v3905_v57  ;;  %v3943_v9 = vor.u32 %v3942_v61, %v3938_v59  ;;  %v1410_v16 = vrot.slane %v1408_v7, 4  ;;  %v1770_v23 = vld [vmem:[#allocation2 + $0x70] sm:$0x8]  ;;  %v13929_v28 = vld [vmem:[#allocation2 + $0x78] sm:$0xf]  ;;  %v1941_v39 = vshll.u32 %v13911_v10, 16 }
  0xdd   : > { %3727 = vst.msk [vmem:[#allocation3 + $0x4] sm:$0xf] %vm3725_vm14, %v3632_v46  ;;  %v4191_v13 = vpop.permute.xlu0 %4190  ;;  %v1386_v46 = vrot.slane %v1384_v54, 4  ;;  %v1399_v14 = vrot.slane %v1397_v0, 4  ;;  %v1773_v35 = vld [vmem:[#allocation2 + $0x80] sm:$0x8] }
  0xde   : > { %2928 = vrot.lane.b32.xlu1 %v2665_v12, %s13203_s29  ;;  %4287 = vst.msk [vmem:[#allocation3] sm:$0xf] %vm4286_vm15, %v4191_v13  ;;  %v3910_v34 = vrot.slane %v3909_v21, 4  ;;  %v1417_v12 = vshll.u32 %v1210_v56, 16  ;;  %v13917_v13 = vrot.slane %v1393_v63, 5  ;;  %v1414_v36 = vor.u32 %v1413_v17, %v1410_v16 }
  0xdf   : > { %3456 = vrot.lane.b32.xlu0 %v3206_v4, %s13204_s30  ;;  %v1208_v4 = vld [vmem:[#allocation2 + $0x6c] sm:$0x1]  ;;  %v1947_v43 = vshrl.u32 %v13929_v28, 16  ;;  %v1950_v63 = vshll.u32 %v13929_v28, 16  ;;  %v13965_v8 = vld [vmem:[#allocation2 + $0x88] sm:$0xf] }
  0xe0   : > { %v3636_v19 = vpop.permute.xlu1 %3635  ;;  %v3915_v50 = vsel %vm13458_vm5, %v3910_v34, %v3914_v26  ;;  %v13924_v21 = vrot.slane %v1417_v12, 5  ;;  %v1390_v26 = vor.u32 %v1389_v62, %v1386_v46  ;;  %v1403_v27 = vshll.u32 %v1208_v4, 16  ;;  %v546_v12 = vld [vmem:[#allocation2 + $0x60] sm:$0x8]  ;;  %v547_v51 = vld [vmem:[#allocation2 + $0x64] sm:$0xf] }
  0xe1   : > { %3729 = vst.msk [vmem:[#allocation3 + $0xc] sm:$0xf] %vm3725_vm14, %v3636_v19  ;;  %v1068_v24 = vpop.permute.xlu0 %1067  ;;  %v1938_v19 = vshrl.u32 %v13911_v10, 16  ;;  %v1427_v34 = vshll.u32 %v1211_v18, 16  ;;  %v1010_v10 = vld [vmem:[#allocation2 + $0x78] sm:$0xf] }
  0xe2   : > { %3454 = vrot.lane.b32.xlu1 %v3193_v6, %s13204_s30  ;;  %1160 = vst.msk [vmem:[#allocation3 + $0x10] sm:$0xf] %vm1155_vm8, %v1068_v24  ;;  %v3946_v6 = vshll.u32 %v3775_v60, 16  ;;  %v1008_v24 = vld [vmem:[#allocation2 + $0x68] sm:$0xf]  ;;  %v1424_v42 = vor.u32 %v1423_v22, %v13924_v21  ;;  %v1391_v45 = vrot.slane %v1390_v26, 4 }
  0xe3   : > { %3645 = vrot.lane.b32.xlu0 %v3573_v20, %s13205_s12  ;;  %v13934_v38 = vrot.slane %v1938_v19, 7  ;;  %v13951_v56 = vrot.slane %v1427_v34, 5  ;;  %v548_v4 = vld [vmem:[#allocation2 + $0x68] sm:$0xf]  ;;  %v712_v16 = vshrl.u32 %v546_v12, 16  ;;  %v717_v17 = vshrl.u32 %v547_v51, 16 }
  0xe4   : > { %v4193_v29 = vpop.permute.xlu1 %4192  ;;  %v3948_v32 = vrot.slane %v3946_v6, 5  ;;  %v13961_v2 = vrot.slane %v1424_v42, 4  ;;  %v1972_v6 = vshll.u32 %v13965_v8, 16  ;;  %v549_v18 = vld [vmem:[#allocation2 + $0x70] sm:$0x8] }
  0xe5   : > { %4288 = vst.msk [vmem:[#allocation3 + $0x4] sm:$0xf] %vm4286_vm15, %v4193_v29  ;;  %v4195_v37 = vpop.permute.xlu0 %4194  ;;  %v13957_v61 = vor.u32 %v1941_v39, %v13934_v38  ;;  %v1945_v3 = vrot.slane %v13934_v38, 4  ;;  %v550_v19 = vld [vmem:[#allocation2 + $0x74] sm:$0xf]  ;;  %v719_v28 = vrot.slane %v717_v17, 7 }
  0xe6   : > { %3458 = vrot.lane.b32.xlu1 %v3215_v25, %s13204_s30  ;;  %4289 = vst.msk [vmem:[#allocation3 + $0x8] sm:$0xf] %vm4286_vm15, %v4195_v37  ;;  %v3939_v25 = vsel %vm13458_vm5, %v3934_v52, %v3938_v59  ;;  %v1933_v37 = vshrl.u32 %v1770_v23, 16  ;;  %v1415_v59 = vrot.slane %v1414_v36, 4  ;;  %v720_v23 = vshll.u32 %v547_v51, 16 }
  0xe7   : > { %3649 = vrot.lane.b32.xlu0 %v3575_v30, %s13205_s12  ;;  %v3944_v30 = vrot.slane %v3943_v9, 4  ;;  %v1969_v9 = vshrl.u32 %v13965_v8, 16  ;;  %v739_v34 = vshrl.u32 %v550_v19, 16  ;;  %v742_v39 = vshll.u32 %v550_v19, 16  ;;  %v2293_v38 = vld [vmem:[#allocation2 + $0x74] sm:$0xf] }
  0xe8   : > { %v1070_v44 = vpop.permute.xlu1 %1069  ;;  %v13954_v60 = vrot.slane %v1933_v37, 11  ;;  %v722_v36 = vor.u32 %v720_v23, %v719_v28  ;;  %v724_v37 = vrot.slane %v719_v28, 4  ;;  %v2494_v19 = vld [vmem:[#allocation2 + $0x7c] sm:$0x1]  ;;  %v2294_v28 = vld [vmem:[#allocation2 + $0x78] sm:$0xf] }
  0xe9   : > { %1161 = vst.msk [vmem:[#allocation3 + $0x14] sm:$0xf] %vm1155_vm8, %v1070_v44  ;;  %v1072_v47 = vpop.permute.xlu0 %1071  ;;  %v1009_v44 = vld [vmem:[#allocation2 + $0x74] sm:$0xf]  ;;  %v3949_v53 = vsel %vm13458_vm5, %v3944_v30, %v3948_v32 }
  0xea   : > { %3647 = vrot.lane.b32.xlu1 %v3574_v33, %s13205_s12  ;;  %1162 = vst.msk [vmem:[#allocation3 + $0x18] sm:$0xf] %vm1155_vm8, %v1072_v47  ;;  %v1400_v33 = vor.u32 %v1399_v14, %v13917_v13  ;;  %v1955_v47 = vshrl.u32 %v1773_v35, 16  ;;  %v1420_v14 = vsel %vm13458_vm5, %v1415_v59, %v13924_v21  ;;  %v726_v21 = vshrl.u32 %v548_v4, 16  ;;  %v2493_v59 = vld [vmem:[#allocation2 + $0x78] sm:$0xf] }
  0xeb   : > { %4206 = vrot.lane.b32.xlu0 %v3915_v50, %s13206_s13  ;;  %v13943_v50 = vld [vmem:[#allocation2 + $0x84] sm:$0xf] }
  0xec   : > { %v4197_v58 = vpop.permute.xlu1 %4196  ;;  %v12982_v11 = vld [vmem:[#allocation3] sm:$0xff]   ;;  %v13949_v55 = vrot.slane %v1400_v33, 4  ;;  %v1960_v7 = vshrl.u32 %v13943_v50, 16  ;;  %v13974_v46 = vrot.slane %v1955_v47, 11  ;;  %v1963_v62 = vshll.u32 %v13943_v50, 16 }
  0xed   : > { %4290 = vst.msk [vmem:[#allocation3 + $0xc] sm:$0xf] %vm4286_vm15, %v4197_v58  ;;  %12827 = vmatprep.mubr.msk.bf16.mxu0 %vm4474_vm1, %v12982_v11  ;;  %v1632_v57 = vpop.permute.xlu0 %1631  ;;  %v1396_v58 = vsel %vm13458_vm5, %v1391_v45, %v13917_v13  ;;  %v13971_v11 = vld [vmem:[#allocation2 + $0x74] sm:$0xf]  ;;  %v728_v32 = vrot.slane %v726_v21, 7  ;;  %v734_v33 = vshrl.u32 %v549_v18, 16 }
  0xee   : > { %3651 = vrot.lane.b32.xlu1 %v3576_v48, %s13205_s12  ;;  %1724 = vst.msk [vmem:[#allocation3 + $0x10] sm:$0xf] %vm1719_vm9, %v1632_v57  ;;  %v13941_v48 = vrot.slane %v1403_v27, 5  ;;  %v13997_v22 = vrot.slane %v1960_v7, 7  ;;  %v2667_v26 = vshrl.u32 %v13971_v11, 16  ;;  %v12000_v27 = vrot.slane %v712_v16, 11 }
  0xef   : > { %1083 = vrot.lane.b32.xlu0 %v1007_v5, %s13199_s25  ;;  %v1949_v5 = vrot.slane %v1947_v43, 7  ;;  %v2670_v30 = vshll.u32 %v13971_v11, 16  ;;  %v12001_v43 = vrot.slane %v734_v33, 11  ;;  %v485_v45 = vld [vmem:[%s13439_s24 + $0x58] sm:$0xf]  ;;  %v1971_v47 = vrot.slane %v1969_v9, 7 }
  0xf0   : > { %v1074_v20 = vpop.permute.xlu1 %1073  ;;  %v1406_v57 = vsel %vm13458_vm5, %v13949_v55, %v13941_v48  ;;  %518 = vst.msk [vmem:[#allocation2 + $0xc4] sm:$0xf] %vm390_vm0, %v485_v45 }
  0xf1   : > { %1163 = vst.msk [vmem:[#allocation3 + $0x1c] sm:$0xf] %vm1155_vm8, %v1074_v20  ;;  %v1636_v29 = vpop.permute.xlu0 %1635  ;;  %v1430_v20 = vsel %vm13458_vm5, %v13961_v2, %v13951_v56  ;;  %v1952_v50 = vor.u32 %v1950_v63, %v1949_v5  ;;  %v486_v63 = vld [vmem:[%s13439_s24 + $0x5c] sm:$0xf]  ;;  %v2669_v5 = vrot.slane %v2667_v26, 4  ;;  %v2672_v7 = vrot.slane %v2670_v30, 5 }
  0xf2   : > { %4208 = vrot.lane.b32.xlu1 %v3925_v15, %s13206_s13  ;;  %1726 = vst.msk [vmem:[#allocation3 + $0x18] sm:$0xf] %vm1719_vm9, %v1636_v29  ;;  %v1944_v15 = vsel %vm13468_vm6, %v13954_v60, %v13957_v61  ;;  %v729_v29 = vshll.u32 %v548_v4, 16  ;;  %v1974_v9 = vor.u32 %v1972_v6, %v1971_v47  ;;  %v3055_v6 = vld [vmem:[#allocation2 + $0x84] sm:$0xf] }
  0xf3   : > { %4210 = vrot.lane.b32.xlu0 %v3939_v25, %s13206_s13  ;;  %519 = vst.msk [vmem:[#allocation2 + $0xc8] sm:$0xf] %vm390_vm0, %v486_v63  ;;  %v2673_v16 = vor.u32 %v2672_v7, %v2669_v5 }
  0xf4   : > { %v1634_v40 = vpop.permute.xlu1 %1633  ;;  %v12984_v41 = vld [vmem:[#allocation3 + $0x8] sm:$0xff]   ;;  %v731_v42 = vor.u32 %v729_v29, %v728_v32  ;;  %v2295_v29 = vld [vmem:[#allocation2 + $0x84] sm:$0xf]  ;;  %v3222_v32 = vshrl.u32 %v3055_v6, 16 }
  0xf5   : > { %1725 = vst.msk [vmem:[#allocation3 + $0x14] sm:$0xf] %vm1719_vm9, %v1634_v40  ;;  %12828 = vmatmul.mubr.msk.bf16.vlgmr.msra.gmra.mxu0 %vm4474_vm1, %v12984_v41  ;;  %v2161_v54 = vpop.permute.xlu0 %2160  ;;  %v1965_v41 = vor.u32 %v1963_v62, %v13997_v22  ;;  %v2676_v62 = vshll.u32 %v2493_v59, 16 }
  0xf6   : > { %1085 = vrot.lane.b32.xlu1 %v1008_v24, %s13199_s25  ;;  %2253 = vst.msk [vmem:[#allocation3 + $0x10] sm:$0xf] %vm2248_vm10, %v2161_v54  ;;  %v551_v24 = vld [vmem:[#allocation2 + $0x78] sm:$0xf]  ;;  %v723_v54 = vsel %vm13468_vm6, %v12000_v27, %v722_v36  ;;  %v732_v60 = vsel %vm13468_vm6, %v724_v37, %v731_v42  ;;  %v2674_v27 = vrot.slane %v2673_v16, 4 }
  0xf7   : > { %1087 = vrot.lane.b32.xlu0 %v1009_v44, %s13199_s25  ;;  %v748_v40 = vshrl.u32 %v551_v24, 16  ;;  %v741_v44 = vrot.slane %v739_v34, 7  ;;  %v751_v56 = vshll.u32 %v551_v24, 16  ;;  %975 = vst.msk [vmem:[#allocation3 + $0x30] sm:$0xf] %vm390_vm0, %v723_v54  ;;  %v2678_v23 = vrot.slane %v2676_v62, 5 }
  0xf8   : > { %v1638_v0 = vpop.permute.xlu1 %1637  ;;  %976 = vst.msk [vmem:[#allocation3 + $0x34] sm:$0xf] %vm390_vm0, %v732_v60  ;;  %v2497_v24 = vld [vmem:[#allocation2 + $0x8c] sm:$0x1]  ;;  %v3058_v36 = vld [vmem:[#allocation2 + $0x94] sm:$0xf] }
  0xf9   : > { %1727 = vst.msk [vmem:[#allocation3 + $0x1c] sm:$0xf] %vm1719_vm9, %v1638_v0  ;;  %v2165_v52 = vpop.permute.xlu0 %2164  ;;  %v750_v55 = vrot.slane %v748_v40, 7  ;;  %v744_v61 = vor.u32 %v742_v39, %v741_v44  ;;  %v746_v0 = vrot.slane %v741_v44, 4  ;;  %v2686_v39 = vshll.u32 %v2494_v19, 16 }
  0xfa   : > { %4212 = vrot.lane.b32.xlu1 %v3949_v53, %s13206_s13  ;;  %2255 = vst.msk [vmem:[#allocation3 + $0x18] sm:$0xf] %vm2248_vm10, %v2165_v52  ;;  %v2495_v53 = vld [vmem:[#allocation2 + $0x84] sm:$0xf]  ;;  %v3056_v40 = vld [vmem:[#allocation2 + $0x88] sm:$0xf]  ;;  %v2679_v42 = vsel %vm13458_vm5, %v2674_v27, %v2678_v23 }
  0xfb   : > { %1647 = vrot.lane.b32.xlu0 %v1396_v58, %s13201_s27  ;;  %v1966_v58 = vsel %vm13468_vm6, %v13974_v46, %v1965_v41  ;;  %v2691_v11 = vshrl.u32 %v2495_v53, 16  ;;  %v2694_v12 = vshll.u32 %v2495_v53, 16  ;;  %v745_v51 = vsel %vm13468_vm6, %v12001_v43, %v744_v61  ;;  %v3057_v53 = vld [vmem:[#allocation2 + $0x90] sm:$0x8] }
  0xfc   : > { %v2163_v13 = vpop.permute.xlu1 %2162  ;;  %977 = vst.msk [vmem:[#allocation3 + $0x38] sm:$0xf] %vm390_vm0, %v745_v51  ;;  %v1967_v46 = vrot.slane %v13997_v22, 4  ;;  %v2710_v43 = vshll.u32 %v2497_v24, 16  ;;  %v3244_v54 = vshrl.u32 %v3058_v36, 16  ;;  %v2688_v61 = vrot.slane %v2686_v39, 5 }
  0xfd   : > { %2254 = vst.msk [vmem:[#allocation3 + $0x14] sm:$0xf] %vm2248_vm10, %v2163_v13  ;;  %v2354_v25 = vpop.permute.xlu0 %2353  ;;  %v2680_v13 = vshrl.u32 %v2493_v59, 16  ;;  %v2693_v17 = vrot.slane %v2691_v11, 4  ;;  %v3231_v59 = vshrl.u32 %v3056_v40, 16  ;;  %v3239_v7 = vshrl.u32 %v3057_v53, 16 }
  0xfe   : > { %1089 = vrot.lane.b32.xlu1 %v1010_v10, %s13199_s25  ;;  %2446 = vst.msk [vmem:[#allocation3 + $0x10] sm:$0xf] %vm2441_vm11, %v2354_v25  ;;  %v753_v10 = vor.u32 %v751_v56, %v750_v55  ;;  %v1975_v22 = vsel %vm13468_vm6, %v1967_v46, %v1974_v9  ;;  %v3054_v25 = vld [vmem:[#allocation2 + $0x80] sm:$0x8]  ;;  %v2296_v55 = vld [vmem:[#allocation2 + $0x88] sm:$0xf] }
  0xff   : > { %1651 = vrot.lane.b32.xlu0 %v1420_v14, %s13201_s27  ;;  %v2496_v14 = vld [vmem:[#allocation2 + $0x88] sm:$0xf]  ;;  %v2682_v21 = vrot.slane %v2680_v13, 4  ;;  %v3217_v44 = vshrl.u32 %v3054_v25, 16  ;;  %v3247_v51 = vshll.u32 %v3058_v36, 16 }
 0x100   : > { %v2167_v35 = vpop.permute.xlu1 %2166  ;;  %v754_v4 = vsel %vm13468_vm6, %v746_v0, %v753_v10  ;;  %v2704_v8 = vshrl.u32 %v2496_v14, 16  ;;  %v3059_v0 = vld [vmem:[#allocation2 + $0x98] sm:$0xf]  ;;  %v3776_v10 = vld [vmem:[#allocation2 + $0x84] sm:$0xf] }
 0x101   : > { %2256 = vst.msk [vmem:[#allocation3 + $0x1c] sm:$0xf] %vm2248_vm10, %v2167_v35  ;;  %v2358_v48 = vpop.permute.xlu0 %2357  ;;  %v2683_v37 = vor.u32 %v2682_v21, %v2678_v23  ;;  %v12032_v5 = vrot.slane %v3217_v44, 11  ;;  %v3253_v46 = vshrl.u32 %v3059_v0, 16  ;;  %v3951_v13 = vshrl.u32 %v3776_v10, 16 }
 0x102   : > { %1649 = vrot.lane.b32.xlu1 %v1406_v57, %s13201_s27  ;;  %2448 = vst.msk [vmem:[#allocation3 + $0x18] sm:$0xf] %vm2441_vm11, %v2358_v48  ;;  %v1953_v57 = vsel %vm13468_vm6, %v1945_v3, %v1952_v50  ;;  %v2696_v3 = vrot.slane %v2694_v12, 5  ;;  %v2706_v35 = vrot.slane %v2704_v8, 4  ;;  %v14052_v48 = vrot.slane %v3222_v32, 7 }
 0x103   : > { %2176 = vrot.lane.b32.xlu0 %v1944_v15, %s13202_s28  ;;  %978 = vst.msk [vmem:[#allocation3 + $0x3c] sm:$0xf] %vm390_vm0, %v754_v4  ;;  %v3225_v50 = vshll.u32 %v3055_v6, 16  ;;  %v2684_v60 = vrot.slane %v2683_v37, 4  ;;  %v14061_v12 = vrot.slane %v3244_v54, 7  ;;  %v3233_v4 = vrot.slane %v3231_v59, 7 }
 0x104   : > { %v2356_v2 = vpop.permute.xlu1 %2355  ;;  %v2697_v30 = vor.u32 %v2696_v3, %v2693_v17  ;;  %v3779_v17 = vld [vmem:[#allocation2 + $0x94] sm:$0xf]  ;;  %v488_v3 = vld [vmem:[%s13439_s24 + $0x64] sm:$0xf]  ;;  %v3229_v19 = vrot.slane %v14052_v48, 4  ;;  %v3255_v21 = vrot.slane %v3253_v46, 7 }
 0x105   : > { %2447 = vst.msk [vmem:[#allocation3 + $0x14] sm:$0xf] %vm2441_vm11, %v2356_v2  ;;  %v2915_v52 = vpop.permute.xlu0 %2914  ;;  %v2712_v2 = vrot.slane %v2710_v43, 5  ;;  %v3227_v11 = vor.u32 %v3225_v50, %v14052_v48  ;;  %v2689_v9 = vsel %vm13458_vm5, %v2684_v60, %v2688_v61  ;;  %v3249_v8 = vor.u32 %v3247_v51, %v14061_v12  ;;  %v1212_v50 = vld [vmem:[#allocation2 + $0x84] sm:$0xf] }
 0x106   : > { %1653 = vrot.lane.b32.xlu1 %v1430_v20, %s13201_s27  ;;  %3007 = vst.msk [vmem:[#allocation3 + $0x10] sm:$0xf] %vm3002_vm12, %v2915_v52  ;;  %v2700_v20 = vshll.u32 %v2496_v14, 16  ;;  %v2698_v45 = vrot.slane %v2697_v30, 4  ;;  %v3954_v14 = vshll.u32 %v3776_v10, 16  ;;  %v3256_v24 = vshll.u32 %v3059_v0, 16 }
 0x107   : > { %2180 = vrot.lane.b32.xlu0 %v1966_v58, %s13202_s28  ;;  %521 = vst.msk [vmem:[#allocation2 + $0xd8] sm:$0xf] %vm390_vm0, %v488_v3  ;;  %v3953_v25 = vrot.slane %v3951_v13, 4  ;;  %v3975_v30 = vshrl.u32 %v3779_v17, 16  ;;  %v3978_v32 = vshll.u32 %v3779_v17, 16  ;;  %v3251_v39 = vrot.slane %v14061_v12, 4 }
 0x108   : > { %v2360_v15 = vpop.permute.xlu1 %2359  ;;  %v2702_v34 = vrot.slane %v2700_v20, 5  ;;  %v12033_v20 = vrot.slane %v3239_v7, 11  ;;  %v3577_v53 = vld [vmem:[#allocation2 + $0x84] sm:$0xf]  ;;  %v3579_v60 = vld [vmem:[#allocation2 + $0x94] sm:$0xf] }
 0x109   : > { %2449 = vst.msk [vmem:[#allocation3 + $0x1c] sm:$0xf] %vm2441_vm11, %v2360_v15  ;;  %v2919_v18 = vpop.permute.xlu0 %2918  ;;  %v487_v15 = vld [vmem:[%s13439_s24 + $0x60] sm:$0xf]  ;;  %v3980_v48 = vrot.slane %v3978_v32, 5 }
 0x10a   : > { %2178 = vrot.lane.b32.xlu1 %v1953_v57, %s13202_s28  ;;  %3009 = vst.msk [vmem:[#allocation3 + $0x18] sm:$0xf] %vm3002_vm12, %v2919_v18  ;;  %v2707_v47 = vor.u32 %v2706_v35, %v2702_v34  ;;  %v2703_v58 = vsel %vm13458_vm5, %v2698_v45, %v2702_v34  ;;  %v3234_v57 = vshll.u32 %v3056_v40, 16  ;;  %v3228_v18 = vsel %vm13468_vm6, %v12032_v5, %v3227_v11  ;;  %v3778_v34 = vld [vmem:[#allocation2 + $0x8c] sm:$0x1] }
 0x10b   : > { %2369 = vrot.lane.b32.xlu0 %v2293_v38, %s13200_s26  ;;  %v3777_v38 = vld [vmem:[#allocation2 + $0x88] sm:$0xf]  ;;  %520 = vst.msk [vmem:[#allocation2 + $0xd4] sm:$0xf] %vm390_vm0, %v487_v15  ;;  %v3780_v35 = vld [vmem:[#allocation2 + $0x98] sm:$0xf]  ;;  %v3258_v40 = vor.u32 %v3256_v24, %v3255_v21 }
 0x10c   : > { %v2917_v26 = vpop.permute.xlu1 %2916  ;;  %v2708_v62 = vrot.slane %v2707_v47, 4  ;;  %v3236_v23 = vor.u32 %v3234_v57, %v3233_v4  ;;  %v3960_v27 = vshll.u32 %v3777_v38, 16  ;;  %v3977_v45 = vrot.slane %v3975_v30, 4  ;;  %v552_v10 = vld [vmem:[#allocation2 + $0x80] sm:$0x8] }
 0x10d   : > { %3008 = vst.msk [vmem:[#allocation3 + $0x14] sm:$0xf] %vm3002_vm12, %v2917_v26  ;;  %v3445_v33 = vpop.permute.xlu0 %3444  ;;  %v3956_v26 = vrot.slane %v3954_v14, 5  ;;  %v3970_v54 = vshll.u32 %v3778_v34, 16  ;;  %v3259_v59 = vsel %vm13468_vm6, %v3251_v39, %v3258_v40  ;;  %v3578_v11 = vld [vmem:[#allocation2 + $0x88] sm:$0xf] }
 0x10e   : > { %2182 = vrot.lane.b32.xlu1 %v1975_v22, %s13202_s28  ;;  %3537 = vst.msk [vmem:[#allocation3 + $0x10] sm:$0xf] %vm3532_vm13, %v3445_v33  ;;  %v2713_v6 = vsel %vm13458_vm5, %v2708_v62, %v2712_v2  ;;  %v3250_v33 = vsel %vm13468_vm6, %v12033_v20, %v3249_v8  ;;  %v3237_v36 = vsel %vm13468_vm6, %v3229_v19, %v3236_v23  ;;  %v1432_v2 = vshrl.u32 %v1212_v50, 16  ;;  %v14109_v4 = vld [vmem:[#allocation2 + $0x94] sm:$0xf] }
 0x10f   : > { %2373 = vrot.lane.b32.xlu0 %v2295_v29, %s13200_s26  ;;  %v3981_v7 = vor.u32 %v3980_v48, %v3977_v45  ;;  %v14103_v12 = vrot.slane %v3970_v54, 5  ;;  %v1435_v62 = vshll.u32 %v1212_v50, 16  ;;  %v554_v46 = vld [vmem:[#allocation2 + $0x88] sm:$0xf]  ;;  %v756_v14 = vshrl.u32 %v552_v10, 16 }
 0x110   : > { %v2921_v41 = vpop.permute.xlu1 %2920  ;;  %v14121_v17 = vrot.slane %v1432_v2, 4  ;;  %v556_v19 = vld [vmem:[#allocation2 + $0x94] sm:$0xf]  ;;  %v3580_v20 = vld [vmem:[#allocation2 + $0x98] sm:$0xf]  ;;  %v770_v23 = vshrl.u32 %v554_v46, 16 }
 0x111   : > { %3010 = vst.msk [vmem:[#allocation3 + $0x1c] sm:$0xf] %vm3002_vm12, %v2921_v41  ;;  %v3449_v56 = vpop.permute.xlu0 %3448  ;;  %v3957_v41 = vor.u32 %v3956_v26, %v3953_v25  ;;  %v14125_v8 = vrot.slane %v1435_v62, 5  ;;  %v3781_v24 = vld [vmem:[#allocation2 + $0x9c] sm:$0x1]  ;;  %v1456_v25 = vshrl.u32 %v14109_v4, 16 }
 0x112   : > { %2371 = vrot.lane.b32.xlu1 %v2294_v28, %s13200_s26  ;;  %3539 = vst.msk [vmem:[#allocation3 + $0x18] sm:$0xf] %vm3532_vm13, %v3449_v56  ;;  %v3964_v28 = vshrl.u32 %v3777_v38, 16  ;;  %v3988_v56 = vshrl.u32 %v3780_v35, 16  ;;  %v14119_v38 = vrot.slane %v3981_v7, 4  ;;  %v1459_v26 = vshll.u32 %v14109_v4, 16 }
 0x113   : > { %2930 = vrot.lane.b32.xlu0 %v2679_v42, %s13203_s29  ;;  %v14090_v42 = vrot.slane %v3960_v27, 5  ;;  %v3958_v61 = vrot.slane %v3957_v41, 4  ;;  %v773_v27 = vshll.u32 %v554_v46, 16  ;;  %v786_v40 = vshll.u32 %v556_v19, 16 }
 0x114   : > { %v3447_v63 = vpop.permute.xlu1 %3446  ;;  %v3966_v43 = vrot.slane %v3964_v28, 4  ;;  %v555_v28 = vld [vmem:[#allocation2 + $0x90] sm:$0x8]  ;;  %v1438_v2 = vor.u32 %v14125_v8, %v14121_v17  ;;  %v1461_v62 = vrot.slane %v1459_v26, 5 }
 0x115   : > { %3538 = vst.msk [vmem:[#allocation3 + $0x14] sm:$0xf] %vm3532_vm13, %v3447_v63  ;;  %v3638_v52 = vpop.permute.xlu0 %3637  ;;  %v14099_v63 = vld [vmem:[#allocation2 + $0x88] sm:$0xf]  ;;  %v778_v34 = vshrl.u32 %v555_v28, 16 }
 0x116   : > { %2375 = vrot.lane.b32.xlu1 %v2296_v55, %s13200_s26  ;;  %3730 = vst.msk [vmem:[#allocation3 + $0x10] sm:$0xf] %vm3725_vm14, %v3638_v52  ;;  %v3984_v55 = vshll.u32 %v3780_v35, 16  ;;  %v3967_v0 = vor.u32 %v3966_v43, %v14090_v42  ;;  %v14107_v52 = vrot.slane %v3988_v56, 4  ;;  %v1441_v3 = vshll.u32 %v14099_v63, 16 }
 0x117   : > { %2934 = vrot.lane.b32.xlu0 %v2703_v58, %s13203_s29  ;;  %v553_v58 = vld [vmem:[#allocation2 + $0x84] sm:$0xf]  ;;  %v557_v35 = vld [vmem:[#allocation2 + $0x98] sm:$0xf]  ;;  %v12003_v45 = vrot.slane %v778_v34, 11 }
 0x118   : > { %v3451_v16 = vpop.permute.xlu1 %3450  ;;  %v14105_v51 = vrot.slane %v3984_v55, 5  ;;  %v14116_v13 = vrot.slane %v3967_v0, 4  ;;  %v761_v15 = vshrl.u32 %v553_v58, 16  ;;  %v792_v41 = vshrl.u32 %v557_v35, 16  ;;  %v1014_v34 = vld [vmem:[#allocation2 + $0x98] sm:$0xf] }
 0x119   : > { %3540 = vst.msk [vmem:[#allocation3 + $0x1c] sm:$0xf] %vm3532_vm13, %v3451_v16  ;;  %v3642_v22 = vpop.permute.xlu0 %3641  ;;  %v795_v48 = vshll.u32 %v557_v35, 16 }
 0x11a   : > { %2932 = vrot.lane.b32.xlu1 %v2689_v9, %s13203_s29  ;;  %3732 = vst.msk [vmem:[#allocation3 + $0x18] sm:$0xf] %vm3725_vm14, %v3642_v22  ;;  %v3963_v9 = vsel %vm13458_vm5, %v3958_v61, %v14090_v42  ;;  %v763_v22 = vrot.slane %v761_v15, 7  ;;  %v1011_v42 = vld [vmem:[#allocation2 + $0x84] sm:$0xf]  ;;  %v794_v56 = vrot.slane %v792_v41, 7 }
 0x11b   : > { %3460 = vrot.lane.b32.xlu0 %v3228_v18, %s13204_s30  ;;  %v764_v18 = vshll.u32 %v553_v58, 16  ;;  %v1012_v58 = vld [vmem:[#allocation2 + $0x88] sm:$0xf] }
 0x11c   : > { %v3640_v29 = vpop.permute.xlu1 %3639  ;;  %v768_v32 = vrot.slane %v763_v22, 4  ;;  %v797_v10 = vor.u32 %v795_v48, %v794_v56 }
 0x11d   : > { %3731 = vst.msk [vmem:[#allocation3 + $0x14] sm:$0xf] %vm3725_vm14, %v3640_v29  ;;  %v4199_v37 = vpop.permute.xlu0 %4198  ;;  %v783_v29 = vshrl.u32 %v556_v19, 16  ;;  %v766_v30 = vor.u32 %v764_v18, %v763_v22  ;;  %v1439_v18 = vrot.slane %v1438_v2, 4 }
 0x11e   : > { %2936 = vrot.lane.b32.xlu1 %v2713_v6, %s13203_s29  ;;  %4291 = vst.msk [vmem:[#allocation3 + $0x10] sm:$0xf] %vm4286_vm15, %v4199_v37  ;;  %v12002_v6 = vrot.slane %v756_v14, 11 }
 0x11f   : > { %3464 = vrot.lane.b32.xlu0 %v3250_v33, %s13204_s30  ;;  %v772_v33 = vrot.slane %v770_v23, 7  ;;  %v785_v39 = vrot.slane %v783_v29, 7  ;;  %v1217_v23 = vld [vmem:[#allocation2 + $0x9c] sm:$0x1] }
 0x120   : > { %v3644_v44 = vpop.permute.xlu1 %3643  ;;  %v767_v43 = vsel %vm13468_vm6, %v12002_v6, %v766_v30 }
 0x121   : > { %3733 = vst.msk [vmem:[#allocation3 + $0x1c] sm:$0xf] %vm3725_vm14, %v3644_v44  ;;  %v1076_v47 = vpop.permute.xlu0 %1075  ;;  %v775_v44 = vor.u32 %v773_v27, %v772_v33  ;;  %v788_v54 = vor.u32 %v786_v40, %v785_v39  ;;  %v790_v55 = vrot.slane %v785_v39, 4  ;;  %v1779_v33 = vld [vmem:[#allocation2 + $0xa0] sm:$0x8] }
 0x122   : > { %3462 = vrot.lane.b32.xlu1 %v3237_v36, %s13204_s30  ;;  %1164 = vst.msk [vmem:[#allocation3 + $0x20] sm:$0xf] %vm1155_vm8, %v1076_v47  ;;  %v3973_v47 = vsel %vm13458_vm5, %v14116_v13, %v14103_v12  ;;  %v1214_v12 = vld [vmem:[#allocation2 + $0x8c] sm:$0x1] }
 0x123   : > { %3653 = vrot.lane.b32.xlu0 %v3577_v53, %s13205_s12  ;;  %v1445_v53 = vshrl.u32 %v14099_v63, 16  ;;  %979 = vst.msk [vmem:[#allocation3 + $0x40] sm:$0xf] %vm390_vm0, %v767_v43  ;;  %v776_v61 = vsel %vm13468_vm6, %v768_v32, %v775_v44  ;;  %v789_v7 = vsel %vm13468_vm6, %v12003_v45, %v788_v54  ;;  %v798_v13 = vsel %vm13468_vm6, %v790_v55, %v797_v10  ;;  %v1778_v32 = vld [vmem:[#allocation2 + $0x98] sm:$0xf] }
 0x124   : > { %v4201_v5 = vpop.permute.xlu1 %4200  ;;  %980 = vst.msk [vmem:[#allocation3 + $0x44] sm:$0xf] %vm390_vm0, %v776_v61  ;;  %981 = vst.msk [vmem:[#allocation3 + $0x48] sm:$0xf] %vm390_vm0, %v789_v7  ;;  %v1451_v63 = vshll.u32 %v1214_v12, 16  ;;  %v1991_v44 = vshrl.u32 %v1778_v32, 16 }
 0x125   : > { %4292 = vst.msk [vmem:[#allocation3 + $0x14] sm:$0xf] %vm4286_vm15, %v4201_v5  ;;  %v4203_v57 = vpop.permute.xlu0 %4202  ;;  %v1216_v5 = vld [vmem:[#allocation2 + $0x98] sm:$0xf]  ;;  %v1447_v46 = vrot.slane %v1445_v53, 4  ;;  %v1999_v53 = vshrl.u32 %v1779_v33, 16 }
 0x126   : > { %3466 = vrot.lane.b32.xlu1 %v3259_v59, %s13204_s30  ;;  %4293 = vst.msk [vmem:[#allocation3 + $0x18] sm:$0xf] %vm4286_vm15, %v4203_v57  ;;  %v3991_v59 = vor.u32 %v14107_v52, %v14105_v51  ;;  %v1458_v52 = vrot.slane %v1456_v25, 4  ;;  %v1443_v57 = vrot.slane %v1441_v3, 5  ;;  %v1465_v15 = vshll.u32 %v1216_v5, 16 }
 0x127   : > { %3657 = vrot.lane.b32.xlu0 %v3579_v60, %s13205_s12  ;;  %v3994_v60 = vshll.u32 %v3781_v24, 16  ;;  %982 = vst.msk [vmem:[#allocation3 + $0x4c] sm:$0xf] %vm390_vm0, %v798_v13  ;;  %v1013_v3 = vld [vmem:[#allocation2 + $0x94] sm:$0xf]  ;;  %v1453_v29 = vrot.slane %v1451_v63, 5 }
 0x128   : > { %v1078_v16 = vpop.permute.xlu1 %1077  ;;  %v3992_v14 = vrot.slane %v3991_v59, 4  ;;  %v1462_v19 = vor.u32 %v1461_v62, %v1458_v52  ;;  %v1448_v22 = vor.u32 %v1447_v46, %v1443_v57  ;;  %v1467_v25 = vrot.slane %v1465_v15, 5  ;;  %v2498_v45 = vld [vmem:[#allocation2 + $0x94] sm:$0xf]  ;;  %v1781_v54 = vld [vmem:[#allocation2 + $0xa8] sm:$0xf] }
 0x129   : > { %1165 = vst.msk [vmem:[#allocation3 + $0x24] sm:$0xf] %vm1155_vm8, %v1078_v16  ;;  %v1080_v21 = vpop.permute.xlu0 %1079  ;;  %v1469_v16 = vshrl.u32 %v1216_v5, 16  ;;  %v1444_v28 = vsel %vm13458_vm5, %v1439_v18, %v1443_v57  ;;  %v2715_v2 = vshrl.u32 %v2498_v45, 16  ;;  %v2718_v5 = vshll.u32 %v2498_v45, 16 }
 0x12a   : > { %3655 = vrot.lane.b32.xlu1 %v3578_v11, %s13205_s12  ;;  %1166 = vst.msk [vmem:[#allocation3 + $0x28] sm:$0xf] %vm1155_vm8, %v1080_v21  ;;  %v3987_v11 = vsel %vm13458_vm5, %v14119_v38, %v14105_v51  ;;  %v3996_v51 = vrot.slane %v3994_v60, 5  ;;  %v1780_v21 = vld [vmem:[#allocation2 + $0xa4] sm:$0xf]  ;;  %v1463_v35 = vrot.slane %v1462_v19, 4 }
 0x12b   : > { %4214 = vrot.lane.b32.xlu0 %v3963_v9, %s13206_s13  ;;  %v1777_v9 = vld [vmem:[#allocation2 + $0x94] sm:$0xf]  ;;  %v1471_v26 = vrot.slane %v1469_v16, 4  ;;  %v2004_v39 = vshrl.u32 %v1780_v21, 16  ;;  %v1449_v41 = vrot.slane %v1448_v22, 4  ;;  %v2007_v59 = vshll.u32 %v1780_v21, 16 }
 0x12c   : > { %v4205_v36 = vpop.permute.xlu1 %4204  ;;  %v12985_v37 = vld [vmem:[#allocation3 + $0x10] sm:$0xff]   ;;  %v1982_v8 = vshrl.u32 %v1777_v9, 16  ;;  %v3997_v24 = vsel %vm13458_vm5, %v3992_v14, %v3996_v51  ;;  %v1468_v55 = vsel %vm13458_vm5, %v1463_v35, %v1467_v25  ;;  %v489_v7 = vld [vmem:[%s13439_s24 + $0x68] sm:$0xf]  ;;  %v2013_v12 = vshrl.u32 %v1781_v54, 16 }
 0x12d   : > { %4294 = vst.msk [vmem:[#allocation3 + $0x1c] sm:$0xf] %vm4286_vm15, %v4205_v36  ;;  %12831 = vmatprep.mubr.msk.bf16.mxu0 %vm4474_vm1, %v12985_v37  ;;  %v1640_v50 = vpop.permute.xlu0 %1639  ;;  %v1985_v37 = vshll.u32 %v1777_v9, 16  ;;  %v1472_v43 = vor.u32 %v1471_v26, %v1467_v25  ;;  %v1454_v60 = vsel %vm13458_vm5, %v1449_v41, %v1453_v29  ;;  %v490_v52 = vld [vmem:[%s13439_s24 + $0x6c] sm:$0xf]  ;;  %v12019_v46 = vrot.slane %v1999_v53, 11 }
 0x12e   : > { %3659 = vrot.lane.b32.xlu1 %v3580_v20, %s13205_s12  ;;  %1728 = vst.msk [vmem:[#allocation3 + $0x20] sm:$0xf] %vm1719_vm9, %v1640_v50  ;;  %v1776_v20 = vld [vmem:[#allocation2 + $0x90] sm:$0x8]  ;;  %v14178_v36 = vrot.slane %v1982_v8, 7  ;;  %v2717_v51 = vrot.slane %v2715_v2, 4 }
 0x12f   : > { %1091 = vrot.lane.b32.xlu0 %v1011_v42, %s13199_s25  ;;  %v1977_v30 = vshrl.u32 %v1776_v20, 16  ;;  %v1475_v42 = vshll.u32 %v1217_v23, 16  ;;  %v1473_v10 = vrot.slane %v1472_v43, 4  ;;  %522 = vst.msk [vmem:[#allocation2 + $0xe4] sm:$0xf] %vm390_vm0, %v489_v7  ;;  %v2720_v15 = vrot.slane %v2718_v5, 5 }
 0x130   : > { %v1082_v0 = vpop.permute.xlu1 %1081  ;;  %v1987_v56 = vor.u32 %v1985_v37, %v14178_v36  ;;  %523 = vst.msk [vmem:[#allocation2 + $0xe8] sm:$0xf] %vm390_vm0, %v490_v52  ;;  %v1989_v14 = vrot.slane %v14178_v36, 4  ;;  %v2501_v16 = vld [vmem:[#allocation2 + $0xa4] sm:$0xf]  ;;  %v2015_v18 = vrot.slane %v2013_v12, 7 }
 0x131   : > { %1167 = vst.msk [vmem:[#allocation3 + $0x2c] sm:$0xf] %vm1155_vm8, %v1082_v0  ;;  %v1644_v4 = vpop.permute.xlu0 %1643  ;;  %v12018_v50 = vrot.slane %v1977_v30, 11  ;;  %v1477_v0 = vrot.slane %v1475_v42, 5  ;;  %v2016_v63 = vshll.u32 %v1781_v54, 16  ;;  %v2739_v23 = vshrl.u32 %v2501_v16, 16 }
 0x132   : > { %4216 = vrot.lane.b32.xlu1 %v3973_v47, %s13206_s13  ;;  %1730 = vst.msk [vmem:[#allocation3 + $0x28] sm:$0xf] %vm1719_vm9, %v1644_v4  ;;  %v14187_v47 = vrot.slane %v2004_v39, 7  ;;  %v2499_v4 = vld [vmem:[#allocation2 + $0x98] sm:$0xf]  ;;  %v2742_v21 = vshll.u32 %v2501_v16, 16  ;;  %v2721_v25 = vor.u32 %v2720_v15, %v2717_v51 }
 0x133   : > { %4218 = vrot.lane.b32.xlu0 %v3987_v11, %s13206_s13  ;;  %v1994_v11 = vshll.u32 %v1778_v32, 16  ;;  %v1988_v57 = vsel %vm13468_vm6, %v12018_v50, %v1987_v56  ;;  %v2724_v20 = vshll.u32 %v2499_v4, 16  ;;  %v2500_v8 = vld [vmem:[#allocation2 + $0x9c] sm:$0x1]  ;;  %v2728_v22 = vshrl.u32 %v2499_v4, 16 }
 0x134   : > { %v1642_v38 = vpop.permute.xlu1 %1641  ;;  %v12986_v17 = vld [vmem:[#allocation3 + $0x18] sm:$0xff]   ;;  %v2009_v9 = vor.u32 %v2007_v59, %v14187_v47  ;;  %v2018_v29 = vor.u32 %v2016_v63, %v2015_v18  ;;  %v2297_v30 = vld [vmem:[#allocation2 + $0x94] sm:$0xf]  ;;  %v3061_v35 = vld [vmem:[#allocation2 + $0xa4] sm:$0xf]  ;;  %v2741_v39 = vrot.slane %v2739_v23, 4 }
 0x135   : > { %1729 = vst.msk [vmem:[#allocation3 + $0x24] sm:$0xf] %vm1719_vm9, %v1642_v38  ;;  %12832 = vmatmul.mubr.msk.bf16.gmra.mxu0 %vm4474_vm1, %v12986_v17  ;;  %v2169_v6 = vpop.permute.xlu0 %2168  ;;  %v1478_v38 = vsel %vm13458_vm5, %v1473_v10, %v1477_v0  ;;  %v2726_v36 = vrot.slane %v2724_v20, 5  ;;  %v2730_v37 = vrot.slane %v2728_v22, 4  ;;  %v2722_v42 = vrot.slane %v2721_v25, 4 }
 0x136   : > { %1093 = vrot.lane.b32.xlu1 %v1012_v58, %s13199_s25  ;;  %2257 = vst.msk [vmem:[#allocation3 + $0x20] sm:$0xf] %vm2248_vm10, %v2169_v6  ;;  %v1993_v58 = vrot.slane %v1991_v44, 7  ;;  %v2010_v6 = vsel %vm13468_vm6, %v12019_v46, %v2009_v9  ;;  %v2299_v45 = vld [vmem:[#allocation2 + $0xa4] sm:$0xf]  ;;  %v3266_v53 = vshrl.u32 %v3061_v35, 16 }
 0x137   : > { %1095 = vrot.lane.b32.xlu0 %v1013_v3, %s13199_s25  ;;  %v2502_v3 = vld [vmem:[#allocation2 + $0xa8] sm:$0xf]  ;;  %v3060_v50 = vld [vmem:[#allocation2 + $0xa0] sm:$0x8]  ;;  %v3064_v54 = vld [vmem:[#allocation2 + $0xb4] sm:$0xf]  ;;  %v2727_v12 = vsel %vm13458_vm5, %v2722_v42, %v2726_v36 }
 0x138   : > { %v1646_v27 = vpop.permute.xlu1 %1645  ;;  %v1996_v17 = vor.u32 %v1994_v11, %v1993_v58  ;;  %v2748_v26 = vshll.u32 %v2502_v3, 16  ;;  %v2752_v32 = vshrl.u32 %v2502_v3, 16  ;;  %v2298_v56 = vld [vmem:[#allocation2 + $0x98] sm:$0xf]  ;;  %v2503_v59 = vld [vmem:[#allocation2 + $0xac] sm:$0x1] }
 0x139   : > { %1731 = vst.msk [vmem:[#allocation3 + $0x2c] sm:$0xf] %vm1719_vm9, %v1646_v27  ;;  %v2173_v40 = vpop.permute.xlu0 %2172  ;;  %v14227_v0 = vld [vmem:[#allocation2 + $0xa8] sm:$0xf]  ;;  %v3063_v2 = vld [vmem:[#allocation2 + $0xb0] sm:$0x8] }
 0x13a   : > { %4220 = vrot.lane.b32.xlu1 %v3997_v24, %s13206_s13  ;;  %2259 = vst.msk [vmem:[#allocation3 + $0x28] sm:$0xf] %vm2248_vm10, %v2173_v40  ;;  %v1997_v27 = vsel %vm13468_vm6, %v1989_v14, %v1996_v17  ;;  %v2744_v40 = vrot.slane %v2742_v21, 5  ;;  %v14219_v43 = vrot.slane %v2748_v26, 5  ;;  %v3261_v10 = vshrl.u32 %v3060_v50, 16 }
 0x13b   : > { %1655 = vrot.lane.b32.xlu0 %v1444_v28, %s13201_s27  ;;  %v2011_v28 = vrot.slane %v14187_v47, 4  ;;  %v3288_v58 = vshrl.u32 %v3064_v54, 16  ;;  %v2300_v11 = vld [vmem:[#allocation2 + $0xa8] sm:$0xf]  ;;  %v3269_v4 = vshll.u32 %v3061_v35, 16  ;;  %v2758_v14 = vshll.u32 %v2503_v59, 16 }
 0x13c   : > { %v2171_v48 = vpop.permute.xlu1 %2170  ;;  %v2745_v47 = vor.u32 %v2744_v40, %v2741_v39  ;;  %v3275_v51 = vshrl.u32 %v14227_v0, 16  ;;  %v3283_v16 = vshrl.u32 %v3063_v2, 16  ;;  %v3291_v17 = vshll.u32 %v3064_v54, 16  ;;  %v3782_v63 = vld [vmem:[#allocation2 + $0xa4] sm:$0xf] }
 0x13d   : > { %2258 = vst.msk [vmem:[#allocation3 + $0x24] sm:$0xf] %vm2248_vm10, %v2171_v48  ;;  %v2362_v61 = vpop.permute.xlu0 %2361  ;;  %v2019_v44 = vsel %vm13468_vm6, %v2011_v28, %v2018_v29  ;;  %v2754_v48 = vrot.slane %v2752_v32, 4  ;;  %v2760_v23 = vrot.slane %v2758_v14, 5  ;;  %v3783_v21 = vld [vmem:[#allocation2 + $0xa8] sm:$0xf] }
 0x13e   : > { %1097 = vrot.lane.b32.xlu1 %v1014_v34, %s13199_s25  ;;  %2450 = vst.msk [vmem:[#allocation3 + $0x20] sm:$0xf] %vm2441_vm11, %v2362_v61  ;;  %v2734_v34 = vshll.u32 %v2500_v8, 16  ;;  %v2731_v61 = vor.u32 %v2730_v37, %v2726_v36  ;;  %v2746_v52 = vrot.slane %v2745_v47, 4  ;;  %v3277_v25 = vrot.slane %v3275_v51, 7 }
 0x13f   : > { %1659 = vrot.lane.b32.xlu0 %v1468_v55, %s13201_s27  ;;  %v3278_v26 = vshll.u32 %v14227_v0, 16  ;;  %v4002_v28 = vshll.u32 %v3782_v63, 16  ;;  %v492_v29 = vld [vmem:[%s13439_s24 + $0x74] sm:$0xf]  ;;  %v12035_v32 = vrot.slane %v3283_v16, 11  ;;  %v4008_v37 = vshll.u32 %v3783_v21, 16 }
 0x140   : > { %v2175_v62 = vpop.permute.xlu1 %2174  ;;  %v2736_v7 = vrot.slane %v2734_v34, 5  ;;  %v2732_v9 = vrot.slane %v2731_v61, 4  ;;  %v2751_v3 = vsel %vm13458_vm5, %v2746_v52, %v14219_v43  ;;  %525 = vst.msk [vmem:[#allocation2 + $0xf8] sm:$0xf] %vm390_vm0, %v492_v29  ;;  %v4012_v39 = vshrl.u32 %v3783_v21, 16 }
 0x141   : > { %2260 = vst.msk [vmem:[#allocation3 + $0x2c] sm:$0xf] %vm2248_vm10, %v2175_v62  ;;  %v2366_v13 = vpop.permute.xlu0 %2365  ;;  %v14234_v62 = vrot.slane %v3266_v53, 7  ;;  %v3784_v42 = vld [vmem:[#allocation2 + $0xac] sm:$0x1]  ;;  %v4004_v50 = vrot.slane %v4002_v28, 5 }
 0x142   : > { %1657 = vrot.lane.b32.xlu1 %v1454_v60, %s13201_s27  ;;  %2452 = vst.msk [vmem:[#allocation3 + $0x28] sm:$0xf] %vm2441_vm11, %v2366_v13  ;;  %v2755_v13 = vor.u32 %v2754_v48, %v14219_v43  ;;  %v2737_v8 = vsel %vm13458_vm5, %v2732_v9, %v2736_v7  ;;  %v3785_v43 = vld [vmem:[#allocation2 + $0xb4] sm:$0xf]  ;;  %v14271_v47 = vld [vmem:[#allocation2 + $0xb8] sm:$0xf] }
 0x143   : > { %2184 = vrot.lane.b32.xlu0 %v1988_v57, %s13202_s28  ;;  %v3065_v57 = vld [vmem:[#allocation2 + $0xb8] sm:$0xf]  ;;  %v3271_v20 = vor.u32 %v3269_v4, %v14234_v62  ;;  %v14274_v59 = vrot.slane %v4008_v37, 5  ;;  %v4018_v61 = vshll.u32 %v3784_v42, 16  ;;  %v4023_v0 = vshrl.u32 %v3785_v43, 16 }
 0x144   : > { %v2364_v19 = vpop.permute.xlu1 %2363  ;;  %v3297_v18 = vshrl.u32 %v3065_v57, 16  ;;  %v2756_v22 = vrot.slane %v2755_v13, 4  ;;  %v3300_v35 = vshll.u32 %v3065_v57, 16  ;;  %v1218_v52 = vld [vmem:[#allocation2 + $0xa4] sm:$0xf]  ;;  %v4036_v16 = vshrl.u32 %v14271_v47, 16 }
 0x145   : > { %2451 = vst.msk [vmem:[#allocation3 + $0x24] sm:$0xf] %vm2441_vm11, %v2364_v19  ;;  %v2923_v24 = vpop.permute.xlu0 %2922  ;;  %v12034_v19 = vrot.slane %v3261_v10, 11  ;;  %v3581_v57 = vld [vmem:[#allocation2 + $0xa4] sm:$0xf]  ;;  %v14288_v9 = vrot.slane %v4018_v61, 5 }
 0x146   : > { %1661 = vrot.lane.b32.xlu1 %v1478_v38, %s13201_s27  ;;  %3011 = vst.msk [vmem:[#allocation3 + $0x20] sm:$0xf] %vm3002_vm12, %v2923_v24  ;;  %v14241_v38 = vrot.slane %v3288_v58, 7  ;;  %v491_v24 = vld [vmem:[%s13439_s24 + $0x70] sm:$0xf]  ;;  %v3299_v34 = vrot.slane %v3297_v18, 7 }
 0x147   : > { %2188 = vrot.lane.b32.xlu0 %v2010_v6, %s13202_s28  ;;  %524 = vst.msk [vmem:[#allocation2 + $0xf4] sm:$0xf] %vm390_vm0, %v491_v24  ;;  %v3272_v36 = vsel %vm13468_vm6, %v12034_v19, %v3271_v20  ;;  %v4032_v58 = vshll.u32 %v14271_v47, 16  ;;  %v14290_v13 = vrot.slane %v4023_v0, 4  ;;  %v560_v14 = vld [vmem:[#allocation2 + $0xa8] sm:$0xf] }
 0x148   : > { %v2368_v33 = vpop.permute.xlu1 %2367  ;;  %v1480_v20 = vshrl.u32 %v1218_v52, 16  ;;  %v814_v24 = vshrl.u32 %v560_v14, 16  ;;  %v817_v28 = vshll.u32 %v560_v14, 16  ;;  %v3584_v42 = vld [vmem:[#allocation2 + $0xb8] sm:$0xf] }
 0x149   : > { %2453 = vst.msk [vmem:[#allocation3 + $0x2c] sm:$0xf] %vm2441_vm11, %v2368_v33  ;;  %v2927_v41 = vpop.permute.xlu0 %2926  ;;  %v3293_v33 = vor.u32 %v3291_v17, %v14241_v38  ;;  %v558_v17 = vld [vmem:[#allocation2 + $0xa0] sm:$0x8]  ;;  %v14296_v19 = vrot.slane %v4032_v58, 5 }
 0x14a   : > { %2186 = vrot.lane.b32.xlu1 %v1997_v27, %s13202_s28  ;;  %3013 = vst.msk [vmem:[#allocation3 + $0x28] sm:$0xf] %vm3002_vm12, %v2927_v41  ;;  %v3999_v27 = vshrl.u32 %v3782_v63, 16  ;;  %v3273_v41 = vrot.slane %v14234_v62, 4  ;;  %v559_v62 = vld [vmem:[#allocation2 + $0xa4] sm:$0xf] }
 0x14b   : > { %2377 = vrot.lane.b32.xlu0 %v2297_v30, %s13200_s26  ;;  %v3294_v54 = vsel %vm13468_vm6, %v12035_v32, %v3293_v33  ;;  %v805_v18 = vshrl.u32 %v559_v62, 16  ;;  %v3583_v63 = vld [vmem:[#allocation2 + $0xb4] sm:$0xf]  ;;  %v808_v21 = vshll.u32 %v559_v62, 16  ;;  %v816_v33 = vrot.slane %v814_v24, 7 }
 0x14c   : > { %v2925_v55 = vpop.permute.xlu1 %2924  ;;  %v4001_v48 = vrot.slane %v3999_v27, 4 }
 0x14d   : > { %3012 = vst.msk [vmem:[#allocation3 + $0x24] sm:$0xf] %vm3002_vm12, %v2925_v55  ;;  %v3453_v60 = vpop.permute.xlu0 %3452  ;;  %v3295_v55 = vrot.slane %v14241_v38, 4 }
 0x14e   : > { %2190 = vrot.lane.b32.xlu1 %v2019_v44, %s13202_s28  ;;  %3541 = vst.msk [vmem:[#allocation3 + $0x20] sm:$0xf] %vm3532_vm13, %v3453_v60  ;;  %v2761_v44 = vsel %vm13458_vm5, %v2756_v22, %v2760_v23  ;;  %v4014_v60 = vrot.slane %v4012_v39, 4  ;;  %v4005_v10 = vor.u32 %v4004_v50, %v4001_v48  ;;  %v1483_v22 = vshll.u32 %v1218_v52, 16  ;;  %v1015_v52 = vld [vmem:[#allocation2 + $0xa4] sm:$0xf] }
 0x14f   : > { %2381 = vrot.lane.b32.xlu0 %v2299_v45, %s13200_s26  ;;  %v3280_v45 = vor.u32 %v3278_v26, %v3277_v25  ;;  %v807_v23 = vrot.slane %v805_v18, 7  ;;  %v3582_v25 = vld [vmem:[#allocation2 + $0xa8] sm:$0xf]  ;;  %v819_v39 = vor.u32 %v817_v28, %v816_v33 }
 0x150   : > { %v2929_v5 = vpop.permute.xlu1 %2928  ;;  %v14300_v26 = vld [vmem:[#allocation2 + $0xa8] sm:$0xf] }
 0x151   : > { %3014 = vst.msk [vmem:[#allocation3 + $0x2c] sm:$0xf] %vm3002_vm12, %v2929_v5  ;;  %v3457_v46 = vpop.permute.xlu0 %3456  ;;  %v4026_v5 = vshll.u32 %v3785_v43, 16  ;;  %v3281_v7 = vsel %vm13468_vm6, %v3273_v41, %v3280_v45  ;;  %v812_v32 = vrot.slane %v807_v23, 4  ;;  %v563_v41 = vld [vmem:[#allocation2 + $0xb8] sm:$0xf] }
 0x152   : > { %2379 = vrot.lane.b32.xlu1 %v2298_v56, %s13200_s26  ;;  %3543 = vst.msk [vmem:[#allocation3 + $0x28] sm:$0xf] %vm3532_vm13, %v3457_v46  ;;  %v3302_v56 = vor.u32 %v3300_v35, %v3299_v34  ;;  %v4015_v46 = vor.u32 %v4014_v60, %v14274_v59  ;;  %v1221_v45 = vld [vmem:[#allocation2 + $0xb4] sm:$0xf]  ;;  %v836_v50 = vshrl.u32 %v563_v41, 16 }
 0x153   : > { %2938 = vrot.lane.b32.xlu0 %v2727_v12, %s13203_s29  ;;  %v820_v47 = vsel %vm13468_vm6, %v812_v32, %v819_v39  ;;  %v561_v60 = vld [vmem:[#allocation2 + $0xb0] sm:$0x8]  ;;  %v1504_v58 = vshrl.u32 %v1221_v45, 16  ;;  %v1507_v62 = vshll.u32 %v1221_v45, 16 }
 0x154   : > { %v3455_v15 = vpop.permute.xlu1 %3454  ;;  %v3303_v4 = vsel %vm13468_vm6, %v3295_v55, %v3302_v56  ;;  %v14305_v35 = vrot.slane %v4015_v46, 4  ;;  %v1485_v55 = vrot.slane %v1483_v22, 5  ;;  %v1489_v56 = vshll.u32 %v14300_v26, 16  ;;  %984 = vst.msk [vmem:[#allocation3 + $0x54] sm:$0xf] %vm390_vm0, %v820_v47 }
 0x155   : > { %3542 = vst.msk [vmem:[#allocation3 + $0x24] sm:$0xf] %vm3532_vm13, %v3455_v15  ;;  %v3646_v6 = vpop.permute.xlu0 %3645  ;;  %v4028_v15 = vrot.slane %v4026_v5, 5  ;;  %v1509_v24 = vrot.slane %v1507_v62, 5 }
 0x156   : > { %2383 = vrot.lane.b32.xlu1 %v2300_v11, %s13200_s26  ;;  %3734 = vst.msk [vmem:[#allocation3 + $0x20] sm:$0xf] %vm3725_vm14, %v3646_v6  ;;  %v14281_v11 = vld [vmem:[#allocation2 + $0xbc] sm:$0x1] }
 0x157   : > { %2942 = vrot.lane.b32.xlu0 %v2751_v3, %s13203_s29  ;;  %v4042_v38 = vshll.u32 %v14281_v11, 16  ;;  %v4006_v3 = vrot.slane %v4005_v10, 4  ;;  %v1783_v11 = vld [vmem:[#allocation2 + $0xb4] sm:$0xf] }
 0x158   : > { %v3459_v30 = vpop.permute.xlu1 %3458 }
 0x159   : > { %3544 = vst.msk [vmem:[#allocation3 + $0x2c] sm:$0xf] %vm3532_vm13, %v3459_v30  ;;  %v3650_v40 = vpop.permute.xlu0 %3649  ;;  %v810_v30 = vor.u32 %v808_v21, %v807_v23  ;;  %v4011_v43 = vsel %vm13458_vm5, %v4006_v3, %v14274_v59  ;;  %v822_v59 = vshrl.u32 %v561_v60, 16  ;;  %v1491_v23 = vrot.slane %v1489_v56, 5  ;;  %v1018_v56 = vld [vmem:[#allocation2 + $0xb8] sm:$0xf] }
 0x15a   : > { %2940 = vrot.lane.b32.xlu1 %v2737_v8, %s13203_s29  ;;  %3736 = vst.msk [vmem:[#allocation3 + $0x28] sm:$0xf] %vm3725_vm14, %v3650_v40  ;;  %v800_v8 = vshrl.u32 %v558_v17, 16  ;;  %v562_v40 = vld [vmem:[#allocation2 + $0xb4] sm:$0xf]  ;;  %v1506_v21 = vrot.slane %v1504_v58, 4 }
 0x15b   : > { %3468 = vrot.lane.b32.xlu0 %v3272_v36, %s13204_s30  ;;  %v4029_v36 = vor.u32 %v4028_v15, %v14290_v13  ;;  %v827_v48 = vshrl.u32 %v562_v40, 16  ;;  %v830_v0 = vshll.u32 %v562_v40, 16  ;;  %v2504_v58 = vld [vmem:[#allocation2 + $0xb4] sm:$0xf] }
 0x15c   : > { %v3648_v53 = vpop.permute.xlu1 %3647  ;;  %v12004_v27 = vrot.slane %v800_v8, 11  ;;  %v1222_v8 = vld [vmem:[#allocation2 + $0xb8] sm:$0xf] }
 0x15d   : > { %3735 = vst.msk [vmem:[#allocation3 + $0x24] sm:$0xf] %vm3725_vm14, %v3648_v53  ;;  %v4207_v2 = vpop.permute.xlu0 %4206  ;;  %v829_v61 = vrot.slane %v827_v48, 7  ;;  %v4030_v10 = vrot.slane %v4029_v36, 4  ;;  %v1513_v28 = vshll.u32 %v1222_v8, 16 }
 0x15e   : > { %2944 = vrot.lane.b32.xlu1 %v2761_v44, %s13203_s29  ;;  %4295 = vst.msk [vmem:[#allocation3 + $0x20] sm:$0xf] %vm4286_vm15, %v4207_v2  ;;  %v811_v37 = vsel %vm13468_vm6, %v12004_v27, %v810_v30  ;;  %v4038_v44 = vrot.slane %v4036_v16, 4  ;;  %v838_v2 = vrot.slane %v836_v50, 7  ;;  %v4021_v16 = vsel %vm13458_vm5, %v14305_v35, %v14288_v9  ;;  %v1016_v9 = vld [vmem:[#allocation2 + $0xa8] sm:$0xf] }
 0x15f   : > { %3472 = vrot.lane.b32.xlu0 %v3294_v54, %s13204_s30  ;;  %983 = vst.msk [vmem:[#allocation3 + $0x50] sm:$0xf] %vm390_vm0, %v811_v37  ;;  %v1482_v54 = vrot.slane %v1480_v20, 4  ;;  %v834_v46 = vrot.slane %v829_v61, 4  ;;  %v1220_v20 = vld [vmem:[#allocation2 + $0xac] sm:$0x1]  ;;  %v4035_v22 = vsel %vm13458_vm5, %v4030_v10, %v14296_v19 }
 0x160   : > { %v3652_v12 = vpop.permute.xlu1 %3651  ;;  %v4039_v14 = vor.u32 %v4038_v44, %v14296_v19  ;;  %v1017_v27 = vld [vmem:[#allocation2 + $0xb4] sm:$0xf]  ;;  %v1499_v33 = vshll.u32 %v1220_v20, 16  ;;  %v1223_v35 = vld [vmem:[#allocation2 + $0xbc] sm:$0x1]  ;;  %v2026_v37 = vshrl.u32 %v1783_v11, 16 }
 0x161   : > { %3737 = vst.msk [vmem:[#allocation3 + $0x2c] sm:$0xf] %vm3725_vm14, %v3652_v12  ;;  %v1084_v51 = vpop.permute.xlu0 %1083  ;;  %v839_v12 = vshll.u32 %v563_v41, 16  ;;  %v1486_v3 = vor.u32 %v1485_v55, %v1482_v54  ;;  %v1782_v36 = vld [vmem:[#allocation2 + $0xb0] sm:$0x8] }
 0x162   : > { %3470 = vrot.lane.b32.xlu1 %v3281_v7, %s13204_s30  ;;  %1168 = vst.msk [vmem:[#allocation3 + $0x30] sm:$0xf] %vm1155_vm8, %v1084_v51  ;;  %v1493_v51 = vshrl.u32 %v14300_v26, 16  ;;  %v1786_v41 = vld [vmem:[#allocation2 + $0xc4] sm:$0xf]  ;;  %v1501_v50 = vrot.slane %v1499_v33, 5 }
 0x163   : > { %3661 = vrot.lane.b32.xlu0 %v3581_v57, %s13205_s12  ;;  %v832_v57 = vor.u32 %v830_v0, %v829_v61  ;;  %v841_v15 = vor.u32 %v839_v12, %v838_v2  ;;  %v1487_v19 = vrot.slane %v1486_v3, 4  ;;  %v1784_v54 = vld [vmem:[#allocation2 + $0xb8] sm:$0xf]  ;;  %v1785_v55 = vld [vmem:[#allocation2 + $0xc0] sm:$0x8]  ;;  %v14358_v60 = vrot.slane %v2026_v37, 7 }
 0x164   : > { %v4209_v6 = vpop.permute.xlu1 %4208  ;;  %v1495_v26 = vrot.slane %v1493_v51, 4  ;;  %v2048_v61 = vshrl.u32 %v1786_v41, 16  ;;  %v2035_v10 = vshrl.u32 %v1784_v54, 16  ;;  %v2043_v62 = vshrl.u32 %v1785_v55, 16  ;;  %v2508_v33 = vld [vmem:[#allocation2 + $0xc8] sm:$0xf] }
 0x165   : > { %4296 = vst.msk [vmem:[#allocation3 + $0x24] sm:$0xf] %vm4286_vm15, %v4209_v6  ;;  %v4211_v29 = vpop.permute.xlu0 %4210  ;;  %v842_v6 = vsel %vm13468_vm6, %v834_v46, %v841_v15  ;;  %v1492_v48 = vsel %vm13458_vm5, %v1487_v19, %v1491_v23 }
 0x166   : > { %3474 = vrot.lane.b32.xlu1 %v3303_v4, %s13204_s30  ;;  %4297 = vst.msk [vmem:[#allocation3 + $0x28] sm:$0xf] %vm4286_vm15, %v4211_v29  ;;  %v12005_v4 = vrot.slane %v822_v59, 11  ;;  %v1517_v29 = vshrl.u32 %v1222_v8, 16  ;;  %v1496_v40 = vor.u32 %v1495_v26, %v1491_v23  ;;  %v2029_v59 = vshll.u32 %v1783_v11, 16 }
 0x167   : > { %3665 = vrot.lane.b32.xlu0 %v3583_v63, %s13205_s12  ;;  %v4044_v63 = vrot.slane %v4042_v38, 5  ;;  %986 = vst.msk [vmem:[#allocation3 + $0x5c] sm:$0xf] %vm390_vm0, %v842_v6  ;;  %v2037_v20 = vrot.slane %v2035_v10, 7  ;;  %v2038_v8 = vshll.u32 %v1784_v54, 16  ;;  %v2800_v54 = vshrl.u32 %v2508_v33, 16 }
 0x168   : > { %v1086_v34 = vpop.permute.xlu1 %1085  ;;  %v833_v17 = vsel %vm13468_vm6, %v12005_v4, %v832_v57  ;;  %v1519_v44 = vrot.slane %v1517_v29, 4  ;;  %v1497_v2 = vrot.slane %v1496_v40, 4  ;;  %v1787_v4 = vld [vmem:[#allocation2 + $0xc8] sm:$0xf]  ;;  %v2031_v46 = vor.u32 %v2029_v59, %v14358_v60  ;;  %v2505_v23 = vld [vmem:[#allocation2 + $0xb8] sm:$0xf] }
 0x169   : > { %1169 = vst.msk [vmem:[#allocation3 + $0x34] sm:$0xf] %vm1155_vm8, %v1086_v34  ;;  %v1088_v53 = vpop.permute.xlu0 %1087  ;;  %v1510_v34 = vor.u32 %v1509_v24, %v1506_v21  ;;  %v2057_v6 = vshrl.u32 %v1787_v4, 16  ;;  %v12021_v24 = vrot.slane %v2043_v62, 11  ;;  %v2060_v19 = vshll.u32 %v1787_v4, 16 }
 0x16a   : > { %3663 = vrot.lane.b32.xlu1 %v3582_v25, %s13205_s12  ;;  %1170 = vst.msk [vmem:[#allocation3 + $0x38] sm:$0xf] %vm1155_vm8, %v1088_v53  ;;  %v4040_v25 = vrot.slane %v4039_v14, 4  ;;  %v2021_v53 = vshrl.u32 %v1782_v36, 16  ;;  %v2051_v14 = vshll.u32 %v1786_v41, 16  ;;  %v1502_v51 = vsel %vm13458_vm5, %v1497_v2, %v1501_v50 }
 0x16b   : > { %4222 = vrot.lane.b32.xlu0 %v4011_v43, %s13206_s13  ;;  %985 = vst.msk [vmem:[#allocation3 + $0x58] sm:$0xf] %vm390_vm0, %v833_v17  ;;  %v1515_v43 = vrot.slane %v1513_v28, 5  ;;  %v1511_v47 = vrot.slane %v1510_v34, 4  ;;  %v2763_v17 = vshrl.u32 %v2504_v58, 16 }
 0x16c   : > { %v4213_v5 = vpop.permute.xlu1 %4212  ;;  %v12987_v7 = vld [vmem:[#allocation3 + $0x20] sm:$0xff]   ;;  %v14388_v36 = vld [vmem:[#allocation2 + $0xbc] sm:$0x1] }
 0x16d   : > { %4298 = vst.msk [vmem:[#allocation3 + $0x2c] sm:$0xf] %vm4286_vm15, %v4213_v5  ;;  %12835 = vmatprep.mubr.msk.bf16.mxu0 %vm4474_vm1, %v12987_v7  ;;  %v1648_v13 = vpop.permute.xlu0 %1647  ;;  %v1523_v5 = vshll.u32 %v1223_v35, 16  ;;  %v1520_v7 = vor.u32 %v1519_v44, %v1515_v43  ;;  %v1516_v57 = vsel %vm13458_vm5, %v1511_v47, %v1515_v43  ;;  %v2765_v26 = vrot.slane %v2763_v17, 4  ;;  %v2507_v28 = vld [vmem:[#allocation2 + $0xc4] sm:$0xf] }
 0x16e   : > { %3667 = vrot.lane.b32.xlu1 %v3584_v42, %s13205_s12  ;;  %1732 = vst.msk [vmem:[#allocation3 + $0x30] sm:$0xf] %vm1719_vm9, %v1648_v13  ;;  %v4045_v42 = vsel %vm13458_vm5, %v4040_v25, %v4044_v63  ;;  %v14367_v13 = vrot.slane %v2048_v61, 7  ;;  %v493_v63 = vld [vmem:[%s13439_s24 + $0x78] sm:$0xf]  ;;  %v2033_v25 = vrot.slane %v14358_v60, 4 }
 0x16f   : > { %1099 = vrot.lane.b32.xlu0 %v1015_v52, %s13199_s25  ;;  %v12020_v52 = vrot.slane %v2021_v53, 11  ;;  %v1521_v3 = vrot.slane %v1520_v7, 4  ;;  %526 = vst.msk [vmem:[#allocation2 + $0x104] sm:$0xf] %vm390_vm0, %v493_v63  ;;  %v2772_v35 = vshll.u32 %v2505_v23, 16  ;;  %v2787_v40 = vshrl.u32 %v2507_v28, 16 }
 0x170   : > { %v1090_v18 = vpop.permute.xlu1 %1089  ;;  %v2053_v11 = vor.u32 %v2051_v14, %v14367_v13  ;;  %v2790_v41 = vshll.u32 %v2507_v28, 16  ;;  %v2796_v44 = vshll.u32 %v2508_v33, 16  ;;  %v2301_v53 = vld [vmem:[#allocation2 + $0xb4] sm:$0xf]  ;;  %v3067_v47 = vld [vmem:[#allocation2 + $0xc4] sm:$0xf] }
 0x171   : > { %1171 = vst.msk [vmem:[#allocation3 + $0x3c] sm:$0xf] %vm1155_vm8, %v1090_v18  ;;  %v1652_v38 = vpop.permute.xlu0 %1651  ;;  %v2766_v18 = vshll.u32 %v2504_v58, 16  ;;  %v2032_v21 = vsel %vm13468_vm6, %v12020_v52, %v2031_v46  ;;  %v2774_v60 = vrot.slane %v2772_v35, 5  ;;  %v2789_v61 = vrot.slane %v2787_v40, 4 }
 0x172   : > { %4224 = vrot.lane.b32.xlu1 %v4021_v16, %s13206_s13  ;;  %1734 = vst.msk [vmem:[#allocation3 + $0x38] sm:$0xf] %vm1719_vm9, %v1652_v38  ;;  %v1525_v16 = vrot.slane %v1523_v5, 5  ;;  %v2054_v37 = vsel %vm13468_vm6, %v12021_v24, %v2053_v11  ;;  %v2798_v7 = vrot.slane %v2796_v44, 5  ;;  %v2303_v58 = vld [vmem:[#allocation2 + $0xc4] sm:$0xf] }
 0x173   : > { %4226 = vrot.lane.b32.xlu0 %v4035_v22, %s13206_s13  ;;  %v3066_v52 = vld [vmem:[#allocation2 + $0xc0] sm:$0x8]  ;;  %v3310_v62 = vshrl.u32 %v3067_v47, 16  ;;  %v2302_v46 = vld [vmem:[#allocation2 + $0xb8] sm:$0xf] }
 0x174   : > { %v1650_v30 = vpop.permute.xlu1 %1649  ;;  %v12988_v32 = vld [vmem:[#allocation3 + $0x28] sm:$0xff]   ;;  %v1526_v29 = vsel %vm13458_vm5, %v1521_v3, %v1525_v16  ;;  %v3313_v3 = vshll.u32 %v3067_v47, 16 }
 0x175   : > { %1733 = vst.msk [vmem:[#allocation3 + $0x34] sm:$0xf] %vm1719_vm9, %v1650_v30  ;;  %12836 = vmatmul.mubr.msk.bf16.gmra.mxu0 %vm4474_vm1, %v12988_v32  ;;  %v2177_v39 = vpop.permute.xlu0 %2176  ;;  %v2040_v30 = vor.u32 %v2038_v8, %v2037_v20  ;;  %v2059_v32 = vrot.slane %v2057_v6, 7  ;;  %v2509_v14 = vld [vmem:[#allocation2 + $0xcc] sm:$0x1]  ;;  %v14412_v63 = vrot.slane %v3310_v62, 7 }
 0x176   : > { %1101 = vrot.lane.b32.xlu1 %v1016_v9, %s13199_s25  ;;  %2261 = vst.msk [vmem:[#allocation3 + $0x30] sm:$0xf] %vm2248_vm10, %v2177_v39  ;;  %v494_v9 = vld [vmem:[%s13439_s24 + $0x7c] sm:$0xf]  ;;  %v2776_v39 = vshrl.u32 %v2505_v23, 16  ;;  %v2806_v11 = vshll.u32 %v2509_v14, 16 }
 0x177   : > { %1103 = vrot.lane.b32.xlu0 %v1017_v27, %s13199_s25  ;;  %527 = vst.msk [vmem:[#allocation2 + $0x108] sm:$0xf] %vm390_vm0, %v494_v9  ;;  %v2768_v27 = vrot.slane %v2766_v18, 5  ;;  %v2062_v50 = vor.u32 %v2060_v19, %v2059_v32  ;;  %v3305_v18 = vshrl.u32 %v3066_v52, 16  ;;  %v2304_v20 = vld [vmem:[#allocation2 + $0xc8] sm:$0xf] }
 0x178   : > { %v1654_v45 = vpop.permute.xlu1 %1653  ;;  %v2778_v59 = vrot.slane %v2776_v39, 4  ;;  %v3069_v9 = vld [vmem:[#allocation2 + $0xd0] sm:$0x8]  ;;  %v3071_v23 = vld [vmem:[#allocation2 + $0xd8] sm:$0xf]  ;;  %v2808_v39 = vrot.slane %v2806_v11, 5 }
 0x179   : > { %1735 = vst.msk [vmem:[#allocation3 + $0x3c] sm:$0xf] %vm1719_vm9, %v1654_v45  ;;  %v2181_v0 = vpop.permute.xlu0 %2180  ;;  %v2769_v43 = vor.u32 %v2768_v27, %v2765_v26  ;;  %v2041_v45 = vsel %vm13468_vm6, %v2033_v25, %v2040_v30  ;;  %v12036_v28 = vrot.slane %v3305_v18, 11  ;;  %v3327_v30 = vshrl.u32 %v3069_v9, 16  ;;  %v3788_v32 = vld [vmem:[#allocation2 + $0xc4] sm:$0xf] }
 0x17a   : > { %4228 = vrot.lane.b32.xlu1 %v4045_v42, %s13206_s13  ;;  %2263 = vst.msk [vmem:[#allocation3 + $0x38] sm:$0xf] %vm2248_vm10, %v2181_v0  ;;  %v2792_v0 = vrot.slane %v2790_v41, 5  ;;  %v2779_v16 = vor.u32 %v2778_v59, %v2774_v60  ;;  %v3341_v35 = vshrl.u32 %v3071_v23, 16  ;;  %v4047_v44 = vshrl.u32 %v3788_v32, 16  ;;  %s13207_s24 = smov 96  }
 0x17b   : > { %1663 = vrot.lane.b32.xlu0 %v1492_v48, %s13201_s27  ;;  %v2055_v48 = vrot.slane %v14367_v13, 4  ;;  %v2770_v5 = vrot.slane %v2769_v43, 4  ;;  %v3789_v43 = vld [vmem:[#allocation2 + $0xc8] sm:$0xf]  ;;  %v564_v11 = vld [vmem:[#allocation2 + $0xc0] sm:$0x8] }
 0x17c   : > { %v2179_v12 = vpop.permute.xlu1 %2178  ;;  %v2793_v13 = vor.u32 %v2792_v0, %v2789_v61  ;;  %v2780_v25 = vrot.slane %v2779_v16, 4  ;;  %v4056_v59 = vshll.u32 %v3789_v43, 16  ;;  %v4060_v61 = vshrl.u32 %v3789_v43, 16  ;;  %v566_v9 = vld [vmem:[#allocation2 + $0xc8] sm:$0xf] }
 0x17d   : > { %2262 = vst.msk [vmem:[#allocation3 + $0x34] sm:$0xf] %vm2248_vm10, %v2179_v12  ;;  %v2370_v15 = vpop.permute.xlu0 %2369  ;;  %v2063_v10 = vsel %vm13468_vm6, %v2055_v48, %v2062_v50  ;;  %v2802_v12 = vrot.slane %v2800_v54, 4  ;;  %v2775_v8 = vsel %vm13458_vm5, %v2770_v5, %v2774_v60  ;;  %v12037_v50 = vrot.slane %v3327_v30, 11  ;;  %v3586_v43 = vld [vmem:[#allocation2 + $0xc8] sm:$0xf] }
 0x17e   : > { %1105 = vrot.lane.b32.xlu1 %v1018_v56, %s13199_s25  ;;  %2454 = vst.msk [vmem:[#allocation3 + $0x30] sm:$0xf] %vm2441_vm11, %v2370_v15  ;;  %v2782_v56 = vshll.u32 %v14388_v36, 16  ;;  %v2794_v6 = vrot.slane %v2793_v13, 4  ;;  %v3317_v60 = vrot.slane %v14412_v63, 4  ;;  %v4049_v5 = vrot.slane %v4047_v44, 4 }
 0x17f   : > { %1667 = vrot.lane.b32.xlu0 %v1516_v57, %s13201_s27  ;;  %v3070_v57 = vld [vmem:[#allocation2 + $0xd4] sm:$0xf]  ;;  %v2803_v24 = vor.u32 %v2802_v12, %v2798_v7  ;;  %v4062_v16 = vrot.slane %v4060_v61, 4 }
 0x180   : > { %v2183_v22 = vpop.permute.xlu1 %2182  ;;  %v2784_v26 = vrot.slane %v2782_v56, 5  ;;  %v2799_v19 = vsel %vm13458_vm5, %v2794_v6, %v2798_v7  ;;  %v3344_v56 = vshll.u32 %v3071_v23, 16  ;;  %v14453_v6 = vld [vmem:[#allocation2 + $0xc4] sm:$0xf]  ;;  %v1227_v61 = vld [vmem:[#allocation2 + $0xd4] sm:$0xf] }
 0x181   : > { %2264 = vst.msk [vmem:[#allocation3 + $0x3c] sm:$0xf] %vm2248_vm10, %v2183_v22  ;;  %v2374_v38 = vpop.permute.xlu0 %2373  ;;  %v3332_v22 = vshrl.u32 %v3070_v57, 16 }
 0x182   : > { %1665 = vrot.lane.b32.xlu1 %v1502_v51, %s13201_s27  ;;  %2456 = vst.msk [vmem:[#allocation3 + $0x38] sm:$0xf] %vm2441_vm11, %v2374_v38  ;;  %v14407_v51 = vld [vmem:[#allocation2 + $0xc8] sm:$0xf] }
 0x183   : > { %2192 = vrot.lane.b32.xlu0 %v2032_v21, %s13202_s28  ;;  %v3319_v38 = vshrl.u32 %v14407_v51, 16  ;;  %v3334_v33 = vrot.slane %v3332_v22, 7  ;;  %v3322_v41 = vshll.u32 %v14407_v51, 16 }
 0x184   : > { %v2372_v34 = vpop.permute.xlu1 %2371 }
 0x185   : > { %2455 = vst.msk [vmem:[#allocation3 + $0x34] sm:$0xf] %vm2441_vm11, %v2372_v34  ;;  %v2931_v42 = vpop.permute.xlu0 %2930  ;;  %v3335_v34 = vshll.u32 %v3070_v57, 16  ;;  %v3321_v40 = vrot.slane %v3319_v38, 7  ;;  %v3339_v52 = vrot.slane %v3334_v33, 4 }
 0x186   : > { %1669 = vrot.lane.b32.xlu1 %v1526_v29, %s13201_s27  ;;  %3015 = vst.msk [vmem:[#allocation3 + $0x30] sm:$0xf] %vm3002_vm12, %v2931_v42  ;;  %v3315_v29 = vor.u32 %v3313_v3, %v14412_v63  ;;  %v2785_v42 = vsel %vm13458_vm5, %v2780_v25, %v2784_v26  ;;  %v3790_v57 = vld [vmem:[#allocation2 + $0xcc] sm:$0x1]  ;;  %v3585_v63 = vld [vmem:[#allocation2 + $0xc4] sm:$0xf] }
 0x187   : > { %2196 = vrot.lane.b32.xlu0 %v2054_v37, %s13202_s28  ;;  %v2804_v37 = vrot.slane %v2803_v24, 4  ;;  %v3337_v54 = vor.u32 %v3335_v34, %v3334_v33  ;;  %v565_v3 = vld [vmem:[#allocation2 + $0xc4] sm:$0xf]  ;;  %v3587_v25 = vld [vmem:[#allocation2 + $0xd4] sm:$0xf]  ;;  %v858_v34 = vshrl.u32 %v566_v9, 16 }
 0x188   : > { %v2376_v55 = vpop.permute.xlu1 %2375  ;;  %v849_v38 = vshrl.u32 %v565_v3, 16  ;;  %v852_v33 = vshll.u32 %v565_v3, 16 }
 0x189   : > { %2457 = vst.msk [vmem:[#allocation3 + $0x3c] sm:$0xf] %vm2441_vm11, %v2376_v55  ;;  %v2935_v2 = vpop.permute.xlu0 %2934  ;;  %v3343_v55 = vrot.slane %v3341_v35, 7  ;;  %v2809_v0 = vsel %vm13458_vm5, %v2804_v37, %v2808_v39  ;;  %v3338_v12 = vsel %vm13468_vm6, %v12037_v50, %v3337_v54 }
 0x18a   : > { %2194 = vrot.lane.b32.xlu1 %v2041_v45, %s13202_s28  ;;  %3017 = vst.msk [vmem:[#allocation3 + $0x38] sm:$0xf] %vm3002_vm12, %v2935_v2  ;;  %v4050_v45 = vshll.u32 %v3788_v32, 16  ;;  %v3324_v2 = vor.u32 %v3322_v41, %v3321_v40  ;;  %v1528_v32 = vshrl.u32 %v14453_v6, 16 }
 0x18b   : > { %2385 = vrot.lane.b32.xlu0 %v2301_v53, %s13200_s26  ;;  %v3316_v53 = vsel %vm13468_vm6, %v12036_v28, %v3315_v29  ;;  %v3346_v62 = vor.u32 %v3344_v56, %v3343_v55  ;;  %v844_v29 = vshrl.u32 %v564_v11, 16  ;;  %v568_v55 = vld [vmem:[#allocation2 + $0xd4] sm:$0xf]  ;;  %v569_v56 = vld [vmem:[#allocation2 + $0xd8] sm:$0xf] }
 0x18c   : > { %v2933_v4 = vpop.permute.xlu1 %2932  ;;  %v4052_v7 = vrot.slane %v4050_v45, 5  ;;  %v3325_v14 = vsel %vm13468_vm6, %v3317_v60, %v3324_v2  ;;  %v880_v2 = vshrl.u32 %v569_v56, 16 }
 0x18d   : > { %3016 = vst.msk [vmem:[#allocation3 + $0x34] sm:$0xf] %vm3002_vm12, %v2933_v4  ;;  %v3461_v15 = vpop.permute.xlu0 %3460  ;;  %v12006_v35 = vrot.slane %v844_v29, 11 }
 0x18e   : > { %2198 = vrot.lane.b32.xlu1 %v2063_v10, %s13202_s28  ;;  %3545 = vst.msk [vmem:[#allocation3 + $0x30] sm:$0xf] %vm3532_vm13, %v3461_v15  ;;  %v3791_v10 = vld [vmem:[#allocation2 + $0xd4] sm:$0xf]  ;;  %v4053_v51 = vor.u32 %v4052_v7, %v4049_v5  ;;  %v14447_v15 = vrot.slane %v4056_v59, 5  ;;  %v1531_v59 = vshll.u32 %v14453_v6, 16 }
 0x18f   : > { %2389 = vrot.lane.b32.xlu0 %v2303_v58, %s13200_s26  ;;  %v4074_v13 = vshll.u32 %v3791_v10, 16 }
 0x190   : > { %v2937_v17 = vpop.permute.xlu1 %2936  ;;  %v4054_v26 = vrot.slane %v4053_v51, 4  ;;  %v1533_v3 = vrot.slane %v1531_v59, 5 }
 0x191   : > { %3018 = vst.msk [vmem:[#allocation3 + $0x3c] sm:$0xf] %vm3002_vm12, %v2937_v17  ;;  %v3465_v21 = vpop.permute.xlu0 %3464  ;;  %v3792_v17 = vld [vmem:[#allocation2 + $0xd8] sm:$0xf] }
 0x192   : > { %2387 = vrot.lane.b32.xlu1 %v2302_v46, %s13200_s26  ;;  %3547 = vst.msk [vmem:[#allocation3 + $0x38] sm:$0xf] %vm3532_vm13, %v3465_v21  ;;  %v4071_v46 = vshrl.u32 %v3791_v10, 16  ;;  %v4076_v21 = vrot.slane %v4074_v13, 5  ;;  %v4080_v24 = vshll.u32 %v3792_v17, 16  ;;  %v4084_v28 = vshrl.u32 %v3792_v17, 16 }
 0x193   : > { %2946 = vrot.lane.b32.xlu0 %v2775_v8, %s13203_s29  ;;  %v4066_v8 = vshll.u32 %v3790_v57, 16  ;;  %v4059_v60 = vsel %vm13458_vm5, %v4054_v26, %v14447_v15  ;;  %v3793_v10 = vld [vmem:[#allocation2 + $0xdc] sm:$0x1]  ;;  %v874_v13 = vshll.u32 %v568_v55, 16  ;;  %v1555_v17 = vshll.u32 %v1227_v61, 16 }
 0x194   : > { %v3463_v27 = vpop.permute.xlu1 %3462  ;;  %v4073_v23 = vrot.slane %v4071_v46, 4  ;;  %v14468_v50 = vrot.slane %v4080_v24, 5 }
 0x195   : > { %3546 = vst.msk [vmem:[#allocation3 + $0x34] sm:$0xf] %vm3532_vm13, %v3463_v27  ;;  %v3654_v36 = vpop.permute.xlu0 %3653  ;;  %v4063_v27 = vor.u32 %v4062_v16, %v14447_v15  ;;  %v14463_v44 = vrot.slane %v4066_v8, 5  ;;  %v1552_v16 = vshrl.u32 %v1227_v61, 16  ;;  %v1557_v29 = vrot.slane %v1555_v17, 5 }
 0x196   : > { %2391 = vrot.lane.b32.xlu1 %v2304_v20, %s13200_s26  ;;  %3738 = vst.msk [vmem:[#allocation3 + $0x30] sm:$0xf] %vm3725_vm14, %v3654_v36  ;;  %v3347_v20 = vsel %vm13468_vm6, %v3339_v52, %v3346_v62  ;;  %v861_v36 = vshll.u32 %v566_v9, 16  ;;  %v4077_v39 = vor.u32 %v4076_v21, %v4073_v23  ;;  %v567_v62 = vld [vmem:[#allocation2 + $0xd0] sm:$0x8] }
 0x197   : > { %2950 = vrot.lane.b32.xlu0 %v2799_v19, %s13203_s29  ;;  %v851_v19 = vrot.slane %v849_v38, 7  ;;  %v866_v57 = vshrl.u32 %v567_v62, 16  ;;  %v4090_v38 = vshll.u32 %v3793_v10, 16 }
 0x198   : > { %v3467_v48 = vpop.permute.xlu1 %3466  ;;  %v4078_v7 = vrot.slane %v4077_v39, 4 }
 0x199   : > { %3548 = vst.msk [vmem:[#allocation3 + $0x3c] sm:$0xf] %vm3532_vm13, %v3467_v48  ;;  %v3658_v47 = vpop.permute.xlu0 %3657  ;;  %v854_v40 = vor.u32 %v852_v33, %v851_v19  ;;  %v856_v41 = vrot.slane %v851_v19, 4  ;;  %v14466_v48 = vrot.slane %v4063_v27, 4  ;;  %v1228_v27 = vld [vmem:[#allocation2 + $0xd8] sm:$0xf] }
 0x19a   : > { %2948 = vrot.lane.b32.xlu1 %v2785_v42, %s13203_s29  ;;  %3740 = vst.msk [vmem:[#allocation3 + $0x38] sm:$0xf] %vm3725_vm14, %v3658_v47  ;;  %v860_v42 = vrot.slane %v858_v34, 7  ;;  %v3588_v47 = vld [vmem:[#allocation2 + $0xd8] sm:$0xf] }
 0x19b   : > { %3476 = vrot.lane.b32.xlu0 %v3316_v53, %s13204_s30  ;;  %v855_v53 = vsel %vm13468_vm6, %v12006_v35, %v854_v40  ;;  %v4069_v24 = vsel %vm13458_vm5, %v14466_v48, %v14463_v44  ;;  %v14506_v33 = vld [vmem:[#allocation2 + $0xd4] sm:$0xf]  ;;  %v1020_v34 = vld [vmem:[#allocation2 + $0xc8] sm:$0xf]  ;;  %v4092_v40 = vrot.slane %v4090_v38, 5 }
 0x19c   : > { %v3656_v58 = vpop.permute.xlu1 %3655  ;;  %v863_v54 = vor.u32 %v861_v36, %v860_v42  ;;  %987 = vst.msk [vmem:[#allocation3 + $0x60] sm:$0xf] %vm390_vm0, %v855_v53  ;;  %v1561_v42 = vshll.u32 %v1228_v27, 16  ;;  %v1021_v53 = vld [vmem:[#allocation2 + $0xd4] sm:$0xf] }
 0x19d   : > { %3739 = vst.msk [vmem:[#allocation3 + $0x34] sm:$0xf] %vm3725_vm14, %v3656_v58  ;;  %v4215_v4 = vpop.permute.xlu0 %4214  ;;  %v4086_v58 = vrot.slane %v4084_v28, 4  ;;  %v1554_v28 = vrot.slane %v1552_v16, 4  ;;  %v1793_v38 = vld [vmem:[#allocation2 + $0xe8] sm:$0xf] }
 0x19e   : > { %2952 = vrot.lane.b32.xlu1 %v2809_v0, %s13203_s29  ;;  %4299 = vst.msk [vmem:[#allocation3 + $0x30] sm:$0xf] %vm4286_vm15, %v4215_v4  ;;  %v871_v0 = vshrl.u32 %v568_v55, 16  ;;  %v864_v52 = vsel %vm13468_vm6, %v856_v41, %v863_v54  ;;  %v1225_v4 = vld [vmem:[#allocation2 + $0xc8] sm:$0xf] }
 0x19f   : > { %3480 = vrot.lane.b32.xlu0 %v3338_v12, %s13204_s30  ;;  %v14479_v12 = vrot.slane %v1528_v32, 4  ;;  %988 = vst.msk [vmem:[#allocation3 + $0x64] sm:$0xf] %vm390_vm0, %v864_v52  ;;  %v1541_v23 = vshrl.u32 %v1225_v4, 16  ;;  %v4087_v11 = vor.u32 %v4086_v58, %v14468_v50  ;;  %v4083_v32 = vsel %vm13458_vm5, %v4078_v7, %v14468_v50  ;;  %v1226_v41 = vld [vmem:[#allocation2 + $0xcc] sm:$0x1] }
 0x1a0   : > { %v3660_v18 = vpop.permute.xlu1 %3659  ;;  %v873_v46 = vrot.slane %v871_v0, 7  ;;  %v1558_v48 = vor.u32 %v1557_v29, %v1554_v28  ;;  %v2070_v50 = vshrl.u32 %v14506_v33, 16  ;;  %v1788_v55 = vld [vmem:[#allocation2 + $0xd0] sm:$0x8]  ;;  %v1547_v61 = vshll.u32 %v1226_v41, 16 }
 0x1a1   : > { %3741 = vst.msk [vmem:[#allocation3 + $0x3c] sm:$0xf] %vm3725_vm14, %v3660_v18  ;;  %v1092_v22 = vpop.permute.xlu0 %1091  ;;  %v883_v18 = vshll.u32 %v569_v56, 16  ;;  %v1534_v19 = vor.u32 %v1533_v3, %v14479_v12  ;;  %v4088_v39 = vrot.slane %v4087_v11, 4  ;;  %v1792_v0 = vld [vmem:[#allocation2 + $0xe4] sm:$0xf] }
 0x1a2   : > { %3478 = vrot.lane.b32.xlu1 %v3325_v14, %s13204_s30  ;;  %1172 = vst.msk [vmem:[#allocation3 + $0x40] sm:$0xf] %vm1155_vm8, %v1092_v22  ;;  %v882_v14 = vrot.slane %v880_v2, 7  ;;  %v876_v8 = vor.u32 %v874_v13, %v873_v46  ;;  %v878_v6 = vrot.slane %v873_v46, 4  ;;  %v1537_v22 = vshll.u32 %v1225_v4, 16 }
 0x1a3   : > { %3669 = vrot.lane.b32.xlu0 %v3585_v63, %s13205_s12  ;;  %v1019_v63 = vld [vmem:[#allocation2 + $0xc4] sm:$0xf]  ;;  %v1535_v54 = vrot.slane %v1534_v19, 4  ;;  %v4093_v2 = vsel %vm13458_vm5, %v4088_v39, %v4092_v40  ;;  %v1229_v7 = vld [vmem:[#allocation2 + $0xdc] sm:$0x1]  ;;  %v1559_v62 = vrot.slane %v1558_v48, 4 }
 0x1a4   : > { %v4217_v30 = vpop.permute.xlu1 %4216  ;;  %v885_v21 = vor.u32 %v883_v18, %v882_v14  ;;  %v1539_v36 = vrot.slane %v1537_v22, 5  ;;  %v1790_v58 = vld [vmem:[#allocation2 + $0xd8] sm:$0xf]  ;;  %v2065_v4 = vshrl.u32 %v1788_v55, 16  ;;  %v2073_v46 = vshll.u32 %v14506_v33, 16 }
 0x1a5   : > { %4300 = vst.msk [vmem:[#allocation3 + $0x34] sm:$0xf] %vm4286_vm15, %v4217_v30  ;;  %v4219_v37 = vpop.permute.xlu0 %4218  ;;  %v1571_v3 = vshll.u32 %v1229_v7, 16  ;;  %v2095_v28 = vshll.u32 %v1792_v0, 16  ;;  %v2510_v33 = vld [vmem:[#allocation2 + $0xd4] sm:$0xf] }
 0x1a6   : > { %3482 = vrot.lane.b32.xlu1 %v3347_v20, %s13204_s30  ;;  %4301 = vst.msk [vmem:[#allocation3 + $0x38] sm:$0xf] %vm4286_vm15, %v4219_v37  ;;  %v12007_v20 = vrot.slane %v866_v57, 11  ;;  %v886_v30 = vsel %vm13468_vm6, %v878_v6, %v885_v21  ;;  %v1543_v37 = vrot.slane %v1541_v23, 4  ;;  %v14527_v57 = vrot.slane %v2070_v50, 7 }
 0x1a7   : > { %3673 = vrot.lane.b32.xlu0 %v3587_v25, %s13205_s12  ;;  %990 = vst.msk [vmem:[#allocation3 + $0x6c] sm:$0xf] %vm390_vm0, %v886_v30  ;;  %v1540_v14 = vsel %vm13458_vm5, %v1535_v54, %v1539_v36  ;;  %v1022_v6 = vld [vmem:[#allocation2 + $0xd8] sm:$0xf]  ;;  %v12022_v21 = vrot.slane %v2065_v4, 11 }
 0x1a8   : > { %v1094_v45 = vpop.permute.xlu1 %1093  ;;  %v877_v25 = vsel %vm13468_vm6, %v12007_v20, %v876_v8  ;;  %v1544_v59 = vor.u32 %v1543_v37, %v1539_v36  ;;  %v2079_v20 = vshrl.u32 %v1790_v58, 16  ;;  %v2082_v36 = vshll.u32 %v1790_v58, 16 }
 0x1a9   : > { %1173 = vst.msk [vmem:[#allocation3 + $0x44] sm:$0xf] %vm1155_vm8, %v1094_v45  ;;  %v1096_v5 = vpop.permute.xlu0 %1095  ;;  %v2101_v37 = vshrl.u32 %v1793_v38, 16  ;;  %v2077_v50 = vrot.slane %v14527_v57, 4 }
 0x1aa   : > { %3671 = vrot.lane.b32.xlu1 %v3586_v43, %s13205_s12  ;;  %1174 = vst.msk [vmem:[#allocation3 + $0x48] sm:$0xf] %vm1155_vm8, %v1096_v5  ;;  %v1565_v43 = vshrl.u32 %v1228_v27, 16  ;;  %v1563_v5 = vrot.slane %v1561_v42, 5  ;;  %v1545_v18 = vrot.slane %v1544_v59, 4  ;;  %v2081_v19 = vrot.slane %v2079_v20, 7 }
 0x1ab   : > { %4230 = vrot.lane.b32.xlu0 %v4059_v60, %s13206_s13  ;;  %989 = vst.msk [vmem:[#allocation3 + $0x68] sm:$0xf] %vm390_vm0, %v877_v25  ;;  %v2103_v55 = vrot.slane %v2101_v37, 7  ;;  %v3074_v37 = vld [vmem:[#allocation2 + $0xe8] sm:$0xf] }
 0x1ac   : > { %v4221_v51 = vpop.permute.xlu1 %4220  ;;  %v12989_v15 = vld [vmem:[#allocation3 + $0x30] sm:$0xff]   ;;  %v1567_v10 = vrot.slane %v1565_v43, 4  ;;  %v1564_v23 = vsel %vm13458_vm5, %v1559_v62, %v1563_v5  ;;  %v2811_v43 = vshrl.u32 %v2510_v33, 16  ;;  %v2084_v54 = vor.u32 %v2082_v36, %v2081_v19 }
 0x1ad   : > { %4302 = vst.msk [vmem:[#allocation3 + $0x3c] sm:$0xf] %vm4286_vm15, %v4221_v51  ;;  %12839 = vmatprep.mubr.msk.bf16.mxu0 %vm4474_vm1, %v12989_v15  ;;  %v1656_v9 = vpop.permute.xlu0 %1655  ;;  %v1791_v51 = vld [vmem:[#allocation2 + $0xe0] sm:$0x8]  ;;  %v2092_v15 = vshrl.u32 %v1792_v0, 16 }
 0x1ae   : > { %3675 = vrot.lane.b32.xlu1 %v3588_v47, %s13205_s12  ;;  %1736 = vst.msk [vmem:[#allocation3 + $0x40] sm:$0xf] %vm1719_vm9, %v1656_v9  ;;  %v14518_v47 = vld [vmem:[%s18041_s2] ss:$0 sm:$0xff]  ;;  %v1568_v9 = vor.u32 %v1567_v10, %v1563_v5  ;;  %v2087_v11 = vshrl.u32 %v1791_v51, 16  ;;  %v2813_v5 = vrot.slane %v2811_v43, 4  ;;  %v2085_v62 = vsel %vm13468_vm6, %v2077_v50, %v2084_v54 }
 0x1af   : > { %1107 = vrot.lane.b32.xlu0 %v1019_v63, %s13199_s25  ;;  %v1549_v63 = vrot.slane %v1547_v61, 5  ;;  %v2094_v27 = vrot.slane %v2092_v15, 7  ;;  %v2305_v15 = vld [vmem:[#allocation2 + $0xd4] sm:$0xf]  ;;  %v2308_v50 = vld [vmem:[#allocation2 + $0xe8] sm:$0xf] }
 0x1b0   : > { %v1098_v26 = vpop.permute.xlu1 %1097  ;;  %v12023_v41 = vrot.slane %v2087_v11, 11  ;;  %v3072_v11 = vld [vmem:[#allocation2 + $0xe0] sm:$0x8] }
 0x1b1   : > { %1175 = vst.msk [vmem:[#allocation3 + $0x4c] sm:$0xf] %vm1155_vm8, %v1098_v26  ;;  %v1660_v35 = vpop.permute.xlu0 %1659  ;;  %v1550_v29 = vsel %vm13458_vm5, %v1545_v18, %v1549_v63  ;;  %v2097_v42 = vor.u32 %v2095_v28, %v2094_v27  ;;  %v2099_v4 = vrot.slane %v2094_v27, 4  ;;  %v3076_v28 = vld [vmem:[#allocation2 + $0xf4] sm:$0xf]  ;;  %v3349_v36 = vshrl.u32 %v3072_v11, 16 }
 0x1b2   : > { %4232 = vrot.lane.b32.xlu1 %v4069_v24, %s13206_s13  ;;  %1738 = vst.msk [vmem:[#allocation3 + $0x48] sm:$0xf] %vm1719_vm9, %v1660_v35  ;;  %v2075_v24 = vor.u32 %v2073_v46, %v14527_v57  ;;  %v1569_v35 = vrot.slane %v1568_v9, 4 }
 0x1b3   : > { %4234 = vrot.lane.b32.xlu0 %v4083_v32, %s13206_s13  ;;  %v1573_v32 = vrot.slane %v1571_v3, 5  ;;  %v3073_v3 = vld [vmem:[#allocation2 + $0xe4] sm:$0xf] }
 0x1b4   : > { %v1658_v44 = vpop.permute.xlu1 %1657  ;;  %v12990_v45 = vld [vmem:[#allocation3 + $0x38] sm:$0xff]   ;;  %v2076_v40 = vsel %vm13468_vm6, %v12022_v21, %v2075_v24  ;;  %v2307_v21 = vld [vmem:[#allocation2 + $0xe4] sm:$0xf] }
 0x1b5   : > { %1737 = vst.msk [vmem:[#allocation3 + $0x44] sm:$0xf] %vm1719_vm9, %v1658_v44  ;;  %v12829_v56 = vpop.f32.mrf.mxu0  ;;  %12840 = vmatmul.mubr.msk.bf16.gmra.mxu0 %vm4474_vm1, %v12990_v45  ;;  %v2185_v60 = vpop.permute.xlu0 %2184  ;;  %v2814_v44 = vshll.u32 %v2510_v33, 16  ;;  %v2513_v45 = vld [vmem:[#allocation2 + $0xe4] sm:$0xf] }
 0x1b6   : > { %1109 = vrot.lane.b32.xlu1 %v1020_v34, %s13199_s25  ;;  %2265 = vst.msk [vmem:[#allocation3 + $0x40] sm:$0xf] %vm2248_vm10, %v2185_v60  ;;  %v4570_v13 = vadd.f32 %v12829_v56, %v14518_v47  ;;  %v2104_v56 = vshll.u32 %v1793_v38, 16  ;;  %v2511_v60 = vld [vmem:[#allocation2 + $0xd8] sm:$0xf]  ;;  %v2835_v61 = vshrl.u32 %v2513_v45, 16 }
 0x1b7   : > { %v14524_v52 = vpop.f32.mrf.mxu0  ;;  %1111 = vrot.lane.b32.xlu0 %v1021_v53, %s13199_s25  ;;  %v1574_v53 = vsel %vm13458_vm5, %v1569_v35, %v1573_v32  ;;  %v2838_v0 = vshll.u32 %v2513_v45, 16  ;;  %v2816_v7 = vrot.slane %v2814_v44, 5  ;;  %v2820_v58 = vshll.u32 %v2511_v60, 16  ;;  %v2515_v35 = vld [vmem:[#allocation2 + $0xec] sm:$0x1] }
 0x1b8   : > { %v1662_v12 = vpop.permute.xlu1 %1661  ;;  %v4690_v25 = vmax.f32 %v4570_v13, 0.0  ;;  %v2106_v57 = vor.u32 %v2104_v56, %v2103_v55  ;;  %v2514_v13 = vld [vmem:[#allocation2 + $0xe8] sm:$0xf]  ;;  %v3354_v38 = vshrl.u32 %v3073_v3, 16  ;;  %v2854_v54 = vshll.u32 %v2515_v35, 16 }
 0x1b9   : > { %1739 = vst.msk [vmem:[#allocation3 + $0x4c] sm:$0xf] %vm1719_vm9, %v1662_v12  ;;  %v12830_v16 = vpop.f32.mrf.mxu0  ;;  %v2189_v17 = vpop.permute.xlu0 %2188  ;;  %v2824_v12 = vshrl.u32 %v2511_v60, 16  ;;  %v2840_v51 = vrot.slane %v2838_v0, 5  ;;  %v2822_v18 = vrot.slane %v2820_v58, 5  ;;  %v2848_v9 = vshrl.u32 %v2514_v13, 16 }
 0x1ba   : > { %4236 = vrot.lane.b32.xlu1 %v4093_v2, %s13206_s13  ;;  %v4573_v8 = vadd.f32 %v12830_v16, %v14518_v47  ;;  %2267 = vst.msk [vmem:[#allocation3 + $0x48] sm:$0xf] %vm2248_vm10, %v2189_v17  ;;  %v2098_v2 = vsel %vm13468_vm6, %v12023_v41, %v2097_v42  ;;  %v2817_v16 = vor.u32 %v2816_v7, %v2813_v5  ;;  %v3357_v41 = vshll.u32 %v3073_v3, 16  ;;  %v3077_v56 = vld [vmem:[#allocation2 + $0xf8] sm:$0xf] }
 0x1bb   : > { %1671 = vrot.lane.b32.xlu0 %v1540_v14, %s13201_s27  ;;  %v2837_v14 = vrot.slane %v2835_v61, 4  ;;  %v2826_v63 = vrot.slane %v2824_v12, 4  ;;  %v2107_v20 = vsel %vm13468_vm6, %v2099_v4, %v2106_v57  ;;  %v2850_v32 = vrot.slane %v2848_v9, 4 }
 0x1bc   : > { %v2187_v22 = vpop.permute.xlu1 %2186  ;;  %v4691_v26 = vmax.f32 %v4573_v8, 0.0  ;;  %v2512_v8 = vld [vmem:[#allocation2 + $0xdc] sm:$0x1]  ;;  %v2818_v24 = vrot.slane %v2817_v16, 4  ;;  %v3376_v42 = vshrl.u32 %v3076_v28, 16  ;;  %v3363_v55 = vshrl.u32 %v3074_v37, 16 }
 0x1bd   : > { %2266 = vst.msk [vmem:[#allocation3 + $0x44] sm:$0xf] %vm2248_vm10, %v2187_v22  ;;  %v2378_v30 = vpop.permute.xlu0 %2377  ;;  %v2830_v27 = vshll.u32 %v2512_v8, 16  ;;  %v12038_v61 = vrot.slane %v3349_v36, 11  ;;  %v3379_v7 = vshll.u32 %v3076_v28, 16  ;;  %v2856_v57 = vrot.slane %v2854_v54, 5 }
 0x1be   : > { %1113 = vrot.lane.b32.xlu1 %v1022_v6, %s13199_s25  ;;  %v14545_v34 = vpack.c.bf16 %v4691_v26, %v4690_v25  ;;  %2458 = vst.msk [vmem:[#allocation3 + $0x40] sm:$0xf] %vm2441_vm11, %v2378_v30  ;;  %v2844_v6 = vshll.u32 %v2514_v13, 16  ;;  %v2827_v26 = vor.u32 %v2826_v63, %v2822_v18  ;;  %v3378_v5 = vrot.slane %v3376_v42, 7  ;;  %v3795_v63 = vld [vmem:[#allocation2 + $0xe8] sm:$0xf] }
 0x1bf   : > { %1675 = vrot.lane.b32.xlu0 %v1564_v23, %s13201_s27  ;;  %v2841_v23 = vor.u32 %v2840_v51, %v2837_v14  ;;  %v2832_v45 = vrot.slane %v2830_v27, 5  ;;  %v3366_v13 = vshll.u32 %v3074_v37, 16  ;;  %v3388_v8 = vshll.u32 %v3077_v56, 16  ;;  %v3589_v42 = vld [vmem:[#allocation2 + $0xe4] sm:$0xf] }
 0x1c0   : > { %v2191_v39 = vpop.permute.xlu1 %2190  ;;  %v2846_v30 = vrot.slane %v2844_v6, 5  ;;  %v2828_v44 = vrot.slane %v2827_v26, 4  ;;  %v3383_v28 = vrot.slane %v3378_v5, 4 }
 0x1c1   : > { %2268 = vst.msk [vmem:[#allocation3 + $0x4c] sm:$0xf] %vm2248_vm10, %v2191_v39  ;;  %v2382_v48 = vpop.permute.xlu0 %2381  ;;  %v2842_v33 = vrot.slane %v2841_v23, 4  ;;  %v2823_v39 = vsel %vm13458_vm5, %v2818_v24, %v2822_v18  ;;  %v3381_v18 = vor.u32 %v3379_v7, %v3378_v5  ;;  %v3797_v23 = vld [vmem:[#allocation2 + $0xf4] sm:$0xf] }
 0x1c2   : > { %1673 = vrot.lane.b32.xlu1 %v1550_v29, %s13201_s27  ;;  %2460 = vst.msk [vmem:[#allocation3 + $0x48] sm:$0xf] %vm2441_vm11, %v2382_v48  ;;  %v2306_v29 = vld [vmem:[#allocation2 + $0xd8] sm:$0xf]  ;;  %v3075_v48 = vld [vmem:[#allocation2 + $0xf0] sm:$0x8]  ;;  %v2833_v58 = vsel %vm13458_vm5, %v2828_v44, %v2832_v45 }
 0x1c3   : > { %2200 = vrot.lane.b32.xlu0 %v2076_v40, %s13202_s28  ;;  %v14579_v40 = vrot.slane %v3354_v38, 7  ;;  %v4104_v38 = vshll.u32 %v3795_v63, 16 }
 0x1c4   : > { %v2380_v59 = vpop.permute.xlu1 %2379 }
 0x1c5   : > { %2459 = vst.msk [vmem:[#allocation3 + $0x44] sm:$0xf] %vm2441_vm11, %v2380_v59  ;;  %v2939_v10 = vpop.permute.xlu0 %2938  ;;  %v2847_v59 = vsel %vm13458_vm5, %v2842_v33, %v2846_v30  ;;  %v3359_v0 = vor.u32 %v3357_v41, %v14579_v40  ;;  %v3361_v9 = vrot.slane %v14579_v40, 4  ;;  %v3796_v33 = vld [vmem:[#allocation2 + $0xec] sm:$0x1]  ;;  %v14610_v37 = vrot.slane %v4104_v38, 5 }
 0x1c6   : > { %1677 = vrot.lane.b32.xlu1 %v1574_v53, %s13201_s27  ;;  %3019 = vst.msk [vmem:[#allocation3 + $0x40] sm:$0xf] %vm3002_vm12, %v2939_v10  ;;  %v2851_v53 = vor.u32 %v2850_v32, %v2846_v30  ;;  %v3794_v10 = vld [vmem:[#allocation2 + $0xe4] sm:$0xf]  ;;  %v4119_v30 = vshrl.u32 %v3797_v23, 16  ;;  %v4122_v32 = vshll.u32 %v3797_v23, 16 }
 0x1c7   : > { %2204 = vrot.lane.b32.xlu0 %v2098_v2, %s13202_s28  ;;  %v3371_v2 = vshrl.u32 %v3075_v48, 16  ;;  %v4095_v51 = vshrl.u32 %v3794_v10, 16  ;;  %v3360_v16 = vsel %vm13468_vm6, %v12038_v61, %v3359_v0  ;;  %v571_v40 = vld [vmem:[#allocation2 + $0xe4] sm:$0xf]  ;;  %v572_v41 = vld [vmem:[#allocation2 + $0xe8] sm:$0xf] }
 0x1c8   : > { %v2384_v46 = vpop.permute.xlu1 %2383  ;;  %v2852_v4 = vrot.slane %v2851_v53, 4  ;;  %v893_v44 = vshrl.u32 %v571_v40, 16  ;;  %v902_v45 = vshrl.u32 %v572_v41, 16  ;;  %v4114_v53 = vshll.u32 %v3796_v33, 16  ;;  %v575_v23 = vld [vmem:[#allocation2 + $0xf8] sm:$0xf] }
 0x1c9   : > { %2461 = vst.msk [vmem:[#allocation3 + $0x4c] sm:$0xf] %vm2441_vm11, %v2384_v46  ;;  %v2943_v17 = vpop.permute.xlu0 %2942  ;;  %v3365_v46 = vrot.slane %v3363_v55, 7  ;;  %v4097_v24 = vrot.slane %v4095_v51, 4  ;;  %v4121_v54 = vrot.slane %v4119_v30, 4  ;;  %v4124_v55 = vrot.slane %v4122_v32, 5 }
 0x1ca   : > { %2202 = vrot.lane.b32.xlu1 %v2085_v62, %s13202_s28  ;;  %3021 = vst.msk [vmem:[#allocation3 + $0x48] sm:$0xf] %vm3002_vm12, %v2943_v17  ;;  %v3385_v62 = vshrl.u32 %v3077_v56, 16  ;;  %v12039_v17 = vrot.slane %v3371_v2, 11  ;;  %v2857_v6 = vsel %vm13458_vm5, %v2852_v4, %v2856_v57  ;;  %v570_v56 = vld [vmem:[#allocation2 + $0xe0] sm:$0x8] }
 0x1cb   : > { %2393 = vrot.lane.b32.xlu0 %v2305_v15, %s13200_s26  ;;  %v4098_v15 = vshll.u32 %v3794_v10, 16  ;;  %v895_v61 = vrot.slane %v893_v44, 7  ;;  %v896_v0 = vshll.u32 %v571_v40, 16  ;;  %v904_v2 = vrot.slane %v902_v45, 7  ;;  %v1233_v38 = vld [vmem:[#allocation2 + $0xf4] sm:$0xf] }
 0x1cc   : > { %v2941_v22 = vpop.permute.xlu1 %2940  ;;  %v3382_v26 = vsel %vm13468_vm6, %v12039_v17, %v3381_v18  ;;  %v4125_v51 = vor.u32 %v4124_v55, %v4121_v54  ;;  %v3590_v17 = vld [vmem:[#allocation2 + $0xe8] sm:$0xf]  ;;  %v14625_v18 = vrot.slane %v4114_v53, 5  ;;  %v573_v32 = vld [vmem:[#allocation2 + $0xf0] sm:$0x8] }
 0x1cd   : > { %3020 = vst.msk [vmem:[#allocation3 + $0x44] sm:$0xf] %vm3002_vm12, %v2941_v22  ;;  %v3469_v25 = vpop.permute.xlu0 %3468  ;;  %v3368_v22 = vor.u32 %v3366_v13, %v3365_v46  ;;  %v4100_v11 = vrot.slane %v4098_v15, 5  ;;  %v898_v46 = vor.u32 %v896_v0, %v895_v61  ;;  %v900_v13 = vrot.slane %v895_v61, 4  ;;  %v1023_v44 = vld [vmem:[#allocation2 + $0xe4] sm:$0xf] }
 0x1ce   : > { %2206 = vrot.lane.b32.xlu1 %v2107_v20, %s13202_s28  ;;  %3549 = vst.msk [vmem:[#allocation3 + $0x40] sm:$0xf] %vm3532_vm13, %v3469_v25  ;;  %v3387_v20 = vrot.slane %v3385_v62, 7  ;;  %v4108_v25 = vshrl.u32 %v3795_v63, 16  ;;  %v3591_v62 = vld [vmem:[#allocation2 + $0xf4] sm:$0xf] }
 0x1cf   : > { %2397 = vrot.lane.b32.xlu0 %v2307_v21, %s13200_s26  ;;  %v4101_v36 = vor.u32 %v4100_v11, %v4097_v24  ;;  %v910_v33 = vshrl.u32 %v573_v32, 16  ;;  %v1796_v32 = vld [vmem:[#allocation2 + $0xf8] sm:$0xf] }
 0x1d0   : > { %v2945_v19 = vpop.permute.xlu1 %2944 }
 0x1d1   : > { %3022 = vst.msk [vmem:[#allocation3 + $0x4c] sm:$0xf] %vm3002_vm12, %v2945_v19  ;;  %v3473_v43 = vpop.permute.xlu0 %3472  ;;  %v3369_v19 = vsel %vm13468_vm6, %v3361_v9, %v3368_v22  ;;  %v4102_v7 = vrot.slane %v4101_v36, 4  ;;  %v574_v22 = vld [vmem:[#allocation2 + $0xf4] sm:$0xf] }
 0x1d2   : > { %2395 = vrot.lane.b32.xlu1 %v2306_v29, %s13200_s26  ;;  %3551 = vst.msk [vmem:[#allocation3 + $0x48] sm:$0xf] %vm3532_vm13, %v3473_v43  ;;  %v3390_v29 = vor.u32 %v3388_v8, %v3387_v20  ;;  %v3798_v43 = vld [vmem:[#allocation2 + $0xf8] sm:$0xf]  ;;  %v918_v36 = vshll.u32 %v574_v22, 16 }
 0x1d3   : > { %2954 = vrot.lane.b32.xlu0 %v2823_v39, %s13203_s29  ;;  %v4110_v39 = vrot.slane %v4108_v25, 4  ;;  %v4132_v4 = vshrl.u32 %v3798_v43, 16  ;;  %v4107_v20 = vsel %vm13458_vm5, %v4102_v7, %v14610_v37  ;;  %v915_v25 = vshrl.u32 %v574_v22, 16  ;;  %v1234_v7 = vld [vmem:[#allocation2 + $0xf8] sm:$0xf] }
 0x1d4   : > { %v3471_v60 = vpop.permute.xlu1 %3470  ;;  %v3391_v48 = vsel %vm13468_vm6, %v3383_v28, %v3390_v29  ;;  %v4126_v28 = vrot.slane %v4125_v51, 4  ;;  %v3799_v29 = vld [vmem:[#allocation2 + $0xfc] sm:$0x1]  ;;  %v1025_v22 = vld [vmem:[#allocation2 + $0xf4] sm:$0xf] }
 0x1d5   : > { %3550 = vst.msk [vmem:[#allocation3 + $0x44] sm:$0xf] %vm3532_vm13, %v3471_v60  ;;  %v3662_v12 = vpop.permute.xlu0 %3661  ;;  %v14617_v60 = vld [vmem:[#allocation2 + $0xe4] sm:$0xf]  ;;  %v4111_v10 = vor.u32 %v4110_v39, %v14610_v37  ;;  %v4134_v24 = vrot.slane %v4132_v4, 4  ;;  %v4138_v0 = vshll.u32 %v3799_v29, 16 }
 0x1d6   : > { %2399 = vrot.lane.b32.xlu1 %v2308_v50, %s13200_s26  ;;  %3742 = vst.msk [vmem:[#allocation3 + $0x40] sm:$0xf] %vm3725_vm14, %v3662_v12  ;;  %v905_v12 = vshll.u32 %v572_v41, 16  ;;  %v1576_v15 = vshrl.u32 %v14617_v60, 16  ;;  %v1579_v11 = vshll.u32 %v14617_v60, 16  ;;  %v1600_v41 = vshrl.u32 %v1233_v38, 16 }
 0x1d7   : > { %2958 = vrot.lane.b32.xlu0 %v2847_v59, %s13203_s29  ;;  %v888_v59 = vshrl.u32 %v570_v56, 16  ;;  %v4112_v8 = vrot.slane %v4111_v10, 4  ;;  %v1235_v29 = vld [vmem:[#allocation2 + $0xfc] sm:$0x1] }
 0x1d8   : > { %v3475_v14 = vpop.permute.xlu1 %3474  ;;  %v1578_v30 = vrot.slane %v1576_v15, 4  ;;  %v1581_v45 = vrot.slane %v1579_v11, 5  ;;  %v1602_v10 = vrot.slane %v1600_v41, 4 }
 0x1d9   : > { %3552 = vst.msk [vmem:[#allocation3 + $0x4c] sm:$0xf] %vm3532_vm13, %v3475_v14  ;;  %v3666_v3 = vpop.permute.xlu0 %3665  ;;  %v12008_v57 = vrot.slane %v888_v59, 11  ;;  %v4117_v59 = vsel %vm13458_vm5, %v4112_v8, %v14625_v18  ;;  %v1609_v18 = vshll.u32 %v1234_v7, 16 }
 0x1da   : > { %2956 = vrot.lane.b32.xlu1 %v2833_v58, %s13203_s29  ;;  %3744 = vst.msk [vmem:[#allocation3 + $0x48] sm:$0xf] %vm3725_vm14, %v3666_v3  ;;  %v4128_v58 = vshll.u32 %v3798_v43, 16  ;;  %v927_v43 = vshll.u32 %v575_v23, 16  ;;  %v1582_v4 = vor.u32 %v1581_v45, %v1578_v30 }
 0x1db   : > { %3484 = vrot.lane.b32.xlu0 %v3360_v16, %s13204_s30  ;;  %v907_v16 = vor.u32 %v905_v12, %v904_v2  ;;  %v899_v63 = vsel %vm13468_vm6, %v12008_v57, %v898_v46  ;;  %v14662_v57 = vld [vmem:[#allocation2 + $0xf4] sm:$0xf]  ;;  %v1024_v46 = vld [vmem:[#allocation2 + $0xe8] sm:$0xf] }
 0x1dc   : > { %v3664_v21 = vpop.permute.xlu1 %3663  ;;  %991 = vst.msk [vmem:[#allocation3 + $0x70] sm:$0xf] %vm390_vm0, %v899_v63  ;;  %v1613_v63 = vshrl.u32 %v1234_v7, 16  ;;  %v1799_v7 = vld [vmem:[#allocation2 + $0x108] sm:$0xf] }
 0x1dd   : > { %3743 = vst.msk [vmem:[#allocation3 + $0x44] sm:$0xf] %vm3725_vm14, %v3664_v21  ;;  %v4223_v27 = vpop.permute.xlu0 %4222  ;;  %v908_v9 = vsel %vm13468_vm6, %v900_v13, %v907_v16  ;;  %v3592_v21 = vld [vmem:[#allocation2 + $0xf8] sm:$0xf]  ;;  %v4140_v16 = vrot.slane %v4138_v0, 5 }
 0x1de   : > { %2960 = vrot.lane.b32.xlu1 %v2857_v6, %s13203_s29  ;;  %4303 = vst.msk [vmem:[#allocation3 + $0x40] sm:$0xf] %vm4286_vm15, %v4223_v27  ;;  %v14633_v6 = vrot.slane %v4128_v58, 5  ;;  %v1615_v30 = vrot.slane %v1613_v63, 4 }
 0x1df   : > { %3488 = vrot.lane.b32.xlu0 %v3382_v26, %s13204_s30  ;;  %992 = vst.msk [vmem:[#allocation3 + $0x74] sm:$0xf] %vm390_vm0, %v908_v9  ;;  %v924_v26 = vshrl.u32 %v575_v23, 16  ;;  %v2114_v9 = vshrl.u32 %v14662_v57, 16  ;;  %v1583_v23 = vrot.slane %v1582_v4, 4 }
 0x1e0   : > { %v3668_v35 = vpop.permute.xlu1 %3667  ;;  %v4135_v61 = vor.u32 %v4134_v24, %v14633_v6 }
 0x1e1   : > { %3745 = vst.msk [vmem:[#allocation3 + $0x4c] sm:$0xf] %vm3725_vm14, %v3668_v35  ;;  %v1100_v50 = vpop.permute.xlu0 %1099  ;;  %v917_v35 = vrot.slane %v915_v25, 7  ;;  %v926_v37 = vrot.slane %v924_v26, 7  ;;  %v1798_v26 = vld [vmem:[#allocation2 + $0x104] sm:$0xf] }
 0x1e2   : > { %3486 = vrot.lane.b32.xlu1 %v3369_v19, %s13204_s30  ;;  %1176 = vst.msk [vmem:[#allocation3 + $0x50] sm:$0xf] %vm1155_vm8, %v1100_v50  ;;  %v1231_v19 = vld [vmem:[#allocation2 + $0xe8] sm:$0xf]  ;;  %v4136_v15 = vrot.slane %v4135_v61, 4 }
 0x1e3   : > { %3677 = vrot.lane.b32.xlu0 %v3589_v42, %s13205_s12  ;;  %v1603_v42 = vshll.u32 %v1233_v38, 16  ;;  %v920_v50 = vor.u32 %v918_v36, %v917_v35  ;;  %v922_v53 = vrot.slane %v917_v35, 4  ;;  %v1585_v55 = vshll.u32 %v1231_v19, 16 }
 0x1e4   : > { %v4225_v5 = vpop.permute.xlu1 %4224  ;;  %v1589_v56 = vshrl.u32 %v1231_v19, 16  ;;  %v929_v60 = vor.u32 %v927_v43, %v926_v37  ;;  %v14680_v37 = vrot.slane %v2114_v9, 7  ;;  %v2136_v43 = vshrl.u32 %v1798_v26, 16 }
 0x1e5   : > { %4304 = vst.msk [vmem:[#allocation3 + $0x44] sm:$0xf] %vm4286_vm15, %v4225_v5  ;;  %v4227_v14 = vpop.permute.xlu0 %4226  ;;  %v1605_v58 = vrot.slane %v1603_v42, 5  ;;  %v1797_v42 = vld [vmem:[#allocation2 + $0x100] sm:$0x8] }
 0x1e6   : > { %3490 = vrot.lane.b32.xlu1 %v3391_v48, %s13204_s30  ;;  %4305 = vst.msk [vmem:[#allocation3 + $0x48] sm:$0xf] %vm4286_vm15, %v4227_v14  ;;  %v12009_v48 = vrot.slane %v910_v33, 11  ;;  %v930_v12 = vsel %vm13468_vm6, %v922_v53, %v929_v60  ;;  %v1587_v14 = vrot.slane %v1585_v55, 5  ;;  %v1591_v51 = vrot.slane %v1589_v56, 4 }
 0x1e7   : > { %3681 = vrot.lane.b32.xlu0 %v3591_v62, %s13205_s12  ;;  %v4131_v62 = vsel %vm13458_vm5, %v4126_v28, %v14633_v6  ;;  %994 = vst.msk [vmem:[#allocation3 + $0x7c] sm:$0xf] %vm390_vm0, %v930_v12  ;;  %v1606_v6 = vor.u32 %v1605_v58, %v1602_v10  ;;  %v1611_v28 = vrot.slane %v1609_v18, 5  ;;  %v1619_v53 = vshll.u32 %v1235_v29, 16  ;;  %v1026_v56 = vld [vmem:[#allocation2 + $0xf8] sm:$0xf] }
 0x1e8   : > { %v1102_v3 = vpop.permute.xlu1 %1101  ;;  %v921_v2 = vsel %vm13468_vm6, %v12009_v48, %v920_v50  ;;  %v1592_v38 = vor.u32 %v1591_v51, %v1587_v14  ;;  %v1588_v41 = vsel %vm13458_vm5, %v1583_v23, %v1587_v14  ;;  %v2139_v12 = vshll.u32 %v1798_v26, 16  ;;  %v2519_v23 = vld [vmem:[#allocation2 + $0x104] sm:$0xf] }
 0x1e9   : > { %1177 = vst.msk [vmem:[#allocation3 + $0x54] sm:$0xf] %vm1155_vm8, %v1102_v3  ;;  %v1104_v27 = vpop.permute.xlu0 %1103  ;;  %v14667_v3 = vpop.f32.mrf.mxu0  ;;  %v1607_v35 = vrot.slane %v1606_v6, 4  ;;  %v1616_v60 = vor.u32 %v1615_v30, %v1611_v28  ;;  %v2883_v30 = vshrl.u32 %v2519_v23, 16 }
 0x1ea   : > { %3679 = vrot.lane.b32.xlu1 %v3590_v17, %s13205_s12  ;;  %1178 = vst.msk [vmem:[#allocation3 + $0x58] sm:$0xf] %vm1155_vm8, %v1104_v27  ;;  %v1232_v17 = vld [vmem:[#allocation2 + $0xec] sm:$0x1]  ;;  %v4141_v27 = vsel %vm13458_vm5, %v4136_v15, %v4140_v16  ;;  %v1593_v48 = vrot.slane %v1592_v38, 4  ;;  %v2126_v15 = vshll.u32 %v1796_v32, 16 }
 0x1eb   : > { %4238 = vrot.lane.b32.xlu0 %v4107_v20, %s13206_s13  ;;  %993 = vst.msk [vmem:[#allocation3 + $0x78] sm:$0xf] %vm390_vm0, %v921_v2  ;;  %v1595_v25 = vshll.u32 %v1232_v17, 16  ;;  %v1612_v61 = vsel %vm13458_vm5, %v1607_v35, %v1611_v28  ;;  %v1617_v51 = vrot.slane %v1616_v60, 4  ;;  %v2145_v16 = vshrl.u32 %v1799_v7, 16 }
 0x1ec   : > { %v4229_v39 = vpop.permute.xlu1 %4228  ;;  %v12991_v40 = vld [vmem:[#allocation3 + $0x40] sm:$0xff]   ;;  %v2148_v38 = vshll.u32 %v1799_v7, 16  ;;  %v2518_v60 = vld [vmem:[#allocation2 + $0xfc] sm:$0x1]  ;;  %vm4849_vm0 = vcmask 257024  }
 0x1ed   : > { %4306 = vst.msk [vmem:[#allocation3 + $0x4c] sm:$0xf] %vm4286_vm15, %v4229_v39  ;;  %12843 = vmatprep.mubr.msk.bf16.mxu0 %vm4474_vm1, %v12991_v40  ;;  %v1664_v54 = vpop.permute.xlu0 %1663  ;;  %v2117_v39 = vshll.u32 %v14662_v57, 16  ;;  %v1597_v50 = vrot.slane %v1595_v25, 5  ;;  %v2517_v25 = vld [vmem:[#allocation2 + $0xf8] sm:$0xf] }
 0x1ee   : > { %3683 = vrot.lane.b32.xlu1 %v3592_v21, %s13205_s12  ;;  %1740 = vst.msk [vmem:[#allocation3 + $0x50] sm:$0xf] %vm1719_vm9, %v1664_v54  ;;  %v1794_v21 = vld [vmem:[#allocation2 + $0xf0] sm:$0x8]  ;;  %v2123_v54 = vshrl.u32 %v1796_v32, 16  ;;  %v2886_v32 = vshll.u32 %v2519_v23, 16 }
 0x1ef   : > { %1115 = vrot.lane.b32.xlu0 %v1023_v44, %s13199_s25  ;;  %v2109_v36 = vshrl.u32 %v1794_v21, 16  ;;  %v2119_v2 = vor.u32 %v2117_v39, %v14680_v37  ;;  %v1598_v4 = vsel %vm13458_vm5, %v1593_v48, %v1597_v50  ;;  %v2868_v35 = vshll.u32 %v2517_v25, 16  ;;  %4854 = vst.msk [vmem:[#allocation4 + $0x10] sm:$0xf] %vm4849_vm0, %v18051_v1  ;;  %4850 = vst.msk [vmem:[#allocation4] sm:$0xf] %vm4849_vm0, %v18051_v1 }
 0x1f0   : > { %v1106_v5 = vpop.permute.xlu1 %1105  ;;  %v2888_v48 = vrot.slane %v2886_v32, 5  ;;  %4851 = vst.msk [vmem:[#allocation4 + $0x4] sm:$0xf] %vm4849_vm0, %v18051_v1  ;;  %4852 = vst.msk [vmem:[#allocation4 + $0x8] sm:$0xf] %vm4849_vm0, %v18051_v1 }
 0x1f1   : > { %1179 = vst.msk [vmem:[#allocation3 + $0x5c] sm:$0xf] %vm1155_vm8, %v1106_v5  ;;  %v1668_v13 = vpop.permute.xlu0 %1667  ;;  %v12024_v0 = vrot.slane %v2109_v36, 11  ;;  %v2131_v5 = vshrl.u32 %v1797_v42, 16  ;;  %v2872_v36 = vshrl.u32 %v2517_v25, 16 }
 0x1f2   : > { %4240 = vrot.lane.b32.xlu1 %v4117_v59, %s13206_s13  ;;  %1742 = vst.msk [vmem:[#allocation3 + $0x58] sm:$0xf] %vm1719_vm9, %v1668_v13  ;;  %v2125_v13 = vrot.slane %v2123_v54, 7 }
 0x1f3   : > { %4242 = vrot.lane.b32.xlu0 %v4131_v62, %s13206_s13  ;;  %v2516_v62 = vld [vmem:[#allocation2 + $0xf4] sm:$0xf]  ;;  %v2874_v54 = vrot.slane %v2872_v36, 4  ;;  %4853 = vst.msk [vmem:[#allocation4 + $0xc] sm:$0xf] %vm4849_vm0, %v18051_v1 }
 0x1f4   : > { %v1666_v20 = vpop.permute.xlu1 %1665  ;;  %v12992_v8 = vld [vmem:[#allocation3 + $0x48] sm:$0xff]   ;;  %v2859_v18 = vshrl.u32 %v2516_v62, 16  ;;  %v2862_v63 = vshll.u32 %v2516_v62, 16  ;;  %v2878_v62 = vshll.u32 %v2518_v60, 16  ;;  %4855 = vst.msk [vmem:[#allocation4 + $0x14] sm:$0xf] %vm4849_vm0, %v18051_v1 }
 0x1f5   : > { %1741 = vst.msk [vmem:[#allocation3 + $0x54] sm:$0xf] %vm1719_vm9, %v1666_v20  ;;  %v12833_v24 = vpop.f32.mrf.mxu0  ;;  %12844 = vmatmul.mubr.msk.bf16.gmra.mxu0 %vm4474_vm1, %v12992_v8  ;;  %v2193_v11 = vpop.permute.xlu0 %2192  ;;  %v2120_v20 = vsel %vm13468_vm6, %v12024_v0, %v2119_v2  ;;  %v12025_v8 = vrot.slane %v2131_v5, 11  ;;  %v2311_v5 = vld [vmem:[#allocation2 + $0x104] sm:$0xf] }
 0x1f6   : > { %1117 = vrot.lane.b32.xlu1 %v1024_v46, %s13199_s25  ;;  %2269 = vst.msk [vmem:[#allocation3 + $0x50] sm:$0xf] %vm2248_vm10, %v2193_v11  ;;  %v4586_v40 = vadd.f32 %v12833_v24, %v14518_v47  ;;  %v1621_v46 = vrot.slane %v1619_v53, 5  ;;  %v2128_v24 = vor.u32 %v2126_v15, %v2125_v13  ;;  %v2147_v11 = vrot.slane %v2145_v16, 7  ;;  %v2521_v16 = vld [vmem:[#allocation2 + $0x10c] sm:$0x1] }
 0x1f7   : > { %v14677_v33 = vpop.f32.mrf.mxu0  ;;  %1119 = vrot.lane.b32.xlu0 %v1025_v22, %s13199_s25  ;;  %v2121_v22 = vrot.slane %v14680_v37, 4  ;;  %v2864_v28 = vrot.slane %v2862_v63, 5  ;;  %v2870_v53 = vrot.slane %v2868_v35, 5  ;;  %4856 = vst.msk [vmem:[#allocation4 + $0x18] sm:$0xf] %vm4849_vm0, %v18051_v1 }
 0x1f8   : > { %v1670_v19 = vpop.permute.xlu1 %1669  ;;  %v4694_v10 = vmax.f32 %v4586_v40, 0.0  ;;  %v1622_v21 = vsel %vm13458_vm5, %v1617_v51, %v1621_v46  ;;  %v2150_v40 = vor.u32 %v2148_v38, %v2147_v11  ;;  %v2902_v38 = vshll.u32 %v2521_v16, 16  ;;  %4857 = vst.msk [vmem:[#allocation4 + $0x1c] sm:$0xf] %vm4849_vm0, %v18051_v1  ;;  %4858 = vst.msk [vmem:[#allocation4 + $0x20] sm:$0xf] %vm4849_vm0, %v18051_v1 }
 0x1f9   : > { %1743 = vst.msk [vmem:[#allocation3 + $0x5c] sm:$0xf] %vm1719_vm9, %v1670_v19  ;;  %v12834_v44 = vpop.f32.mrf.mxu0  ;;  %v2197_v45 = vpop.permute.xlu0 %2196  ;;  %v2129_v37 = vsel %vm13468_vm6, %v2121_v22, %v2128_v24  ;;  %v2312_v24 = vld [vmem:[#allocation2 + $0x108] sm:$0xf] }
 0x1fa   : > { %4244 = vrot.lane.b32.xlu1 %v4141_v27, %s13206_s13  ;;  %v4589_v55 = vadd.f32 %v12834_v44, %v14518_v47  ;;  %2271 = vst.msk [vmem:[#allocation3 + $0x58] sm:$0xf] %vm2248_vm10, %v2197_v45  ;;  %v2138_v47 = vrot.slane %v2136_v43, 7  ;;  %v2861_v27 = vrot.slane %v2859_v18, 4  ;;  %v2520_v43 = vld [vmem:[#allocation2 + $0x108] sm:$0xf] }
 0x1fb   : > { %1679 = vrot.lane.b32.xlu0 %v1588_v41, %s13201_s27  ;;  %v2309_v44 = vld [vmem:[#allocation2 + $0xf4] sm:$0xf]  ;;  %v2885_v45 = vrot.slane %v2883_v30, 4  ;;  %4859 = vst.msk [vmem:[#allocation4 + $0x24] sm:$0xf] %vm4849_vm0, %v18051_v1 }
 0x1fc   : > { %v2195_v59 = vpop.permute.xlu1 %2194  ;;  %v4695_v58 = vmax.f32 %v4589_v55, 0.0  ;;  %v2141_v6 = vor.u32 %v2139_v12, %v2138_v47  ;;  %v2143_v39 = vrot.slane %v2138_v47, 4  ;;  %v2865_v42 = vor.u32 %v2864_v28, %v2861_v27  ;;  %v3079_v55 = vld [vmem:[#allocation2 + $0x104] sm:$0xf]  ;;  %4860 = vst.msk [vmem:[#allocation4 + $0x28] sm:$0xf] %vm4849_vm0, %v18051_v1 }
 0x1fd   : > { %2270 = vst.msk [vmem:[#allocation3 + $0x54] sm:$0xf] %vm2248_vm10, %v2195_v59  ;;  %v2386_v57 = vpop.permute.xlu0 %2385  ;;  %v2892_v59 = vshll.u32 %v2520_v43, 16  ;;  %v2889_v7 = vor.u32 %v2888_v48, %v2885_v45  ;;  %v2875_v12 = vor.u32 %v2874_v54, %v2870_v53 }
 0x1fe   : > { %1121 = vrot.lane.b32.xlu1 %v1026_v56, %s13199_s25  ;;  %v14698_v14 = vpack.c.bf16 %v4695_v58, %v4694_v10  ;;  %2462 = vst.msk [vmem:[#allocation3 + $0x50] sm:$0xf] %vm2441_vm11, %v2386_v57  ;;  %v2142_v29 = vsel %vm13468_vm6, %v12025_v8, %v2141_v6  ;;  %v2151_v56 = vsel %vm13468_vm6, %v2143_v39, %v2150_v40  ;;  %v2866_v2 = vrot.slane %v2865_v42, 4  ;;  %v3082_v58 = vld [vmem:[#allocation2 + $0x114] sm:$0xf] }
 0x1ff   : > { %1683 = vrot.lane.b32.xlu0 %v1612_v61, %s13201_s27  ;;  %v2896_v61 = vshrl.u32 %v2520_v43, 16  ;;  %v3398_v10 = vshrl.u32 %v3079_v55, 16  ;;  %v2310_v57 = vld [vmem:[#allocation2 + $0xf8] sm:$0xf]  ;;  %v2894_v46 = vrot.slane %v2892_v59, 5  ;;  %v3420_v18 = vshrl.u32 %v3082_v58, 16 }
 0x200   : > { %v2199_v17 = vpop.permute.xlu1 %2198  ;;  %v2871_v15 = vsel %vm13458_vm5, %v2866_v2, %v2870_v53  ;;  %v2890_v63 = vrot.slane %v2889_v7, 4  ;;  %v3401_v6 = vshll.u32 %v3079_v55, 16  ;;  %v2876_v23 = vrot.slane %v2875_v12, 4  ;;  %v3800_v40 = vld [vmem:[#allocation2 + $0x104] sm:$0xf] }
 0x201   : > { %2272 = vst.msk [vmem:[#allocation3 + $0x5c] sm:$0xf] %vm2248_vm10, %v2199_v17  ;;  %v2390_v9 = vpop.permute.xlu0 %2389  ;;  %v2898_v13 = vrot.slane %v2896_v61, 4  ;;  %v3080_v17 = vld [vmem:[#allocation2 + $0x108] sm:$0xf]  ;;  %v14732_v8 = vrot.slane %v3398_v10, 7 }
 0x202   : > { %1681 = vrot.lane.b32.xlu1 %v1598_v4, %s13201_s27  ;;  %2464 = vst.msk [vmem:[#allocation3 + $0x58] sm:$0xf] %vm2441_vm11, %v2390_v9  ;;  %v3078_v4 = vld [vmem:[#allocation2 + $0x100] sm:$0x8]  ;;  %v3081_v9 = vld [vmem:[#allocation2 + $0x110] sm:$0x8]  ;;  %v2895_v32 = vsel %vm13458_vm5, %v2890_v63, %v2894_v46 }
 0x203   : > { %2208 = vrot.lane.b32.xlu0 %v2120_v20, %s13202_s28  ;;  %v3393_v20 = vshrl.u32 %v3078_v4, 16  ;;  %v2899_v11 = vor.u32 %v2898_v13, %v2894_v46  ;;  %v3407_v25 = vshrl.u32 %v3080_v17, 16  ;;  %v3415_v28 = vshrl.u32 %v3081_v9, 16  ;;  %v3803_v61 = vld [vmem:[#allocation2 + $0x114] sm:$0xf] }
 0x204   : > { %v2388_v26 = vpop.permute.xlu1 %2387  ;;  %v3423_v30 = vshll.u32 %v3082_v58, 16  ;;  %v3403_v35 = vor.u32 %v3401_v6, %v14732_v8  ;;  %v2904_v42 = vrot.slane %v2902_v38, 5  ;;  %v4143_v54 = vshrl.u32 %v3800_v40, 16  ;;  %v3801_v58 = vld [vmem:[#allocation2 + $0x108] sm:$0xf] }
 0x205   : > { %2463 = vst.msk [vmem:[#allocation3 + $0x54] sm:$0xf] %vm2441_vm11, %v2388_v26  ;;  %v2947_v19 = vpop.permute.xlu0 %2946  ;;  %v3083_v26 = vld [vmem:[#allocation2 + $0x118] sm:$0xf]  ;;  %v3409_v43 = vrot.slane %v3407_v25, 7  ;;  %v12041_v48 = vrot.slane %v3415_v28, 11 }
 0x206   : > { %1685 = vrot.lane.b32.xlu1 %v1622_v21, %s13201_s27  ;;  %3023 = vst.msk [vmem:[#allocation3 + $0x50] sm:$0xf] %vm3002_vm12, %v2947_v19  ;;  %v2880_v21 = vrot.slane %v2878_v62, 5  ;;  %v12040_v19 = vrot.slane %v3393_v20, 11  ;;  %v3429_v39 = vshrl.u32 %v3083_v26, 16  ;;  %v4146_v55 = vshll.u32 %v3800_v40, 16  ;;  %s17939_s27 = scalar_lea.vmem %s18050_s11, %s12405_s14 }
 0x207   : > { %2212 = vrot.lane.b32.xlu0 %v2142_v29, %s13202_s28  ;;  %v3422_v29 = vrot.slane %v3420_v18, 7  ;;  %v3432_v59 = vshll.u32 %v3083_v26, 16  ;;  %v3405_v2 = vrot.slane %v14732_v8, 4  ;;  %v4167_v62 = vshrl.u32 %v3803_v61, 16  ;;  %v3804_v18 = vld [vmem:[#allocation2 + $0x118] sm:$0xf] }
 0x208   : > { %v2392_v41 = vpop.permute.xlu1 %2391  ;;  %v2881_v36 = vsel %vm13458_vm5, %v2876_v23, %v2880_v21  ;;  %v3404_v53 = vsel %vm13468_vm6, %v12040_v19, %v3403_v35  ;;  %v3431_v60 = vrot.slane %v3429_v39, 7  ;;  %v4148_v12 = vrot.slane %v4146_v55, 5  ;;  %v3593_v63 = vld [vmem:[#allocation2 + $0x104] sm:$0xf]  ;;  %v3802_v25 = vld [vmem:[#allocation2 + $0x10c] sm:$0x1] }
 0x209   : > { %2465 = vst.msk [vmem:[#allocation3 + $0x5c] sm:$0xf] %vm2441_vm11, %v2392_v41  ;;  %v2951_v50 = vpop.permute.xlu0 %2950  ;;  %v2900_v41 = vrot.slane %v2899_v11, 4  ;;  %v4170_v4 = vshll.u32 %v3803_v61, 16  ;;  %v3427_v46 = vrot.slane %v3422_v29, 4  ;;  %v4156_v16 = vshrl.u32 %v3801_v58, 16 }
 0x20a   : > { %2210 = vrot.lane.b32.xlu1 %v2129_v37, %s13202_s28  ;;  %3025 = vst.msk [vmem:[#allocation3 + $0x58] sm:$0xf] %vm3002_vm12, %v2951_v50  ;;  %v3425_v50 = vor.u32 %v3423_v30, %v3422_v29  ;;  %v3434_v13 = vor.u32 %v3432_v59, %v3431_v60  ;;  %v4169_v8 = vrot.slane %v4167_v62, 4  ;;  %v4180_v11 = vshrl.u32 %v3804_v18, 16  ;;  %v3595_v26 = vld [vmem:[#allocation2 + $0x114] sm:$0xf] }
 0x20b   : > { %2401 = vrot.lane.b32.xlu0 %v2309_v44, %s13200_s26  ;;  %v3410_v44 = vshll.u32 %v3080_v17, 16  ;;  %v4172_v6 = vrot.slane %v4170_v4, 5  ;;  %v4158_v21 = vrot.slane %v4156_v16, 4  ;;  %v3594_v30 = vld [vmem:[#allocation2 + $0x108] sm:$0xf]  ;;  %v4162_v19 = vshll.u32 %v3802_v25, 16 }
 0x20c   : > { %v2949_v0 = vpop.permute.xlu1 %2948  ;;  %v3426_v10 = vsel %vm13468_vm6, %v12041_v48, %v3425_v50  ;;  %v3435_v9 = vsel %vm13468_vm6, %v3427_v46, %v3434_v13  ;;  %v3805_v39 = vld [vmem:[#allocation2 + $0x11c] sm:$0x1]  ;;  %4861 = vst.msk [vmem:[#allocation4 + $0x2c] sm:$0xf] %vm4849_vm0, %v18051_v1  ;;  %4862 = vst.msk [vmem:[#allocation4 + $0x30] sm:$0xf] %vm4849_vm0, %v18051_v1 }
 0x20d   : > { %3024 = vst.msk [vmem:[#allocation3 + $0x54] sm:$0xf] %vm3002_vm12, %v2949_v0  ;;  %v3477_v47 = vpop.permute.xlu0 %3476  ;;  %v2905_v0 = vsel %vm13458_vm5, %v2900_v41, %v2904_v42  ;;  %v4173_v28 = vor.u32 %v4172_v6, %v4169_v8  ;;  %v4186_v50 = vshll.u32 %v3805_v39, 16 }
 0x20e   : > { %2214 = vrot.lane.b32.xlu1 %v2151_v56, %s13202_s28  ;;  %3553 = vst.msk [vmem:[#allocation3 + $0x50] sm:$0xf] %vm3532_vm13, %v3477_v47  ;;  %v4145_v47 = vrot.slane %v4143_v54, 4 }
 0x20f   : > { %2405 = vrot.lane.b32.xlu0 %v2311_v5, %s13200_s26  ;;  %v3412_v5 = vor.u32 %v3410_v44, %v3409_v43  ;;  %v4174_v41 = vrot.slane %v4173_v28, 4  ;;  %v3596_v43 = vld [vmem:[#allocation2 + $0x118] sm:$0xf]  ;;  %v4188_v61 = vrot.slane %v4186_v50, 5  ;;  %4863 = vst.msk [vmem:[#allocation4 + $0x34] sm:$0xf] %vm4849_vm0, %v18051_v1 }
 0x210   : > { %v2953_v51 = vpop.permute.xlu1 %2952  ;;  %v4149_v20 = vor.u32 %v4148_v12, %v4145_v47  ;;  %4864 = vst.msk [vmem:[#allocation4 + $0x38] sm:$0xf] %vm4849_vm0, %v18051_v1  ;;  %4865 = vst.msk [vmem:[#allocation4 + $0x3c] sm:$0xf] %vm4849_vm0, %v18051_v1 }
 0x211   : > { %3026 = vst.msk [vmem:[#allocation3 + $0x5c] sm:$0xf] %vm3002_vm12, %v2953_v51  ;;  %v3481_v22 = vpop.permute.xlu0 %3480  ;;  %v3413_v51 = vsel %vm13468_vm6, %v3405_v2, %v3412_v5 }
 0x212   : > { %2403 = vrot.lane.b32.xlu1 %v2310_v57, %s13200_s26  ;;  %3555 = vst.msk [vmem:[#allocation3 + $0x58] sm:$0xf] %vm3532_vm13, %v3481_v22 }
 0x213   : > { %2962 = vrot.lane.b32.xlu0 %v2871_v15, %s13203_s29  ;;  %v4152_v15 = vshll.u32 %v3801_v58, 16  ;;  %4866 = vst.msk [vmem:[#allocation4 + $0x40] sm:$0xf] %vm4849_vm0, %v18051_v1  ;;  %4867 = vst.msk [vmem:[#allocation4 + $0x44] sm:$0xf] %vm4849_vm0, %v18051_v1 }
 0x214   : > { %v3479_v27 = vpop.permute.xlu1 %3478  ;;  %4868 = vst.msk [vmem:[#allocation4 + $0x48] sm:$0xf] %vm4849_vm0, %v18051_v1  ;;  %4869 = vst.msk [vmem:[#allocation4 + $0x4c] sm:$0xf] %vm4849_vm0, %v18051_v1 }
 0x215   : > { %3554 = vst.msk [vmem:[#allocation3 + $0x54] sm:$0xf] %vm3532_vm13, %v3479_v27  ;;  %v3670_v37 = vpop.permute.xlu0 %3669  ;;  %v4154_v23 = vrot.slane %v4152_v15, 5  ;;  %v4150_v27 = vrot.slane %v4149_v20, 4 }
 0x216   : > { %2407 = vrot.lane.b32.xlu1 %v2312_v24, %s13200_s26  ;;  %3746 = vst.msk [vmem:[#allocation3 + $0x50] sm:$0xf] %vm3725_vm14, %v3670_v37  ;;  %v4176_v24 = vshll.u32 %v3804_v18, 16 }
 0x217   : > { %2966 = vrot.lane.b32.xlu0 %v2895_v32, %s13203_s29  ;;  %v4159_v32 = vor.u32 %v4158_v21, %v4154_v23  ;;  %v4155_v40 = vsel %vm13458_vm5, %v4150_v27, %v4154_v23  ;;  %4870 = vst.msk [vmem:[#allocation4 + $0x50] sm:$0xf] %vm4849_vm0, %v18051_v1  ;;  %4871 = vst.msk [vmem:[#allocation4 + $0x54] sm:$0xf] %vm4849_vm0, %v18051_v1 }
 0x218   : > { %v3483_v45 = vpop.permute.xlu1 %3482  ;;  %v4178_v35 = vrot.slane %v4176_v24, 5  ;;  %4872 = vst.msk [vmem:[#allocation4 + $0x58] sm:$0xf] %vm4849_vm0, %v18051_v1  ;;  %4873 = vst.msk [vmem:[#allocation4 + $0x5c] sm:$0xf] %vm4849_vm0, %v18051_v1 }
 0x219   : > { %3556 = vst.msk [vmem:[#allocation3 + $0x5c] sm:$0xf] %vm3532_vm13, %v3483_v45  ;;  %v3674_v56 = vpop.permute.xlu0 %3673  ;;  %v4160_v44 = vrot.slane %v4159_v32, 4  ;;  %v4164_v45 = vrot.slane %v4162_v19, 5 }
 0x21a   : > { %2964 = vrot.lane.b32.xlu1 %v2881_v36, %s13203_s29  ;;  %3748 = vst.msk [vmem:[#allocation3 + $0x58] sm:$0xf] %vm3725_vm14, %v3674_v56  ;;  %v4182_v36 = vrot.slane %v4180_v11, 4  ;;  %v4179_v55 = vsel %vm13458_vm5, %v4174_v41, %v4178_v35 }
 0x21b   : > { %3492 = vrot.lane.b32.xlu0 %v3404_v53, %s13204_s30  ;;  %v4165_v60 = vsel %vm13458_vm5, %v4160_v44, %v4164_v45  ;;  %4874 = vst.msk [vmem:[#allocation4 + $0x60] sm:$0xf] %vm4849_vm0, %v18051_v1  ;;  %4875 = vst.msk [vmem:[#allocation4 + $0x64] sm:$0xf] %vm4849_vm0, %v18051_v1 }
 0x21c   : > { %v3672_v7 = vpop.permute.xlu1 %3671  ;;  %v4183_v48 = vor.u32 %v4182_v36, %v4178_v35  ;;  %4876 = vst.msk [vmem:[#allocation4 + $0x68] sm:$0xf] %vm4849_vm0, %v18051_v1  ;;  %4877 = vst.msk [vmem:[#allocation4 + $0x6c] sm:$0xf] %vm4849_vm0, %v18051_v1 }
 0x21d   : > { %3747 = vst.msk [vmem:[#allocation3 + $0x54] sm:$0xf] %vm3725_vm14, %v3672_v7  ;;  %v4231_v57 = vpop.permute.xlu0 %4230 }
 0x21e   : > { %2968 = vrot.lane.b32.xlu1 %v2905_v0, %s13203_s29  ;;  %4307 = vst.msk [vmem:[#allocation3 + $0x50] sm:$0xf] %vm4286_vm15, %v4231_v57  ;;  %v4184_v59 = vrot.slane %v4183_v48, 4 }
 0x21f   : > { %3496 = vrot.lane.b32.xlu0 %v3426_v10, %s13204_s30  ;;  %4878 = vst.msk [vmem:[#allocation4 + $0x70] sm:$0xf] %vm4849_vm0, %v18051_v1  ;;  %4879 = vst.msk [vmem:[#allocation4 + $0x74] sm:$0xf] %vm4849_vm0, %v18051_v1 }
 0x220   : > { %v3676_v17 = vpop.permute.xlu1 %3675  ;;  %v4189_v5 = vsel %vm13458_vm5, %v4184_v59, %v4188_v61 }
 0x221   : > { %3749 = vst.msk [vmem:[#allocation3 + $0x5c] sm:$0xf] %vm3725_vm14, %v3676_v17  ;;  %v1108_v22 = vpop.permute.xlu0 %1107 }
 0x222   : > { %3494 = vrot.lane.b32.xlu1 %v3413_v51, %s13204_s30  ;;  %1180 = vst.msk [vmem:[#allocation3 + $0x60] sm:$0xf] %vm1155_vm8, %v1108_v22 }
 0x223   : > { %3685 = vrot.lane.b32.xlu0 %v3593_v63, %s13205_s12 }
 0x224   : > { %v4233_v38 = vpop.permute.xlu1 %4232 }
 0x225   : > { %4308 = vst.msk [vmem:[#allocation3 + $0x54] sm:$0xf] %vm4286_vm15, %v4233_v38  ;;  %v4235_v29 = vpop.permute.xlu0 %4234 }
 0x226   : > { %3498 = vrot.lane.b32.xlu1 %v3435_v9, %s13204_s30  ;;  %4309 = vst.msk [vmem:[#allocation3 + $0x58] sm:$0xf] %vm4286_vm15, %v4235_v29 }
 0x227   : > { %3689 = vrot.lane.b32.xlu0 %v3595_v26, %s13205_s12 }
 0x228   : > { %v1110_v37 = vpop.permute.xlu1 %1109 }
 0x229   : > { %1181 = vst.msk [vmem:[#allocation3 + $0x64] sm:$0xf] %vm1155_vm8, %v1110_v37  ;;  %v1112_v42 = vpop.permute.xlu0 %1111 }
 0x22a   : > { %3687 = vrot.lane.b32.xlu1 %v3594_v30, %s13205_s12  ;;  %1182 = vst.msk [vmem:[#allocation3 + $0x68] sm:$0xf] %vm1155_vm8, %v1112_v42 }
 0x22b   : > { %4246 = vrot.lane.b32.xlu0 %v4155_v40, %s13206_s13 }
 0x22c   : > { %v4237_v53 = vpop.permute.xlu1 %4236  ;;  %v12993_v54 = vld [vmem:[#allocation3 + $0x50] sm:$0xff]  }
 0x22d   : > { %4310 = vst.msk [vmem:[#allocation3 + $0x5c] sm:$0xf] %vm4286_vm15, %v4237_v53  ;;  %12847 = vmatprep.mubr.msk.bf16.mxu0 %vm4474_vm1, %v12993_v54  ;;  %v1672_v56 = vpop.permute.xlu0 %1671 }
 0x22e   : > { %3691 = vrot.lane.b32.xlu1 %v3596_v43, %s13205_s12  ;;  %1744 = vst.msk [vmem:[#allocation3 + $0x60] sm:$0xf] %vm1719_vm9, %v1672_v56 }
 0x22f   : > { %4250 = vrot.lane.b32.xlu0 %v4179_v55, %s13206_s13 }
 0x230   : > { %v1114_v0 = vpop.permute.xlu1 %1113 }
 0x231   : > { %1183 = vst.msk [vmem:[#allocation3 + $0x6c] sm:$0xf] %vm1155_vm8, %v1114_v0  ;;  %v1676_v2 = vpop.permute.xlu0 %1675 }
 0x232   : > { %4248 = vrot.lane.b32.xlu1 %v4165_v60, %s13206_s13  ;;  %1746 = vst.msk [vmem:[#allocation3 + $0x68] sm:$0xf] %vm1719_vm9, %v1676_v2 }
 0x234   : > { %v1674_v7 = vpop.permute.xlu1 %1673  ;;  %v12994_v10 = vld [vmem:[#allocation3 + $0x58] sm:$0xff]  }
 0x235   : > { %1745 = vst.msk [vmem:[#allocation3 + $0x64] sm:$0xf] %vm1719_vm9, %v1674_v7  ;;  %12848 = vmatmul.mubr.msk.bf16.gmra.mxu0 %vm4474_vm1, %v12994_v10  ;;  %v2201_v58 = vpop.permute.xlu0 %2200 }
 0x236   : > { %4252 = vrot.lane.b32.xlu1 %v4189_v5, %s13206_s13  ;;  %2273 = vst.msk [vmem:[#allocation3 + $0x60] sm:$0xf] %vm2248_vm10, %v2201_v58 }
 0x238   : > { %v1678_v47 = vpop.permute.xlu1 %1677 }
 0x239   : > { %1747 = vst.msk [vmem:[#allocation3 + $0x6c] sm:$0xf] %vm1719_vm9, %v1678_v47  ;;  %v2205_v12 = vpop.permute.xlu0 %2204 }
 0x23a   : > { %2275 = vst.msk [vmem:[#allocation3 + $0x68] sm:$0xf] %vm2248_vm10, %v2205_v12 }
 0x23c   : > { %v2203_v62 = vpop.permute.xlu1 %2202 }
 0x23d   : > { %2274 = vst.msk [vmem:[#allocation3 + $0x64] sm:$0xf] %vm2248_vm10, %v2203_v62  ;;  %v2394_v4 = vpop.permute.xlu0 %2393 }
 0x23e   : > { %2466 = vst.msk [vmem:[#allocation3 + $0x60] sm:$0xf] %vm2441_vm11, %v2394_v4 }
 0x240   : > { %v2207_v57 = vpop.permute.xlu1 %2206 }
 0x241   : > { %2276 = vst.msk [vmem:[#allocation3 + $0x6c] sm:$0xf] %vm2248_vm10, %v2207_v57  ;;  %v2398_v46 = vpop.permute.xlu0 %2397  ;;  %v13001_v57 = vld [vmem:[%s18048_s9 + $0x4] ss:$8 sps:$4 sm:$0xff]  }
 0x242   : > { %2468 = vst.msk [vmem:[#allocation3 + $0x68] sm:$0xf] %vm2441_vm11, %v2398_v46  ;;  %4816 = vmatprep.mubr.bf16.mxu1 %v13001_v57  ;;  %v14860_v46 = vpop.f32.mrf.mxu0 }
 0x244   : > { %v2396_v13 = vpop.permute.xlu1 %2395 }
 0x245   : > { %2467 = vst.msk [vmem:[#allocation3 + $0x64] sm:$0xf] %vm2441_vm11, %v2396_v13  ;;  %v2955_v51 = vpop.permute.xlu0 %2954  ;;  %v12837_v13 = vpop.f32.mrf.mxu0 }
 0x246   : > { %3027 = vst.msk [vmem:[#allocation3 + $0x60] sm:$0xf] %vm3002_vm12, %v2955_v51 }
 0x247   : > { %v4593_v51 = vpop.f32.mrf.mxu0 }
 0x248   : > { %v2400_v15 = vpop.permute.xlu1 %2399 }
 0x249   : > { %2469 = vst.msk [vmem:[#allocation3 + $0x6c] sm:$0xf] %vm2441_vm11, %v2400_v15  ;;  %v2959_v16 = vpop.permute.xlu0 %2958  ;;  %v12838_v15 = vpop.f32.mrf.mxu0 }
 0x24a   : > { %3029 = vst.msk [vmem:[#allocation3 + $0x68] sm:$0xf] %vm3002_vm12, %v2959_v16 }
 0x24b   : > { %v4596_v16 = vpop.f32.mrf.mxu0 }
 0x24c   : > { %v2957_v17 = vpop.permute.xlu1 %2956 }
 0x24d   : > { %3028 = vst.msk [vmem:[#allocation3 + $0x64] sm:$0xf] %vm3002_vm12, %v2957_v17  ;;  %v3485_v18 = vpop.permute.xlu0 %3484 }
 0x24e   : > { %3557 = vst.msk [vmem:[#allocation3 + $0x60] sm:$0xf] %vm3532_vm13, %v3485_v18 }
 0x250   : > { %v2961_v63 = vpop.permute.xlu1 %2960 }
 0x251   : > { %3030 = vst.msk [vmem:[#allocation3 + $0x6c] sm:$0xf] %vm3002_vm12, %v2961_v63  ;;  %v3489_v20 = vpop.permute.xlu0 %3488 }
 0x252   : > { %3559 = vst.msk [vmem:[#allocation3 + $0x68] sm:$0xf] %vm3532_vm13, %v3489_v20 }
 0x254   : > { %v3487_v8 = vpop.permute.xlu1 %3486 }
 0x255   : > { %3558 = vst.msk [vmem:[#allocation3 + $0x64] sm:$0xf] %vm3532_vm13, %v3487_v8  ;;  %v3678_v6 = vpop.permute.xlu0 %3677 }
 0x256   : > { %3750 = vst.msk [vmem:[#allocation3 + $0x60] sm:$0xf] %vm3725_vm14, %v3678_v6 }
 0x258   : > { %v3491_v9 = vpop.permute.xlu1 %3490 }
 0x259   : > { %3560 = vst.msk [vmem:[#allocation3 + $0x6c] sm:$0xf] %vm3532_vm13, %v3491_v9  ;;  %v3682_v22 = vpop.permute.xlu0 %3681 }
 0x25a   : > { %3752 = vst.msk [vmem:[#allocation3 + $0x68] sm:$0xf] %vm3725_vm14, %v3682_v22 }
 0x25c   : > { %v3680_v23 = vpop.permute.xlu1 %3679 }
 0x25d   : > { %3751 = vst.msk [vmem:[#allocation3 + $0x64] sm:$0xf] %vm3725_vm14, %v3680_v23  ;;  %v4239_v21 = vpop.permute.xlu0 %4238 }
 0x25e   : > { %4311 = vst.msk [vmem:[#allocation3 + $0x60] sm:$0xf] %vm4286_vm15, %v4239_v21 }
 0x260   : > { %v3684_v24 = vpop.permute.xlu1 %3683 }
 0x261   : > { %3753 = vst.msk [vmem:[#allocation3 + $0x6c] sm:$0xf] %vm3725_vm14, %v3684_v24  ;;  %v1116_v11 = vpop.permute.xlu0 %1115 }
 0x262   : > { %1184 = vst.msk [vmem:[#allocation3 + $0x70] sm:$0xf] %vm1155_vm8, %v1116_v11 }
 0x264   : > { %v4241_v38 = vpop.permute.xlu1 %4240 }
 0x265   : > { %4312 = vst.msk [vmem:[#allocation3 + $0x64] sm:$0xf] %vm4286_vm15, %v4241_v38  ;;  %v4243_v25 = vpop.permute.xlu0 %4242 }
 0x266   : > { %4313 = vst.msk [vmem:[#allocation3 + $0x68] sm:$0xf] %vm4286_vm15, %v4243_v25 }
 0x268   : > { %v1118_v26 = vpop.permute.xlu1 %1117 }
 0x269   : > { %1185 = vst.msk [vmem:[#allocation3 + $0x74] sm:$0xf] %vm1155_vm8, %v1118_v26  ;;  %v1120_v27 = vpop.permute.xlu0 %1119 }
 0x26a   : > { %1186 = vst.msk [vmem:[#allocation3 + $0x78] sm:$0xf] %vm1155_vm8, %v1120_v27 }
 0x26c   : > { %v4245_v28 = vpop.permute.xlu1 %4244  ;;  %v12995_v29 = vld [vmem:[#allocation3 + $0x60] sm:$0xff]  }
 0x26d   : > { %4314 = vst.msk [vmem:[#allocation3 + $0x6c] sm:$0xf] %vm4286_vm15, %v4245_v28  ;;  %12851 = vmatprep.mubr.msk.bf16.mxu0 %vm4474_vm1, %v12995_v29  ;;  %v1680_v30 = vpop.permute.xlu0 %1679  ;;  %v14873_v29 = vld [vmem:[%s18041_s2] ss:$0 sm:$0xff] }
 0x26e   : > { %1748 = vst.msk [vmem:[#allocation3 + $0x70] sm:$0xf] %vm1719_vm9, %v1680_v30 }
 0x270   : > { %v1122_v32 = vpop.permute.xlu1 %1121 }
 0x271   : > { %1187 = vst.msk [vmem:[#allocation3 + $0x7c] sm:$0xf] %vm1155_vm8, %v1122_v32  ;;  %v1684_v19 = vpop.permute.xlu0 %1683  ;;  %vm6435_vm8 = vcmask 523264  }
 0x272   : > { %1750 = vst.msk [vmem:[#allocation3 + $0x78] sm:$0xf] %vm1719_vm9, %v1684_v19 }
 0x274   : > { %v1682_v35 = vpop.permute.xlu1 %1681  ;;  %v12996_v36 = vld [vmem:[#allocation3 + $0x68] sm:$0xff]  }
 0x275   : > { %1749 = vst.msk [vmem:[#allocation3 + $0x74] sm:$0xf] %vm1719_vm9, %v1682_v35  ;;  %12852 = vmatmul.mubr.msk.bf16.gmra.mxu0 %vm4474_vm1, %v12996_v36  ;;  %v2209_v37 = vpop.permute.xlu0 %2208  ;;  %v12841_v17 = vpop.f32.mrf.mxu0 }
 0x276   : > { %2277 = vst.msk [vmem:[#allocation3 + $0x70] sm:$0xf] %vm2248_vm10, %v2209_v37  ;;  %v4618_v35 = vadd.f32 %v14873_v29, %v12841_v17 }
 0x277   : > { %v4609_v18 = vpop.f32.mrf.mxu0 }
 0x278   : > { %v1686_v39 = vpop.permute.xlu1 %1685 }
 0x279   : > { %1751 = vst.msk [vmem:[#allocation3 + $0x7c] sm:$0xf] %vm1719_vm9, %v1686_v39  ;;  %v2213_v40 = vpop.permute.xlu0 %2212  ;;  %v12842_v63 = vpop.f32.mrf.mxu0  ;;  %vm6645_vm9 = vcmask 519168  }
 0x27a   : > { %2279 = vst.msk [vmem:[#allocation3 + $0x78] sm:$0xf] %vm2248_vm10, %v2213_v40  ;;  %v4621_v30 = vadd.f32 %v14873_v29, %v12842_v63 }
 0x27b   : > { %v4612_v20 = vpop.f32.mrf.mxu0 }
 0x27c   : > { %v2211_v41 = vpop.permute.xlu1 %2210  ;;  %v4703_v40 = vmax.f32 %v4621_v30, 0.0 }
 0x27d   : > { %2278 = vst.msk [vmem:[#allocation3 + $0x74] sm:$0xf] %vm2248_vm10, %v2211_v41  ;;  %v2402_v42 = vpop.permute.xlu0 %2401  ;;  %v4613_v41 = vadd.f32 %v14873_v29, %v4612_v20  ;;  %v4594_v20 = vadd.f32 %v14873_v29, %v4593_v51  ;;  %v4581_v51 = vadd.f32 %v14873_v29, %v14860_v46 }
 0x27e   : > { %2470 = vst.msk [vmem:[#allocation3 + $0x70] sm:$0xf] %vm2441_vm11, %v2402_v42 }
 0x280   : > { %v2215_v43 = vpop.permute.xlu1 %2214 }
 0x281   : > { %2280 = vst.msk [vmem:[#allocation3 + $0x7c] sm:$0xf] %vm2248_vm10, %v2215_v43  ;;  %v2406_v44 = vpop.permute.xlu0 %2405  ;;  %vm7503_vm10 = vcmask 1043968  }
 0x282   : > { %2472 = vst.msk [vmem:[#allocation3 + $0x78] sm:$0xf] %vm2441_vm11, %v2406_v44 }
 0x284   : > { %v2404_v45 = vpop.permute.xlu1 %2403 }
 0x285   : > { %2471 = vst.msk [vmem:[#allocation3 + $0x74] sm:$0xf] %vm2441_vm11, %v2404_v45  ;;  %v2963_v48 = vpop.permute.xlu0 %2962 }
 0x286   : > { %3031 = vst.msk [vmem:[#allocation3 + $0x70] sm:$0xf] %vm3002_vm12, %v2963_v48 }
 0x288   : > { %v2408_v50 = vpop.permute.xlu1 %2407 }
 0x289   : > { %2473 = vst.msk [vmem:[#allocation3 + $0x7c] sm:$0xf] %vm2441_vm11, %v2408_v50  ;;  %v2967_v53 = vpop.permute.xlu0 %2966  ;;  %v4702_v50 = vmax.f32 %v4618_v35, 0.0 }
 0x28a   : > { %3033 = vst.msk [vmem:[#allocation3 + $0x78] sm:$0xf] %vm3002_vm12, %v2967_v53  ;;  %v4610_v53 = vadd.f32 %v14873_v29, %v4609_v18 }
 0x28c   : > { %v2965_v54 = vpop.permute.xlu1 %2964 }
 0x28d   : > { %3032 = vst.msk [vmem:[#allocation3 + $0x74] sm:$0xf] %vm3002_vm12, %v2965_v54  ;;  %v3493_v55 = vpop.permute.xlu0 %3492 }
 0x28e   : > { %3561 = vst.msk [vmem:[#allocation3 + $0x70] sm:$0xf] %vm3532_vm13, %v3493_v55 }
 0x290   : > { %v2969_v56 = vpop.permute.xlu1 %2968 }
 0x291   : > { %3034 = vst.msk [vmem:[#allocation3 + $0x7c] sm:$0xf] %vm3002_vm12, %v2969_v56  ;;  %v3497_v60 = vpop.permute.xlu0 %3496 }
 0x292   : > { %3563 = vst.msk [vmem:[#allocation3 + $0x78] sm:$0xf] %vm3532_vm13, %v3497_v60 }
 0x294   : > { %v3495_v59 = vpop.permute.xlu1 %3494 }
 0x295   : > { %3562 = vst.msk [vmem:[#allocation3 + $0x74] sm:$0xf] %vm3532_vm13, %v3495_v59  ;;  %v3686_v61 = vpop.permute.xlu0 %3685  ;;  %v4605_v59 = vadd.f32 %v14873_v29, %v12838_v15 }
 0x296   : > { %3754 = vst.msk [vmem:[#allocation3 + $0x70] sm:$0xf] %vm3725_vm14, %v3686_v61  ;;  %v4701_v61 = vmax.f32 %v4613_v41, 0.0 }
 0x298   : > { %v3499_v0 = vpop.permute.xlu1 %3498 }
 0x299   : > { %3564 = vst.msk [vmem:[#allocation3 + $0x7c] sm:$0xf] %vm3532_vm13, %v3499_v0  ;;  %v3690_v2 = vpop.permute.xlu0 %3689  ;;  %v4735_v0 = vpack.c.bf16 %v4703_v40, %v4702_v50 }
 0x29a   : > { %3756 = vst.msk [vmem:[#allocation3 + $0x78] sm:$0xf] %vm3725_vm14, %v3690_v2 }
 0x29c   : > { %v3688_v5 = vpop.permute.xlu1 %3687 }
 0x29d   : > { %3755 = vst.msk [vmem:[#allocation3 + $0x74] sm:$0xf] %vm3725_vm14, %v3688_v5  ;;  %v4247_v7 = vpop.permute.xlu0 %4246 }
 0x29e   : > { %4315 = vst.msk [vmem:[#allocation3 + $0x70] sm:$0xf] %vm4286_vm15, %v4247_v7 }
 0x2a0   : > { %v3692_v10 = vpop.permute.xlu1 %3691 }
 0x2a1   : > { %3757 = vst.msk [vmem:[#allocation3 + $0x7c] sm:$0xf] %vm3725_vm14, %v3692_v10  ;;  %v4251_v58 = vpop.permute.xlu0 %4250  ;;  %v4602_v10 = vadd.f32 %v14873_v29, %v12837_v13 }
 0x2a2   : > { %4317 = vst.msk [vmem:[#allocation3 + $0x78] sm:$0xf] %vm4286_vm15, %v4251_v58  ;;  %v4700_v58 = vmax.f32 %v4610_v53, 0.0 }
 0x2a3   : > { %v4698_v63 = vmax.f32 %v4602_v10, 0.0 }
 0x2a4   : > { %v4249_v47 = vpop.permute.xlu1 %4248  ;;  %v4734_v57 = vpack.c.bf16 %v4701_v61, %v4700_v58  ;;  %v5611_v61 = vld [vmem:[#allocation4 + $0x6c] sm:$0x8] }
 0x2a5   : > { %4316 = vst.msk [vmem:[#allocation3 + $0x74] sm:$0xf] %vm4286_vm15, %v4249_v47 }
 0x2a8   : > { %v4253_v12 = vpop.permute.xlu1 %4252 }
 0x2a9   : > { %4318 = vst.msk [vmem:[#allocation3 + $0x7c] sm:$0xf] %vm4286_vm15, %v4253_v12 }
 0x2ac   : > { %v12997_v62 = vld [vmem:[#allocation3 + $0x70] sm:$0xff]  }
 0x2ad   : > { %12855 = vmatprep.mubr.msk.bf16.mxu0 %vm4474_vm1, %v12997_v62  ;;  %v4699_v62 = vmax.f32 %v4605_v59, 0.0 }
 0x2b0   : > { %v12998_v4 = vld [vmem:[#allocation3 + $0x78] sm:$0xff]  }
 0x2b1   : > { %12856 = vmatmul.mubr.msk.bf16.gmra.mxu0 %vm4474_vm1, %v12998_v4  ;;  %v4597_v4 = vadd.f32 %v14873_v29, %v4596_v16  ;;  %v4696_v16 = vmax.f32 %v4594_v20, 0.0 }
 0x2b5   : > { %v14862_v8 = vpop.f32.mrf.mxu0 }
 0x2b7   : > { %v14864_v6 = vpop.f32.mrf.mxu0 }
 0x2b9   : > { %v14866_v9 = vpop.f32.mrf.mxu0 }
 0x2bb   : > { %v14868_v22 = vpop.f32.mrf.mxu0 }
 0x2bc   : > { %v4629_v46 = vadd.f32 %v14873_v29, %v14868_v22 }
 0x2f5   : > { %v12849_v23 = vpop.f32.mrf.mxu0 }
 0x2f6   : > { %v4650_v13 = vadd.f32 %v14873_v29, %v12849_v23  ;;  %v4637_v23 = vadd.f32 %v14873_v29, %v14866_v9 }
 0x2f7   : > { %v4641_v21 = vpop.f32.mrf.mxu0 }
 0x2f8   : > { %v4707_v40 = vmax.f32 %v4637_v23, 0.0 }
 0x2f9   : > { %v12850_v24 = vpop.f32.mrf.mxu0 }
 0x2fa   : > { %v4653_v15 = vadd.f32 %v14873_v29, %v12850_v24  ;;  %v4642_v24 = vadd.f32 %v14873_v29, %v4641_v21  ;;  %v4693_v21 = vmax.f32 %v4581_v51, 0.0 }
 0x2fb   : > { %v4644_v11 = vpop.f32.mrf.mxu0 }
 0x335   : > { %v12853_v38 = vpop.f32.mrf.mxu0 }
 0x336   : > { %v4666_v54 = vadd.f32 %v14873_v29, %v12853_v38 }
 0x337   : > { %v4657_v25 = vpop.f32.mrf.mxu0 }
 0x338   : > { %v4714_v47 = vmax.f32 %v4666_v54, 0.0  ;;  %v4658_v12 = vadd.f32 %v14873_v29, %v4657_v25  ;;  %v4711_v25 = vmax.f32 %v4653_v15, 0.0  ;;  %v13002_v54 = vld [vmem:[%s18048_s9 + $0x14] ss:$8 sps:$4 sm:$0xff]   ;;  %v5057_v15 = vld [vmem:[#allocation4 + $0x4] sm:$0xf] }
 0x339   : > { %v12854_v26 = vpop.f32.mrf.mxu0  ;;  %5073 = vrot.lane.b32.xlu0 %v5057_v15, %s13200_s26 }
 0x33a   : > { %v4669_v43 = vadd.f32 %v14873_v29, %v12854_v26  ;;  %v4712_v38 = vmax.f32 %v4658_v12, 0.0  ;;  %v4733_v26 = vpack.c.bf16 %v4699_v62, %v4698_v63 }
 0x33b   : > { %v4660_v27 = vpop.f32.mrf.mxu0 }
 0x33c   : > { %v4715_v2 = vmax.f32 %v4669_v43, 0.0  ;;  %v4661_v5 = vadd.f32 %v14873_v29, %v4660_v27  ;;  %v4697_v27 = vmax.f32 %v4597_v4, 0.0  ;;  %v4626_v43 = vadd.f32 %v14873_v29, %v14864_v6  ;;  %v5107_v4 = vld [vmem:[#allocation4 + $0x8] sm:$0x1] }
 0x33e   : > { %v4741_v17 = vpack.c.bf16 %v4715_v2, %v4714_v47  ;;  %v4713_v18 = vmax.f32 %v4661_v5, 0.0  ;;  %v4704_v22 = vmax.f32 %v4626_v43, 0.0  ;;  %v5705_v2 = vshrl.u32 %v5611_v61, 16  ;;  %v5599_v61 = vld [vmem:[#allocation4 + $0x24] sm:$0x8] }
 0x340   : > { %v4740_v30 = vpack.c.bf16 %v4713_v18, %v4712_v38  ;;  %v12119_v47 = vrot.slane %v5705_v2, 11  ;;  %v5132_v18 = vshll.u32 %v5107_v4, 16  ;;  %v5441_v2 = vld [vmem:[#allocation4 + $0x2c] sm:$0x1]  ;;  %v5627_v4 = vshrl.u32 %v5599_v61, 16 }
 0x342   : > { %v5134_v20 = vrot.slane %v5132_v18, 5 }
 0x371   : > { %v12857_v28 = vpop.f32.mrf.mxu0 }
 0x372   : > { %v4682_v19 = vadd.f32 %v14873_v29, %v12857_v28  ;;  %v4645_v28 = vadd.f32 %v14873_v29, %v4644_v11  ;;  %v4634_v11 = vadd.f32 %v14873_v29, %v14862_v8 }
 0x373   : > { %v4673_v32 = vpop.f32.mrf.mxu0 }
 0x374   : > { %v4674_v37 = vadd.f32 %v14873_v29, %v4673_v32  ;;  %v4718_v44 = vmax.f32 %v4682_v19, 0.0  ;;  %v4710_v32 = vmax.f32 %v4650_v13, 0.0  ;;  %v4732_v19 = vpack.c.bf16 %v4697_v27, %v4696_v16  ;;  %v13013_v27 = vld [vmem:[%s18042_s3 + $0x80] sm:$0xff]  }
 0x375   : > { %v12858_v36 = vpop.f32.mrf.mxu0  ;;  %v4706_v9 = vmax.f32 %v4634_v11, 0.0  ;;  %v4922_v11 = vld [vmem:[#allocation4 + $0x4] sm:$0xf] }
 0x376   : > { %v4685_v39 = vadd.f32 %v14873_v29, %v12858_v36  ;;  %v4716_v55 = vmax.f32 %v4674_v37, 0.0  ;;  %v4739_v35 = vpack.c.bf16 %v4711_v25, %v4710_v32  ;;  %v4709_v36 = vmax.f32 %v4645_v28, 0.0  ;;  %v5811_v25 = vld [vmem:[#allocation4 + $0x70] sm:$0xf]  ;;  %v5812_v28 = vld [vmem:[#allocation4 + $0x74] sm:$0x1] }
 0x377   : > { %v4676_v42 = vpop.f32.mrf.mxu0  ;;  %v4578_v37 = vadd.f32 %v14873_v29, %v14677_v33  ;;  %v4565_v33 = vadd.f32 %v14873_v29, %v14667_v3  ;;  %v12999_v3 = vld [vmem:[%s18048_s9] ss:$8 sps:$4 sm:$0xff]   ;;  %v5915_v16 = vshll.u32 %v5811_v25, 16  ;;  %v5921_v32 = vshll.u32 %v5812_v28, 16 }
 0x378   : > { %v4719_v45 = vmax.f32 %v4685_v39, 0.0  ;;  %v4677_v48 = vadd.f32 %v14873_v29, %v4676_v42  ;;  %v4708_v39 = vmax.f32 %v4642_v24, 0.0 }
 0x379   : > { %v4692_v42 = vmax.f32 %v4578_v37, 0.0  ;;  %v4689_v50 = vmax.f32 %v4565_v33, 0.0  ;;  %v5917_v51 = vrot.slane %v5915_v16, 5  ;;  %v5923_v23 = vrot.slane %v5921_v32, 5  ;;  %v4921_v37 = vld [vmem:[#allocation4] sm:$0x8] }
 0x37a   : > { %v4717_v56 = vmax.f32 %v4677_v48, 0.0  ;;  %v4743_v60 = vpack.c.bf16 %v4719_v45, %v4718_v44  ;;  %v4738_v41 = vpack.c.bf16 %v4709_v36, %v4708_v39  ;;  %v4737_v44 = vpack.c.bf16 %v4707_v40, %v4706_v9  ;;  %v5437_v9 = vld [vmem:[#allocation4 + $0x14] sm:$0x1] }
 0x37b   : > { %v4730_v8 = vpack.c.bf16 %v4693_v21, %v4692_v42  ;;  %v4705_v45 = vmax.f32 %v4629_v46, 0.0  ;;  %v4562_v48 = vadd.f32 %v14873_v29, %v14524_v52  ;;  %v13004_v52 = vld [vmem:[%s18048_s9 + $0x10] ss:$8 sps:$4 sm:$0xff]   ;;  %v13007_v29 = vld [vmem:[%s18048_s9 + $0x20] ss:$8 sps:$4 sm:$0xff]   ;;  %v4938_v39 = vshrl.u32 %v4921_v37, 16 }
 0x37c   : > { %v4742_v7 = vpack.c.bf16 %v4717_v56, %v4716_v55  ;;  %12467 = vmatprep.subr.bf16.mxu1 %v4743_v60  ;;  %v13008_v55 = vld [vmem:[%s18048_s9 + $0x34] ss:$8 sps:$4 sm:$0xff]   ;;  %v13010_v56 = vld [vmem:[%s18048_s9 + $0x30] ss:$8 sps:$4 sm:$0xff]   ;;  %v4943_v21 = vshrl.u32 %v4922_v11, 16  ;;  %v4946_v40 = vshll.u32 %v4922_v11, 16 }
 0x37d   : > { %12468 = vmatpush3.bf16.msra.mxu1 %v4735_v0  ;;  %v4736_v53 = vpack.c.bf16 %v4705_v45, %v4704_v22  ;;  %v5612_v60 = vld [vmem:[#allocation4 + $0x70] sm:$0xf]  ;;  %v5106_v0 = vld [vmem:[#allocation4 + $0x4] sm:$0xf]  ;;  %v12096_v46 = vrot.slane %v4938_v39, 11 }
 0x37e   : > { %12469 = vmatprep.subr.bf16.mxu1 %v4742_v7  ;;  %v5710_v59 = vshrl.u32 %v5612_v60, 16  ;;  %v5713_v7 = vshll.u32 %v5612_v60, 16  ;;  %v5123_v10 = vshrl.u32 %v5106_v0, 16  ;;  %v5126_v58 = vshll.u32 %v5106_v0, 16  ;;  %v5267_v42 = vld [vmem:[#allocation4 + $0xc] sm:$0x8] }
 0x37f   : > { %v5284_v33 = vshrl.u32 %v5267_v42, 16  ;;  %v5109_v45 = vld [vmem:[#allocation4 + $0x14] sm:$0x1]  ;;  %v5269_v22 = vld [vmem:[#allocation4 + $0x18] sm:$0x8] }
 0x380   : > { %v5712_v5 = vrot.slane %v5710_v59, 7  ;;  %v5125_v62 = vrot.slane %v5123_v10, 4  ;;  %v5800_v59 = vld [vmem:[#allocation4 + $0x2c] sm:$0x1]  ;;  %v5271_v0 = vld [vmem:[#allocation4 + $0x24] sm:$0x8] }
 0x381   : > { %12470 = vmatpush3.bf16.msra.mxu1 %v4734_v57  ;;  %v5128_v57 = vrot.slane %v5126_v58, 5  ;;  %v5113_v10 = vld [vmem:[#allocation4 + $0x2c] sm:$0x1]  ;;  %v5601_v58 = vld [vmem:[#allocation4 + $0x30] sm:$0x8] }
 0x382   : > { %12471 = vmatprep.subr.bf16.mxu1 %v4741_v17  ;;  %v5715_v12 = vor.u32 %v5713_v7, %v5712_v5  ;;  %v4923_v5 = vld [vmem:[#allocation4 + $0xc] sm:$0x8]  ;;  %v5806_v37 = vld [vmem:[#allocation4 + $0x50] sm:$0x1]  ;;  %v5115_v11 = vld [vmem:[#allocation4 + $0x38] sm:$0x1] }
 0x383   : > { %v5129_v63 = vor.u32 %v5128_v57, %v5125_v62  ;;  %v5837_v62 = vshll.u32 %v5800_v59, 16  ;;  %v5273_v57 = vld [vmem:[#allocation4 + $0x30] sm:$0x8]  ;;  %v5447_v59 = vld [vmem:[#allocation4 + $0x50] sm:$0x1] }
 0x384   : > { %v5716_v17 = vsel %vm13468_vm6, %v12119_v47, %v5715_v12  ;;  %v5323_v16 = vshrl.u32 %v5273_v57, 16 }
 0x385   : > { %12472 = vmatpush3.bf16.msra.mxu1 %v4733_v26  ;;  %5731 = vrot.lane.b32.xlu1 %v5716_v17, %s13206_s13  ;;  %v5130_v13 = vrot.slane %v5129_v63, 4  ;;  %v13011_v26 = vld [vmem:[%s18042_s3 + $0x88] sm:$0xff]   ;;  %v5310_v63 = vshrl.u32 %v5271_v0, 16 }
 0x386   : > { %12473 = vmatprep.subr.bf16.mxu1 %v4740_v30  ;;  %12859 = vmatprep.subr.bf16.mxu0 %v13011_v26  ;;  %v5912_v30 = vshrl.u32 %v5811_v25, 16 }
 0x387   : > { %v5135_v38 = vsel %vm13458_vm5, %v5130_v13, %v5134_v20  ;;  %12860 = vmatpush3.bf16.msra.mxu0 %v13011_v26  ;;  %v5490_v13 = vshll.u32 %v5441_v2, 16  ;;  %v5640_v26 = vshrl.u32 %v5601_v58, 16 }
 0x388   : > { %5234 = vrot.lane.b32.xlu0 %v5135_v38, %s13206_s13  ;;  %12861 = vmatprep.subr.bf16.mxu0 %v13013_v27  ;;  %v5914_v24 = vrot.slane %v5912_v30, 4  ;;  %v5174_v38 = vshll.u32 %v5113_v10, 16 }
 0x389   : > { %12474 = vmatpush3.bf16.msra.mxu1 %v4732_v19 }
 0x38a   : > { %12475 = vmatprep.subr.bf16.mxu1 %v4739_v35  ;;  %v5918_v19 = vor.u32 %v5917_v51, %v5914_v24  ;;  %v15032_v51 = vrot.slane %v5837_v62, 5  ;;  %v5810_v62 = vld [vmem:[#allocation4 + $0x68] sm:$0x1] }
 0x38b   : > { %12862 = vmatpush3.bf16.msra.mxu0 %v13013_v27  ;;  %v4951_v27 = vshrl.u32 %v4923_v5, 16 }
 0x38c   : > { %v5919_v35 = vrot.slane %v5918_v19, 4  ;;  %v15034_v19 = vrot.slane %v5627_v4, 11 }
 0x38d   : > { %12476 = vmatpush3.bf16.msra.mxu1 %v14698_v14  ;;  %v4688_v14 = vmax.f32 %v4562_v48, 0.0  ;;  %v5597_v48 = vld [vmem:[#allocation4 + $0x18] sm:$0x8]  ;;  %v15046_v42 = vrot.slane %v4951_v27, 11 }
 0x38e   : > { %12477 = vmatprep.subr.bf16.mxu1 %v4738_v41  ;;  %v5924_v36 = vsel %vm13458_vm5, %v5919_v35, %v5923_v23  ;;  %v4945_v41 = vrot.slane %v4943_v21, 7  ;;  %v5443_v23 = vld [vmem:[#allocation4 + $0x38] sm:$0x1]  ;;  %v15040_v21 = vrot.slane %v5490_v13, 5  ;;  %v4925_v13 = vld [vmem:[#allocation4 + $0x18] sm:$0x8] }
 0x38f   : > { %v4728_v6 = vpack.c.bf16 %v4689_v50, %v4688_v14  ;;  %5940 = vst.msk [vmem:[#allocation5 + $0x5c] sm:$0xf] %vm4849_vm0, %v5924_v36  ;;  %v5802_v50 = vld [vmem:[#allocation4 + $0x38] sm:$0x1]  ;;  %v5439_v14 = vld [vmem:[#allocation4 + $0x20] sm:$0x1] }
 0x390   : > { %v4948_v43 = vor.u32 %v4946_v40, %v4945_v41  ;;  %v5476_v60 = vshll.u32 %v5439_v14, 16  ;;  %v15038_v36 = vrot.slane %v5310_v63, 11  ;;  %v15042_v40 = vrot.slane %v5174_v38, 5  ;;  %v5605_v14 = vld [vmem:[#allocation4 + $0x48] sm:$0x8] }
 0x391   : > { %12478 = vmatpush3.bf16.msra.mxu1 %v4730_v8  ;;  %v5666_v5 = vshrl.u32 %v5605_v14, 16 }
 0x392   : > { %12479 = vmatprep.subr.bf16.mxu1 %v4737_v44  ;;  %v4949_v8 = vsel %vm13468_vm6, %v12096_v46, %v4948_v43  ;;  %v5462_v44 = vshll.u32 %v5437_v9, 16  ;;  %v15026_v28 = vrot.slane %v5476_v60, 5  ;;  %v15044_v46 = vrot.slane %v5640_v26, 11  ;;  %v5119_v60 = vld [vmem:[#allocation4 + $0x50] sm:$0x1] }
 0x393   : > { %5049 = vst.msk [vmem:[#allocation5] sm:$0xf] %vm4849_vm0, %v4949_v8  ;;  %v15048_v43 = vrot.slane %v5323_v16, 11  ;;  %v5808_v8 = vld [vmem:[#allocation4 + $0x5c] sm:$0x1]  ;;  %v5216_v63 = vshll.u32 %v5119_v60, 16 }
 0x394   : > { %v13017_v16 = vld [vmem:[%s18042_s3 + $0x78] sm:$0xff]  }
 0x395   : > { %12480 = vmatpush3.bf16.msra.mxu1 %v14545_v34  ;;  %v13005_v34 = vld [vmem:[%s18048_s9 + $0x24] ss:$8 sps:$4 sm:$0xff]  }
 0x396   : > { %12481 = vmatprep.subr.bf16.mxu1 %v4736_v53  ;;  %v15013_v53 = vrot.slane %v5284_v33, 11  ;;  %v5504_v33 = vshll.u32 %v5443_v23, 16  ;;  %v4927_v23 = vld [vmem:[#allocation4 + $0x24] sm:$0x8] }
 0x397   : > { %v4977_v14 = vshrl.u32 %v4927_v23, 16 }
 0x398   : > { %v15052_v0 = vrot.slane %v5504_v33, 5 }
 0x399   : > { %12482 = vmatpush3.bf16.msra.mxu1 %v4728_v6  ;;  %v15015_v6 = vrot.slane %v5462_v44, 5  ;;  %v5603_v44 = vld [vmem:[#allocation4 + $0x3c] sm:$0x8] }
 0x39a   : > { %12507 = vmatprep.subr.bf16.mxu1 %v13017_v16 }
 0x39c   : > { %4817 = vmatmul.mubr.bf16.vlgmr.msra.gmra.mxu1 %v12999_v3  ;;  %v5146_v3 = vshll.u32 %v5109_v45, 16 }
 0x39d   : > { %4824 = vmatprep.mubr.bf16.mxu1 %v13002_v54  ;;  %v5614_v54 = vshrl.u32 %v5597_v48, 16  ;;  %v5879_v48 = vshll.u32 %v5806_v37, 16 }
 0x39e   : > { %v15017_v12 = vrot.slane %v5146_v3, 5 }
 0x39f   : > { %v15019_v15 = vrot.slane %v5614_v54, 11  ;;  %v5445_v54 = vld [vmem:[#allocation4 + $0x44] sm:$0x1] }
 0x3a0   : > { %v5518_v58 = vshll.u32 %v5445_v54, 16 }
 0x3a2   : > { %v15073_v33 = vrot.slane %v5518_v58, 5 }
 0x3a4   : > { %4825 = vmatmul.mubr.bf16.gmra.mxu1 %v13004_v52  ;;  %v5297_v52 = vshrl.u32 %v5269_v22, 16  ;;  %v5188_v22 = vshll.u32 %v5115_v11, 16 }
 0x3a5   : > { %4832 = vmatprep.mubr.bf16.mxu1 %v13005_v34  ;;  %v5804_v34 = vld [vmem:[#allocation4 + $0x44] sm:$0x1] }
 0x3a6   : > { %v5865_v47 = vshll.u32 %v5804_v34, 16  ;;  %v15021_v17 = vrot.slane %v5297_v52, 11  ;;  %v5117_v52 = vld [vmem:[#allocation4 + $0x44] sm:$0x1]  ;;  %v5277_v34 = vld [vmem:[#allocation4 + $0x48] sm:$0x8] }
 0x3a7   : > { %v15054_v10 = vrot.slane %v5188_v22, 5  ;;  %v5349_v4 = vshrl.u32 %v5277_v34, 16  ;;  %v15079_v22 = vrot.slane %v5216_v63, 5 }
 0x3a8   : > { %v15030_v24 = vrot.slane %v5865_v47, 5  ;;  %v5202_v47 = vshll.u32 %v5117_v52, 16 }
 0x3ab   : > { %v5074_v20 = vpop.permute.xlu0 %5073 }
 0x3ac   : > { %4833 = vmatmul.mubr.bf16.gmra.mxu1 %v13007_v29  ;;  %v5798_v29 = vld [vmem:[#allocation4 + $0x20] sm:$0x1]  ;;  %5098 = vst.msk [vmem:[#allocation5] sm:$0xf] %vm5097_vm2, %v5074_v20  ;;  %v5532_v20 = vshll.u32 %v5447_v59, 16 }
 0x3ad   : > { %4840 = vmatprep.mubr.bf16.mxu1 %v13008_v55  ;;  %v5111_v55 = vld [vmem:[#allocation4 + $0x20] sm:$0x1]  ;;  %v5823_v7 = vshll.u32 %v5798_v29, 16 }
 0x3ae   : > { %v5160_v18 = vshll.u32 %v5111_v55, 16  ;;  %v5893_v55 = vshll.u32 %v5808_v8, 16  ;;  %v15075_v8 = vrot.slane %v5202_v47, 5 }
 0x3af   : > { %v15028_v30 = vrot.slane %v5823_v7, 5 }
 0x3b0   : > { %v15036_v35 = vrot.slane %v5160_v18, 5  ;;  %v15056_v18 = vrot.slane %v5879_v48, 5  ;;  %v15058_v26 = vrot.slane %v5893_v55, 5 }
 0x3b4   : > { %4841 = vmatmul.mubr.bf16.gmra.mxu1 %v13010_v56  ;;  %v5851_v56 = vshll.u32 %v5802_v50, 16  ;;  %v5275_v50 = vld [vmem:[#allocation4 + $0x3c] sm:$0x8] }
 0x3b5   : > { %v5336_v2 = vshrl.u32 %v5275_v50, 16  ;;  %v15081_v50 = vrot.slane %v5532_v20, 5  ;;  %v15095_v20 = vld [vmem:[#allocation4 + $0x54] sm:$0x8] }
 0x3b6   : > { %v15024_v25 = vrot.slane %v5851_v56, 5  ;;  %v5653_v56 = vshrl.u32 %v5603_v44, 16  ;;  %v15077_v44 = vrot.slane %v5349_v4, 11 }
 0x3b7   : > { %v15069_v11 = vrot.slane %v5336_v2, 11 }
 0x3b8   : > { %v15060_v27 = vrot.slane %v5653_v56, 11 }
 0x3fa   : > { %v5235_v41 = vpop.permute.xlu0 %5234 }
 0x3fb   : > { %5259 = vst.msk [vmem:[#allocation5] sm:$0xf] %vm5258_vm3, %v5235_v41  ;;  %v15071_v41 = vrot.slane %v5666_v5, 11 }
 0x45c   : > { %v12483_v32 = vpop.f32.mrf.mxu1 }
 0x45e   : > { %v12484_v39 = vpop.f32.mrf.mxu1 }
 0x45f   : > { %v12485_v9 = vadd.f32 %v12484_v39, %v12483_v32  ;;  %v13018_v32 = vld [vmem:[%s18042_s3 + $0x38] sm:$0xff]   ;;  %v5907_v39 = vshll.u32 %v5810_v62, 16  ;;  %v13020_v62 = vld [vmem:[%s18042_s3 + $0x30] sm:$0xff]  }
 0x460   : > { %v12486_v45 = vpop.f32.mrf.mxu1  ;;  %12508 = vmatpush3.bf16.msra.mxu1 %v13018_v32 }
 0x461   : > { %v12406_v3 = vpack.c.bf16 %v12485_v9, %v12485_v9  ;;  %v15085_v59 = vrot.slane %v5907_v39, 5 }
 0x462   : > { %v12487_v29 = vpop.f32.mrf.mxu1 }
 0x463   : > { %4913 = vst.msk [vmem:[#allocation4 + $0x10] sm:$0xf] %vm4849_vm0, %v12406_v3  ;;  %v12488_v61 = vadd.f32 %v12487_v29, %v12486_v45  ;;  %v4964_v45 = vshrl.u32 %v4925_v13, 16 }
 0x464   : > { %v12489_v7 = vpop.f32.mrf.mxu1 }
 0x465   : > { %v12407_v57 = vpack.c.bf16 %v12488_v61, %v12488_v61  ;;  %v13019_v61 = vld [vmem:[%s18042_s3 + $0x70] sm:$0xff]   ;;  %v15090_v47 = vrot.slane %v4964_v45, 11 }
 0x466   : > { %v12490_v38 = vpop.f32.mrf.mxu1  ;;  %12509 = vmatprep.subr.bf16.mxu1 %v13019_v61 }
 0x467   : > { %4914 = vst.msk [vmem:[#allocation4 + $0x1c] sm:$0xf] %vm4849_vm0, %v12407_v57  ;;  %v12491_v37 = vadd.f32 %v12490_v38, %v12489_v7  ;;  %12510 = vmatpush3.bf16.msra.mxu1 %v13020_v62 }
 0x468   : > { %v12492_v9 = vpop.f32.mrf.mxu1 }
 0x469   : > { %v12408_v48 = vpack.c.bf16 %v12491_v37, %v12491_v37  ;;  %v15097_v37 = vrot.slane %v4977_v14, 11 }
 0x46a   : > { %v12493_v3 = vpop.f32.mrf.mxu1  ;;  %v5058_v54 = vld [vmem:[#allocation4 + $0x10] sm:$0xf] }
 0x46b   : > { %v5268_v52 = vld [vmem:[#allocation4 + $0x10] sm:$0xf]  ;;  %4915 = vst.msk [vmem:[#allocation4 + $0x28] sm:$0xf] %vm4849_vm0, %v12408_v48  ;;  %v12494_v29 = vadd.f32 %v12493_v3, %v12492_v9  ;;  %5075 = vrot.lane.b32.xlu1 %v5058_v54, %s13200_s26 }
 0x46c   : > { %v5436_v34 = vld [vmem:[#allocation4 + $0x10] sm:$0xf]  ;;  %v5289_v55 = vshrl.u32 %v5268_v52, 16  ;;  %v12495_v2 = vpop.f32.mrf.mxu1  ;;  %v5292_v63 = vshll.u32 %v5268_v52, 16 }
 0x46d   : > { %v5453_v56 = vshrl.u32 %v5436_v34, 16  ;;  %v5108_v60 = vld [vmem:[#allocation4 + $0x10] sm:$0xf]  ;;  %v5456_v5 = vshll.u32 %v5436_v34, 16  ;;  %v12409_v4 = vpack.c.bf16 %v12494_v29, %v12494_v29 }
 0x46e   : > { %v5137_v7 = vshrl.u32 %v5108_v60, 16  ;;  %v5140_v58 = vshll.u32 %v5108_v60, 16  ;;  %v5291_v57 = vrot.slane %v5289_v55, 7  ;;  %v5420_v13 = vld [vmem:[#allocation4 + $0x10] sm:$0xf]  ;;  %v12496_v16 = vpop.f32.mrf.mxu1 }
 0x46f   : > { %v5797_v38 = vld [vmem:[#allocation4 + $0x1c] sm:$0xf]  ;;  %v5455_v23 = vrot.slane %v5453_v56, 4  ;;  %5428 = vst.msk [vmem:[#allocation5 + $0x4] sm:$0xf] %vm4849_vm0, %v5420_v13  ;;  %v12497_v45 = vadd.f32 %v12496_v16, %v12495_v2  ;;  %v5458_v52 = vrot.slane %v5456_v5, 5 }
 0x470   : > { %v5749_v32 = vld [vmem:[#allocation4 + $0x1c] sm:$0xf]  ;;  %v5814_v39 = vshrl.u32 %v5797_v38, 16  ;;  %v5817_v9 = vshll.u32 %v5797_v38, 16  ;;  %4916 = vst.msk [vmem:[#allocation4 + $0x34] sm:$0xf] %vm4849_vm0, %v12409_v4  ;;  %v5294_v48 = vor.u32 %v5292_v63, %v5291_v57  ;;  %v12498_v54 = vpop.f32.mrf.mxu1 }
 0x471   : > { %5765 = vrot.lane.b32.xlu0 %v5749_v32, %s13207_s24  ;;  %v5598_v3 = vld [vmem:[#allocation4 + $0x1c] sm:$0xf]  ;;  %v5139_v34 = vrot.slane %v5137_v7, 4  ;;  %v5142_v29 = vrot.slane %v5140_v58, 5  ;;  %v12410_v60 = vpack.c.bf16 %v12497_v45, %v12497_v45  ;;  %v5459_v57 = vor.u32 %v5458_v52, %v5455_v23 }
 0x472   : > { %v5619_v55 = vshrl.u32 %v5598_v3, 16  ;;  %v5816_v14 = vrot.slane %v5814_v39, 4  ;;  %v5819_v56 = vrot.slane %v5817_v9, 5  ;;  %v5799_v62 = vld [vmem:[#allocation4 + $0x28] sm:$0xf]  ;;  %v5295_v2 = vsel %vm13468_vm6, %v15013_v53, %v5294_v48  ;;  %v12499_v4 = vpop.f32.mrf.mxu1 }
 0x473   : > { %v5059_v13 = vld [vmem:[#allocation4 + $0x1c] sm:$0xf]  ;;  %v5750_v38 = vld [vmem:[#allocation4 + $0x28] sm:$0xf]  ;;  %v5143_v63 = vor.u32 %v5142_v29, %v5139_v34  ;;  %v5828_v5 = vshrl.u32 %v5799_v62, 16  ;;  %v5831_v7 = vshll.u32 %v5799_v62, 16  ;;  %v12500_v58 = vadd.f32 %v12499_v4, %v12498_v54 }
 0x474   : > { %v5820_v16 = vor.u32 %v5819_v56, %v5816_v14  ;;  %4917 = vst.msk [vmem:[#allocation4 + $0x40] sm:$0xf] %vm4849_vm0, %v12410_v60  ;;  %5767 = vrot.lane.b32.xlu1 %v5750_v38, %s13207_s24  ;;  %v5270_v32 = vld [vmem:[#allocation4 + $0x1c] sm:$0xf]  ;;  %v12501_v39 = vpop.f32.mrf.mxu1  ;;  %v5460_v9 = vrot.slane %v5459_v57, 4  ;;  %v5621_v1 = vrot.slane %v5619_v55, 7 }
 0x475   : > { %5077 = vrot.lane.b32.xlu0 %v5059_v13, %s13200_s26  ;;  %v5144_v45 = vrot.slane %v5143_v63, 4  ;;  %v5622_v61 = vshll.u32 %v5598_v3, 16  ;;  %v5830_v48 = vrot.slane %v5828_v5, 4  ;;  %v5833_v23 = vrot.slane %v5831_v7, 5  ;;  %v5438_v34 = vld [vmem:[#allocation4 + $0x1c] sm:$0xf] }
 0x476   : > { %v5821_v53 = vrot.slane %v5820_v16, 4  ;;  %v12411_v52 = vpack.c.bf16 %v12500_v58, %v12500_v58  ;;  %v13021_v29 = vld [vmem:[%s18042_s3 + $0x68] sm:$0xff]   ;;  %v5465_v54 = vsel %vm13458_vm5, %v5460_v9, %v15015_v6  ;;  %v12502_v3 = vpop.f32.mrf.mxu1  ;;  %v5302_v62 = vshrl.u32 %v5270_v32, 16  ;;  %v13023_v5 = vld [vmem:[%s18042_s3 + $0x60] sm:$0xff]  }
 0x477   : > { %v5801_v14 = vld [vmem:[#allocation4 + $0x34] sm:$0xf]  ;;  %v5060_v56 = vld [vmem:[#allocation4 + $0x28] sm:$0xf]  ;;  %v5149_v55 = vsel %vm13458_vm5, %v5144_v45, %v15017_v12  ;;  %v5624_v60 = vor.u32 %v5622_v61, %v5621_v1  ;;  %v5834_v38 = vor.u32 %v5833_v23, %v5830_v48  ;;  %v12503_v6 = vadd.f32 %v12502_v3, %v12501_v39  ;;  %12511 = vmatprep.subr.bf16.mxu1 %v13021_v29  ;;  %v13024_v39 = vld [vmem:[%s18042_s3 + $0x20] sm:$0xff]  }
 0x478   : > { %v13022_v13 = vld [vmem:[%s18042_s3 + $0x28] sm:$0xff]   ;;  %v5842_v4 = vshrl.u32 %v5801_v14, 16  ;;  %v5845_v57 = vshll.u32 %v5801_v14, 16  ;;  %5079 = vrot.lane.b32.xlu1 %v5060_v56, %s13200_s26  ;;  %4918 = vst.msk [vmem:[#allocation4 + $0x4c] sm:$0xf] %vm4849_vm0, %v12411_v52  ;;  %v5304_v1 = vrot.slane %v5302_v62, 7  ;;  %v12504_v16 = vpop.f32.mrf.mxu1  ;;  %v5826_v52 = vsel %vm13458_vm5, %v5821_v53, %v15028_v30 }
 0x479   : > { %5387 = vrot.lane.b32.xlu0 %v5295_v2, %s13207_s24  ;;  %v5625_v12 = vsel %vm13468_vm6, %v15019_v15, %v5624_v60  ;;  %v5305_v61 = vshll.u32 %v5270_v32, 16  ;;  %v5467_v63 = vshrl.u32 %v5438_v34, 16  ;;  %v5835_v7 = vrot.slane %v5834_v38, 4  ;;  %v5600_v45 = vld [vmem:[#allocation4 + $0x28] sm:$0xf]  ;;  %12512 = vmatpush3.bf16.msra.mxu1 %v13022_v13 }
 0x47a   : > { %v5844_v2 = vrot.slane %v5842_v4, 4  ;;  %v5847_v58 = vrot.slane %v5845_v57, 5  ;;  %v12412_v9 = vpack.c.bf16 %v12503_v6, %v12503_v6  ;;  %v5470_v23 = vshll.u32 %v5438_v34, 16  ;;  %v5110_v29 = vld [vmem:[#allocation4 + $0x1c] sm:$0xf]  ;;  %12513 = vmatprep.subr.bf16.mxu1 %v13023_v5  ;;  %v12505_v60 = vpop.f32.mrf.mxu1 }
 0x47b   : > { %v5803_v15 = vld [vmem:[#allocation4 + $0x40] sm:$0xf]  ;;  %v5307_v48 = vor.u32 %v5305_v61, %v5304_v1  ;;  %v5469_v32 = vrot.slane %v5467_v63, 4  ;;  %v5840_v34 = vsel %vm13458_vm5, %v5835_v7, %v15032_v51  ;;  %5933 = vst.msk [vmem:[#allocation5 + $0x8] sm:$0xf] %vm4849_vm0, %v5826_v52  ;;  %v5632_v62 = vshrl.u32 %v5600_v45, 16 }
 0x47c   : > { %v5848_v14 = vor.u32 %v5847_v58, %v5844_v2  ;;  %v5856_v56 = vshrl.u32 %v5803_v15, 16  ;;  %v5859_v3 = vshll.u32 %v5803_v15, 16  ;;  %5236 = vrot.lane.b32.xlu1 %v5149_v55, %s13206_s13  ;;  %4919 = vst.msk [vmem:[#allocation4 + $0x58] sm:$0xf] %vm4849_vm0, %v12412_v9  ;;  %v5472_v53 = vrot.slane %v5470_v23, 5  ;;  %v13025_v55 = vld [vmem:[%s18042_s3 + $0x58] sm:$0xff]  }
 0x47d   : > { %5564 = vrot.lane.b32.xlu0 %v5465_v54, %s13200_s26  ;;  %v5308_v30 = vsel %vm13468_vm6, %v15021_v17, %v5307_v48  ;;  %5934 = vst.msk [vmem:[#allocation5 + $0x14] sm:$0xf] %vm4849_vm0, %v5840_v34  ;;  %v5635_v54 = vshll.u32 %v5600_v45, 16  ;;  %v5151_v51 = vshrl.u32 %v5110_v29, 16  ;;  %12514 = vmatpush3.bf16.msra.mxu1 %v13024_v39  ;;  %v5634_v1 = vrot.slane %v5632_v62, 7  ;;  %v13026_v48 = vld [vmem:[%s18042_s3 + $0x18] sm:$0xff]  }
 0x47e   : > { %v5849_v13 = vrot.slane %v5848_v14, 4  ;;  %v5858_v38 = vrot.slane %v5856_v56, 4  ;;  %v5861_v4 = vrot.slane %v5859_v3, 5  ;;  %v5473_v6 = vor.u32 %v5472_v53, %v5469_v32  ;;  %12515 = vmatprep.subr.bf16.mxu1 %v13025_v55  ;;  %v5272_v58 = vld [vmem:[#allocation4 + $0x28] sm:$0xf]  ;;  %v13027_v14 = vld [vmem:[%s18042_s3 + $0x50] sm:$0xff]  }
 0x47f   : > { %v5805_v57 = vld [vmem:[#allocation4 + $0x4c] sm:$0xf]  ;;  %v5154_v61 = vshll.u32 %v5110_v29, 16  ;;  %v12506_v63 = vadd.f32 %v12505_v60, %v12504_v16  ;;  %v5637_v45 = vor.u32 %v5635_v54, %v5634_v1  ;;  %v5153_v39 = vrot.slane %v5151_v51, 4  ;;  %v5440_v16 = vld [vmem:[#allocation4 + $0x28] sm:$0xf] }
 0x480   : > { %v5854_v17 = vsel %vm13458_vm5, %v5849_v13, %v15024_v25  ;;  %v5862_v5 = vor.u32 %v5861_v4, %v5858_v38  ;;  %v5870_v7 = vshrl.u32 %v5805_v57, 16  ;;  %v5873_v2 = vshll.u32 %v5805_v57, 16  ;;  %5389 = vrot.lane.b32.xlu1 %v5308_v30, %s13207_s24  ;;  %v5751_v52 = vld [vmem:[#allocation4 + $0x34] sm:$0xf]  ;;  %v15165_v30 = vld [vmem:[#allocation4 + $0x30] sm:$0x8] }
 0x481   : > { %5717 = vrot.lane.b32.xlu0 %v5625_v12, %s13206_s13  ;;  %5935 = vst.msk [vmem:[#allocation5 + $0x20] sm:$0xf] %vm4849_vm0, %v5854_v17  ;;  %v5474_v9 = vrot.slane %v5473_v6, 4  ;;  %v5156_v15 = vrot.slane %v5154_v61, 5  ;;  %v12413_v29 = vpack.c.bf16 %v12506_v63, %v12506_v63  ;;  %v5112_v12 = vld [vmem:[#allocation4 + $0x28] sm:$0xf]  ;;  %12516 = vmatpush3.bf16.msra.mxu1 %v13026_v48  ;;  %v5638_v38 = vsel %vm13468_vm6, %v15034_v19, %v5637_v45 }
 0x482   : > { %v5863_v25 = vrot.slane %v5862_v5, 4  ;;  %v5872_v32 = vrot.slane %v5870_v7, 4  ;;  %v5875_v23 = vrot.slane %v5873_v2, 5  ;;  %v5315_v60 = vshrl.u32 %v5272_v58, 16  ;;  %v13028_v53 = vld [vmem:[%s18042_s3 + $0x10] sm:$0xff]   ;;  %12517 = vmatprep.subr.bf16.mxu1 %v13027_v14 }
 0x483   : > { %v5807_v56 = vld [vmem:[#allocation4 + $0x58] sm:$0xf]  ;;  %v5479_v3 = vsel %vm13458_vm5, %v5474_v9, %v15026_v28  ;;  %v5157_v34 = vor.u32 %v5156_v15, %v5153_v39  ;;  %4920 = vst.msk [vmem:[#allocation4 + $0x64] sm:$0xf] %vm4849_vm0, %v12413_v29  ;;  %v5061_v13 = vld [vmem:[#allocation4 + $0x34] sm:$0xf] }
 0x484   : > { %v5868_v62 = vsel %vm13458_vm5, %v5863_v25, %v15030_v24  ;;  %v5884_v54 = vshrl.u32 %v5807_v56, 16  ;;  %v5887_v55 = vshll.u32 %v5807_v56, 16  ;;  %5566 = vrot.lane.b32.xlu1 %v5479_v3, %s13200_s26  ;;  %v13012_v28 = vld [vmem:[#allocation5 + $0x8] ss:$12 sps:$4 sm:$0xff]   ;;  %v5317_v4 = vrot.slane %v5315_v60, 7 }
 0x485   : > { %5769 = vrot.lane.b32.xlu0 %v5751_v52, %s13207_s24  ;;  %5936 = vst.msk [vmem:[#allocation5 + $0x2c] sm:$0xf] %vm4849_vm0, %v5868_v62  ;;  %v5481_v51 = vshrl.u32 %v5440_v16, 16  ;;  %v15180_v57 = vld [vmem:[#allocation4 + $0x34] sm:$0xf]  ;;  %v5876_v24 = vor.u32 %v5875_v23, %v5872_v32  ;;  %12863 = vmatprep.mubr.msk.bf16.mxu0 %vm6168_vm4, %v13012_v28  ;;  %v5484_v61 = vshll.u32 %v5440_v16, 16 }
 0x486   : > { %v5886_v6 = vrot.slane %v5884_v54, 4  ;;  %v5889_v1 = vrot.slane %v5887_v55, 5  ;;  %v15183_v63 = vld [vmem:[#allocation4 + $0x34] sm:$0xf]  ;;  %v5158_v17 = vrot.slane %v5157_v34, 4  ;;  %v5318_v5 = vshll.u32 %v5272_v58, 16  ;;  %12518 = vmatpush3.bf16.msra.mxu1 %v13028_v53 }
 0x487   : > { %v5483_v7 = vrot.slane %v5481_v51, 4  ;;  %v5165_v2 = vshrl.u32 %v5112_v12, 16  ;;  %v5442_v9 = vld [vmem:[#allocation4 + $0x34] sm:$0xf]  ;;  %v5486_v45 = vrot.slane %v5484_v61, 5  ;;  %v5168_v39 = vshll.u32 %v5112_v12, 16 }
 0x488   : > { %v5890_v19 = vor.u32 %v5889_v1, %v5886_v6  ;;  %5719 = vrot.lane.b32.xlu1 %v5638_v38, %s13206_s13  ;;  %v4990_v15 = vshrl.u32 %v15165_v30, 16  ;;  %v13029_v16 = vld [vmem:[%s18042_s3 + $0x48] sm:$0xff]   ;;  %v5320_v48 = vor.u32 %v5318_v5, %v5317_v4  ;;  %v5645_v58 = vshrl.u32 %v15180_v57, 16  ;;  %v5752_v12 = vld [vmem:[#allocation4 + $0x40] sm:$0xf] }
 0x489   : > { %5081 = vrot.lane.b32.xlu0 %v5061_v13, %s13200_s26  ;;  %v5167_v25 = vrot.slane %v5165_v2, 4  ;;  %v18060_v32 = vshrl.u32 %v15095_v20, 16  ;;  %v13030_v52 = vld [vmem:[%s18042_s3 + $0x8] sm:$0xff]   ;;  %v5877_v29 = vrot.slane %v5876_v24, 4  ;;  %v5487_v14 = vor.u32 %v5486_v45, %v5483_v7  ;;  %12519 = vmatprep.subr.bf16.mxu1 %v13029_v16  ;;  %v13031_v34 = vld [vmem:[%s18042_s3 + $0x40] sm:$0xff]  }
 0x48a   : > { %v5170_v56 = vrot.slane %v5168_v39, 5  ;;  %v5328_v3 = vshrl.u32 %v15183_v63, 16  ;;  %v5891_v60 = vrot.slane %v5890_v19, 4  ;;  %v5163_v20 = vsel %vm13458_vm5, %v5158_v17, %v15036_v35  ;;  %v5809_v30 = vld [vmem:[#allocation4 + $0x64] sm:$0xf]  ;;  %12520 = vmatpush3.bf16.msra.mxu1 %v13030_v52 }
 0x48b   : > { %v15194_v23 = vrot.slane %v18060_v32, 11  ;;  %v5495_v53 = vshrl.u32 %v5442_v9, 16  ;;  %v5498_v62 = vshll.u32 %v5442_v9, 16  ;;  %v5898_v54 = vshrl.u32 %v5809_v30, 16  ;;  %v15211_v51 = vld [vmem:[#allocation4 + $0x40] sm:$0xf]  ;;  %12521 = vmatprep.subr.bf16.mxu1 %v13031_v34 }
 0x48c   : > { %5771 = vrot.lane.b32.xlu1 %v5752_v12, %s13207_s24  ;;  %v5901_v55 = vshll.u32 %v5809_v30, 16  ;;  %v13014_v28 = vld [vmem:[#allocation5 + $0x20] ss:$12 sps:$4 sm:$0xff]   ;;  %v5171_v13 = vor.u32 %v5170_v56, %v5167_v25  ;;  %v5321_v38 = vsel %vm13468_vm6, %v15038_v36, %v5320_v48  ;;  %v5647_v4 = vrot.slane %v5645_v58, 7  ;;  %v5607_v35 = vld [vmem:[#allocation4 + $0x54] sm:$0x8] }
 0x48d   : > { %5238 = vrot.lane.b32.xlu0 %v5163_v20, %s13206_s13  ;;  %v13032_v24 = vld [vmem:[%s18042_s3] sm:$0xff]   ;;  %v5900_v6 = vrot.slane %v5898_v54, 4  ;;  %12864 = vmatmul.mubr.msk.bf16.vlgmr.msra.gmra.mxu0 %vm6168_vm4, %v13014_v28  ;;  %v5488_v61 = vrot.slane %v5487_v14, 4  ;;  %v5330_v17 = vrot.slane %v5328_v3, 7  ;;  %v5114_v5 = vld [vmem:[#allocation4 + $0x34] sm:$0xf]  ;;  %v5882_v19 = vsel %vm13458_vm5, %v5877_v29, %v15056_v18 }
 0x48e   : > { %v5903_v1 = vrot.slane %v5901_v55, 5  ;;  %v5062_v7 = vld [vmem:[#allocation4 + $0x40] sm:$0xf]  ;;  %v5172_v2 = vrot.slane %v5171_v13, 4  ;;  %v5497_v9 = vrot.slane %v5495_v53, 4  ;;  %v5500_v36 = vrot.slane %v5498_v62, 5  ;;  %12522 = vmatpush3.bf16.msra.mxu1 %v13032_v24 }
 0x48f   : > { %v5648_v39 = vshll.u32 %v15180_v57, 16  ;;  %v5896_v16 = vsel %vm13458_vm5, %v5891_v60, %v15058_v26  ;;  %5937 = vst.msk [vmem:[#allocation5 + $0x38] sm:$0xf] %vm4849_vm0, %v5882_v19  ;;  %v5658_v48 = vshrl.u32 %v15211_v51, 16  ;;  %v5331_v25 = vshll.u32 %v15183_v63, 16 }
 0x490   : > { %v5904_v45 = vor.u32 %v5903_v1, %v5900_v6  ;;  %5083 = vrot.lane.b32.xlu1 %v5062_v7, %s13200_s26  ;;  %5938 = vst.msk [vmem:[#allocation5 + $0x44] sm:$0xf] %vm4849_vm0, %v5896_v16  ;;  %v5179_v18 = vshrl.u32 %v5114_v5, 16  ;;  %v5182_v58 = vshll.u32 %v5114_v5, 16  ;;  %v15230_v32 = vld [vmem:[#allocation4 + $0x5c] sm:$0x1]  ;;  %v5493_v26 = vsel %vm13458_vm5, %v5488_v61, %v15040_v21 }
 0x491   : > { %5391 = vrot.lane.b32.xlu0 %v5321_v38, %s13207_s24  ;;  %v15232_v52 = vrot.slane %v4990_v15, 11  ;;  %v5650_v57 = vor.u32 %v5648_v39, %v5647_v4  ;;  %v5444_v12 = vld [vmem:[#allocation4 + $0x40] sm:$0xf]  ;;  %v5679_v14 = vshrl.u32 %v5607_v35, 16  ;;  %v5421_v56 = vld [vmem:[#allocation4 + $0x1c] sm:$0xf]  ;;  %v5177_v63 = vsel %vm13458_vm5, %v5172_v2, %v15042_v40 }
 0x492   : > { %v5905_v29 = vrot.slane %v5904_v45, 4  ;;  %v5333_v3 = vor.u32 %v5331_v25, %v5330_v17  ;;  %v5501_v34 = vor.u32 %v5500_v36, %v5497_v9  ;;  %v5116_v60 = vld [vmem:[#allocation4 + $0x40] sm:$0xf]  ;;  %5429 = vst.msk [vmem:[#allocation5 + $0x10] sm:$0xf] %vm4849_vm0, %v5421_v56  ;;  %v5660_v30 = vrot.slane %v5658_v48, 7 }
 0x493   : > { %v15241_v15 = vld [vmem:[#allocation4 + $0x3c] sm:$0x8]  ;;  %v15243_v20 = vld [vmem:[#allocation4 + $0x48] sm:$0x8]  ;;  %v5661_v21 = vshll.u32 %v15211_v51, 16  ;;  %v5181_v53 = vrot.slane %v5179_v18, 4 }
 0x494   : > { %5240 = vrot.lane.b32.xlu1 %v5177_v63, %s13206_s13  ;;  %v15248_v62 = vld [vmem:[#allocation4 + $0x40] sm:$0xf]  ;;  %v5546_v40 = vshll.u32 %v15230_v32, 16  ;;  %v5184_v54 = vrot.slane %v5182_v58, 5  ;;  %v5509_v55 = vshrl.u32 %v5444_v12, 16  ;;  %v5910_v28 = vsel %vm13458_vm5, %v5905_v29, %v15085_v59 }
 0x495   : > { %5568 = vrot.lane.b32.xlu0 %v5493_v26, %s13200_s26  ;;  %v5422_v13 = vld [vmem:[#allocation4 + $0x28] sm:$0xf]  ;;  %v5423_v38 = vld [vmem:[#allocation4 + $0x34] sm:$0xf]  ;;  %v5512_v4 = vshll.u32 %v5444_v12, 16  ;;  %v5193_v35 = vshrl.u32 %v5116_v60, 16  ;;  %v5651_v59 = vsel %vm13468_vm6, %v15044_v46, %v5650_v57  ;;  %v5334_v17 = vsel %vm13468_vm6, %v15048_v43, %v5333_v3 }
 0x496   : > { %v5196_v24 = vshll.u32 %v5116_v60, 16  ;;  %5939 = vst.msk [vmem:[#allocation5 + $0x50] sm:$0xf] %vm4849_vm0, %v5910_v28  ;;  %v15255_v6 = vld [vmem:[#allocation4 + $0x4c] sm:$0xf]  ;;  %v15259_v61 = vrot.slane %v5679_v14, 11  ;;  %v5663_v45 = vor.u32 %v5661_v21, %v5660_v30  ;;  %v5185_v39 = vor.u32 %v5184_v54, %v5181_v53 }
 0x497   : > { %v15257_v51 = vld [vmem:[#allocation4 + $0x4c] sm:$0xf]  ;;  %5430 = vst.msk [vmem:[#allocation5 + $0x1c] sm:$0xf] %vm4849_vm0, %v5422_v13  ;;  %5431 = vst.msk [vmem:[#allocation5 + $0x28] sm:$0xf] %vm4849_vm0, %v5423_v38 }
 0x498   : > { %v5118_v1 = vld [vmem:[#allocation4 + $0x4c] sm:$0xf]  ;;  %v5502_v5 = vrot.slane %v5501_v34, 4  ;;  %v5003_v2 = vshrl.u32 %v15241_v15, 16  ;;  %5393 = vrot.lane.b32.xlu1 %v5334_v17, %s13207_s24  ;;  %v13015_v9 = vld [vmem:[#allocation5 + $0x38] ss:$12 sps:$4 sm:$0xff]   ;;  %v5664_v54 = vsel %vm13468_vm6, %v15060_v27, %v5663_v45 }
 0x499   : > { %v5446_v7 = vld [vmem:[#allocation4 + $0x4c] sm:$0xf]  ;;  %5721 = vrot.lane.b32.xlu0 %v5651_v59, %s13206_s13  ;;  %v5341_v36 = vshrl.u32 %v15248_v62, 16  ;;  %v5016_v19 = vshrl.u32 %v15243_v20, 16  ;;  %v5511_v46 = vrot.slane %v5509_v55, 4  ;;  %v5207_v16 = vshrl.u32 %v5118_v1, 16  ;;  %12867 = vmatprep.mubr.msk.bf16.mxu0 %vm6168_vm4, %v13015_v9 }
 0x49a   : > { %v5424_v48 = vld [vmem:[#allocation4 + $0x40] sm:$0xf]  ;;  %v5425_v25 = vld [vmem:[#allocation4 + $0x4c] sm:$0xf]  ;;  %v5514_v43 = vrot.slane %v5512_v4, 5  ;;  %v5195_v18 = vrot.slane %v5193_v35, 4  ;;  %v5507_v14 = vsel %vm13458_vm5, %v5502_v5, %v15052_v0 }
 0x49b   : > { %v5198_v58 = vrot.slane %v5196_v24, 5  ;;  %v5210_v29 = vshll.u32 %v5118_v1, 16  ;;  %5432 = vst.msk [vmem:[#allocation5 + $0x34] sm:$0xf] %vm4849_vm0, %v5424_v48  ;;  %5433 = vst.msk [vmem:[#allocation5 + $0x40] sm:$0xf] %vm4849_vm0, %v5425_v25 }
 0x49c   : > { %v5426_v57 = vld [vmem:[#allocation4 + $0x58] sm:$0xf]  ;;  %v5753_v12 = vld [vmem:[#allocation4 + $0x4c] sm:$0xf]  ;;  %v5671_v56 = vshrl.u32 %v15255_v6, 16  ;;  %v5354_v26 = vshrl.u32 %v15257_v51, 16  ;;  %5570 = vrot.lane.b32.xlu1 %v5507_v14, %s13200_s26  ;;  %v5515_v28 = vor.u32 %v5514_v43, %v5511_v46 }
 0x49d   : > { %v15282_v63 = vld [vmem:[#allocation4 + $0x5c] sm:$0x1]  ;;  %5434 = vst.msk [vmem:[#allocation5 + $0x4c] sm:$0xf] %vm4849_vm0, %v5426_v57  ;;  %v5427_v3 = vld [vmem:[#allocation4 + $0x64] sm:$0xf]  ;;  %5773 = vrot.lane.b32.xlu0 %v5753_v12, %s13207_s24  ;;  %v5199_v13 = vor.u32 %v5198_v58, %v5195_v18 }
 0x49e   : > { %v5343_v34 = vrot.slane %v5341_v36, 7  ;;  %v5344_v60 = vshll.u32 %v15248_v62, 16  ;;  %v5523_v15 = vshrl.u32 %v5446_v7, 16  ;;  %v5526_v20 = vshll.u32 %v5446_v7, 16  ;;  %v15288_v30 = vld [vmem:[#allocation4 + $0x58] sm:$0xf] }
 0x49f   : > { %5435 = vst.msk [vmem:[#allocation5 + $0x58] sm:$0xf] %vm4849_vm0, %v5427_v3  ;;  %v13016_v0 = vld [vmem:[#allocation5 + $0x50] ss:$12 sps:$4 sm:$0xff]   ;;  %v5209_v21 = vrot.slane %v5207_v16, 4  ;;  %v5212_v53 = vrot.slane %v5210_v29, 5 }
 0x4a0   : > { %v5186_v55 = vrot.slane %v5185_v39, 4  ;;  %v5608_v38 = vld [vmem:[#allocation4 + $0x58] sm:$0xf]  ;;  %v4924_v4 = vld [vmem:[#allocation4 + $0x10] sm:$0xf]  ;;  %12868 = vmatmul.mubr.msk.bf16.gmra.mxu0 %vm6168_vm4, %v13016_v0  ;;  %v5673_v62 = vrot.slane %v5671_v56, 7  ;;  %5723 = vrot.lane.b32.xlu1 %v5664_v54, %s13206_s13  ;;  %v5346_v36 = vor.u32 %v5344_v60, %v5343_v34 }
 0x4a1   : > { %v5063_v35 = vld [vmem:[#allocation4 + $0x4c] sm:$0xf]  ;;  %v5674_v24 = vshll.u32 %v15255_v6, 16  ;;  %v5356_v1 = vrot.slane %v5354_v26, 7  ;;  %v5357_v59 = vshll.u32 %v15257_v51, 16  ;;  %v5525_v17 = vrot.slane %v5523_v15, 4 }
 0x4a2   : > { %5085 = vrot.lane.b32.xlu0 %v5063_v35, %s13200_s26  ;;  %v5528_v27 = vrot.slane %v5526_v20, 5  ;;  %v5367_v5 = vshrl.u32 %v15288_v30, 16  ;;  %v5230_v7 = vshll.u32 %v15282_v63, 16  ;;  %v15301_v9 = vld [vmem:[#allocation4 + $0x54] sm:$0x8]  ;;  %v5213_v45 = vor.u32 %v5212_v53, %v5209_v21 }
 0x4a3   : > { %v5684_v39 = vshrl.u32 %v5608_v38, 16  ;;  %v5448_v46 = vld [vmem:[#allocation4 + $0x58] sm:$0xf]  ;;  %v15303_v6 = vrot.slane %v5003_v2, 11  ;;  %v5516_v16 = vrot.slane %v5515_v28, 4  ;;  %v5200_v51 = vrot.slane %v5199_v13, 4 }
 0x4a4   : > { %v4956_v48 = vshrl.u32 %v4924_v4, 16  ;;  %v15305_v25 = vrot.slane %v5016_v19, 11  ;;  %v5191_v43 = vsel %vm13458_vm5, %v5186_v55, %v15054_v10  ;;  %v5754_v18 = vld [vmem:[#allocation4 + $0x58] sm:$0xf]  ;;  %v15310_v58 = vor.u32 %v5674_v24, %v5673_v62  ;;  %v4926_v60 = vld [vmem:[#allocation4 + $0x1c] sm:$0xf] }
 0x4a5   : > { %v15312_v29 = vor.u32 %v5357_v59, %v5356_v1  ;;  %v5029_v57 = vshrl.u32 %v15301_v9, 16  ;;  %5775 = vrot.lane.b32.xlu1 %v5754_v18, %s13207_s24  ;;  %v5529_v2 = vor.u32 %v5528_v27, %v5525_v17  ;;  %v5369_v12 = vrot.slane %v5367_v5, 7  ;;  %v5120_v56 = vld [vmem:[#allocation4 + $0x58] sm:$0xf]  ;;  %v4932_v24 = vld [vmem:[#allocation4 + $0x40] sm:$0xf] }
 0x4a6   : > { %5242 = vrot.lane.b32.xlu0 %v5191_v43, %s13206_s13  ;;  %v5370_v19 = vshll.u32 %v15288_v30, 16  ;;  %v5537_v14 = vshrl.u32 %v5448_v46, 16  ;;  %v5347_v10 = vsel %vm13468_vm6, %v15069_v11, %v5346_v36  ;;  %v15321_v26 = vrot.slane %v5213_v45, 4  ;;  %v5064_v21 = vld [vmem:[#allocation4 + $0x58] sm:$0xf] }
 0x4a7   : > { %v5686_v3 = vrot.slane %v5684_v39, 7  ;;  %v5687_v34 = vshll.u32 %v5608_v38, 16  ;;  %v5521_v15 = vsel %vm13458_vm5, %v5516_v16, %v15073_v33  ;;  %v5205_v20 = vsel %vm13458_vm5, %v5200_v51, %v15075_v8  ;;  %v4928_v33 = vld [vmem:[#allocation4 + $0x28] sm:$0xf]  ;;  %v4934_v5 = vld [vmem:[#allocation4 + $0x4c] sm:$0xf] }
 0x4a8   : > { %v5540_v30 = vshll.u32 %v5448_v46, 16  ;;  %v4958_v0 = vrot.slane %v4956_v48, 7  ;;  %v5677_v11 = vsel %vm13468_vm6, %v15071_v41, %v15310_v58  ;;  %v5360_v53 = vsel %vm13468_vm6, %v15077_v44, %v15312_v29  ;;  %v4930_v41 = vld [vmem:[#allocation4 + $0x34] sm:$0xf]  ;;  %v4936_v43 = vld [vmem:[#allocation4 + $0x58] sm:$0xf] }
 0x4a9   : > { %v5221_v54 = vshrl.u32 %v5120_v56, 16  ;;  %v4959_v55 = vshll.u32 %v4924_v4, 16  ;;  %5087 = vrot.lane.b32.xlu1 %v5064_v21, %s13200_s26  ;;  %v15339_v8 = vrot.slane %v5529_v2, 4  ;;  %v15341_v28 = vor.u32 %v5370_v19, %v5369_v12  ;;  %v5610_v19 = vld [vmem:[#allocation4 + $0x64] sm:$0xf] }
 0x4aa   : > { %5395 = vrot.lane.b32.xlu0 %v5347_v10, %s13207_s24  ;;  %v15343_v13 = vrot.slane %v5537_v14, 4  ;;  %v4969_v38 = vshrl.u32 %v4926_v60, 16  ;;  %v5219_v44 = vsel %vm13458_vm5, %v15321_v26, %v15079_v22  ;;  %v15349_v35 = vor.u32 %v5687_v34, %v5686_v3  ;;  %v5282_v10 = vld [vmem:[#allocation4 + $0x64] sm:$0xf]  ;;  %v5609_v21 = vld [vmem:[#allocation4 + $0x60] sm:$0x8] }
 0x4ab   : > { %v5224_v4 = vshll.u32 %v5120_v56, 16  ;;  %v4961_v62 = vor.u32 %v4959_v55, %v4958_v0  ;;  %v15351_v1 = vrot.slane %v5540_v30, 5  ;;  %v4972_v17 = vshll.u32 %v4926_v60, 16  ;;  %v5281_v55 = vld [vmem:[#allocation4 + $0x60] sm:$0x8] }
 0x4ac   : > { %v4971_v59 = vrot.slane %v4969_v38, 7  ;;  %v4982_v27 = vshrl.u32 %v4928_v33, 16  ;;  %v15353_v36 = vrot.slane %v5221_v54, 4  ;;  %v4985_v39 = vshll.u32 %v4928_v33, 16 }
 0x4ad   : > { %v4962_v45 = vsel %vm13468_vm6, %v15046_v42, %v4961_v62  ;;  %v4995_v46 = vshrl.u32 %v4930_v41, 16  ;;  %5244 = vrot.lane.b32.xlu1 %v5205_v20, %s13206_s13  ;;  %v4998_v51 = vshll.u32 %v4930_v41, 16  ;;  %v5008_v48 = vshrl.u32 %v4932_v24, 16  ;;  %v5450_v20 = vld [vmem:[#allocation4 + $0x64] sm:$0xf] }
 0x4ae   : > { %5572 = vrot.lane.b32.xlu0 %v5521_v15, %s13200_s26  ;;  %5050 = vst.msk [vmem:[#allocation5 + $0xc] sm:$0xf] %vm4849_vm0, %v4962_v45  ;;  %v4974_v22 = vor.u32 %v4972_v17, %v4971_v59  ;;  %v4984_v16 = vrot.slane %v4982_v27, 7  ;;  %v5011_v58 = vshll.u32 %v4932_v24, 16  ;;  %v5021_v29 = vshrl.u32 %v4934_v5, 16 }
 0x4af   : > { %v4997_v18 = vrot.slane %v4995_v46, 7  ;;  %v5024_v2 = vshll.u32 %v4934_v5, 16  ;;  %v5226_v12 = vrot.slane %v5224_v4, 5  ;;  %v5010_v56 = vrot.slane %v5008_v48, 7 }
 0x4b0   : > { %v4975_v42 = vsel %vm13468_vm6, %v15090_v47, %v4974_v22  ;;  %v4987_v14 = vor.u32 %v4985_v39, %v4984_v16  ;;  %v5023_v3 = vrot.slane %v5021_v29, 7  ;;  %v5034_v34 = vshrl.u32 %v4936_v43, 16  ;;  %v15428_v29 = vpop.permute.xlu1 %5731 }
 0x4b1   : > { %5051 = vst.msk [vmem:[#allocation5 + $0x18] sm:$0xf] %vm4849_vm0, %v4975_v42  ;;  %v5000_v26 = vor.u32 %v4998_v51, %v4997_v18  ;;  %v5037_v60 = vshll.u32 %v4936_v43, 16  ;;  %5397 = vrot.lane.b32.xlu1 %v5360_v53, %s13207_s24  ;;  %v5535_v15 = vsel %vm13458_vm5, %v15339_v8, %v15081_v50  ;;  %v5013_v30 = vor.u32 %v5011_v58, %v5010_v56  ;;  %v5755_v43 = vld [vmem:[#allocation4 + $0x64] sm:$0xf] }
 0x4b2   : > { %5725 = vrot.lane.b32.xlu0 %v5677_v11, %s13206_s13  ;;  %v4988_v47 = vsel %vm13468_vm6, %v15097_v37, %v4987_v14  ;;  %v12103_v0 = vrot.slane %v5029_v57, 11  ;;  %v5697_v54 = vshrl.u32 %v5610_v19, 16  ;;  %v5026_v53 = vor.u32 %v5024_v2, %v5023_v3  ;;  %v5756_v58 = vld [vmem:[#allocation4 + $0x70] sm:$0xf] }
 0x4b3   : > { %5052 = vst.msk [vmem:[#allocation5 + $0x24] sm:$0xf] %vm4849_vm0, %v4988_v47  ;;  %v5001_v11 = vsel %vm13468_vm6, %v15232_v52, %v5000_v26  ;;  %v5036_v50 = vrot.slane %v5034_v34, 7  ;;  %v5543_v33 = vor.u32 %v15351_v1, %v15343_v13  ;;  %v5227_v37 = vor.u32 %v5226_v12, %v15353_v36 }
 0x4b4   : > { %v5380_v8 = vshrl.u32 %v5282_v10, 16  ;;  %5053 = vst.msk [vmem:[#allocation5 + $0x30] sm:$0xf] %vm4849_vm0, %v5001_v11  ;;  %v5014_v9 = vsel %vm13468_vm6, %v15303_v6, %v5013_v30  ;;  %v5551_v57 = vshrl.u32 %v5450_v20, 16  ;;  %v5554_v38 = vshll.u32 %v5450_v20, 16 }
 0x4b5   : > { %5054 = vst.msk [vmem:[#allocation5 + $0x3c] sm:$0xf] %vm4849_vm0, %v5014_v9  ;;  %v5027_v52 = vsel %vm13468_vm6, %v15305_v25, %v5026_v53  ;;  %v5039_v41 = vor.u32 %v5037_v60, %v5036_v50  ;;  %5574 = vrot.lane.b32.xlu1 %v5535_v15, %s13200_s26  ;;  %v5548_v13 = vrot.slane %v5546_v40, 5  ;;  %v5692_v4 = vshrl.u32 %v5609_v21, 16 }
 0x4b6   : > { %5246 = vrot.lane.b32.xlu0 %v5219_v44, %s13206_s13  ;;  %v5375_v62 = vshrl.u32 %v5281_v55, 16  ;;  %5055 = vst.msk [vmem:[#allocation5 + $0x48] sm:$0xf] %vm4849_vm0, %v5027_v52  ;;  %v5373_v6 = vsel %vm13468_vm6, %v15194_v23, %v15341_v28  ;;  %v5690_v25 = vsel %vm13468_vm6, %v15259_v61, %v15349_v35  ;;  %v5232_v44 = vrot.slane %v5230_v7, 5  ;;  %v5451_v23 = vld [vmem:[#allocation4 + $0x68] sm:$0x1] }
 0x4b7   : > { %v5040_v32 = vsel %vm13468_vm6, %v12103_v0, %v5039_v41  ;;  %v5544_v40 = vrot.slane %v5543_v33, 4  ;;  %v5699_v24 = vrot.slane %v5697_v54, 7  ;;  %v5700_v1 = vshll.u32 %v5610_v19, 16 }
 0x4b8   : > { %v5383_v59 = vshll.u32 %v5282_v10, 16  ;;  %5056 = vst.msk [vmem:[#allocation5 + $0x54] sm:$0xf] %vm4849_vm0, %v5040_v32  ;;  %v5228_v17 = vrot.slane %v5227_v37, 4  ;;  %v5382_v27 = vrot.slane %v5380_v8, 7  ;;  %v5553_v28 = vrot.slane %v5551_v57, 4 }
 0x4b9   : > { %v5556_v5 = vrot.slane %v5554_v38, 5  ;;  %5727 = vrot.lane.b32.xlu1 %v5690_v25, %s13206_s13  ;;  %v12118_v61 = vrot.slane %v5692_v4, 11  ;;  %v5702_v63 = vor.u32 %v5700_v1, %v5699_v24  ;;  %v12111_v7 = vrot.slane %v5375_v62, 11 }
 0x4ba   : > { %5399 = vrot.lane.b32.xlu0 %v5373_v6, %s13207_s24  ;;  %v5560_v35 = vshll.u32 %v5451_v23, 16  ;;  %v5549_v36 = vsel %vm13458_vm5, %v5544_v40, %v5548_v13  ;;  %v5233_v45 = vsel %vm13458_vm5, %v5228_v17, %v5232_v44  ;;  %v5385_v39 = vor.u32 %v5383_v59, %v5382_v27 }
 0x4bb   : > { %v5557_v46 = vor.u32 %v5556_v5, %v5553_v28  ;;  %v5703_v22 = vsel %vm13468_vm6, %v12118_v61, %v5702_v63 }
 0x4bc   : > { %v5386_v16 = vsel %vm13468_vm6, %v12111_v7, %v5385_v39  ;;  %v5562_v48 = vrot.slane %v5560_v35, 5 }
 0x4bd   : > { %5248 = vrot.lane.b32.xlu1 %v5233_v45, %s13206_s13  ;;  %v5558_v51 = vrot.slane %v5557_v46, 4  ;;  %v13045_v46 = vld [vmem:[%s18049_s10] sm:$0xff]  }
 0x4be   : > { %5576 = vrot.lane.b32.xlu0 %v5549_v36, %s13200_s26 }
 0x4bf   : > { %v5563_v18 = vsel %vm13458_vm5, %v5558_v51, %v5562_v48 }
 0x4c1   : > { %5401 = vrot.lane.b32.xlu1 %v5386_v16, %s13207_s24 }
 0x4c2   : > { %5729 = vrot.lane.b32.xlu0 %v5703_v22, %s13206_s13 }
 0x4c5   : > { %5578 = vrot.lane.b32.xlu1 %v5563_v18, %s13200_s26 }
 0x4c6   : > { %5777 = vrot.lane.b32.xlu0 %v5755_v43, %s13207_s24 }
 0x4c9   : > { %5779 = vrot.lane.b32.xlu1 %v5756_v58, %s13207_s24 }
 0x4dd   : > { %v5076_v2 = vpop.permute.xlu1 %5075 }
 0x4de   : > { %5099 = vst.msk [vmem:[#allocation5 + $0xc] sm:$0xf] %vm5097_vm2, %v5076_v2 }
 0x4e3   : > { %v5766_v12 = vpop.permute.xlu0 %5765 }
 0x4e6   : > { %v5768_v42 = vpop.permute.xlu1 %5767 }
 0x4e7   : > { %v5078_v19 = vpop.permute.xlu0 %5077 }
 0x4e8   : > { %5100 = vst.msk [vmem:[#allocation5 + $0x18] sm:$0xf] %vm5097_vm2, %v5078_v19 }
 0x4ea   : > { %v5080_v56 = vpop.permute.xlu1 %5079 }
 0x4eb   : > { %v5388_v14 = vpop.permute.xlu0 %5387  ;;  %5101 = vst.msk [vmem:[#allocation5 + $0x24] sm:$0xf] %vm5097_vm2, %v5080_v56 }
 0x4ec   : > { %5412 = vst.msk [vmem:[#allocation5] sm:$0xf] %vm5411_vm7, %v5388_v14 }
 0x4ee   : > { %v5237_v26 = vpop.permute.xlu1 %5236 }
 0x4ef   : > { %v5565_v10 = vpop.permute.xlu0 %5564  ;;  %5260 = vst.msk [vmem:[#allocation5 + $0xc] sm:$0xf] %vm5258_vm3, %v5237_v26 }
 0x4f0   : > { %5588 = vst.msk [vmem:[#allocation5 + $0x4] sm:$0xf] %vm5097_vm2, %v5565_v10 }
 0x4f2   : > { %v5390_v34 = vpop.permute.xlu1 %5389 }
 0x4f3   : > { %v5718_v3 = vpop.permute.xlu0 %5717  ;;  %5413 = vst.msk [vmem:[#allocation5 + $0xc] sm:$0xf] %vm5411_vm7, %v5390_v34 }
 0x4f4   : > { %5741 = vst.msk [vmem:[#allocation5 + $0x4] sm:$0xf] %vm5258_vm3, %v5718_v3 }
 0x4f5   : > { %5789 = vst.msk [vmem:[#allocation5 + $0x4] sm:$0xf] %vm5411_vm7, %v5766_v12 }
 0x4f6   : > { %v5567_v15 = vpop.permute.xlu1 %5566 }
 0x4f7   : > { %v5770_v60 = vpop.permute.xlu0 %5769  ;;  %5589 = vst.msk [vmem:[#allocation5 + $0x10] sm:$0xf] %vm5097_vm2, %v5567_v15 }
 0x4fa   : > { %v5720_v47 = vpop.permute.xlu1 %5719  ;;  %v13033_v55 = vld [vmem:[#allocation5] ss:$12 sps:$4 sm:$0xff]  }
 0x4fb   : > { %v5082_v20 = vpop.permute.xlu0 %5081  ;;  %5742 = vst.msk [vmem:[#allocation5 + $0x10] sm:$0xf] %vm5258_vm3, %v5720_v47 }
 0x4fc   : > { %5102 = vst.msk [vmem:[#allocation5 + $0x30] sm:$0xf] %vm5097_vm2, %v5082_v20 }
 0x4fd   : > { %5790 = vst.msk [vmem:[#allocation5 + $0x10] sm:$0xf] %vm5411_vm7, %v5768_v42 }
 0x4fe   : > { %v5772_v0 = vpop.permute.xlu1 %5771 }
 0x4ff   : > { %v5239_v30 = vpop.permute.xlu0 %5238 }
 0x500   : > { %5261 = vst.msk [vmem:[#allocation5 + $0x18] sm:$0xf] %vm5258_vm3, %v5239_v30 }
 0x502   : > { %v5084_v54 = vpop.permute.xlu1 %5083 }
 0x503   : > { %v5392_v21 = vpop.permute.xlu0 %5391  ;;  %5103 = vst.msk [vmem:[#allocation5 + $0x3c] sm:$0xf] %vm5097_vm2, %v5084_v54 }
 0x504   : > { %5414 = vst.msk [vmem:[#allocation5 + $0x18] sm:$0xf] %vm5411_vm7, %v5392_v21  ;;  %v13035_v11 = vld [vmem:[#allocation5 + $0x4] ss:$12 sps:$4 sm:$0xff]   ;;  %v12120_v21 = vld [vmem:[%s18043_s4] ss:$0 sm:$0xff] }
 0x505   : > { %6213 = vmatprep.mubr.bf16.mxu1 %v13035_v11 }
 0x506   : > { %v5241_v50 = vpop.permute.xlu1 %5240  ;;  %6214 = vmatmul.mubr.bf16.vlgmr.msra.gmra.mxu1 %v13033_v55 }
 0x507   : > { %v5569_v53 = vpop.permute.xlu0 %5568  ;;  %5262 = vst.msk [vmem:[#allocation5 + $0x24] sm:$0xf] %vm5258_vm3, %v5241_v50 }
 0x508   : > { %5590 = vst.msk [vmem:[#allocation5 + $0x1c] sm:$0xf] %vm5097_vm2, %v5569_v53 }
 0x50a   : > { %v5394_v37 = vpop.permute.xlu1 %5393 }
 0x50b   : > { %v5722_v33 = vpop.permute.xlu0 %5721  ;;  %5415 = vst.msk [vmem:[#allocation5 + $0x24] sm:$0xf] %vm5411_vm7, %v5394_v37 }
 0x50c   : > { %5743 = vst.msk [vmem:[#allocation5 + $0x1c] sm:$0xf] %vm5258_vm3, %v5722_v33 }
 0x50d   : > { %5791 = vst.msk [vmem:[#allocation5 + $0x1c] sm:$0xf] %vm5411_vm7, %v5770_v60 }
 0x50e   : > { %v5571_v9 = vpop.permute.xlu1 %5570 }
 0x50f   : > { %v5774_v8 = vpop.permute.xlu0 %5773  ;;  %5591 = vst.msk [vmem:[#allocation5 + $0x28] sm:$0xf] %vm5097_vm2, %v5571_v9 }
 0x512   : > { %v5724_v38 = vpop.permute.xlu1 %5723  ;;  %v13038_v6 = vld [vmem:[#allocation5 + $0x18] ss:$12 sps:$4 sm:$0xff]  }
 0x513   : > { %5744 = vst.msk [vmem:[#allocation5 + $0x28] sm:$0xf] %vm5258_vm3, %v5724_v38 }
 0x514   : > { %v5086_v57 = vpop.permute.xlu0 %5085  ;;  %5792 = vst.msk [vmem:[#allocation5 + $0x28] sm:$0xf] %vm5411_vm7, %v5772_v0 }
 0x515   : > { %5104 = vst.msk [vmem:[#allocation5 + $0x48] sm:$0xf] %vm5097_vm2, %v5086_v57 }
 0x517   : > { %v5776_v41 = vpop.permute.xlu1 %5775 }
 0x518   : > { %v5243_v52 = vpop.permute.xlu0 %5242 }
 0x519   : > { %5263 = vst.msk [vmem:[#allocation5 + $0x30] sm:$0xf] %vm5258_vm3, %v5243_v52 }
 0x51b   : > { %v5088_v4 = vpop.permute.xlu1 %5087  ;;  %v13036_v62 = vld [vmem:[#allocation5 + $0x1c] ss:$12 sps:$4 sm:$0xff]  }
 0x51c   : > { %v5396_v13 = vpop.permute.xlu0 %5395  ;;  %5105 = vst.msk [vmem:[#allocation5 + $0x54] sm:$0xf] %vm5097_vm2, %v5088_v4  ;;  %6221 = vmatprep.mubr.bf16.mxu1 %v13036_v62 }
 0x51d   : > { %5416 = vst.msk [vmem:[#allocation5 + $0x30] sm:$0xf] %vm5411_vm7, %v5396_v13  ;;  %6222 = vmatmul.mubr.bf16.gmra.mxu1 %v13038_v6 }
 0x51f   : > { %v5245_v44 = vpop.permute.xlu1 %5244 }
 0x520   : > { %v5573_v25 = vpop.permute.xlu0 %5572  ;;  %5264 = vst.msk [vmem:[#allocation5 + $0x3c] sm:$0xf] %vm5258_vm3, %v5245_v44 }
 0x521   : > { %5592 = vst.msk [vmem:[#allocation5 + $0x34] sm:$0xf] %vm5097_vm2, %v5573_v25 }
 0x523   : > { %v5398_v40 = vpop.permute.xlu1 %5397 }
 0x524   : > { %v5726_v32 = vpop.permute.xlu0 %5725  ;;  %5417 = vst.msk [vmem:[#allocation5 + $0x3c] sm:$0xf] %vm5411_vm7, %v5398_v40 }
 0x525   : > { %5745 = vst.msk [vmem:[#allocation5 + $0x34] sm:$0xf] %vm5258_vm3, %v5726_v32 }
 0x526   : > { %5793 = vst.msk [vmem:[#allocation5 + $0x34] sm:$0xf] %vm5411_vm7, %v5774_v8 }
 0x527   : > { %v5575_v1 = vpop.permute.xlu1 %5574 }
 0x528   : > { %v5247_v24 = vpop.permute.xlu0 %5246  ;;  %5593 = vst.msk [vmem:[#allocation5 + $0x40] sm:$0xf] %vm5097_vm2, %v5575_v1 }
 0x529   : > { %5265 = vst.msk [vmem:[#allocation5 + $0x48] sm:$0xf] %vm5258_vm3, %v5247_v24 }
 0x52b   : > { %v5728_v17 = vpop.permute.xlu1 %5727  ;;  %v13041_v63 = vld [vmem:[#allocation5 + $0x30] ss:$12 sps:$4 sm:$0xff]  }
 0x52c   : > { %v5400_v59 = vpop.permute.xlu0 %5399  ;;  %5746 = vst.msk [vmem:[#allocation5 + $0x40] sm:$0xf] %vm5258_vm3, %v5728_v17 }
 0x52d   : > { %5418 = vst.msk [vmem:[#allocation5 + $0x48] sm:$0xf] %vm5411_vm7, %v5400_v59  ;;  %5794 = vst.msk [vmem:[#allocation5 + $0x40] sm:$0xf] %vm5411_vm7, %v5776_v41 }
 0x52f   : > { %v5249_v23 = vpop.permute.xlu1 %5248 }
 0x530   : > { %v5577_v27 = vpop.permute.xlu0 %5576  ;;  %5266 = vst.msk [vmem:[#allocation5 + $0x54] sm:$0xf] %vm5258_vm3, %v5249_v23 }
 0x531   : > { %5594 = vst.msk [vmem:[#allocation5 + $0x4c] sm:$0xf] %vm5097_vm2, %v5577_v27 }
 0x533   : > { %v5402_v5 = vpop.permute.xlu1 %5401 }
 0x534   : > { %v5730_v28 = vpop.permute.xlu0 %5729  ;;  %5419 = vst.msk [vmem:[#allocation5 + $0x54] sm:$0xf] %vm5411_vm7, %v5402_v5  ;;  %v13039_v61 = vld [vmem:[#allocation5 + $0x34] ss:$12 sps:$4 sm:$0xff]  }
 0x535   : > { %5747 = vst.msk [vmem:[#allocation5 + $0x4c] sm:$0xf] %vm5258_vm3, %v5730_v28  ;;  %6229 = vmatprep.mubr.bf16.mxu1 %v13039_v61 }
 0x536   : > { %6230 = vmatmul.mubr.bf16.gmra.mxu1 %v13041_v63 }
 0x537   : > { %v5579_v35 = vpop.permute.xlu1 %5578 }
 0x538   : > { %v5778_v7 = vpop.permute.xlu0 %5777  ;;  %5595 = vst.msk [vmem:[#allocation5 + $0x58] sm:$0xf] %vm5097_vm2, %v5579_v35 }
 0x539   : > { %5795 = vst.msk [vmem:[#allocation5 + $0x4c] sm:$0xf] %vm5411_vm7, %v5778_v7 }
 0x53a   : > { %5748 = vst.msk [vmem:[#allocation5 + $0x58] sm:$0xf] %vm5258_vm3, %v15428_v29 }
 0x53b   : > { %v5780_v36 = vpop.permute.xlu1 %5779  ;;  %v13044_v39 = vld [vmem:[#allocation5 + $0x48] ss:$12 sps:$4 sm:$0xff]  }
 0x53c   : > { %5796 = vst.msk [vmem:[#allocation5 + $0x58] sm:$0xf] %vm5411_vm7, %v5780_v36 }
 0x543   : > { %v13042_v45 = vld [vmem:[#allocation5 + $0x4c] ss:$12 sps:$4 sm:$0xff]  }
 0x544   : > { %6237 = vmatprep.mubr.bf16.mxu1 %v13042_v45 }
 0x545   : > { %6238 = vmatmul.mubr.bf16.gmra.mxu1 %v13044_v39 }
 0x546   : > { %12879 = vmatprep.mubr.msk.bf16.mxu1 %vm6435_vm8, %v13045_v46  ;;  %v13046_v46 = vld [vmem:[%s18049_s10 + $0x8] sm:$0xff]  }
 0x54d   : > { %v12865_v29 = vpop.f32.mrf.mxu0 }
 0x54f   : > { %v6280_v12 = vpop.f32.mrf.mxu0 }
 0x551   : > { %v12866_v42 = vpop.f32.mrf.mxu0 }
 0x553   : > { %v6283_v56 = vpop.f32.mrf.mxu0 }
 0x560   : > { %v12869_v26 = vpop.f32.mrf.mxu0 }
 0x562   : > { %v6296_v34 = vpop.f32.mrf.mxu0 }
 0x564   : > { %v12870_v0 = vpop.f32.mrf.mxu0 }
 0x566   : > { %v6299_v9 = vpop.f32.mrf.mxu0 }
 0x5c6   : > { %v12523_v22 = vpop.f32.mrf.mxu1 }
 0x5c8   : > { %v12524_v16 = vpop.f32.mrf.mxu1 }
 0x5c9   : > { %v12525_v4 = vadd.f32 %v12524_v16, %v12523_v22  ;;  %v13047_v22 = vld [vmem:[%s18049_s10 + $0x10] sm:$0xff]   ;;  %v13048_v16 = vld [vmem:[%s18049_s10 + $0x18] sm:$0xff]  }
 0x5ca   : > { %v12526_v51 = vpop.f32.mrf.mxu1 }
 0x5cb   : > { %v6216_v59 = vadd.f32 %v12525_v4, %v12120_v21 }
 0x5cc   : > { %v12527_v48 = vpop.f32.mrf.mxu1 }
 0x5cd   : > { %v12528_v57 = vadd.f32 %v12527_v48, %v12526_v51  ;;  %v6281_v63 = vadd.f32 %v6280_v12, %v6216_v59  ;;  %v13049_v51 = vld [vmem:[%s18049_s10 + $0x20] sm:$0xff]   ;;  %v13050_v48 = vld [vmem:[%s18049_s10 + $0x28] sm:$0xff]   ;;  %v13056_v12 = vld [vmem:[%s18049_s10 + $0x58] sm:$0xff]  }
 0x5cf   : > { %v6219_v44 = vadd.f32 %v12528_v57, %v12120_v21  ;;  %v6311_v45 = vmax.f32 %v6281_v63, 0.0 }
 0x5d1   : > { %v6284_v28 = vadd.f32 %v6283_v56, %v6219_v44  ;;  %v13060_v56 = vld [vmem:[%s18049_s10 + $0x78] sm:$0xff]  }
 0x5d3   : > { %v6312_v36 = vmax.f32 %v6284_v28, 0.0 }
 0x5d5   : > { %v6351_v39 = vpack.c.bf16 %v6312_v36, %v6311_v45 }
 0x5dd   : > { %v12529_v43 = vpop.f32.mrf.mxu1 }
 0x5df   : > { %v12530_v18 = vpop.f32.mrf.mxu1 }
 0x5e0   : > { %v12531_v33 = vadd.f32 %v12530_v18, %v12529_v43  ;;  %v13051_v43 = vld [vmem:[%s18049_s10 + $0x30] sm:$0xff]   ;;  %v13052_v18 = vld [vmem:[%s18049_s10 + $0x38] sm:$0xff]  }
 0x5e1   : > { %v12532_v58 = vpop.f32.mrf.mxu1 }
 0x5e2   : > { %v6224_v62 = vadd.f32 %v12531_v33, %v12120_v21 }
 0x5e3   : > { %v12533_v2 = vpop.f32.mrf.mxu1 }
 0x5e4   : > { %v12534_v55 = vadd.f32 %v12533_v2, %v12532_v58  ;;  %v6289_v17 = vadd.f32 %v12865_v29, %v6224_v62  ;;  %v13053_v58 = vld [vmem:[%s18049_s10 + $0x40] sm:$0xff]   ;;  %v13054_v29 = vld [vmem:[%s18049_s10 + $0x48] sm:$0xff]   ;;  %v13055_v2 = vld [vmem:[%s18049_s10 + $0x50] sm:$0xff]  }
 0x5e6   : > { %v6227_v38 = vadd.f32 %v12534_v55, %v12120_v21  ;;  %v6313_v7 = vmax.f32 %v6289_v17, 0.0 }
 0x5e8   : > { %v6292_v32 = vadd.f32 %v12866_v42, %v6227_v38  ;;  %v13058_v42 = vld [vmem:[%s18049_s10 + $0x68] sm:$0xff]  }
 0x5ea   : > { %v6314_v5 = vmax.f32 %v6292_v32, 0.0 }
 0x5ec   : > { %v6352_v35 = vpack.c.bf16 %v6314_v5, %v6313_v7 }
 0x5f6   : > { %v12535_v19 = vpop.f32.mrf.mxu1 }
 0x5f8   : > { %v12536_v14 = vpop.f32.mrf.mxu1 }
 0x5f9   : > { %v12537_v47 = vadd.f32 %v12536_v14, %v12535_v19  ;;  %v13057_v19 = vld [vmem:[%s18049_s10 + $0x60] sm:$0xff]   ;;  %v13059_v14 = vld [vmem:[%s18049_s10 + $0x70] sm:$0xff]  }
 0x5fa   : > { %v12538_v10 = vpop.f32.mrf.mxu1 }
 0x5fb   : > { %v6232_v37 = vadd.f32 %v12537_v47, %v12120_v21 }
 0x5fc   : > { %v12539_v3 = vpop.f32.mrf.mxu1 }
 0x5fd   : > { %v12540_v15 = vadd.f32 %v12539_v3, %v12538_v10  ;;  %v6297_v6 = vadd.f32 %v6296_v34, %v6232_v37  ;;  %v18061_v10 = vmov 0  }
 0x5fe   : > { %6655 = vst.msk [vmem:[#allocation6 + $0x24] sm:$0xf] %vm6645_vm9, %v18061_v10  ;;  %6646 = vst.msk [vmem:[#allocation6] sm:$0xf] %vm6645_vm9, %v18061_v10 }
 0x5ff   : > { %v6235_v11 = vadd.f32 %v12540_v15, %v12120_v21  ;;  %v6315_v27 = vmax.f32 %v6297_v6, 0.0  ;;  %6647 = vst.msk [vmem:[#allocation6 + $0x4] sm:$0xf] %vm6645_vm9, %v18061_v10  ;;  %6648 = vst.msk [vmem:[#allocation6 + $0x8] sm:$0xf] %vm6645_vm9, %v18061_v10 }
 0x600   : > { %6649 = vst.msk [vmem:[#allocation6 + $0xc] sm:$0xf] %vm6645_vm9, %v18061_v10  ;;  %6650 = vst.msk [vmem:[#allocation6 + $0x10] sm:$0xf] %vm6645_vm9, %v18061_v10 }
 0x601   : > { %v6300_v52 = vadd.f32 %v6299_v9, %v6235_v11  ;;  %6651 = vst.msk [vmem:[#allocation6 + $0x14] sm:$0xf] %vm6645_vm9, %v18061_v10  ;;  %6652 = vst.msk [vmem:[#allocation6 + $0x18] sm:$0xf] %vm6645_vm9, %v18061_v10 }
 0x602   : > { %6653 = vst.msk [vmem:[#allocation6 + $0x1c] sm:$0xf] %vm6645_vm9, %v18061_v10  ;;  %6654 = vst.msk [vmem:[#allocation6 + $0x20] sm:$0xf] %vm6645_vm9, %v18061_v10 }
 0x603   : > { %v6316_v40 = vmax.f32 %v6300_v52, 0.0  ;;  %6656 = vst.msk [vmem:[#allocation6 + $0x28] sm:$0xf] %vm6645_vm9, %v18061_v10  ;;  %6657 = vst.msk [vmem:[#allocation6 + $0x2c] sm:$0xf] %vm6645_vm9, %v18061_v10 }
 0x604   : > { %6658 = vst.msk [vmem:[#allocation6 + $0x30] sm:$0xf] %vm6645_vm9, %v18061_v10  ;;  %6659 = vst.msk [vmem:[#allocation6 + $0x34] sm:$0xf] %vm6645_vm9, %v18061_v10 }
 0x605   : > { %v12541_v60 = vpop.f32.mrf.mxu1  ;;  %v6353_v61 = vpack.c.bf16 %v6316_v40, %v6315_v27  ;;  %6660 = vst.msk [vmem:[#allocation6 + $0x38] sm:$0xf] %vm6645_vm9, %v18061_v10  ;;  %6661 = vst.msk [vmem:[#allocation6 + $0x3c] sm:$0xf] %vm6645_vm9, %v18061_v10  ;;  %v6879_v47 = vld [vmem:[#allocation6] sm:$0x8] }
 0x606   : > { %6662 = vst.msk [vmem:[#allocation6 + $0x40] sm:$0xf] %vm6645_vm9, %v18061_v10  ;;  %6663 = vst.msk [vmem:[#allocation6 + $0x44] sm:$0xf] %vm6645_vm9, %v18061_v10  ;;  %v7344_v3 = vld [vmem:[#allocation6 + $0x8] sm:$0xf] }
 0x607   : > { %v12542_v20 = vpop.f32.mrf.mxu1  ;;  %6664 = vst.msk [vmem:[#allocation6 + $0x48] sm:$0xf] %vm6645_vm9, %v18061_v10  ;;  %6665 = vst.msk [vmem:[#allocation6 + $0x4c] sm:$0xf] %vm6645_vm9, %v18061_v10  ;;  %7409 = vrot.lane.b32.xlu1 %v7344_v3, %s13206_s13  ;;  %v6881_v38 = vld [vmem:[#allocation6 + $0x8] sm:$0xf] }
 0x608   : > { %v12543_v30 = vadd.f32 %v12542_v20, %v12541_v60  ;;  %6666 = vst.msk [vmem:[#allocation6 + $0x50] sm:$0xf] %vm6645_vm9, %v18061_v10  ;;  %6667 = vst.msk [vmem:[#allocation6 + $0x54] sm:$0xf] %vm6645_vm9, %v18061_v10  ;;  %v8032_v60 = vld [vmem:[#allocation6 + $0x10] sm:$0x8] }
 0x609   : > { %v12544_v54 = vpop.f32.mrf.mxu1  ;;  %6668 = vst.msk [vmem:[#allocation6 + $0x58] sm:$0xf] %vm6645_vm9, %v18061_v10  ;;  %6669 = vst.msk [vmem:[#allocation6 + $0x5c] sm:$0xf] %vm6645_vm9, %v18061_v10  ;;  %v8035_v34 = vld [vmem:[#allocation6 + $0x20] sm:$0x8] }
 0x60a   : > { %v6240_v53 = vadd.f32 %v12543_v30, %v12120_v21  ;;  %6670 = vst.msk [vmem:[#allocation6 + $0x60] sm:$0xf] %vm6645_vm9, %v18061_v10  ;;  %6671 = vst.msk [vmem:[#allocation6 + $0x64] sm:$0xf] %vm6645_vm9, %v18061_v10  ;;  %v8629_v15 = vld [vmem:[#allocation6 + $0x2c] sm:$0x1] }
 0x60b   : > { %v12545_v50 = vpop.f32.mrf.mxu1  ;;  %6672 = vst.msk [vmem:[#allocation6 + $0x68] sm:$0xf] %vm6645_vm9, %v18061_v10  ;;  %6673 = vst.msk [vmem:[#allocation6 + $0x6c] sm:$0xf] %vm6645_vm9, %v18061_v10  ;;  %v6880_v30 = vld [vmem:[#allocation6 + $0x4] sm:$0xf] }
 0x60c   : > { %v12546_v8 = vadd.f32 %v12545_v50, %v12544_v54  ;;  %v6305_v41 = vadd.f32 %v12869_v26, %v6240_v53  ;;  %6674 = vst.msk [vmem:[#allocation6 + $0x70] sm:$0xf] %vm6645_vm9, %v18061_v10  ;;  %6675 = vst.msk [vmem:[#allocation6 + $0x74] sm:$0xf] %vm6645_vm9, %v18061_v10  ;;  %v7343_v26 = vld [vmem:[#allocation6 + $0x4] sm:$0xf] }
 0x60d   : > { %6676 = vst.msk [vmem:[#allocation6 + $0x78] sm:$0xf] %vm6645_vm9, %v18061_v10  ;;  %6677 = vst.msk [vmem:[#allocation6 + $0x7c] sm:$0xf] %vm6645_vm9, %v18061_v10  ;;  %7407 = vrot.lane.b32.xlu0 %v7343_v26, %s13206_s13  ;;  %v8041_v20 = vld [vmem:[#allocation6 + $0x40] sm:$0x8] }
 0x60e   : > { %v6243_v13 = vadd.f32 %v12546_v8, %v12120_v21  ;;  %v6317_v24 = vmax.f32 %v6305_v41, 0.0  ;;  %6678 = vst.msk [vmem:[#allocation6 + $0x80] sm:$0xf] %vm6645_vm9, %v18061_v10  ;;  %6679 = vst.msk [vmem:[#allocation6 + $0x84] sm:$0xf] %vm6645_vm9, %v18061_v10  ;;  %v6928_v21 = vshrl.u32 %v6879_v47, 16 }
 0x60f   : > { %6680 = vst.msk [vmem:[#allocation6 + $0x88] sm:$0xf] %vm6645_vm9, %v18061_v10  ;;  %6681 = vst.msk [vmem:[#allocation6 + $0x8c] sm:$0xf] %vm6645_vm9, %v18061_v10  ;;  %v6933_v54 = vshrl.u32 %v6880_v30, 16  ;;  %v6936_v55 = vshll.u32 %v6880_v30, 16 }
 0x610   : > { %v6308_v25 = vadd.f32 %v12870_v0, %v6243_v13  ;;  %6682 = vst.msk [vmem:[#allocation6 + $0x90] sm:$0xf] %vm6645_vm9, %v18061_v10  ;;  %6683 = vst.msk [vmem:[#allocation6 + $0x94] sm:$0xf] %vm6645_vm9, %v18061_v10  ;;  %v8626_v0 = vld [vmem:[#allocation6 + $0x1c] sm:$0x1] }
 0x611   : > { %6684 = vst.msk [vmem:[#allocation6 + $0x98] sm:$0xf] %vm6645_vm9, %v18061_v10  ;;  %6685 = vst.msk [vmem:[#allocation6 + $0x9c] sm:$0xf] %vm6645_vm9, %v18061_v10  ;;  %v8103_v11 = vshrl.u32 %v8035_v34, 16  ;;  %v8081_v53 = vshrl.u32 %v8032_v60, 16 }
 0x612   : > { %v6318_v1 = vmax.f32 %v6308_v25, 0.0  ;;  %6686 = vst.msk [vmem:[#allocation6 + $0xa0] sm:$0xf] %vm6645_vm9, %v18061_v10  ;;  %6687 = vst.msk [vmem:[#allocation6 + $0xa4] sm:$0xf] %vm6645_vm9, %v18061_v10  ;;  %v8716_v50 = vshll.u32 %v8629_v15, 16 }
 0x613   : > { %6688 = vst.msk [vmem:[#allocation6 + $0xa8] sm:$0xf] %vm6645_vm9, %v18061_v10  ;;  %6689 = vst.msk [vmem:[#allocation6 + $0xac] sm:$0xf] %vm6645_vm9, %v18061_v10  ;;  %v12219_v33 = vrot.slane %v6928_v21, 11  ;;  %v6935_v37 = vrot.slane %v6933_v54, 7 }
 0x614   : > { %v6354_v23 = vpack.c.bf16 %v6318_v1, %v6317_v24  ;;  %6690 = vst.msk [vmem:[#allocation6 + $0xb0] sm:$0xf] %vm6645_vm9, %v18061_v10  ;;  %6691 = vst.msk [vmem:[#allocation6 + $0xb4] sm:$0xf] %vm6645_vm9, %v18061_v10  ;;  %v8147_v8 = vshrl.u32 %v8041_v20, 16  ;;  %v8692_v9 = vshll.u32 %v8626_v0, 16 }
 0x615   : > { %6692 = vst.msk [vmem:[#allocation6 + $0xb8] sm:$0xf] %vm6645_vm9, %v18061_v10  ;;  %6693 = vst.msk [vmem:[#allocation6 + $0xbc] sm:$0xf] %vm6645_vm9, %v18061_v10  ;;  %v8038_v57 = vld [vmem:[#allocation6 + $0x30] sm:$0x8]  ;;  %v6938_v41 = vor.u32 %v6936_v55, %v6935_v37 }
 0x616   : > { %12871 = vmatprep.subr.bf16.mxu1 %v6354_v23  ;;  %6694 = vst.msk [vmem:[#allocation6 + $0xc0] sm:$0xf] %vm6645_vm9, %v18061_v10  ;;  %6695 = vst.msk [vmem:[#allocation6 + $0xc4] sm:$0xf] %vm6645_vm9, %v18061_v10  ;;  %v8635_v52 = vld [vmem:[#allocation6 + $0x4c] sm:$0x1] }
 0x617   : > { %12872 = vmatpush3.bf16.msra.mxu1 %v6354_v23  ;;  %6696 = vst.msk [vmem:[#allocation6 + $0xc8] sm:$0xf] %vm6645_vm9, %v18061_v10  ;;  %6697 = vst.msk [vmem:[#allocation6 + $0xcc] sm:$0xf] %vm6645_vm9, %v18061_v10  ;;  %v6942_v13 = vshrl.u32 %v6881_v38, 16  ;;  %v6945_v4 = vshll.u32 %v6881_v38, 16  ;;  %v6939_v40 = vsel %vm13468_vm6, %v12219_v33, %v6938_v41 }
 0x618   : > { %12873 = vmatprep.subr.bf16.mxu1 %v6353_v61  ;;  %6698 = vst.msk [vmem:[#allocation6 + $0xd0] sm:$0xf] %vm6645_vm9, %v18061_v10  ;;  %6699 = vst.msk [vmem:[#allocation6 + $0xd4] sm:$0xf] %vm6645_vm9, %v18061_v10  ;;  %v6885_v62 = vld [vmem:[#allocation6 + $0x20] sm:$0x8] }
 0x619   : > { %6700 = vst.msk [vmem:[#allocation6 + $0xd8] sm:$0xf] %vm6645_vm9, %v18061_v10  ;;  %6701 = vst.msk [vmem:[#allocation6 + $0xdc] sm:$0xf] %vm6645_vm9, %v18061_v10  ;;  %v15690_v6 = vrot.slane %v8103_v11, 11  ;;  %v15692_v25 = vrot.slane %v8081_v53, 11 }
 0x61a   : > { %6702 = vst.msk [vmem:[#allocation6 + $0xe0] sm:$0xf] %vm6645_vm9, %v18061_v10  ;;  %6703 = vst.msk [vmem:[#allocation6 + $0xe4] sm:$0xf] %vm6645_vm9, %v18061_v10  ;;  %v15694_v44 = vrot.slane %v8716_v50, 5  ;;  %v8125_v32 = vshrl.u32 %v8038_v57, 16 }
 0x61b   : > { %12874 = vmatpush3.bf16.msra.mxu1 %v6353_v61  ;;  %6704 = vst.msk [vmem:[#allocation6 + $0xe8] sm:$0xf] %vm6645_vm9, %v18061_v10  ;;  %6705 = vst.msk [vmem:[#allocation6 + $0xec] sm:$0xf] %vm6645_vm9, %v18061_v10  ;;  %v6940_v24 = vrot.slane %v6935_v37, 4  ;;  %v6944_v1 = vrot.slane %v6942_v13, 7 }
 0x61c   : > { %12875 = vmatprep.subr.bf16.mxu1 %v6352_v35  ;;  %6706 = vst.msk [vmem:[#allocation6 + $0xf0] sm:$0xf] %vm6645_vm9, %v18061_v10  ;;  %6707 = vst.msk [vmem:[#allocation6 + $0xf4] sm:$0xf] %vm6645_vm9, %v18061_v10  ;;  %v15698_v59 = vrot.slane %v8147_v8, 11  ;;  %v15700_v17 = vrot.slane %v8692_v9, 5 }
 0x61d   : > { %6708 = vst.msk [vmem:[#allocation6 + $0xf8] sm:$0xf] %vm6645_vm9, %v18061_v10  ;;  %6709 = vst.msk [vmem:[#allocation6 + $0xfc] sm:$0xf] %vm6645_vm9, %v18061_v10  ;;  %v8764_v27 = vshll.u32 %v8635_v52, 16  ;;  %v6972_v23 = vshrl.u32 %v6885_v62, 16  ;;  %v6947_v7 = vor.u32 %v6945_v4, %v6944_v1 }
 0x61e   : > { %6710 = vst.msk [vmem:[#allocation6 + $0x100] sm:$0xf] %vm6645_vm9, %v18061_v10  ;;  %6711 = vst.msk [vmem:[#allocation6 + $0x104] sm:$0xf] %vm6645_vm9, %v18061_v10  ;;  %v9185_v28 = vld [vmem:[#allocation6 + $0x20] sm:$0x8] }
 0x61f   : > { %12876 = vmatpush3.bf16.msra.mxu1 %v6352_v35  ;;  %6712 = vst.msk [vmem:[#allocation6 + $0x108] sm:$0xf] %vm6645_vm9, %v18061_v10  ;;  %6713 = vst.msk [vmem:[#allocation6 + $0x10c] sm:$0xf] %vm6645_vm9, %v18061_v10  ;;  %v8047_v61 = vld [vmem:[#allocation6 + $0x60] sm:$0x8] }
 0x620   : > { %12877 = vmatprep.subr.bf16.mxu1 %v6351_v39  ;;  %6714 = vst.msk [vmem:[#allocation6 + $0x110] sm:$0xf] %vm6645_vm9, %v18061_v10  ;;  %6715 = vst.msk [vmem:[#allocation6 + $0x114] sm:$0xf] %vm6645_vm9, %v18061_v10  ;;  %v8632_v63 = vld [vmem:[#allocation6 + $0x3c] sm:$0x1] }
 0x621   : > { %6716 = vst.msk [vmem:[#allocation6 + $0x118] sm:$0xf] %vm6645_vm9, %v18061_v10  ;;  %6717 = vst.msk [vmem:[#allocation6 + $0x11c] sm:$0xf] %vm6645_vm9, %v18061_v10  ;;  %v6882_v35 = vld [vmem:[#allocation6 + $0x10] sm:$0x8] }
 0x622   : > { %7311 = vst.msk [vmem:[#allocation7] sm:$0xf] %vm6645_vm9, %v6939_v40  ;;  %v8044_v45 = vld [vmem:[#allocation6 + $0x50] sm:$0x8]  ;;  %v8638_v26 = vld [vmem:[#allocation6 + $0x5c] sm:$0x1] }
 0x623   : > { %12878 = vmatpush3.bf16.msra.mxu1 %v6351_v39  ;;  %v8641_v39 = vld [vmem:[#allocation6 + $0x6c] sm:$0x1]  ;;  %v6950_v3 = vshrl.u32 %v6882_v35, 16  ;;  %v15715_v15 = vrot.slane %v8764_v27, 5  ;;  %v13062_v54 = vld [vmem:[%s18044_s5 + $0x38] sm:$0xff]   ;;  %v8788_v33 = vshll.u32 %v8638_v26, 16 }
 0x624   : > { %v8812_v10 = vshll.u32 %v8641_v39, 16  ;;  %v6888_v55 = vld [vmem:[#allocation6 + $0x30] sm:$0x8]  ;;  %v13063_v8 = vld [vmem:[%s18044_s5 + $0x70] sm:$0xff]  }
 0x625   : > { %v8050_v37 = vld [vmem:[#allocation6 + $0x70] sm:$0x8]  ;;  %v15734_v41 = vrot.slane %v6950_v3, 11 }
 0x626   : > { %12880 = vmatmul.mubr.msk.bf16.vlgmr.msra.gmra.mxu1 %vm6435_vm8, %v13046_v46  ;;  %v7541_v46 = vld [vmem:[#allocation6 + $0x1c] sm:$0x1]  ;;  %v15732_v38 = vrot.slane %v8812_v10, 5  ;;  %v9188_v1 = vld [vmem:[#allocation6 + $0x30] sm:$0x8] }
 0x627   : > { %12883 = vmatprep.mubr.msk.bf16.mxu1 %vm6435_vm8, %v13047_v22  ;;  %v7628_v34 = vshll.u32 %v7541_v46, 16 }
 0x629   : > { %v15736_v13 = vrot.slane %v7628_v34, 5 }
 0x62e   : > { %12884 = vmatmul.mubr.msk.bf16.gmra.mxu1 %vm6435_vm8, %v13048_v16  ;;  %v15703_v16 = vrot.slane %v8125_v32, 11 }
 0x62f   : > { %12887 = vmatprep.mubr.msk.bf16.mxu1 %vm6435_vm8, %v13049_v51  ;;  %v6948_v51 = vsel %vm13468_vm6, %v6940_v24, %v6947_v7  ;;  %v6994_v24 = vshrl.u32 %v6888_v55, 16 }
 0x630   : > { %7312 = vst.msk [vmem:[#allocation7 + $0x14] sm:$0xf] %vm6645_vm9, %v6948_v51  ;;  %v15753_v51 = vld [vmem:[#allocation6 + $0x8c] sm:$0x1] }
 0x636   : > { %12888 = vmatmul.mubr.msk.bf16.gmra.mxu1 %vm6435_vm8, %v13050_v48  ;;  %v9234_v48 = vshrl.u32 %v9185_v28, 16 }
 0x637   : > { %12891 = vmatprep.mubr.msk.bf16.mxu1 %vm6435_vm8, %v13051_v43  ;;  %v6891_v43 = vld [vmem:[#allocation6 + $0x40] sm:$0x8] }
 0x638   : > { %v7016_v20 = vshrl.u32 %v6891_v43, 16  ;;  %v15717_v21 = vrot.slane %v9234_v48, 11  ;;  %v9256_v48 = vshrl.u32 %v9188_v1, 16 }
 0x63a   : > { %v15740_v32 = vrot.slane %v7016_v20, 11 }
 0x63e   : > { %12892 = vmatmul.mubr.msk.bf16.gmra.mxu1 %vm6435_vm8, %v13052_v18  ;;  %v9191_v18 = vld [vmem:[#allocation6 + $0x40] sm:$0x8] }
 0x63f   : > { %12895 = vmatprep.mubr.msk.bf16.mxu1 %vm6435_vm8, %v13053_v58  ;;  %v9278_v47 = vshrl.u32 %v9191_v18, 16 }
 0x641   : > { %v15742_v40 = vrot.slane %v9278_v47, 11 }
 0x646   : > { %12896 = vmatmul.mubr.msk.bf16.gmra.mxu1 %vm6435_vm8, %v13054_v29  ;;  %v8191_v29 = vshrl.u32 %v8047_v61, 16  ;;  %v8213_v61 = vshrl.u32 %v8050_v37, 16  ;;  %v15773_v37 = vrot.slane %v9256_v48, 11 }
 0x647   : > { %12899 = vmatprep.mubr.msk.bf16.mxu1 %vm6435_vm8, %v13055_v2  ;;  %v8740_v2 = vshll.u32 %v8632_v63, 16 }
 0x648   : > { %v15723_v53 = vrot.slane %v8191_v29, 11  ;;  %v15762_v26 = vrot.slane %v8213_v61, 11 }
 0x649   : > { %v15725_v50 = vrot.slane %v8740_v2, 5  ;;  %v13064_v2 = vld [vmem:[%s18044_s5 + $0x30] sm:$0xff]  }
 0x64e   : > { %12900 = vmatmul.mubr.msk.bf16.gmra.mxu1 %vm6435_vm8, %v13056_v12  ;;  %v8053_v12 = vld [vmem:[#allocation6 + $0x80] sm:$0x8] }
 0x64f   : > { %12903 = vmatprep.mubr.msk.bf16.mxu1 %vm6435_vm8, %v13057_v19  ;;  %v15709_v19 = vrot.slane %v6972_v23, 11  ;;  %v8235_v0 = vshrl.u32 %v8053_v12, 16  ;;  %v15759_v12 = vrot.slane %v6994_v24, 11  ;;  %v13067_v24 = vld [vmem:[%s18044_s5 + $0x60] sm:$0xff]  }
 0x656   : > { %12904 = vmatmul.mubr.msk.bf16.gmra.mxu1 %vm6435_vm8, %v13058_v42  ;;  %v13061_v42 = vld [vmem:[%s18044_s5 + $0x78] sm:$0xff]  }
 0x657   : > { %12907 = vmatprep.mubr.msk.bf16.mxu1 %vm6435_vm8, %v13059_v14  ;;  %12573 = vmatprep.subr.bf16.mxu0 %v13061_v42 }
 0x658   : > { %12574 = vmatpush3.bf16.msra.mxu0 %v13062_v54 }
 0x659   : > { %12575 = vmatprep.subr.bf16.mxu0 %v13063_v8 }
 0x65c   : > { %12576 = vmatpush3.bf16.msra.mxu0 %v13064_v2  ;;  %v13068_v2 = vld [vmem:[%s18044_s5 + $0x20] sm:$0xff]  }
 0x65e   : > { %12908 = vmatmul.mubr.msk.bf16.gmra.mxu1 %vm6435_vm8, %v13060_v56  ;;  %v8169_v56 = vshrl.u32 %v8044_v45, 16  ;;  %v15749_v45 = vrot.slane %v8788_v33, 5  ;;  %v13066_v33 = vld [vmem:[%s18044_s5 + $0x28] sm:$0xff]  }
 0x660   : > { %v15730_v57 = vrot.slane %v8169_v56, 11 }
 0x679   : > { %v7410_v62 = vpop.permute.xlu1 %7409 }
 0x67a   : > { %7505 = vst.msk [vmem:[#allocation7 + $0x14] sm:$0xf] %vm7503_vm10, %v7410_v62 }
 0x67f   : > { %v7408_v52 = vpop.permute.xlu0 %7407 }
 0x680   : > { %7504 = vst.msk [vmem:[#allocation7] sm:$0xf] %vm7503_vm10, %v7408_v52 }
 0x6e6   : > { %v12881_v5 = vpop.f32.mrf.mxu1 }
 0x6e7   : > { %v12416_v36 = vpack.c.bf16 %v12881_v5, %v12881_v5  ;;  %v15744_v5 = vrot.slane %v8235_v0, 11 }
 0x6e8   : > { %v6518_v22 = vpop.f32.mrf.mxu1 }
 0x6e9   : > { %6849 = vst.msk [vmem:[#allocation6 + $0x24] sm:$0xf] %vm6645_vm9, %v12416_v36  ;;  %v12414_v58 = vpack.c.bf16 %v6518_v22, %v6518_v22 }
 0x6ea   : > { %v12882_v14 = vpop.f32.mrf.mxu1 }
 0x6eb   : > { %6847 = vst.msk [vmem:[#allocation6 + $0x14] sm:$0xf] %vm6645_vm9, %v12414_v58  ;;  %v12417_v60 = vpack.c.bf16 %v12882_v14, %v12882_v14 }
 0x6ec   : > { %v6521_v30 = vpop.f32.mrf.mxu1 }
 0x6ed   : > { %6850 = vst.msk [vmem:[#allocation6 + $0x28] sm:$0xf] %vm6645_vm9, %v12417_v60  ;;  %v12415_v11 = vpack.c.bf16 %v6521_v30, %v6521_v30  ;;  %v13065_v30 = vld [vmem:[%s18044_s5 + $0x68] sm:$0xff]  }
 0x6ee   : > { %v12885_v9 = vpop.f32.mrf.mxu1  ;;  %12577 = vmatprep.subr.bf16.mxu0 %v13065_v30 }
 0x6ef   : > { %6848 = vst.msk [vmem:[#allocation6 + $0x18] sm:$0xf] %vm6645_vm9, %v12415_v11  ;;  %v12420_v4 = vpack.c.bf16 %v12885_v9, %v12885_v9  ;;  %12578 = vmatpush3.bf16.msra.mxu0 %v13066_v33 }
 0x6f0   : > { %v9841_v27 = vld [vmem:[#allocation6 + $0x24] sm:$0xf]  ;;  %v6534_v28 = vpop.f32.mrf.mxu1  ;;  %12579 = vmatprep.subr.bf16.mxu0 %v13067_v24 }
 0x6f1   : > { %v7347_v23 = vld [vmem:[#allocation6 + $0x24] sm:$0xf]  ;;  %v9890_v63 = vshrl.u32 %v9841_v27, 16  ;;  %v9893_v7 = vshll.u32 %v9841_v27, 16  ;;  %6853 = vst.msk [vmem:[#allocation6 + $0x44] sm:$0xf] %vm6645_vm9, %v12420_v4  ;;  %v12418_v35 = vpack.c.bf16 %v6534_v28, %v6534_v28 }
 0x6f2   : > { %7415 = vrot.lane.b32.xlu0 %v7347_v23, %s13206_s13  ;;  %v8036_v36 = vld [vmem:[#allocation6 + $0x24] sm:$0xf]  ;;  %v12886_v39 = vpop.f32.mrf.mxu1  ;;  %v15751_v22 = vld [vmem:[#allocation6 + $0x14] sm:$0xf] }
 0x6f3   : > { %v8108_v46 = vshrl.u32 %v8036_v36, 16  ;;  %v9892_v43 = vrot.slane %v9890_v63, 4  ;;  %v9895_v18 = vrot.slane %v9893_v7, 5  ;;  %v9649_v58 = vld [vmem:[#allocation6 + $0x24] sm:$0xf]  ;;  %v12421_v29 = vpack.c.bf16 %v12886_v39, %v12886_v39  ;;  %12580 = vmatpush3.bf16.msra.mxu0 %v13068_v2 }
 0x6f4   : > { %6851 = vst.msk [vmem:[#allocation6 + $0x34] sm:$0xf] %vm6645_vm9, %v12418_v35  ;;  %v9842_v42 = vld [vmem:[#allocation6 + $0x28] sm:$0xf]  ;;  %v6537_v56 = vpop.f32.mrf.mxu1  ;;  %v8086_v10 = vshrl.u32 %v15751_v22, 16  ;;  %v8111_v0 = vshll.u32 %v8036_v36, 16 }
 0x6f5   : > { %v7348_v14 = vld [vmem:[#allocation6 + $0x28] sm:$0xf]  ;;  %v9896_v3 = vor.u32 %v9895_v18, %v9892_v43  ;;  %v9899_v34 = vshll.u32 %v9842_v42, 16  ;;  %v9903_v60 = vshrl.u32 %v9842_v42, 16  ;;  %6854 = vst.msk [vmem:[#allocation6 + $0x48] sm:$0xf] %vm6645_vm9, %v12421_v29  ;;  %v12419_v55 = vpack.c.bf16 %v6537_v56, %v6537_v56 }
 0x6f6   : > { %9713 = vrot.lane.b32.xlu0 %v9649_v58, %s13206_s13  ;;  %7417 = vrot.lane.b32.xlu1 %v7348_v14, %s13206_s13  ;;  %v8110_v20 = vrot.slane %v8108_v46, 7  ;;  %v8037_v47 = vld [vmem:[#allocation6 + $0x28] sm:$0xf]  ;;  %v8627_v11 = vld [vmem:[#allocation6 + $0x24] sm:$0xf]  ;;  %v12889_v4 = vpop.f32.mrf.mxu1  ;;  %v15788_v39 = vrot.slane %v8086_v10, 7 }
 0x6f7   : > { %v8117_v54 = vshrl.u32 %v8037_v47, 16  ;;  %v15775_v8 = vrot.slane %v9899_v34, 5  ;;  %v15777_v9 = vrot.slane %v9903_v60, 4  ;;  %v7345_v52 = vld [vmem:[#allocation6 + $0x14] sm:$0xf]  ;;  %v8120_v61 = vshll.u32 %v8037_v47, 16 }
 0x6f8   : > { %v9847_v1 = vld [vmem:[#allocation6 + $0x44] sm:$0xf]  ;;  %v9650_v27 = vld [vmem:[#allocation6 + $0x28] sm:$0xf]  ;;  %v8113_v23 = vor.u32 %v8111_v0, %v8110_v20  ;;  %6852 = vst.msk [vmem:[#allocation6 + $0x38] sm:$0xf] %vm6645_vm9, %v12419_v55  ;;  %v12424_v63 = vpack.c.bf16 %v12889_v4, %v12889_v4 }
 0x6f9   : > { %v8119_v28 = vrot.slane %v8117_v54, 7  ;;  %v15784_v7 = vrot.slane %v9896_v3, 4  ;;  %v9938_v35 = vshrl.u32 %v9847_v1, 16  ;;  %v9941_v36 = vshll.u32 %v9847_v1, 16  ;;  %v7346_v48 = vld [vmem:[#allocation6 + $0x18] sm:$0xf] }
 0x6fa   : > { %7411 = vrot.lane.b32.xlu0 %v7345_v52, %s13206_s13  ;;  %9715 = vrot.lane.b32.xlu1 %v9650_v27, %s13206_s13  ;;  %v8115_v43 = vrot.slane %v8110_v20, 4  ;;  %v8697_v58 = vshrl.u32 %v8627_v11, 16  ;;  %v8700_v29 = vshll.u32 %v8627_v11, 16  ;;  %6857 = vst.msk [vmem:[#allocation6 + $0x64] sm:$0xf] %vm6645_vm9, %v12424_v63  ;;  %v9906_v42 = vor.u32 %v15777_v9, %v15775_v8  ;;  %v13069_v9 = vld [vmem:[%s18044_s5 + $0x58] sm:$0xff]  }
 0x6fb   : > { %v9844_v46 = vld [vmem:[#allocation6 + $0x34] sm:$0xf]  ;;  %v8122_v18 = vor.u32 %v8120_v61, %v8119_v28  ;;  %v9940_v14 = vrot.slane %v9938_v35, 4  ;;  %v9943_v56 = vrot.slane %v9941_v36, 5  ;;  %v8628_v3 = vld [vmem:[#allocation6 + $0x28] sm:$0xf]  ;;  %v8114_v20 = vsel %vm13468_vm6, %v15690_v6, %v8113_v23  ;;  %12581 = vmatprep.subr.bf16.mxu0 %v13069_v9 }
 0x6fc   : > { %v9914_v10 = vshrl.u32 %v9844_v46, 16  ;;  %v9917_v34 = vshll.u32 %v9844_v46, 16  ;;  %v9848_v60 = vld [vmem:[#allocation6 + $0x48] sm:$0xf]  ;;  %v8089_v47 = vshll.u32 %v15751_v22, 16  ;;  %v8699_v30 = vrot.slane %v8697_v58, 4 }
 0x6fd   : > { %v9947_v54 = vshll.u32 %v9848_v60, 16  ;;  %v9951_v55 = vshrl.u32 %v9848_v60, 16  ;;  %v8123_v11 = vsel %vm13468_vm6, %v8115_v43, %v8122_v18  ;;  %v7351_v33 = vld [vmem:[#allocation6 + $0x44] sm:$0xf]  ;;  %v8702_v22 = vrot.slane %v8700_v29, 5  ;;  %v6550_v43 = vpop.f32.mrf.mxu1 }
 0x6fe   : > { %v9916_v0 = vrot.slane %v9914_v10, 4  ;;  %8436 = vrot.lane.b32.xlu0 %v8114_v20, %s13206_s13  ;;  %7413 = vrot.lane.b32.xlu1 %v7346_v48, %s13206_s13  ;;  %v9919_v52 = vrot.slane %v9917_v34, 5  ;;  %v15808_v6 = vor.u32 %v8089_v47, %v15788_v39  ;;  %v8706_v4 = vshll.u32 %v8628_v3, 16  ;;  %v8034_v24 = vld [vmem:[#allocation6 + $0x18] sm:$0xf]  ;;  %v13070_v1 = vld [vmem:[%s18044_s5 + $0xf8] sm:$0xff]  }
 0x6ff   : > { %v9944_v27 = vor.u32 %v9943_v56, %v9940_v14  ;;  %v15813_v23 = vrot.slane %v9947_v54, 5  ;;  %v15815_v28 = vrot.slane %v9951_v55, 4  ;;  %v9845_v61 = vld [vmem:[#allocation6 + $0x38] sm:$0xf]  ;;  %v8710_v63 = vshrl.u32 %v8628_v3, 16  ;;  %12685 = vmatprep.subr.bf16.mxu1 %v13070_v1  ;;  %v13071_v14 = vld [vmem:[%s18044_s5 + $0x18] sm:$0xff]  }
 0x700   : > { %v9920_v35 = vor.u32 %v9919_v52, %v9916_v0  ;;  %v9923_v36 = vshll.u32 %v9845_v61, 16  ;;  %v9927_v46 = vshrl.u32 %v9845_v61, 16  ;;  %v8703_v48 = vor.u32 %v8702_v22, %v8699_v30  ;;  %v8624_v34 = vld [vmem:[#allocation6 + $0x14] sm:$0xf]  ;;  %v9653_v20 = vld [vmem:[#allocation6 + $0x44] sm:$0xf]  ;;  %12582 = vmatpush3.bf16.msra.mxu0 %v13071_v14  ;;  %v12890_v52 = vpop.f32.mrf.mxu1 }
 0x701   : > { %v15817_v18 = vrot.slane %v9906_v42, 4  ;;  %v15821_v58 = vrot.slane %v8706_v4, 5  ;;  %v8095_v29 = vshrl.u32 %v8034_v24, 16  ;;  %v9853_v2 = vld [vmem:[#allocation6 + $0x64] sm:$0xf]  ;;  %v8092_v42 = vsel %vm13468_vm6, %v15692_v25, %v15808_v6  ;;  %v13073_v61 = vld [vmem:[%s18044_s5 + $0x50] sm:$0xff]  }
 0x702   : > { %8438 = vrot.lane.b32.xlu1 %v8123_v11, %s13206_s13  ;;  %7423 = vrot.lane.b32.xlu0 %v7351_v33, %s13206_s13  ;;  %v9921_v56 = vrot.slane %v9920_v35, 4  ;;  %v15826_v10 = vrot.slane %v9923_v36, 5  ;;  %v15828_v3 = vrot.slane %v9927_v46, 4  ;;  %v15834_v60 = vrot.slane %v9944_v27, 4  ;;  %v7352_v25 = vld [vmem:[#allocation6 + $0x48] sm:$0xf] }
 0x703   : > { %18062 = vst [vmem:[#allocation9_spill] sm:$0xff] %v15817_v18  ;;  %v15836_v47 = vrot.slane %v8703_v48, 4  ;;  %v8097_v30 = vrot.slane %v8095_v29, 7  ;;  %v8712_v0 = vrot.slane %v8710_v63, 4  ;;  %v9954_v54 = vor.u32 %v15815_v28, %v15813_v23  ;;  %v8625_v9 = vld [vmem:[#allocation6 + $0x18] sm:$0xf]  ;;  %12583 = vmatprep.subr.bf16.mxu0 %v13073_v61 }
 0x704   : > { %v9926_v55 = vsel %vm13458_vm5, %v9921_v56, %v15826_v10  ;;  %v9930_v11 = vor.u32 %v15828_v3, %v15826_v10  ;;  %v9986_v33 = vshrl.u32 %v9853_v2, 16  ;;  %v13072_v6 = vld [vmem:[%s18044_s5 + $0xb8] sm:$0xff]   ;;  %v8098_v22 = vshll.u32 %v8034_v24, 16  ;;  %v9654_v56 = vld [vmem:[#allocation6 + $0x48] sm:$0xf]  ;;  %v13079_v28 = vld [vmem:[%s18044_s5 + $0x8] sm:$0xff]  }
 0x705   : > { %10307 = vst.msk [vmem:[#allocation7 + $0x38] sm:$0xf] %vm6645_vm9, %v9926_v55  ;;  %v8713_v4 = vor.u32 %v8712_v0, %v15821_v58  ;;  %v9989_v1 = vshll.u32 %v9853_v2, 16  ;;  %v12422_v27 = vpack.c.bf16 %v6550_v43, %v6550_v43  ;;  %v8093_v63 = vrot.slane %v15788_v39, 4  ;;  %v8042_v48 = vld [vmem:[#allocation6 + $0x44] sm:$0xf]  ;;  %12686 = vmatpush3.bf16.msra.mxu1 %v13072_v6 }
 0x706   : > { %9721 = vrot.lane.b32.xlu0 %v9653_v20, %s13206_s13  ;;  %7425 = vrot.lane.b32.xlu1 %v7352_v25, %s13206_s13  ;;  %v9988_v35 = vrot.slane %v9986_v33, 4  ;;  %v8673_v36 = vshrl.u32 %v8624_v34, 16  ;;  %v8676_v46 = vshll.u32 %v8624_v34, 16  ;;  %v8709_v24 = vsel %vm13458_vm5, %v15836_v47, %v15821_v58  ;;  %v8043_v2 = vld [vmem:[#allocation6 + $0x48] sm:$0xf]  ;;  %v13074_v39 = vld [vmem:[%s18044_s5 + $0xf0] sm:$0xff]   ;;  %v6553_v25 = vpop.f32.mrf.mxu1 }
 0x707   : > { %v8100_v29 = vor.u32 %v8098_v22, %v8097_v30  ;;  %v9991_v14 = vrot.slane %v9989_v1, 5  ;;  %6855 = vst.msk [vmem:[#allocation6 + $0x54] sm:$0xf] %vm6645_vm9, %v12422_v27  ;;  %v8682_v43 = vshll.u32 %v8625_v9, 16  ;;  %v8686_v0 = vshrl.u32 %v8625_v9, 16  ;;  %v13075_v58 = vld [vmem:[%s18044_s5 + $0x10] sm:$0xff]   ;;  %12687 = vmatprep.subr.bf16.mxu1 %v13074_v39 }
 0x708   : > { %v8675_v34 = vrot.slane %v8673_v36, 4  ;;  %v8678_v20 = vrot.slane %v8676_v46, 5  ;;  %v12425_v55 = vpack.c.bf16 %v12890_v52, %v12890_v52  ;;  %v8714_v47 = vrot.slane %v8713_v4, 4  ;;  %v15871_v22 = vld [vmem:[#allocation6 + $0x34] sm:$0xf]  ;;  %12584 = vmatpush3.bf16.msra.mxu0 %v13075_v58 }
 0x709   : > { %v9992_v30 = vor.u32 %v9991_v14, %v9988_v35  ;;  %v15869_v33 = vrot.slane %v8682_v43, 5  ;;  %v8152_v6 = vshrl.u32 %v8042_v48, 16  ;;  %v8155_v9 = vshll.u32 %v8042_v48, 16  ;;  %v8633_v61 = vld [vmem:[#allocation6 + $0x44] sm:$0xf]  ;;  %v13077_v48 = vld [vmem:[%s18044_s5 + $0x48] sm:$0xff]  }
 0x70a   : > { %8432 = vrot.lane.b32.xlu0 %v8092_v42, %s13206_s13  ;;  %9723 = vrot.lane.b32.xlu1 %v9654_v56, %s13206_s13  ;;  %v8679_v1 = vor.u32 %v8678_v20, %v8675_v34  ;;  %6858 = vst.msk [vmem:[#allocation6 + $0x68] sm:$0xf] %vm6645_vm9, %v12425_v55  ;;  %v8688_v52 = vrot.slane %v8686_v0, 4  ;;  %v8161_v27 = vshrl.u32 %v8043_v2, 16  ;;  %v13076_v42 = vld [vmem:[%s18044_s5 + $0xb0] sm:$0xff]   ;;  %v8101_v4 = vsel %vm13468_vm6, %v8093_v63, %v8100_v29  ;;  %v12893_v34 = vpop.f32.mrf.mxu1  ;;  %v13078_v63 = vld [vmem:[%s18044_s5 + $0xe8] sm:$0xff]  }
 0x70b   : > { %v15879_v35 = vrot.slane %v8152_v6, 7  ;;  %v8164_v36 = vshll.u32 %v8043_v2, 16  ;;  %v12423_v46 = vpack.c.bf16 %v6553_v25, %v6553_v25  ;;  %v8130_v56 = vshrl.u32 %v15871_v22, 16  ;;  %12688 = vmatpush3.bf16.msra.mxu1 %v13076_v42  ;;  %12585 = vmatprep.subr.bf16.mxu0 %v13077_v48  ;;  %v13081_v42 = vld [vmem:[%s18044_s5 + $0x40] sm:$0xff]   ;;  %v8040_v48 = vld [vmem:[#allocation6 + $0x38] sm:$0xf] }
 0x70c   : > { %v15884_v14 = vrot.slane %v8679_v1, 4  ;;  %v8689_v43 = vor.u32 %v8688_v52, %v15869_v33  ;;  %v8163_v39 = vrot.slane %v8161_v27, 7  ;;  %v15894_v29 = vrot.slane %v9954_v54, 4  ;;  %v7349_v54 = vld [vmem:[#allocation6 + $0x34] sm:$0xf]  ;;  %12689 = vmatprep.subr.bf16.mxu1 %v13078_v63  ;;  %12586 = vmatpush3.bf16.msra.mxu0 %v13079_v28  ;;  %v6566_v27 = vpop.f32.mrf.mxu1 }
 0x70d   : > { %v15899_v2 = vrot.slane %v9930_v11, 4  ;;  %v8719_v20 = vsel %vm13458_vm5, %v8714_v47, %v15694_v44  ;;  %6856 = vst.msk [vmem:[#allocation6 + $0x58] sm:$0xf] %vm6645_vm9, %v12423_v46  ;;  %v8745_v0 = vshrl.u32 %v8633_v61, 16  ;;  %v15910_v55 = vrot.slane %v9992_v30, 4  ;;  %v13080_v30 = vld [vmem:[%s18044_s5 + $0xa8] sm:$0xff]   ;;  %12587 = vmatprep.subr.bf16.mxu0 %v13081_v42 }
 0x70e   : > { %18063 = vst [vmem:[#allocation10_spill] sm:$0xff] %v15894_v29  ;;  %9060 = vrot.lane.b32.xlu0 %v8709_v24, %s13206_s13  ;;  %8434 = vrot.lane.b32.xlu1 %v8101_v4, %s13206_s13  ;;  %v9850_v10 = vld [vmem:[#allocation6 + $0x54] sm:$0xf]  ;;  %v15913_v3 = vor.u32 %v8155_v9, %v15879_v35  ;;  %v8159_v11 = vrot.slane %v15879_v35, 4  ;;  %v8133_v24 = vshll.u32 %v15871_v22, 16  ;;  %v15917_v58 = vrot.slane %v8689_v43, 4 }
 0x70f   : > { %18064 = vst [vmem:[#allocation11_spill] sm:$0xff] %v15899_v2  ;;  %18065 = vst [vmem:[#allocation12_spill] sm:$0xff] %v15910_v55  ;;  %v9962_v44 = vshrl.u32 %v9850_v10, 16  ;;  %v9965_v25 = vshll.u32 %v9850_v10, 16  ;;  %v15919_v47 = vrot.slane %v8130_v56, 7  ;;  %v8685_v6 = vsel %vm13458_vm5, %v15884_v14, %v15869_v33  ;;  %12690 = vmatpush3.bf16.msra.mxu1 %v13080_v30 }
 0x710   : > { %v8166_v1 = vor.u32 %v8164_v36, %v8163_v39  ;;  %v8634_v22 = vld [vmem:[#allocation6 + $0x48] sm:$0xf]  ;;  %v8747_v9 = vrot.slane %v8745_v0, 4  ;;  %v8748_v52 = vshll.u32 %v8633_v61, 16  ;;  %v12428_v43 = vpack.c.bf16 %v12893_v34, %v12893_v34  ;;  %v9651_v33 = vld [vmem:[#allocation6 + $0x34] sm:$0xf] }
 0x711   : > { %v9964_v4 = vrot.slane %v9962_v44, 4  ;;  %v9967_v35 = vrot.slane %v9965_v25, 5  ;;  %v9854_v46 = vld [vmem:[#allocation6 + $0x68] sm:$0xf]  ;;  %v12426_v56 = vpack.c.bf16 %v6566_v27, %v6566_v27  ;;  %v7350_v36 = vld [vmem:[#allocation6 + $0x38] sm:$0xf]  ;;  %v15945_v0 = vor.u32 %v8133_v24, %v15919_v47 }
 0x712   : > { %7419 = vrot.lane.b32.xlu0 %v7349_v54, %s13206_s13  ;;  %9062 = vrot.lane.b32.xlu1 %v8719_v20, %s13206_s13  ;;  %v9995_v14 = vshll.u32 %v9854_v46, 16  ;;  %v9999_v39 = vshrl.u32 %v9854_v46, 16  ;;  %v8750_v63 = vrot.slane %v8748_v52, 5  ;;  %v13082_v20 = vld [vmem:[%s18044_s5 + $0xe0] sm:$0xff]   ;;  %v8754_v28 = vshll.u32 %v8634_v22, 16 }
 0x713   : > { %v8758_v54 = vshrl.u32 %v8634_v22, 16  ;;  %6861 = vst.msk [vmem:[#allocation6 + $0x84] sm:$0xf] %vm6645_vm9, %v12428_v43  ;;  %6859 = vst.msk [vmem:[#allocation6 + $0x74] sm:$0xf] %vm6645_vm9, %v12426_v56  ;;  %v13083_v44 = vld [vmem:[%s18044_s5] sm:$0xff]   ;;  %v9968_v25 = vor.u32 %v9967_v35, %v9964_v4  ;;  %12691 = vmatprep.subr.bf16.mxu1 %v13082_v20  ;;  %v15964_v35 = vsel %vm13468_vm6, %v8159_v11, %v8166_v1 }
 0x714   : > { %v8630_v10 = vld [vmem:[#allocation6 + $0x34] sm:$0xf]  ;;  %v15952_v30 = vrot.slane %v9995_v14, 5  ;;  %v10001_v52 = vrot.slane %v9999_v39, 4  ;;  %v9851_v27 = vld [vmem:[#allocation6 + $0x58] sm:$0xf]  ;;  %v8751_v43 = vor.u32 %v8750_v63, %v8747_v9  ;;  %12588 = vmatpush3.bf16.msra.mxu0 %v13083_v44 }
 0x715   : > { %v8139_v42 = vshrl.u32 %v8040_v48, 16  ;;  %v13084_v24 = vld [vmem:[%s18044_s5 + $0xa0] sm:$0xff]   ;;  %v9971_v22 = vshll.u32 %v9851_v27, 16  ;;  %v9975_v46 = vshrl.u32 %v9851_v27, 16  ;;  %v15959_v56 = vrot.slane %v8754_v28, 5 }
 0x716   : > { %18066 = vst [vmem:[#allocation13_spill] sm:$0xff] %v15952_v30  ;;  %9717 = vrot.lane.b32.xlu0 %v9651_v33, %s13206_s13  ;;  %7421 = vrot.lane.b32.xlu1 %v7350_v36, %s13206_s13  ;;  %v10002_v4 = vor.u32 %v10001_v52, %v15952_v30  ;;  %v8142_v39 = vshll.u32 %v8040_v48, 16  ;;  %v8631_v20 = vld [vmem:[#allocation6 + $0x38] sm:$0xf]  ;;  %v13088_v33 = vld [vmem:[%s18044_s5 + $0xd8] sm:$0xff]   ;;  %v8760_v63 = vrot.slane %v8758_v54, 4 }
 0x717   : > { %v8141_v14 = vrot.slane %v8139_v42, 7  ;;  %12692 = vmatpush3.bf16.msra.mxu1 %v13084_v24  ;;  %v15969_v36 = vrot.slane %v9971_v22, 5  ;;  %v15971_v9 = vrot.slane %v9975_v46, 4  ;;  %v8721_v28 = vshrl.u32 %v8630_v10, 16  ;;  %v9652_v27 = vld [vmem:[#allocation6 + $0x38] sm:$0xf]  ;;  %v12894_v24 = vpop.f32.mrf.mxu1 }
 0x718   : > { %v15973_v52 = vrot.slane %v9968_v25, 4  ;;  %v8137_v1 = vrot.slane %v15919_v47, 4  ;;  %v8724_v48 = vshll.u32 %v8630_v10, 16  ;;  %12693 = vmatprep.subr.bf16.mxu1 %v13088_v33  ;;  %v15982_v44 = vrot.slane %v8751_v43, 4  ;;  %v8048_v22 = vld [vmem:[#allocation6 + $0x64] sm:$0xf] }
 0x719   : > { %v8761_v54 = vor.u32 %v8760_v63, %v15959_v56  ;;  %v8723_v25 = vrot.slane %v8721_v28, 4  ;;  %v8730_v42 = vshll.u32 %v8631_v20, 16  ;;  %v15985_v46 = vrot.slane %v10002_v4, 4  ;;  %v8049_v4 = vld [vmem:[#allocation6 + $0x68] sm:$0xf] }
 0x71a   : > { %9056 = vrot.lane.b32.xlu0 %v8685_v6, %s13206_s13  ;;  %9719 = vrot.lane.b32.xlu1 %v9652_v27, %s13206_s13  ;;  %v8144_v62 = vor.u32 %v8142_v39, %v8141_v14  ;;  %v9859_v11 = vld [vmem:[#allocation6 + $0x84] sm:$0xf]  ;;  %v9856_v34 = vld [vmem:[#allocation6 + $0x74] sm:$0xf]  ;;  %v8726_v47 = vrot.slane %v8724_v48, 5  ;;  %v12429_v10 = vpack.c.bf16 %v12894_v24, %v12894_v24  ;;  %v9978_v6 = vor.u32 %v15971_v9, %v15969_v36 }
 0x71b   : > { %18067 = vst [vmem:[#allocation14_spill] sm:$0xff] %v15985_v46  ;;  %v10034_v33 = vshrl.u32 %v9859_v11, 16  ;;  %v10037_v27 = vshll.u32 %v9859_v11, 16  ;;  %v8734_v43 = vshrl.u32 %v8631_v20, 16  ;;  %v15989_v61 = vrot.slane %v8761_v54, 4  ;;  %v13091_v14 = vld [vmem:[%s18044_s5 + $0x98] sm:$0xff]   ;;  %v6569_v54 = vpop.f32.mrf.mxu1 }
 0x71c   : > { %v10010_v63 = vshrl.u32 %v9856_v34, 16  ;;  %v10013_v28 = vshll.u32 %v9856_v34, 16  ;;  %v8727_v29 = vor.u32 %v8726_v47, %v8723_v25  ;;  %6862 = vst.msk [vmem:[#allocation6 + $0x88] sm:$0xf] %vm6645_vm9, %v12429_v10  ;;  %v18068_v39 = vsel %vm13468_vm6, %v15698_v59, %v15913_v3  ;;  %v13092_v25 = vld [vmem:[%s18044_s5 + $0xd0] sm:$0xff]   ;;  %12694 = vmatpush3.bf16.msra.mxu1 %v13091_v14  ;;  %v13094_v14 = vld [vmem:[%s18044_s5 + $0xc8] sm:$0xff]  }
 0x71d   : > { %v18069_v34 = vsel %vm13458_vm5, %v15917_v58, %v15700_v17  ;;  %v10036_v20 = vrot.slane %v10034_v33, 4  ;;  %v10039_v9 = vrot.slane %v10037_v27, 5  ;;  %v16007_v11 = vrot.slane %v8730_v42, 5  ;;  %v7355_v24 = vld [vmem:[#allocation6 + $0x64] sm:$0xf]  ;;  %12695 = vmatprep.subr.bf16.mxu1 %v13092_v25  ;;  %v13093_v42 = vld [vmem:[%s18044_s5 + $0x90] sm:$0xff]  }
 0x71e   : > { %8444 = vrot.lane.b32.xlu0 %v18068_v39, %s13206_s13  ;;  %9058 = vrot.lane.b32.xlu1 %v18069_v34, %s13206_s13  ;;  %v8196_v48 = vshrl.u32 %v8048_v22, 16  ;;  %v10012_v59 = vrot.slane %v10010_v63, 4  ;;  %v10015_v3 = vrot.slane %v10013_v28, 5  ;;  %v16012_v47 = vrot.slane %v8727_v29, 4  ;;  %v16014_v27 = vld [vmem:[#allocation6 + $0x54] sm:$0xf] }
 0x71f   : > { %v8199_v10 = vshll.u32 %v8048_v22, 16  ;;  %v10040_v39 = vor.u32 %v10039_v9, %v10036_v20  ;;  %v8736_v58 = vrot.slane %v8734_v43, 4  ;;  %v8205_v33 = vshrl.u32 %v8049_v4, 16  ;;  %v8639_v43 = vld [vmem:[#allocation6 + $0x64] sm:$0xf] }
 0x720   : > { %v8198_v17 = vrot.slane %v8196_v48, 7  ;;  %v16025_v29 = vsel %vm13468_vm6, %v8137_v1, %v8144_v62  ;;  %v8208_v22 = vshll.u32 %v8049_v4, 16  ;;  %v12427_v28 = vpack.c.bf16 %v6569_v54, %v6569_v54  ;;  %v9657_v20 = vld [vmem:[#allocation6 + $0x64] sm:$0xf]  ;;  %v7356_v9 = vld [vmem:[#allocation6 + $0x68] sm:$0xf]  ;;  %12696 = vmatpush3.bf16.msra.mxu1 %v13093_v42 }
 0x721   : > { %v16033_v34 = vrot.slane %v9978_v6, 4  ;;  %v10016_v1 = vor.u32 %v10015_v3, %v10012_v59  ;;  %v8737_v4 = vor.u32 %v8736_v58, %v16007_v11  ;;  %v8207_v54 = vrot.slane %v8205_v33, 7  ;;  %v8640_v25 = vld [vmem:[#allocation6 + $0x68] sm:$0xf]  ;;  %12697 = vmatprep.subr.bf16.mxu1 %v13094_v14  ;;  %v8046_v33 = vld [vmem:[#allocation6 + $0x58] sm:$0xf] }
 0x722   : > { %8446 = vrot.lane.b32.xlu1 %v15964_v35, %s13206_s13  ;;  %7431 = vrot.lane.b32.xlu0 %v7355_v24, %s13206_s13  ;;  %v16044_v35 = vor.u32 %v8199_v10, %v8198_v17  ;;  %6860 = vst.msk [vmem:[#allocation6 + $0x78] sm:$0xf] %vm6645_vm9, %v12427_v28  ;;  %v8174_v6 = vshrl.u32 %v16014_v27, 16  ;;  %v12897_v24 = vpop.f32.mrf.mxu1  ;;  %v16048_v59 = vrot.slane %v10040_v39, 4  ;;  %v8793_v62 = vshrl.u32 %v8639_v43, 16  ;;  %v13095_v28 = vld [vmem:[%s18044_s5 + $0x88] sm:$0xff]  }
 0x723   : > { %18070 = vst [vmem:[#allocation15_spill] sm:$0xff] %v16033_v34  ;;  %v9860_v3 = vld [vmem:[#allocation6 + $0x88] sm:$0xf]  ;;  %v16050_v58 = vrot.slane %v8737_v4, 4  ;;  %v12432_v63 = vpack.c.bf16 %v12897_v24, %v12897_v24  ;;  %v8203_v10 = vrot.slane %v8198_v17, 4  ;;  %v8210_v34 = vor.u32 %v8208_v22, %v8207_v54 }
 0x724   : > { %18071 = vst [vmem:[#allocation16_spill] sm:$0xff] %v16048_v59  ;;  %v10043_v46 = vshll.u32 %v9860_v3, 16  ;;  %v10047_v48 = vshrl.u32 %v9860_v3, 16  ;;  %v10017_v39 = vrot.slane %v10016_v1, 4  ;;  %v8795_v42 = vrot.slane %v8793_v62, 4  ;;  %v13096_v17 = vld [vmem:[%s18044_s5 + $0xc0] sm:$0xff]   ;;  %12698 = vmatpush3.bf16.msra.mxu1 %v13095_v28  ;;  %v6582_v18 = vpop.f32.mrf.mxu1 }
 0x725   : > { %v8796_v4 = vshll.u32 %v8639_v43, 16  ;;  %v8802_v2 = vshll.u32 %v8640_v25, 16  ;;  %6865 = vst.msk [vmem:[#allocation6 + $0xa4] sm:$0xf] %vm6645_vm9, %v12432_v63  ;;  %v16069_v1 = vrot.slane %v8174_v6, 7  ;;  %v8177_v43 = vshll.u32 %v16014_v27, 16  ;;  %12699 = vmatprep.subr.bf16.mxu1 %v13096_v17 }
 0x726   : > { %9729 = vrot.lane.b32.xlu0 %v9657_v20, %s13206_s13  ;;  %7433 = vrot.lane.b32.xlu1 %v7356_v9, %s13206_s13  ;;  %v8636_v62 = vld [vmem:[#allocation6 + $0x54] sm:$0xf]  ;;  %v16072_v63 = vrot.slane %v10043_v46, 5  ;;  %v10049_v20 = vrot.slane %v10047_v48, 4  ;;  %v8806_v54 = vshrl.u32 %v8640_v25, 16  ;;  %v16076_v3 = vsel %vm13468_vm6, %v8203_v10, %v8210_v34 }
 0x727   : > { %v8798_v9 = vrot.slane %v8796_v4, 5  ;;  %v9658_v24 = vld [vmem:[#allocation6 + $0x68] sm:$0xf]  ;;  %v16078_v22 = vrot.slane %v8802_v2, 5  ;;  %v8183_v14 = vshrl.u32 %v8046_v33, 16  ;;  %v8186_v6 = vshll.u32 %v8046_v33, 16 }
 0x728   : > { %18072 = vst [vmem:[#allocation17_spill] sm:$0xff] %v16072_v63  ;;  %v18073_v46 = vsel %vm13468_vm6, %v15703_v16, %v15945_v0  ;;  %v8808_v25 = vrot.slane %v8806_v54, 4  ;;  %v12430_v28 = vpack.c.bf16 %v6582_v18, %v6582_v18  ;;  %v8637_v34 = vld [vmem:[#allocation6 + $0x58] sm:$0xf]  ;;  %v8769_v10 = vshrl.u32 %v8636_v62, 16  ;;  %v13097_v18 = vld [vmem:[%s18044_s5 + $0x80] sm:$0xff]  }
 0x729   : > { %v9857_v27 = vld [vmem:[#allocation6 + $0x78] sm:$0xf]  ;;  %v8799_v48 = vor.u32 %v8798_v9, %v8795_v42  ;;  %v16088_v33 = vor.u32 %v8177_v43, %v16069_v1  ;;  %v8185_v17 = vrot.slane %v8183_v14, 7  ;;  %v10050_v59 = vor.u32 %v10049_v20, %v16072_v63  ;;  %12700 = vmatpush3.bf16.msra.mxu1 %v13097_v18 }
 0x72a   : > { %8440 = vrot.lane.b32.xlu0 %v18073_v46, %s13206_s13  ;;  %9731 = vrot.lane.b32.xlu1 %v9658_v24, %s13206_s13  ;;  %v10019_v2 = vshll.u32 %v9857_v27, 16  ;;  %v10023_v4 = vshrl.u32 %v9857_v27, 16  ;;  %v8181_v16 = vrot.slane %v16069_v1, 4  ;;  %6863 = vst.msk [vmem:[#allocation6 + $0x94] sm:$0xf] %vm6645_vm9, %v12430_v28  ;;  %v8772_v0 = vshll.u32 %v8636_v62, 16 }
 0x72b   : > { %v16091_v55 = vrot.slane %v8799_v48, 4  ;;  %v8771_v24 = vrot.slane %v8769_v10, 4  ;;  %v8778_v43 = vshll.u32 %v8637_v34, 16  ;;  %v18074_v14 = vsel %vm13458_vm5, %v15982_v44, %v15959_v56  ;;  %v12898_v56 = vpop.f32.mrf.mxu1  ;;  %v8054_v44 = vld [vmem:[#allocation6 + $0x84] sm:$0xf] }
 0x72c   : > { %v10021_v42 = vrot.slane %v10019_v2, 5  ;;  %v10025_v9 = vrot.slane %v10023_v4, 4  ;;  %v9865_v54 = vld [vmem:[#allocation6 + $0xa4] sm:$0xf]  ;;  %v8188_v1 = vor.u32 %v8186_v6, %v8185_v17  ;;  %v8809_v62 = vor.u32 %v8808_v25, %v16078_v22  ;;  %v8055_v2 = vld [vmem:[#allocation6 + $0x88] sm:$0xf] }
 0x72d   : > { %v10082_v20 = vshrl.u32 %v9865_v54, 16  ;;  %v10085_v46 = vshll.u32 %v9865_v54, 16  ;;  %v8774_v10 = vrot.slane %v8772_v0, 5  ;;  %v6886_v4 = vld [vmem:[#allocation6 + $0x24] sm:$0xf]  ;;  %v8782_v0 = vshrl.u32 %v8637_v34, 16 }
 0x72e   : > { %9068 = vrot.lane.b32.xlu0 %v18074_v14, %s13206_s13  ;;  %8442 = vrot.lane.b32.xlu1 %v16025_v29, %s13206_s13  ;;  %v10022_v27 = vsel %vm13458_vm5, %v10017_v39, %v10021_v42  ;;  %v10026_v48 = vor.u32 %v10025_v9, %v10021_v42  ;;  %v16113_v29 = vrot.slane %v10050_v59, 4  ;;  %v7353_v17 = vld [vmem:[#allocation6 + $0x54] sm:$0xf]  ;;  %v16120_v9 = vrot.slane %v8778_v43, 5 }
 0x72f   : > { %10315 = vst.msk [vmem:[#allocation7 + $0xd8] sm:$0xf] %vm6645_vm9, %v10022_v27  ;;  %v10084_v6 = vrot.slane %v10082_v20, 4  ;;  %v10087_v25 = vrot.slane %v10085_v46, 5  ;;  %v8775_v42 = vor.u32 %v8774_v10, %v8771_v24  ;;  %v12433_v54 = vpack.c.bf16 %v12898_v56, %v12898_v56  ;;  %v9655_v20 = vld [vmem:[#allocation6 + $0x54] sm:$0xf] }
 0x730   : > { %18075 = vst [vmem:[#allocation18_spill] sm:$0xff] %v16113_v29  ;;  %v18076_v59 = vsel %vm13458_vm5, %v15989_v61, %v15715_v15  ;;  %v16131_v18 = vsel %vm13468_vm6, %v8181_v16, %v8188_v1  ;;  %v16133_v14 = vrot.slane %v8809_v62, 4  ;;  %v8240_v24 = vshrl.u32 %v8054_v44, 16  ;;  %v7354_v15 = vld [vmem:[#allocation6 + $0x58] sm:$0xf] }
 0x731   : > { %v8249_v43 = vshrl.u32 %v8055_v2, 16  ;;  %v10088_v34 = vor.u32 %v10087_v25, %v10084_v6  ;;  %v9862_v46 = vld [vmem:[#allocation6 + $0x94] sm:$0xf]  ;;  %v16135_v27 = vrot.slane %v8775_v42, 4  ;;  %6866 = vst.msk [vmem:[#allocation6 + $0xa8] sm:$0xf] %vm6645_vm9, %v12433_v54 }
 0x732   : > { %7427 = vrot.lane.b32.xlu0 %v7353_v17, %s13206_s13  ;;  %9070 = vrot.lane.b32.xlu1 %v18076_v59, %s13206_s13  ;;  %v8784_v10 = vrot.slane %v8782_v0, 4  ;;  %v6977_v56 = vshrl.u32 %v6886_v4, 16  ;;  %v6585_v17 = vpop.f32.mrf.mxu1  ;;  %v10058_v61 = vshrl.u32 %v9862_v46, 16  ;;  %v10061_v59 = vshll.u32 %v9862_v46, 16  ;;  %v8051_v6 = vld [vmem:[#allocation6 + $0x74] sm:$0xf] }
 0x733   : > { %v16138_v39 = vrot.slane %v8240_v24, 7  ;;  %v8243_v16 = vshll.u32 %v8054_v44, 16  ;;  %v8251_v62 = vrot.slane %v8249_v43, 7  ;;  %v8252_v28 = vshll.u32 %v8055_v2, 16  ;;  %v9186_v24 = vld [vmem:[#allocation6 + $0x24] sm:$0xf] }
 0x734   : > { %v8785_v1 = vor.u32 %v8784_v10, %v16120_v9  ;;  %v16141_v29 = vrot.slane %v6977_v56, 7  ;;  %v12901_v25 = vpop.f32.mrf.mxu1  ;;  %v16145_v42 = vrot.slane %v10026_v48, 4  ;;  %v10060_v44 = vrot.slane %v10058_v61, 4  ;;  %v8562_v10 = vld [vmem:[#allocation6 + $0x24] sm:$0xf] }
 0x735   : > { %v10063_v54 = vrot.slane %v10061_v59, 5  ;;  %v16151_v43 = vrot.slane %v10088_v34, 4  ;;  %v12431_v46 = vpack.c.bf16 %v6585_v17, %v6585_v17  ;;  %v9656_v48 = vld [vmem:[#allocation6 + $0x58] sm:$0xf]  ;;  %v16158_v56 = vor.u32 %v8243_v16, %v16138_v39  ;;  %8594 = vst.msk [vmem:[#allocation7 + $0x30] sm:$0xf] %vm6645_vm9, %v8562_v10 }
 0x736   : > { %9725 = vrot.lane.b32.xlu0 %v9655_v20, %s13206_s13  ;;  %7429 = vrot.lane.b32.xlu1 %v7354_v15, %s13206_s13  ;;  %18077 = vst [vmem:[#allocation19_spill] sm:$0xff] %v16145_v42  ;;  %v6980_v20 = vshll.u32 %v6886_v4, 16  ;;  %v16160_v15 = vrot.slane %v8785_v1, 4  ;;  %v8247_v61 = vrot.slane %v16138_v39, 4  ;;  %v8218_v59 = vshrl.u32 %v8051_v6, 16  ;;  %v6598_v42 = vpop.f32.mrf.mxu1 }
 0x737   : > { %18078 = vst [vmem:[#allocation20_spill] sm:$0xff] %v16151_v43  ;;  %v8254_v34 = vor.u32 %v8252_v28, %v8251_v62  ;;  %6864 = vst.msk [vmem:[#allocation6 + $0x98] sm:$0xf] %vm6645_vm9, %v12431_v46  ;;  %v8221_v2 = vshll.u32 %v8051_v6, 16  ;;  %v9239_v4 = vshrl.u32 %v9186_v24, 16  ;;  %v18079_v16 = vsel %vm13458_vm5, %v16012_v47, %v16007_v11 }
 0x738   : > { %v6982_v0 = vor.u32 %v6980_v20, %v16141_v29  ;;  %v6887_v17 = vld [vmem:[#allocation6 + $0x28] sm:$0xf]  ;;  %v10064_v39 = vor.u32 %v10063_v54, %v10060_v44  ;;  %v16173_v1 = vrot.slane %v8218_v59, 7  ;;  %v8645_v62 = vld [vmem:[#allocation6 + $0x84] sm:$0xf]  ;;  %v12436_v20 = vpack.c.bf16 %v12901_v25, %v12901_v25 }
 0x739   : > { %v8563_v43 = vld [vmem:[#allocation6 + $0x28] sm:$0xf]  ;;  %v12434_v6 = vpack.c.bf16 %v6598_v42, %v6598_v42  ;;  %v16179_v30 = vrot.slane %v9239_v4, 7  ;;  %v8246_v11 = vsel %vm13468_vm6, %v15744_v5, %v16158_v56  ;;  %v8791_v47 = vsel %vm13458_vm5, %v16160_v15, %v15749_v45  ;;  %v16385_v56 = vld [vmem:[#allocation6 + $0x94] sm:$0xf] }
 0x73a   : > { %9064 = vrot.lane.b32.xlu0 %v18079_v16, %s13206_s13  ;;  %9727 = vrot.lane.b32.xlu1 %v9656_v48, %s13206_s13  ;;  %v9866_v28 = vld [vmem:[#allocation6 + $0xa8] sm:$0xf]  ;;  %8595 = vst.msk [vmem:[#allocation7 + $0x44] sm:$0xf] %vm6645_vm9, %v8563_v43  ;;  %v6983_v63 = vsel %vm13468_vm6, %v15709_v19, %v6982_v0  ;;  %v9242_v25 = vshll.u32 %v9186_v24, 16  ;;  %v6986_v42 = vshrl.u32 %v6887_v17, 16  ;;  %v16195_v54 = vor.u32 %v8221_v2, %v16173_v1 }
 0x73b   : > { %v10091_v46 = vshll.u32 %v9866_v28, 16  ;;  %v10095_v10 = vshrl.u32 %v9866_v28, 16  ;;  %7315 = vst.msk [vmem:[#allocation7 + $0x50] sm:$0xf] %vm6645_vm9, %v6983_v63  ;;  %6869 = vst.msk [vmem:[#allocation6 + $0xc4] sm:$0xf] %vm6645_vm9, %v12436_v20  ;;  %v18080_v63 = vsel %vm13468_vm6, %v15723_v53, %v16044_v35  ;;  %v18081_v24 = vsel %vm13458_vm5, %v16050_v58, %v15725_v50 }
 0x73c   : > { %6867 = vst.msk [vmem:[#allocation6 + $0xb4] sm:$0xf] %vm6645_vm9, %v12434_v6  ;;  %v7359_v19 = vld [vmem:[#allocation6 + $0x84] sm:$0xf]  ;;  %v8646_v43 = vld [vmem:[#allocation6 + $0x88] sm:$0xf]  ;;  %v9244_v59 = vor.u32 %v9242_v25, %v16179_v30  ;;  %v16212_v6 = vsel %vm13468_vm6, %v8247_v61, %v8254_v34 }
 0x73d   : > { %v16192_v0 = vrot.slane %v10091_v46, 5  ;;  %v10097_v44 = vrot.slane %v10095_v10, 4  ;;  %v8841_v48 = vshrl.u32 %v8645_v62, 16  ;;  %v6988_v2 = vrot.slane %v6986_v42, 7  ;;  %v8560_v28 = vld [vmem:[#allocation6 + $0x14] sm:$0xf] }
 0x73e   : > { %8452 = vrot.lane.b32.xlu0 %v18080_v63, %s13206_s13  ;;  %9066 = vrot.lane.b32.xlu1 %v18081_v24, %s13206_s13  ;;  %v6989_v4 = vshll.u32 %v6887_v17, 16  ;;  %v8844_v16 = vshll.u32 %v8645_v62, 16  ;;  %v10065_v20 = vrot.slane %v10064_v39, 4  ;;  %v6984_v53 = vrot.slane %v16141_v29, 4  ;;  %v16215_v46 = vld [vmem:[#allocation6 + $0x78] sm:$0xf] }
 0x73f   : > { %v8843_v35 = vrot.slane %v8841_v48, 4  ;;  %8592 = vst.msk [vmem:[#allocation7 + $0x8] sm:$0xf] %vm6645_vm9, %v8560_v28  ;;  %v9863_v50 = vld [vmem:[#allocation6 + $0x98] sm:$0xf]  ;;  %v9245_v58 = vsel %vm13468_vm6, %v15717_v21, %v9244_v59  ;;  %v8850_v10 = vshll.u32 %v8646_v43, 16  ;;  %v10098_v25 = vor.u32 %v10097_v44, %v16192_v0 }
 0x740   : > { %v6991_v17 = vor.u32 %v6989_v4, %v6988_v2  ;;  %v8846_v62 = vrot.slane %v8844_v16, 5  ;;  %v6883_v39 = vld [vmem:[#allocation6 + $0x14] sm:$0xf]  ;;  %v10067_v61 = vshll.u32 %v9863_v50, 16  ;;  %v10071_v34 = vshrl.u32 %v9863_v50, 16 }
 0x741   : > { %9617 = vst.msk [vmem:[#allocation7 + $0xc] sm:$0xf] %vm6645_vm9, %v9245_v58  ;;  %v9187_v42 = vld [vmem:[#allocation6 + $0x28] sm:$0xf]  ;;  %v8854_v44 = vshrl.u32 %v8646_v43, 16  ;;  %v8227_v63 = vshrl.u32 %v16215_v46, 16 }
 0x742   : > { %8454 = vrot.lane.b32.xlu1 %v16076_v3, %s13206_s13  ;;  %7439 = vrot.lane.b32.xlu0 %v7359_v19, %s13206_s13  ;;  %v6992_v21 = vsel %vm13468_vm6, %v6984_v53, %v6991_v17  ;;  %v8847_v48 = vor.u32 %v8846_v62, %v8843_v35  ;;  %v10069_v24 = vrot.slane %v10067_v61, 5  ;;  %v10073_v59 = vrot.slane %v10071_v34, 4  ;;  %v7539_v50 = vld [vmem:[#allocation6 + $0x14] sm:$0xf]  ;;  %v9661_v53 = vld [vmem:[#allocation6 + $0x84] sm:$0xf] }
 0x743   : > { %7316 = vst.msk [vmem:[#allocation7 + $0x64] sm:$0xf] %vm6645_vm9, %v6992_v21  ;;  %v8225_v2 = vrot.slane %v16173_v1, 4  ;;  %v6955_v4 = vshrl.u32 %v6883_v39, 16  ;;  %v16237_v28 = vrot.slane %v8850_v10, 5  ;;  %v8230_v3 = vshll.u32 %v16215_v46, 16 }
 0x744   : > { %v16235_v16 = vrot.slane %v8847_v48, 4  ;;  %v9248_v19 = vshrl.u32 %v9187_v42, 16  ;;  %v7360_v35 = vld [vmem:[#allocation6 + $0x88] sm:$0xf]  ;;  %v10070_v43 = vsel %vm13458_vm5, %v10065_v20, %v10069_v24  ;;  %v10074_v58 = vor.u32 %v10073_v59, %v10069_v24  ;;  %v7540_v21 = vld [vmem:[#allocation6 + $0x18] sm:$0xf] }
 0x745   : > { %v16242_v17 = vrot.slane %v6955_v4, 7  ;;  %v6958_v62 = vshll.u32 %v6883_v39, 16  ;;  %10319 = vst.msk [vmem:[#allocation7 + $0x128] sm:$0xf] %vm6645_vm9, %v10070_v43  ;;  %v8229_v10 = vrot.slane %v8227_v63, 7  ;;  %v9251_v46 = vshll.u32 %v9187_v42, 16 }
 0x746   : > { %9737 = vrot.lane.b32.xlu0 %v9661_v53, %s13206_s13  ;;  %7441 = vrot.lane.b32.xlu1 %v7360_v35, %s13206_s13  ;;  %v9250_v61 = vrot.slane %v9248_v19, 7  ;;  %v8856_v34 = vrot.slane %v8854_v44, 4  ;;  %v16247_v48 = vrot.slane %v10098_v25, 4  ;;  %v9246_v20 = vrot.slane %v16179_v30, 4  ;;  %v8561_v59 = vld [vmem:[#allocation6 + $0x18] sm:$0xf] }
 0x747   : > { %v6960_v29 = vor.u32 %v6958_v62, %v16242_v17  ;;  %v7609_v24 = vshrl.u32 %v7539_v50, 16  ;;  %v9662_v39 = vld [vmem:[#allocation6 + $0x88] sm:$0xf]  ;;  %v8853_v4 = vsel %vm13458_vm5, %v16235_v16, %v16237_v28  ;;  %v7612_v42 = vshll.u32 %v7539_v50, 16  ;;  %v6884_v44 = vld [vmem:[#allocation6 + $0x18] sm:$0xf] }
 0x748   : > { %v9253_v53 = vor.u32 %v9251_v46, %v9250_v61  ;;  %v8857_v63 = vor.u32 %v8856_v34, %v16237_v28  ;;  %8593 = vst.msk [vmem:[#allocation7 + $0x1c] sm:$0xf] %vm6645_vm9, %v8561_v59  ;;  %v7618_v19 = vshll.u32 %v7540_v21, 16  ;;  %v7622_v35 = vshrl.u32 %v7540_v21, 16  ;;  %v9871_v43 = vld [vmem:[#allocation6 + $0xc4] sm:$0xf] }
 0x749   : > { %v6961_v25 = vsel %vm13468_vm6, %v15734_v41, %v6960_v29  ;;  %v7611_v30 = vrot.slane %v7609_v24, 4  ;;  %v18082_v62 = vsel %vm13468_vm6, %v15730_v57, %v16088_v33  ;;  %v16267_v50 = vrot.slane %v10074_v58, 4  ;;  %v6892_v46 = vld [vmem:[#allocation6 + $0x44] sm:$0xf]  ;;  %v9868_v58 = vld [vmem:[#allocation6 + $0xb4] sm:$0xf] }
 0x74a   : > { %8448 = vrot.lane.b32.xlu0 %v18082_v62, %s13206_s13  ;;  %9739 = vrot.lane.b32.xlu1 %v9662_v39, %s13206_s13  ;;  %v8232_v61 = vor.u32 %v8230_v3, %v8229_v10  ;;  %7313 = vst.msk [vmem:[#allocation7 + $0x28] sm:$0xf] %vm6645_vm9, %v6961_v25  ;;  %v9254_v41 = vsel %vm13468_vm6, %v9246_v20, %v9253_v53  ;;  %v7614_v29 = vrot.slane %v7612_v42, 5  ;;  %v16273_v34 = vrot.slane %v8857_v63, 4  ;;  %v8642_v25 = vld [vmem:[#allocation6 + $0x74] sm:$0xf] }
 0x74b   : > { %9618 = vst.msk [vmem:[#allocation7 + $0x20] sm:$0xf] %vm6645_vm9, %v9254_v41  ;;  %v18083_v21 = vshll.u32 %v15753_v51, 16  ;;  %v7620_v33 = vrot.slane %v7618_v19, 5  ;;  %v6964_v24 = vshrl.u32 %v6884_v44, 16  ;;  %v10130_v3 = vshrl.u32 %v9871_v43, 16 }
 0x74c   : > { %v7615_v59 = vor.u32 %v7614_v29, %v7611_v30  ;;  %v10133_v10 = vshll.u32 %v9871_v43, 16  ;;  %v7624_v39 = vrot.slane %v7622_v35, 4  ;;  %v6967_v20 = vshll.u32 %v6884_v44, 16  ;;  %v8643_v29 = vld [vmem:[#allocation6 + $0x78] sm:$0xf] }
 0x74d   : > { %v16277_v57 = vrot.slane %v18083_v21, 5  ;;  %v6966_v62 = vrot.slane %v6964_v24, 7  ;;  %v7021_v53 = vshrl.u32 %v6892_v46, 16  ;;  %v7024_v42 = vshll.u32 %v6892_v46, 16 }
 0x74e   : > { %v18084_v51 = vsel %vm13458_vm5, %v16091_v55, %v16078_v22  ;;  %8450 = vrot.lane.b32.xlu1 %v16131_v18, %s13206_s13  ;;  %v7616_v63 = vrot.slane %v7615_v59, 4  ;;  %v6962_v30 = vrot.slane %v16242_v17, 4  ;;  %v7625_v19 = vor.u32 %v7624_v39, %v7620_v33 }
 0x74f   : > { %9076 = vrot.lane.b32.xlu0 %v18084_v51, %s13206_s13  ;;  %v10106_v35 = vshrl.u32 %v9868_v58, 16  ;;  %v6969_v43 = vor.u32 %v6967_v20, %v6966_v62  ;;  %v16288_v41 = vrot.slane %v7021_v53, 7  ;;  %v10109_v44 = vshll.u32 %v9868_v58, 16  ;;  %v7357_v51 = vld [vmem:[#allocation6 + $0x74] sm:$0xf]  ;;  %v12902_v53 = vpop.f32.mrf.mxu1 }
 0x750   : > { %v8817_v46 = vshrl.u32 %v8642_v25, 16  ;;  %v7621_v21 = vsel %vm13458_vm5, %v7616_v63, %v7620_v33  ;;  %v10132_v24 = vrot.slane %v10130_v3, 4  ;;  %v10135_v55 = vrot.slane %v10133_v10, 5  ;;  %v9192_v62 = vld [vmem:[#allocation6 + $0x44] sm:$0xf] }
 0x751   : > { %v7626_v22 = vrot.slane %v7625_v19, 4  ;;  %8002 = vst.msk [vmem:[#allocation7 + $0x2c] sm:$0xf] %vm6645_vm9, %v7621_v21  ;;  %v6970_v18 = vsel %vm13468_vm6, %v6962_v30, %v6969_v43  ;;  %v7026_v17 = vor.u32 %v7024_v42, %v16288_v41  ;;  %v10108_v59 = vrot.slane %v10106_v35, 4  ;;  %v6893_v42 = vld [vmem:[#allocation6 + $0x48] sm:$0xf] }
 0x752   : > { %v10111_v39 = vrot.slane %v10109_v44, 5  ;;  %v18085_v33 = vsel %vm13458_vm5, %v16133_v14, %v15732_v38  ;;  %7314 = vst.msk [vmem:[#allocation7 + $0x3c] sm:$0xf] %vm6645_vm9, %v6970_v18  ;;  %v8819_v3 = vrot.slane %v8817_v46, 4  ;;  %v8820_v10 = vshll.u32 %v8642_v25, 16 }
 0x753   : > { %7435 = vrot.lane.b32.xlu0 %v7357_v51, %s13206_s13  ;;  %9078 = vrot.lane.b32.xlu1 %v18085_v33, %s13206_s13  ;;  %v7631_v58 = vsel %vm13458_vm5, %v7626_v22, %v15736_v13  ;;  %v8826_v20 = vshll.u32 %v8643_v29, 16  ;;  %v9659_v63 = vld [vmem:[#allocation6 + $0x74] sm:$0xf]  ;;  %v7358_v30 = vld [vmem:[#allocation6 + $0x78] sm:$0xf]  ;;  %v16311_v19 = vsel %vm13468_vm6, %v8225_v2, %v8232_v61  ;;  %v7027_v38 = vsel %vm13468_vm6, %v15740_v32, %v7026_v17 }
 0x754   : > { %8003 = vst.msk [vmem:[#allocation7 + $0x40] sm:$0xf] %vm6645_vm9, %v7631_v58  ;;  %v8830_v13 = vshrl.u32 %v8643_v29, 16  ;;  %v12437_v14 = vpack.c.bf16 %v12902_v53, %v12902_v53  ;;  %v8060_v25 = vld [vmem:[#allocation6 + $0xa4] sm:$0xf]  ;;  %v8863_v43 = vsel %vm13458_vm5, %v16273_v34, %v16277_v57  ;;  %v8822_v1 = vrot.slane %v8820_v10, 5 }
 0x755   : > { %v8566_v35 = vld [vmem:[#allocation6 + $0x44] sm:$0xf]  ;;  %7319 = vst.msk [vmem:[#allocation7 + $0xa0] sm:$0xf] %vm6645_vm9, %v7027_v38  ;;  %v9283_v2 = vshrl.u32 %v9192_v62, 16  ;;  %v9286_v61 = vshll.u32 %v9192_v62, 16  ;;  %v10136_v46 = vor.u32 %v10135_v55, %v10132_v24  ;;  %v10112_v51 = vor.u32 %v10111_v39, %v10108_v59 }
 0x756   : > { %v8059_v44 = vld [vmem:[#allocation6 + $0xa0] sm:$0x8]  ;;  %8598 = vst.msk [vmem:[#allocation7 + $0x80] sm:$0xf] %vm6645_vm9, %v8566_v35  ;;  %v16323_v21 = vrot.slane %v8826_v20, 5  ;;  %v7030_v32 = vshrl.u32 %v6893_v42, 16  ;;  %v8823_v18 = vor.u32 %v8822_v1, %v8819_v3 }
 0x757   : > { %6870 = vst.msk [vmem:[#allocation6 + $0xc8] sm:$0xf] %vm6645_vm9, %v12437_v14  ;;  %v7033_v29 = vshll.u32 %v6893_v42, 16  ;;  %v8644_v22 = vld [vmem:[#allocation6 + $0x7c] sm:$0x1]  ;;  %9733 = vrot.lane.b32.xlu0 %v9659_v63, %s13206_s13  ;;  %7437 = vrot.lane.b32.xlu1 %v7358_v30, %s13206_s13  ;;  %v16328_v17 = vrot.slane %v9283_v2, 7 }
 0x758   : > { %v8284_v62 = vshrl.u32 %v8060_v25, 16  ;;  %v7536_v33 = vld [vmem:[#allocation6 + $0x4] sm:$0xf]  ;;  %v7028_v58 = vrot.slane %v16288_v41, 4  ;;  %v7032_v24 = vrot.slane %v7030_v32, 7  ;;  %v8279_v55 = vshrl.u32 %v8059_v44, 16 }
 0x759   : > { %v8832_v10 = vrot.slane %v8830_v13, 4  ;;  %v8567_v20 = vld [vmem:[#allocation6 + $0x48] sm:$0xf]  ;;  %v9288_v53 = vor.u32 %v9286_v61, %v16328_v17  ;;  %v8287_v38 = vshll.u32 %v8060_v25, 16  ;;  %v8836_v63 = vshll.u32 %v8644_v22, 16 }
 0x75a   : > { %v16332_v42 = vrot.slane %v8284_v62, 7  ;;  %v7537_v14 = vld [vmem:[#allocation6 + $0x8] sm:$0xf]  ;;  %8599 = vst.msk [vmem:[#allocation7 + $0x94] sm:$0xf] %vm6645_vm9, %v8567_v20  ;;  %v16335_v39 = vrot.slane %v10136_v46, 4  ;;  %v7035_v3 = vor.u32 %v7033_v29, %v7032_v24  ;;  %v18086_v13 = vsel %vm13458_vm5, %v16135_v27, %v16120_v9 }
 0x75b   : > { %v9660_v59 = vld [vmem:[#allocation6 + $0x78] sm:$0xf]  ;;  %v8833_v30 = vor.u32 %v8832_v10, %v16323_v21  ;;  %v7585_v41 = vshrl.u32 %v7536_v33, 16  ;;  %v9193_v35 = vld [vmem:[#allocation6 + $0x48] sm:$0xf]  ;;  %9072 = vrot.lane.b32.xlu0 %v18086_v13, %s13206_s13  ;;  %v16345_v25 = vrot.slane %v10112_v51, 4  ;;  %v9289_v2 = vsel %vm13468_vm6, %v15742_v40, %v9288_v53 }
 0x75c   : > { %9735 = vrot.lane.b32.xlu1 %v9660_v59, %s13206_s13  ;;  %v16347_v1 = vrot.slane %v8823_v18, 4  ;;  %v7588_v61 = vshll.u32 %v7536_v33, 16  ;;  %v16352_v44 = vld [vmem:[#allocation6 + $0xa8] sm:$0xf]  ;;  %9621 = vst.msk [vmem:[#allocation7 + $0x5c] sm:$0xf] %vm6645_vm9, %v9289_v2  ;;  %v7036_v46 = vsel %vm13468_vm6, %v7028_v58, %v7035_v3  ;;  %v16361_v51 = vor.u32 %v8287_v38, %v16332_v42  ;;  %v6601_v33 = vpop.f32.mrf.mxu1 }
 0x75d   : > { %v16357_v9 = vrot.slane %v8279_v55, 11  ;;  %v7587_v27 = vrot.slane %v7585_v41, 4  ;;  %v7594_v32 = vshll.u32 %v7537_v14, 16  ;;  %v8564_v29 = vld [vmem:[#allocation6 + $0x34] sm:$0xf]  ;;  %v16363_v40 = vrot.slane %v8836_v63, 5 }
 0x75e   : > { %v9872_v22 = vld [vmem:[#allocation6 + $0xc8] sm:$0xf]  ;;  %7320 = vst.msk [vmem:[#allocation7 + $0xb4] sm:$0xf] %vm6645_vm9, %v7036_v46  ;;  %v7590_v18 = vrot.slane %v7588_v61, 5  ;;  %v7598_v62 = vshrl.u32 %v7537_v14, 16  ;;  %v12905_v3 = vpop.f32.mrf.mxu1  ;;  %v12435_v61 = vpack.c.bf16 %v6601_v33, %v6601_v33 }
 0x75f   : > { %8596 = vst.msk [vmem:[#allocation7 + $0x58] sm:$0xf] %vm6645_vm9, %v8564_v29  ;;  %v7363_v24 = vld [vmem:[#allocation6 + $0xa4] sm:$0xf]  ;;  %v10139_v58 = vshll.u32 %v9872_v22, 16  ;;  %v10143_v55 = vshrl.u32 %v9872_v22, 16  ;;  %8460 = vrot.lane.b32.xlu0 %v8246_v11, %s13206_s13 }
 0x760   : > { %v16366_v10 = vrot.slane %v8833_v30, 4  ;;  %v9290_v20 = vrot.slane %v16328_v17, 4  ;;  %v7538_v53 = vld [vmem:[#allocation6 + $0xc] sm:$0x1]  ;;  %9074 = vrot.lane.b32.xlu1 %v8791_v47, %s13206_s13  ;;  %v7591_v38 = vor.u32 %v7590_v18, %v7587_v27  ;;  %v7596_v63 = vrot.slane %v7594_v32, 5  ;;  %v6614_v18 = vpop.f32.mrf.mxu1 }
 0x761   : > { %v9292_v14 = vshrl.u32 %v9193_v35, 16  ;;  %v9295_v59 = vshll.u32 %v9193_v35, 16  ;;  %v8056_v17 = vld [vmem:[#allocation6 + $0x90] sm:$0x8]  ;;  %v16381_v30 = vrot.slane %v10139_v58, 5  ;;  %v10145_v41 = vrot.slane %v10143_v55, 4 }
 0x762   : > { %v8293_v13 = vshrl.u32 %v16352_v44, 16  ;;  %v8296_v5 = vshll.u32 %v16352_v44, 16  ;;  %v7592_v11 = vrot.slane %v7591_v38, 4  ;;  %v7600_v45 = vrot.slane %v7598_v62, 4  ;;  %6868 = vst.msk [vmem:[#allocation6 + $0xb8] sm:$0xf] %vm6645_vm9, %v12435_v61 }
 0x763   : > { %v9294_v2 = vrot.slane %v9292_v14, 7  ;;  %v10146_v15 = vor.u32 %v10145_v41, %v16381_v30  ;;  %v7604_v46 = vshll.u32 %v7538_v53, 16  ;;  %v8257_v35 = vshrl.u32 %v8056_v17, 16  ;;  %7447 = vrot.lane.b32.xlu0 %v7363_v24, %s13206_s13  ;;  %v6889_v22 = vld [vmem:[#allocation6 + $0x34] sm:$0xf] }
 0x764   : > { %v8295_v47 = vrot.slane %v8293_v13, 7  ;;  %8462 = vrot.lane.b32.xlu1 %v16212_v6, %s13206_s13  ;;  %v7597_v27 = vsel %vm13458_vm5, %v7592_v11, %v7596_v63  ;;  %v7601_v32 = vor.u32 %v7600_v45, %v7596_v63  ;;  %v8262_v29 = vshrl.u32 %v16385_v56, 16  ;;  %v8565_v62 = vld [vmem:[#allocation6 + $0x38] sm:$0xf]  ;;  %v7364_v33 = vld [vmem:[#allocation6 + $0xa8] sm:$0xf]  ;;  %v7416_v53 = vpop.permute.xlu0 %7415 }
 0x765   : > { %v9297_v44 = vor.u32 %v9295_v59, %v9294_v2  ;;  %v8829_v6 = vsel %vm13458_vm5, %v16347_v1, %v16323_v21  ;;  %v8290_v24 = vsel %vm13468_vm6, %v16357_v9, %v16361_v51  ;;  %v8839_v58 = vsel %vm13458_vm5, %v16366_v10, %v16363_v40  ;;  %8000 = vst.msk [vmem:[#allocation7 + $0x4] sm:$0xf] %vm6645_vm9, %v7597_v27  ;;  %v8058_v17 = vld [vmem:[#allocation6 + $0x98] sm:$0xf]  ;;  %v9189_v41 = vld [vmem:[#allocation6 + $0x34] sm:$0xf] }
 0x766   : > { %v7606_v55 = vrot.slane %v7604_v46, 5  ;;  %8597 = vst.msk [vmem:[#allocation7 + $0x6c] sm:$0xf] %vm6645_vm9, %v8565_v62  ;;  %v8291_v63 = vrot.slane %v16332_v42, 4  ;;  %v8298_v14 = vor.u32 %v8296_v5, %v8295_v47  ;;  %v7602_v59 = vrot.slane %v7601_v32, 4  ;;  %v12906_v47 = vpop.f32.mrf.mxu1 }
 0x767   : > { %v9298_v38 = vsel %vm13468_vm6, %v9290_v20, %v9297_v44  ;;  %7508 = vst.msk [vmem:[#allocation7 + $0x50] sm:$0xf] %vm7503_vm10, %v7416_v53  ;;  %v16413_v13 = vrot.slane %v10146_v15, 4  ;;  %v12440_v11 = vpack.c.bf16 %v12905_v3, %v12905_v3  ;;  %v6999_v2 = vshrl.u32 %v6889_v22, 16  ;;  %v6890_v45 = vld [vmem:[#allocation6 + $0x38] sm:$0xf] }
 0x768   : > { %9622 = vst.msk [vmem:[#allocation7 + $0x70] sm:$0xf] %vm6645_vm9, %v9298_v38  ;;  %v7002_v61 = vshll.u32 %v6889_v22, 16  ;;  %v18087_v42 = vsel %vm13468_vm6, %v15762_v26, %v16195_v54  ;;  %7449 = vrot.lane.b32.xlu1 %v7364_v33, %s13206_s13  ;;  %v7607_v20 = vsel %vm13458_vm5, %v7602_v59, %v7606_v55  ;;  %v16425_v5 = vrot.slane %v8257_v35, 11  ;;  %v8065_v44 = vld [vmem:[#allocation6 + $0xc0] sm:$0x8]  ;;  %v9714_v32 = vpop.permute.xlu0 %9713  ;;  %v7418_v22 = vpop.permute.xlu1 %7417 }
 0x769   : > { %8456 = vrot.lane.b32.xlu0 %v18087_v42, %s13206_s13  ;;  %v16427_v15 = vrot.slane %v8262_v29, 7  ;;  %v12438_v3 = vpack.c.bf16 %v6614_v18, %v6614_v18  ;;  %8001 = vst.msk [vmem:[#allocation7 + $0x18] sm:$0xf] %vm6645_vm9, %v7607_v20  ;;  %v8265_v46 = vshll.u32 %v16385_v56, 16  ;;  %6873 = vst.msk [vmem:[#allocation6 + $0xe4] sm:$0xf] %vm6645_vm9, %v12440_v11  ;;  %v12441_v54 = vpack.c.bf16 %v12906_v47, %v12906_v47 }
 0x76a   : > { %v7001_v27 = vrot.slane %v6999_v2, 7  ;;  %v8271_v26 = vshrl.u32 %v8058_v17, 16  ;;  %v16434_v35 = vsel %vm13468_vm6, %v8291_v63, %v8298_v14  ;;  %v9261_v29 = vshrl.u32 %v9189_v41, 16  ;;  %v8066_v33 = vld [vmem:[#allocation6 + $0xc4] sm:$0xf] }
 0x76b   : > { %6871 = vst.msk [vmem:[#allocation6 + $0xd4] sm:$0xf] %vm6645_vm9, %v12438_v3  ;;  %v9264_v18 = vshll.u32 %v9189_v41, 16  ;;  %v7008_v62 = vshrl.u32 %v6890_v45, 16  ;;  %v9869_v56 = vld [vmem:[#allocation6 + $0xb8] sm:$0xf]  ;;  %v16458_v47 = vor.u32 %v8265_v46, %v16427_v15 }
 0x76c   : > { %9809 = vst.msk [vmem:[#allocation7 + $0xc] sm:$0xf] %vm7503_vm10, %v9714_v32  ;;  %7509 = vst.msk [vmem:[#allocation7 + $0x64] sm:$0xf] %vm7503_vm10, %v7418_v22  ;;  %v7004_v55 = vor.u32 %v7002_v61, %v7001_v27  ;;  %v8273_v53 = vrot.slane %v8271_v26, 7  ;;  %v8274_v38 = vshll.u32 %v8058_v17, 16  ;;  %8458 = vrot.lane.b32.xlu1 %v16311_v19, %s13206_s13  ;;  %v7412_v42 = vpop.permute.xlu0 %7411  ;;  %v9716_v20 = vpop.permute.xlu1 %9715 }
 0x76d   : > { %6874 = vst.msk [vmem:[#allocation6 + $0xe8] sm:$0xf] %vm6645_vm9, %v12441_v54  ;;  %v7011_v59 = vshll.u32 %v6890_v45, 16  ;;  %9084 = vrot.lane.b32.xlu0 %v8853_v4, %s13206_s13  ;;  %v10115_v63 = vshll.u32 %v9869_v56, 16  ;;  %v10119_v14 = vshrl.u32 %v9869_v56, 16  ;;  %v16448_v41 = vrot.slane %v9261_v29, 7 }
 0x76e   : > { %v7010_v11 = vrot.slane %v7008_v62, 7  ;;  %v7005_v17 = vsel %vm13468_vm6, %v15759_v12, %v7004_v55  ;;  %v7006_v2 = vrot.slane %v7001_v27, 4  ;;  %v8323_v61 = vshrl.u32 %v8065_v44, 16  ;;  %7506 = vst.msk [vmem:[#allocation7 + $0x28] sm:$0xf] %vm7503_vm10, %v7412_v42 }
 0x76f   : > { %v8328_v45 = vshrl.u32 %v8066_v33, 16  ;;  %v10117_v3 = vrot.slane %v10115_v63, 5  ;;  %v10121_v16 = vrot.slane %v10119_v14, 4  ;;  %7317 = vst.msk [vmem:[#allocation7 + $0x78] sm:$0xf] %vm6645_vm9, %v7005_v17  ;;  %v9266_v28 = vor.u32 %v9264_v18, %v16448_v41 }
 0x770   : > { %v7013_v4 = vor.u32 %v7011_v59, %v7010_v11  ;;  %9810 = vst.msk [vmem:[#allocation7 + $0x20] sm:$0xf] %vm7503_vm10, %v9716_v20  ;;  %v7361_v19 = vld [vmem:[#allocation6 + $0x94] sm:$0xf]  ;;  %v8276_v12 = vor.u32 %v8274_v38, %v8273_v53  ;;  %v8331_v26 = vshll.u32 %v8066_v33, 16  ;;  %9086 = vrot.lane.b32.xlu1 %v8863_v43, %s13206_s13  ;;  %v8269_v22 = vrot.slane %v16427_v15, 4  ;;  %v7414_v15 = vpop.permute.xlu1 %7413 }
 0x771   : > { %v16460_v27 = vrot.slane %v8328_v45, 7  ;;  %v9190_v54 = vld [vmem:[#allocation6 + $0x38] sm:$0xf]  ;;  %7443 = vrot.lane.b32.xlu0 %v7361_v19, %s13206_s13  ;;  %v10118_v44 = vsel %vm13458_vm5, %v16345_v25, %v10117_v3  ;;  %v10122_v46 = vor.u32 %v10121_v16, %v10117_v3  ;;  %v9877_v32 = vld [vmem:[#allocation6 + $0xe4] sm:$0xf]  ;;  %v9267_v29 = vsel %vm13468_vm6, %v15773_v37, %v9266_v28  ;;  %v8437_v25 = vpop.permute.xlu0 %8436 }
 0x772   : > { %v9663_v18 = vld [vmem:[#allocation6 + $0x94] sm:$0xf]  ;;  %v7362_v62 = vld [vmem:[#allocation6 + $0x98] sm:$0xf]  ;;  %10323 = vst.msk [vmem:[#allocation7 + $0x178] sm:$0xf] %vm6645_vm9, %v10118_v44  ;;  %v7014_v57 = vsel %vm13468_vm6, %v7006_v2, %v7013_v4  ;;  %v16502_v28 = vsel %vm13468_vm6, %v8269_v22, %v8276_v12 }
 0x773   : > { %v10178_v33 = vshrl.u32 %v9877_v32, 16  ;;  %v10181_v56 = vshll.u32 %v9877_v32, 16  ;;  %v9874_v34 = vld [vmem:[#allocation6 + $0xd4] sm:$0xf]  ;;  %9619 = vst.msk [vmem:[#allocation7 + $0x34] sm:$0xf] %vm6645_vm9, %v9267_v29  ;;  %v16484_v37 = vor.u32 %v8331_v26, %v16460_v27 }
 0x774   : > { %v16480_v43 = vrot.slane %v8323_v61, 11  ;;  %v10154_v55 = vshrl.u32 %v9874_v34, 16  ;;  %v10157_v53 = vshll.u32 %v9874_v34, 16  ;;  %v9878_v38 = vld [vmem:[#allocation6 + $0xe8] sm:$0xf]  ;;  %v9270_v59 = vshrl.u32 %v9190_v54, 16  ;;  %7445 = vrot.lane.b32.xlu1 %v7362_v62, %s13206_s13  ;;  %v8439_v44 = vpop.permute.xlu1 %8438  ;;  %v6617_v34 = vpop.f32.mrf.mxu1 }
 0x775   : > { %7318 = vst.msk [vmem:[#allocation7 + $0x8c] sm:$0xf] %vm6645_vm9, %v7014_v57  ;;  %v16488_v63 = vrot.slane %v10178_v33, 4  ;;  %v16490_v14 = vrot.slane %v10181_v56, 5  ;;  %v10187_v11 = vshll.u32 %v9878_v38, 16  ;;  %v10191_v17 = vshrl.u32 %v9878_v38, 16  ;;  %9741 = vrot.lane.b32.xlu0 %v9663_v18, %s13206_s13  ;;  %v7424_v32 = vpop.permute.xlu0 %7423 }
 0x776   : > { %8530 = vst.msk [vmem:[#allocation7 + $0x2c] sm:$0xf] %vm7503_vm10, %v8437_v25  ;;  %7507 = vst.msk [vmem:[#allocation7 + $0x3c] sm:$0xf] %vm7503_vm10, %v7414_v15  ;;  %v8067_v2 = vld [vmem:[#allocation6 + $0xc8] sm:$0xf]  ;;  %v8268_v61 = vsel %vm13468_vm6, %v16425_v5, %v16458_v47  ;;  %v12909_v40 = vpop.f32.mrf.mxu1 }
 0x777   : > { %v10156_v45 = vrot.slane %v10154_v55, 4  ;;  %v10159_v42 = vrot.slane %v10157_v53, 5  ;;  %v9272_v20 = vrot.slane %v9270_v59, 7  ;;  %v7545_v3 = vld [vmem:[#allocation6 + $0x34] sm:$0xf]  ;;  %v16498_v16 = vrot.slane %v10122_v46, 4 }
 0x778   : > { %v9268_v4 = vrot.slane %v16448_v41, 4  ;;  %v9273_v19 = vshll.u32 %v9190_v54, 16  ;;  %v7546_v26 = vld [vmem:[#allocation6 + $0x38] sm:$0xf]  ;;  %v10184_v18 = vor.u32 %v16490_v14, %v16488_v63  ;;  %v8334_v46 = vsel %vm13468_vm6, %v16480_v43, %v16484_v37  ;;  %v8062_v56 = vld [vmem:[#allocation6 + $0xb0] sm:$0x8] }
 0x779   : > { %v9664_v29 = vld [vmem:[#allocation6 + $0x98] sm:$0xf]  ;;  %v8337_v62 = vshrl.u32 %v8067_v2, 16  ;;  %v8340_v33 = vshll.u32 %v8067_v2, 16  ;;  %8531 = vst.msk [vmem:[#allocation7 + $0x40] sm:$0xf] %vm7503_vm10, %v8439_v44  ;;  %9080 = vrot.lane.b32.xlu0 %v8829_v6, %s13206_s13  ;;  %v10160_v25 = vor.u32 %v10159_v42, %v10156_v45  ;;  %v7426_v44 = vpop.permute.xlu1 %7425  ;;  %v12439_v45 = vpack.c.bf16 %v6617_v34, %v6617_v34 }
 0x77a   : > { %7512 = vst.msk [vmem:[#allocation7 + $0xa0] sm:$0xf] %vm7503_vm10, %v7424_v32  ;;  %v16513_v41 = vrot.slane %v10187_v11, 5  ;;  %v16515_v12 = vrot.slane %v10191_v17, 4  ;;  %v9275_v54 = vor.u32 %v9273_v19, %v9272_v20  ;;  %v7657_v22 = vshrl.u32 %v7545_v3, 16  ;;  %9743 = vrot.lane.b32.xlu1 %v9664_v29, %s13206_s13  ;;  %v9722_v19 = vpop.permute.xlu0 %9721 }
 0x77b   : > { %v16517_v57 = vld [vmem:[#allocation6 + $0xb4] sm:$0xf]  ;;  %v8339_v15 = vrot.slane %v8337_v62, 7  ;;  %v7660_v55 = vshll.u32 %v7545_v3, 16  ;;  %v7666_v53 = vshll.u32 %v7546_v26, 16  ;;  %v8335_v11 = vrot.slane %v16460_v27, 4 }
 0x77c   : > { %v7547_v38 = vld [vmem:[#allocation6 + $0x3c] sm:$0x1]  ;;  %v9276_v59 = vsel %vm13468_vm6, %v9268_v4, %v9275_v54  ;;  %v7659_v17 = vrot.slane %v7657_v22, 4  ;;  %v7670_v2 = vshrl.u32 %v7546_v26, 16  ;;  %v6897_v20 = vld [vmem:[#allocation6 + $0x60] sm:$0x8]  ;;  %v10194_v27 = vor.u32 %v16515_v12, %v16513_v41 }
 0x77d   : > { %9620 = vst.msk [vmem:[#allocation7 + $0x48] sm:$0xf] %vm6645_vm9, %v9276_v59  ;;  %v8342_v21 = vor.u32 %v8340_v33, %v8339_v15  ;;  %v7662_v1 = vrot.slane %v7660_v55, 5  ;;  %v7668_v6 = vrot.slane %v7666_v53, 5  ;;  %v6898_v42 = vld [vmem:[#allocation6 + $0x64] sm:$0xf]  ;;  %8468 = vrot.lane.b32.xlu0 %v8290_v24, %s13206_s13 }
 0x77e   : > { %9813 = vst.msk [vmem:[#allocation7 + $0x5c] sm:$0xf] %vm7503_vm10, %v9722_v19  ;;  %7513 = vst.msk [vmem:[#allocation7 + $0xb4] sm:$0xf] %vm7503_vm10, %v7426_v44  ;;  %v7367_v3 = vld [vmem:[#allocation6 + $0xc4] sm:$0xf]  ;;  %9082 = vrot.lane.b32.xlu1 %v8839_v58, %s13206_s13  ;;  %v8433_v10 = vpop.permute.xlu0 %8432  ;;  %v9724_v58 = vpop.permute.xlu1 %9723 }
 0x77f   : > { %v8301_v4 = vshrl.u32 %v8062_v56, 16  ;;  %v8306_v26 = vshrl.u32 %v16517_v57, 16  ;;  %v7672_v32 = vrot.slane %v7670_v2, 4  ;;  %v8570_v29 = vld [vmem:[#allocation6 + $0x64] sm:$0xf]  ;;  %v16547_v62 = vrot.slane %v10160_v25, 4 }
 0x780   : > { %v7663_v33 = vor.u32 %v7662_v1, %v7659_v17  ;;  %6872 = vst.msk [vmem:[#allocation6 + $0xd8] sm:$0xf] %vm6645_vm9, %v12439_v45  ;;  %v7676_v56 = vshll.u32 %v7547_v38, 16  ;;  %v7060_v54 = vshrl.u32 %v6897_v20, 16  ;;  %v8648_v22 = vld [vmem:[#allocation6 + $0x94] sm:$0xf]  ;;  %v16560_v55 = vsel %vm13468_vm6, %v8335_v11, %v8342_v21 }
 0x781   : > { %8602 = vst.msk [vmem:[#allocation7 + $0xd0] sm:$0xf] %vm6645_vm9, %v8570_v29  ;;  %v16551_v34 = vrot.slane %v8306_v26, 7  ;;  %v8309_v9 = vshll.u32 %v16517_v57, 16  ;;  %v7673_v51 = vor.u32 %v7672_v32, %v7668_v6  ;;  %v7065_v24 = vshrl.u32 %v6898_v42, 16  ;;  %v16556_v25 = vld [vmem:[#allocation7 + $0x3c] sm:$0xff]  ;;  %7455 = vrot.lane.b32.xlu0 %v7367_v3, %s13206_s13 }
 0x782   : > { %v16554_v15 = vld [vmem:[#allocation6 + $0x98] sm:$0xf]  ;;  %v7664_v53 = vrot.slane %v7663_v33, 4  ;;  %v7678_v38 = vrot.slane %v7676_v56, 5  ;;  %v9197_v59 = vld [vmem:[#allocation6 + $0x60] sm:$0x8]  ;;  %v12444_v17 = vpack.c.bf16 %v12909_v40, %v12909_v40  ;;  %8470 = vrot.lane.b32.xlu1 %v16434_v35, %s13206_s13  ;;  %v8435_v33 = vpop.permute.xlu1 %8434 }
 0x783   : > { %8528 = vst.msk [vmem:[#allocation7 + $0x4] sm:$0xf] %vm7503_vm10, %v8433_v10  ;;  %9814 = vst.msk [vmem:[#allocation7 + $0x70] sm:$0xf] %vm7503_vm10, %v9724_v58  ;;  %v16564_v57 = vrot.slane %v8301_v4, 11  ;;  %v7674_v2 = vrot.slane %v7673_v51, 4  ;;  %v16578_v32 = vor.u32 %v8309_v9, %v16551_v34 }
 0x784   : > { %v12225_v20 = vrot.slane %v7060_v54, 11  ;;  %v16566_v19 = vrot.slane %v7065_v24, 7  ;;  %v8064_v44 = vld [vmem:[#allocation6 + $0xb8] sm:$0xf]  ;;  %v16571_v11 = vld [vmem:[#allocation7 + $0x28] sm:$0xff]  ;;  %v7669_v21 = vsel %vm13458_vm5, %v7664_v53, %v7668_v6  ;;  %v7068_v1 = vshll.u32 %v6898_v42, 16  ;;  %v9061_v42 = vpop.permute.xlu0 %9060 }
 0x785   : > { %v8865_v45 = vshrl.u32 %v8648_v22, 16  ;;  %v8868_v26 = vshll.u32 %v8648_v22, 16  ;;  %6877 = vst.msk [vmem:[#allocation6 + $0x104] sm:$0xf] %vm6645_vm9, %v12444_v17  ;;  %v8571_v4 = vld [vmem:[#allocation6 + $0x68] sm:$0xf]  ;;  %v12273_v35 = vcombine.low %v16571_v11, %v16556_v25  ;;  %v7679_v3 = vsel %vm13458_vm5, %v7674_v2, %v7678_v38  ;;  %8464 = vrot.lane.b32.xlu0 %v8268_v61, %s13206_s13 }
 0x786   : > { %8006 = vst.msk [vmem:[#allocation7 + $0x7c] sm:$0xf] %vm6645_vm9, %v7669_v21  ;;  %v8874_v29 = vshll.u32 %v16554_v15, 16  ;;  %v9198_v6 = vld [vmem:[#allocation6 + $0x64] sm:$0xf]  ;;  %v7070_v54 = vor.u32 %v7068_v1, %v16566_v19  ;;  %v8878_v51 = vshrl.u32 %v16554_v15, 16  ;;  %v9063_v47 = vpop.permute.xlu1 %9062  ;;  %v8312_v63 = vsel %vm13468_vm6, %v16564_v57, %v16578_v32 }
 0x787   : > { %8603 = vst.msk [vmem:[#allocation7 + $0xe4] sm:$0xf] %vm6645_vm9, %v8571_v4  ;;  %v7368_v56 = vld [vmem:[#allocation6 + $0xc8] sm:$0xf]  ;;  %8007 = vst.msk [vmem:[#allocation7 + $0x90] sm:$0xf] %vm6645_vm9, %v7679_v3  ;;  %v6630_v4 = vpop.f32.mrf.mxu1 }
 0x788   : > { %v8867_v22 = vrot.slane %v8865_v45, 4  ;;  %v8870_v9 = vrot.slane %v8868_v26, 5  ;;  %9154 = vst.msk [vmem:[#allocation7 + $0x30] sm:$0xf] %vm7503_vm10, %v9061_v42  ;;  %8529 = vst.msk [vmem:[#allocation7 + $0x18] sm:$0xf] %vm7503_vm10, %v8435_v33  ;;  %7457 = vrot.lane.b32.xlu1 %v7368_v56, %s13206_s13  ;;  %v7071_v17 = vsel %vm13468_vm6, %v12225_v20, %v7070_v54  ;;  %v7420_v5 = vpop.permute.xlu0 %7419 }
 0x789   : > { %v9875_v24 = vld [vmem:[#allocation6 + $0xd8] sm:$0xf]  ;;  %v8313_v40 = vrot.slane %v16551_v34, 4  ;;  %v8315_v10 = vshrl.u32 %v8064_v44, 16  ;;  %v8318_v58 = vshll.u32 %v8064_v44, 16  ;;  %v9322_v53 = vshrl.u32 %v9197_v59, 16 }
 0x78a   : > { %v10163_v15 = vshll.u32 %v9875_v24, 16  ;;  %v10167_v38 = vshrl.u32 %v9875_v24, 16  ;;  %v8871_v2 = vor.u32 %v8870_v9, %v8867_v22  ;;  %v6899_v21 = vld [vmem:[#allocation6 + $0x68] sm:$0xf]  ;;  %v7365_v1 = vld [vmem:[#allocation6 + $0xb4] sm:$0xf] }
 0x78b   : > { %7323 = vst.msk [vmem:[#allocation7 + $0xf0] sm:$0xf] %vm6645_vm9, %v7071_v17  ;;  %v16602_v59 = vrot.slane %v8874_v29, 5  ;;  %v8317_v44 = vrot.slane %v8315_v10, 7  ;;  %v9327_v45 = vshrl.u32 %v9198_v6, 16  ;;  %v9330_v26 = vshll.u32 %v9198_v6, 16  ;;  %7451 = vrot.lane.b32.xlu0 %v7365_v1, %s13206_s13  ;;  %v12910_v17 = vpop.f32.mrf.mxu1  ;;  %v7422_v1 = vpop.permute.xlu1 %7421 }
 0x78c   : > { %v16604_v61 = vrot.slane %v10163_v15, 5  ;;  %v16606_v3 = vrot.slane %v10167_v38, 4  ;;  %v16608_v42 = vrot.slane %v8871_v2, 4  ;;  %v12255_v20 = vrot.slane %v9322_v53, 11  ;;  %7510 = vst.msk [vmem:[#allocation7 + $0x78] sm:$0xf] %vm7503_vm10, %v7420_v5  ;;  %8466 = vrot.lane.b32.xlu1 %v16502_v28, %s13206_s13 }
 0x78d   : > { %9155 = vst.msk [vmem:[#allocation7 + $0x44] sm:$0xf] %vm7503_vm10, %v9063_v47  ;;  %v8320_v33 = vor.u32 %v8318_v58, %v8317_v44  ;;  %v16612_v29 = vrot.slane %v9327_v45, 7  ;;  %v7074_v56 = vshrl.u32 %v6899_v21, 16  ;;  %v7077_v54 = vshll.u32 %v6899_v21, 16  ;;  %v16641_v28 = vld [vmem:[%s18044_s5 + $0x118] sm:$0xff]   ;;  %v9718_v21 = vpop.permute.xlu0 %9717 }
 0x78e   : > { %v16614_v6 = vld [vmem:[#allocation6 + $0x9c] sm:$0x1]  ;;  %v7542_v22 = vld [vmem:[#allocation6 + $0x24] sm:$0xf]  ;;  %v16619_v9 = vrot.slane %v10184_v18, 4  ;;  %v10166_v24 = vsel %vm13458_vm5, %v16547_v62, %v16604_v61  ;;  %v10170_v10 = vor.u32 %v16606_v3, %v16604_v61  ;;  %v7072_v53 = vrot.slane %v16566_v19, 4  ;;  %12911 = vmatprep.subr.bf16.mxu0 %v16641_v28  ;;  %12951 = vmatprep.subr.bf16.mxu1 %v16641_v28 }
 0x78f   : > { %v16634_v14 = vld [vmem:[#allocation6 + $0x28] sm:$0xf]  ;;  %v7366_v58 = vld [vmem:[#allocation6 + $0xb8] sm:$0xf]  ;;  %10327 = vst.msk [vmem:[#allocation7 + $0x1c8] sm:$0xf] %vm6645_vm9, %v10166_v24  ;;  %v9332_v62 = vor.u32 %v9330_v26, %v16612_v29  ;;  %v8877_v26 = vsel %vm13458_vm5, %v16608_v42, %v16602_v59  ;;  %v12442_v19 = vpack.c.bf16 %v6630_v4, %v6630_v4  ;;  %8476 = vrot.lane.b32.xlu0 %v8334_v46, %s13206_s13 }
 0x790   : > { %v16636_v18 = vld [vmem:[#allocation6 + $0x68] sm:$0xf]  ;;  %v7076_v15 = vrot.slane %v7074_v56, 7  ;;  %v16646_v38 = vrot.slane %v8878_v51, 4  ;;  %v16651_v2 = vrot.slane %v10194_v27, 4  ;;  %v12445_v51 = vpack.c.bf16 %v12910_v17, %v12910_v17  ;;  %7453 = vrot.lane.b32.xlu1 %v7366_v58, %s13206_s13 }
 0x791   : > { %v13085_v44 = vld [vmem:[#allocation7] ss:$20 sps:$4 sm:$0xff]   ;;  %v13087_v45 = vld [vmem:[#allocation7 + $0x4] ss:$20 sps:$4 sm:$0xff]   ;;  %9811 = vst.msk [vmem:[#allocation7 + $0x34] sm:$0xf] %vm7503_vm10, %v9718_v21  ;;  %v16667_v27 = vsel %vm13468_vm6, %v8313_v40, %v8320_v33  ;;  %v9333_v47 = vsel %vm13468_vm6, %v12255_v20, %v9332_v62  ;;  %v9720_v62 = vpop.permute.xlu1 %9719 }
 0x792   : > { %v16657_v5 = vld [vmem:[#allocation6 + $0xe0] sm:$0x8]  ;;  %7511 = vst.msk [vmem:[#allocation7 + $0x8c] sm:$0xf] %vm7503_vm10, %v7422_v1  ;;  %v7371_v12 = vld [vmem:[#allocation6 + $0xe4] sm:$0xf]  ;;  %v7079_v4 = vor.u32 %v7077_v54, %v7076_v15  ;;  %11208 = vmatprep.mubr.bf16.mxu0 %v13087_v45  ;;  %v8881_v46 = vor.u32 %v16646_v38, %v16602_v59 }
 0x793   : > { %v7633_v56 = vshrl.u32 %v7542_v22, 16  ;;  %v8568_v24 = vld [vmem:[#allocation6 + $0x54] sm:$0xf]  ;;  %9625 = vst.msk [vmem:[#allocation7 + $0xac] sm:$0xf] %vm6645_vm9, %v9333_v47  ;;  %v8884_v34 = vshll.u32 %v16614_v6, 16  ;;  %11209 = vmatmul.mubr.bf16.vlgmr.msra.gmra.mxu0 %v13085_v44  ;;  %7463 = vrot.lane.b32.xlu0 %v7371_v12, %s13206_s13 }
 0x794   : > { %v7636_v40 = vshll.u32 %v7542_v22, 16  ;;  %v7642_v33 = vshll.u32 %v16634_v14, 16  ;;  %v7646_v20 = vshrl.u32 %v16634_v14, 16  ;;  %v9883_v54 = vld [vmem:[#allocation6 + $0x104] sm:$0xf]  ;;  %v7080_v37 = vsel %vm13468_vm6, %v7072_v53, %v7079_v4  ;;  %v9057_v14 = vpop.permute.xlu0 %9056  ;;  %12912 = vmatpush3.bf16.msra.mxu0 %v16641_v28  ;;  %8478 = vrot.lane.b32.xlu1 %v16560_v55, %s13206_s13 }
 0x795   : > { %6875 = vst.msk [vmem:[#allocation6 + $0xf4] sm:$0xf] %vm6645_vm9, %v12442_v19  ;;  %6878 = vst.msk [vmem:[#allocation6 + $0x108] sm:$0xf] %vm6645_vm9, %v12445_v51  ;;  %v13089_v43 = vld [vmem:[#allocation7 + $0x2c] ss:$20 sps:$4 sm:$0xff]   ;;  %v9059_v55 = vpop.permute.xlu1 %9058 }
 0x796   : > { %8600 = vst.msk [vmem:[#allocation7 + $0xa8] sm:$0xf] %vm6645_vm9, %v8568_v24  ;;  %v7635_v6 = vrot.slane %v7633_v56, 4  ;;  %v9336_v22 = vshrl.u32 %v16636_v18, 16  ;;  %v16690_v58 = vld [vmem:[#allocation6 + $0xe4] sm:$0xf]  ;;  %11216 = vmatprep.mubr.bf16.mxu0 %v13089_v43 }
 0x797   : > { %7324 = vst.msk [vmem:[#allocation7 + $0x104] sm:$0xf] %vm6645_vm9, %v7080_v37  ;;  %v7638_v15 = vrot.slane %v7636_v40, 5  ;;  %v7644_v17 = vrot.slane %v7642_v33, 5  ;;  %v9334_v21 = vrot.slane %v16612_v29, 4  ;;  %v9339_v1 = vshll.u32 %v16636_v18, 16  ;;  %8472 = vrot.lane.b32.xlu0 %v8312_v63, %s13206_s13 }
 0x798   : > { %9152 = vst.msk [vmem:[#allocation7 + $0x8] sm:$0xf] %vm7503_vm10, %v9057_v14  ;;  %9812 = vst.msk [vmem:[#allocation7 + $0x48] sm:$0xf] %vm7503_vm10, %v9720_v62  ;;  %v9338_v53 = vrot.slane %v9336_v22, 7  ;;  %v10226_v38 = vshrl.u32 %v9883_v54, 16  ;;  %v8445_v43 = vpop.permute.xlu0 %8444 }
 0x799   : > { %v10229_v45 = vshll.u32 %v9883_v54, 16  ;;  %v8367_v19 = vshrl.u32 %v16657_v5, 16  ;;  %v7544_v44 = vld [vmem:[#allocation6 + $0x2c] sm:$0x1]  ;;  %v16702_v29 = vrot.slane %v8884_v34, 5  ;;  %v7639_v18 = vor.u32 %v7638_v15, %v7635_v6  ;;  %v8447_v57 = vpop.permute.xlu1 %8446 }
 0x79a   : > { %v8372_v51 = vshrl.u32 %v16690_v58, 16  ;;  %v7648_v47 = vrot.slane %v7646_v20, 4  ;;  %v16705_v4 = vld [vmem:[#allocation6 + $0xd0] sm:$0x8]  ;;  %v7372_v56 = vld [vmem:[#allocation6 + $0xe8] sm:$0xf]  ;;  %v9341_v24 = vor.u32 %v9339_v1, %v9338_v53  ;;  %v6633_v53 = vpop.f32.mrf.mxu1 }
 0x79b   : > { %v10228_v40 = vrot.slane %v10226_v38, 4  ;;  %v10231_v5 = vrot.slane %v10229_v45, 5  ;;  %v8375_v33 = vshll.u32 %v16690_v58, 16  ;;  %v16708_v54 = vld [vmem:[#allocation6 + $0xd4] sm:$0xf]  ;;  %v7640_v37 = vrot.slane %v7639_v18, 4  ;;  %7465 = vrot.lane.b32.xlu1 %v7372_v56, %s13206_s13  ;;  %11217 = vmatmul.mubr.bf16.gmra.mxu0 %v12273_v35 }
 0x79c   : > { %v16710_v12 = vrot.slane %v8372_v51, 7  ;;  %v7649_v34 = vor.u32 %v7648_v47, %v7644_v17  ;;  %v7652_v6 = vshll.u32 %v7544_v44, 16  ;;  %v8569_v22 = vld [vmem:[#allocation6 + $0x58] sm:$0xf]  ;;  %8534 = vst.msk [vmem:[#allocation7 + $0x7c] sm:$0xf] %vm7503_vm10, %v8445_v43  ;;  %v9342_v14 = vsel %vm13468_vm6, %v9334_v21, %v9341_v24  ;;  %v7432_v32 = vpop.permute.xlu0 %7431  ;;  %9088 = vrot.lane.b32.xlu0 %v8877_v26, %s13206_s13 }
 0x79d   : > { %9153 = vst.msk [vmem:[#allocation7 + $0x1c] sm:$0xf] %vm7503_vm10, %v9059_v55  ;;  %v16714_v20 = vrot.slane %v8881_v46, 4  ;;  %v10232_v58 = vor.u32 %v10231_v5, %v10228_v40  ;;  %v16718_v62 = vrot.slane %v8367_v19, 11  ;;  %v9880_v15 = vld [vmem:[#allocation6 + $0xf4] sm:$0xf]  ;;  %v7645_v46 = vsel %vm13458_vm5, %v7640_v37, %v7644_v17 }
 0x79e   : > { %v9884_v1 = vld [vmem:[#allocation6 + $0x108] sm:$0xf]  ;;  %8601 = vst.msk [vmem:[#allocation7 + $0xbc] sm:$0xf] %vm6645_vm9, %v8569_v22  ;;  %9626 = vst.msk [vmem:[#allocation7 + $0xc0] sm:$0xf] %vm6645_vm9, %v9342_v14  ;;  %v16738_v63 = vor.u32 %v8375_v33, %v16710_v12  ;;  %v12443_v24 = vpack.c.bf16 %v6633_v53, %v6633_v53  ;;  %v7434_v22 = vpop.permute.xlu1 %7433 }
 0x79f   : > { %v10202_v21 = vshrl.u32 %v9880_v15, 16  ;;  %v10205_v38 = vshll.u32 %v9880_v15, 16  ;;  %v8350_v45 = vshrl.u32 %v16708_v54, 16  ;;  %8004 = vst.msk [vmem:[#allocation7 + $0x54] sm:$0xf] %vm6645_vm9, %v7645_v46  ;;  %v7650_v19 = vrot.slane %v7649_v34, 4  ;;  %8474 = vrot.lane.b32.xlu1 %v16667_v27, %s13206_s13 }
 0x7a0   : > { %v7654_v44 = vrot.slane %v7652_v6, 5  ;;  %v10235_v18 = vshll.u32 %v9884_v1, 16  ;;  %v8345_v51 = vshrl.u32 %v16705_v4, 16  ;;  %v8073_v56 = vld [vmem:[#allocation6 + $0xe8] sm:$0xf]  ;;  %v16743_v40 = vrot.slane %v10170_v10, 4  ;;  %v9730_v6 = vpop.permute.xlu0 %9729 }
 0x7a1   : > { %v10204_v17 = vrot.slane %v10202_v21, 4  ;;  %v10207_v47 = vrot.slane %v10205_v38, 5  ;;  %8535 = vst.msk [vmem:[#allocation7 + $0x90] sm:$0xf] %vm7503_vm10, %v8447_v57  ;;  %7516 = vst.msk [vmem:[#allocation7 + $0xf0] sm:$0xf] %vm7503_vm10, %v7432_v32  ;;  %v8887_v25 = vsel %vm13458_vm5, %v16714_v20, %v16702_v29  ;;  %v8378_v14 = vsel %vm13468_vm6, %v16718_v62, %v16738_v63 }
 0x7a2   : > { %v7655_v11 = vsel %vm13458_vm5, %v7650_v19, %v7654_v44  ;;  %v10239_v35 = vshrl.u32 %v9884_v1, 16  ;;  %v6894_v4 = vld [vmem:[#allocation6 + $0x50] sm:$0x8]  ;;  %v6895_v5 = vld [vmem:[#allocation6 + $0x54] sm:$0xf]  ;;  %v16761_v61 = vrot.slane %v10232_v58, 4  ;;  %v9902_v1 = vsel %vm13458_vm5, %v15784_v7, %v15775_v8 }
 0x7a3   : > { %v10208_v3 = vor.u32 %v10207_v47, %v10204_v17  ;;  %8005 = vst.msk [vmem:[#allocation7 + $0x68] sm:$0xf] %vm6645_vm9, %v7655_v11  ;;  %v16764_v10 = vrot.slane %v8350_v45, 7  ;;  %v8353_v29 = vshll.u32 %v16708_v54, 16  ;;  %6876 = vst.msk [vmem:[#allocation6 + $0xf8] sm:$0xf] %vm6645_vm9, %v12443_v24  ;;  %9090 = vrot.lane.b32.xlu1 %v8887_v25, %s13206_s13  ;;  %v9732_v17 = vpop.permute.xlu1 %9731 }
 0x7a4   : > { %v16768_v33 = vld [vmem:[#allocation6 + $0xd8] sm:$0xf]  ;;  %v7369_v43 = vld [vmem:[#allocation6 + $0xd4] sm:$0xf]  ;;  %v16770_v55 = vld [vmem:[#allocation7 + $0x44] sm:$0xff]  ;;  %v16772_v59 = vrot.slane %v10235_v18, 5  ;;  %v8441_v63 = vpop.permute.xlu0 %8440 }
 0x7a5   : > { %v16774_v42 = vrot.slane %v8345_v51, 11  ;;  %v8381_v26 = vshrl.u32 %v8073_v56, 16  ;;  %v8384_v27 = vshll.u32 %v8073_v56, 16  ;;  %v9194_v37 = vld [vmem:[#allocation6 + $0x50] sm:$0x8]  ;;  %v16783_v58 = vor.u32 %v8353_v29, %v16764_v10  ;;  %7459 = vrot.lane.b32.xlu0 %v7369_v43, %s13206_s13 }
 0x7a6   : > { %v16776_v34 = vld [vmem:[#allocation6 + $0x54] sm:$0xf]  ;;  %v13098_v20 = vld [vmem:[#allocation7 + $0x8] ss:$20 sps:$4 sm:$0xff]   ;;  %v13100_v54 = vld [vmem:[#allocation7 + $0xc] ss:$20 sps:$4 sm:$0xff]  }
 0x7a7   : > { %v8379_v15 = vrot.slane %v16710_v12, 4  ;;  %9817 = vst.msk [vmem:[#allocation7 + $0xac] sm:$0xf] %vm7503_vm10, %v9730_v6  ;;  %7517 = vst.msk [vmem:[#allocation7 + $0x104] sm:$0xf] %vm7503_vm10, %v7434_v22  ;;  %v16792_v53 = vld [vmem:[#allocation7 + $0x30] sm:$0xff]  ;;  %11369 = vmatprep.mubr.bf16.mxu1 %v13100_v54  ;;  %v8356_v44 = vsel %vm13468_vm6, %v16774_v42, %v16783_v58 }
 0x7a8   : > { %v16794_v46 = vrot.slane %v10239_v35, 4  ;;  %v8383_v21 = vrot.slane %v8381_v26, 7  ;;  %v7038_v62 = vshrl.u32 %v6894_v4, 16  ;;  %v7043_v38 = vshrl.u32 %v6895_v5, 16  ;;  %10305 = vst.msk [vmem:[#allocation7 + $0x10] sm:$0xf] %vm6645_vm9, %v9902_v1  ;;  %11370 = vmatmul.mubr.bf16.vlgmr.msra.gmra.mxu1 %v13098_v20  ;;  %v9069_v54 = vpop.permute.xlu0 %9068 }
 0x7a9   : > { %v16799_v12 = vrot.slane %v10208_v3, 4  ;;  %v12275_v8 = vcombine.low %v16792_v53, %v16770_v55  ;;  %v7046_v7 = vshll.u32 %v6895_v5, 16  ;;  %v8359_v45 = vshrl.u32 %v16768_v33, 16  ;;  %v13101_v19 = vld [vmem:[#allocation7 + $0x34] ss:$20 sps:$4 sm:$0xff]   ;;  %12955 = vmatpush3.bf16.msra.mxu1 %v16641_v28  ;;  %8484 = vrot.lane.b32.xlu0 %v8378_v14, %s13206_s13 }
 0x7aa   : > { %v8386_v18 = vor.u32 %v8384_v27, %v8383_v21  ;;  %v12224_v51 = vrot.slane %v7038_v62, 11  ;;  %v16808_v57 = vrot.slane %v7043_v38, 7  ;;  %v6896_v32 = vld [vmem:[#allocation6 + $0x58] sm:$0xf]  ;;  %v8362_v56 = vshll.u32 %v16768_v33, 16  ;;  %11377 = vmatprep.mubr.bf16.mxu1 %v13101_v19 }
 0x7ab   : > { %v8361_v47 = vrot.slane %v8359_v45, 7  ;;  %v9300_v24 = vshrl.u32 %v9194_v37, 16  ;;  %v9305_v25 = vshrl.u32 %v16776_v34, 16  ;;  %v9196_v11 = vld [vmem:[#allocation6 + $0x58] sm:$0xf]  ;;  %v8357_v29 = vrot.slane %v16764_v10, 4 }
 0x7ac   : > { %8532 = vst.msk [vmem:[#allocation7 + $0x54] sm:$0xf] %vm7503_vm10, %v8441_v63  ;;  %9818 = vst.msk [vmem:[#allocation7 + $0xc0] sm:$0xf] %vm7503_vm10, %v9732_v17  ;;  %v7370_v35 = vld [vmem:[#allocation6 + $0xd8] sm:$0xf]  ;;  %v8387_v4 = vsel %vm13468_vm6, %v8379_v15, %v8386_v18  ;;  %v7048_v3 = vor.u32 %v7046_v7, %v16808_v57 }
 0x7ad   : > { %v9881_v5 = vld [vmem:[#allocation6 + $0xf8] sm:$0xf]  ;;  %v9308_v33 = vshll.u32 %v16776_v34, 16  ;;  %7461 = vrot.lane.b32.xlu1 %v7370_v35, %s13206_s13  ;;  %v12254_v26 = vrot.slane %v9300_v24, 11  ;;  %v7050_v27 = vrot.slane %v16808_v57, 4  ;;  %v9307_v6 = vrot.slane %v9305_v25, 7  ;;  %v8443_v34 = vpop.permute.xlu1 %8442  ;;  %8480 = vrot.lane.b32.xlu0 %v8356_v44, %s13206_s13 }
 0x7ae   : > { %v10211_v43 = vshll.u32 %v9881_v5, 16  ;;  %v10215_v42 = vshrl.u32 %v9881_v5, 16  ;;  %v7049_v37 = vsel %vm13468_vm6, %v12224_v51, %v7048_v3  ;;  %v7052_v22 = vshrl.u32 %v6896_v32, 16  ;;  %v8077_v10 = vld [vmem:[#allocation6 + $0x100] sm:$0x8] }
 0x7af   : > { %v7055_v20 = vshll.u32 %v6896_v32, 16  ;;  %7321 = vst.msk [vmem:[#allocation7 + $0xc8] sm:$0xf] %vm6645_vm9, %v7049_v37  ;;  %v8364_v14 = vor.u32 %v8362_v56, %v8361_v47  ;;  %v9314_v15 = vshrl.u32 %v9196_v11, 16  ;;  %v8078_v1 = vld [vmem:[#allocation6 + $0x104] sm:$0xf]  ;;  %v9310_v21 = vor.u32 %v9308_v33, %v9307_v6 }
 0x7b0   : > { %v16825_v58 = vrot.slane %v10211_v43, 5  ;;  %v16827_v28 = vrot.slane %v10215_v42, 4  ;;  %9158 = vst.msk [vmem:[#allocation7 + $0x80] sm:$0xf] %vm7503_vm10, %v9069_v54  ;;  %8533 = vst.msk [vmem:[#allocation7 + $0x68] sm:$0xf] %vm7503_vm10, %v8443_v34  ;;  %11378 = vmatmul.mubr.bf16.gmra.mxu1 %v12275_v8 }
 0x7b1   : > { %v7054_v62 = vrot.slane %v7052_v22, 7  ;;  %v9312_v38 = vrot.slane %v9307_v6, 4  ;;  %v9317_v7 = vshll.u32 %v9196_v11, 16  ;;  %v7551_v45 = vld [vmem:[#allocation6 + $0x54] sm:$0xf]  ;;  %8486 = vrot.lane.b32.xlu1 %v8387_v4, %s13206_s13  ;;  %v9316_v51 = vrot.slane %v9314_v15, 7  ;;  %v9071_v25 = vpop.permute.xlu1 %9070 }
 0x7b2   : > { %v10214_v19 = vsel %vm13458_vm5, %v16799_v12, %v16825_v58  ;;  %v10218_v18 = vor.u32 %v16827_v28, %v16825_v58  ;;  %v8411_v57 = vshrl.u32 %v8077_v10, 16  ;;  %v16840_v32 = vld [vmem:[#allocation6 + $0x58] sm:$0xf]  ;;  %v9665_v63 = vld [vmem:[#allocation6 + $0xa4] sm:$0xf]  ;;  %v9311_v44 = vsel %vm13468_vm6, %v12254_v26, %v9310_v21  ;;  %v7428_v12 = vpop.permute.xlu0 %7427  ;;  %v16851_v4 = vld [vmem:[#allocation7 + $0x8c] sm:$0xff] }
 0x7b3   : > { %10331 = vst.msk [vmem:[#allocation7 + $0x218] sm:$0xf] %vm6645_vm9, %v10214_v19  ;;  %v7057_v17 = vor.u32 %v7055_v20, %v7054_v62  ;;  %v8416_v47 = vshrl.u32 %v8078_v1, 16  ;;  %v8419_v56 = vshll.u32 %v8078_v1, 16  ;;  %v8074_v24 = vld [vmem:[#allocation6 + $0xf0] sm:$0x8]  ;;  %v8365_v11 = vsel %vm13468_vm6, %v8357_v29, %v8364_v14  ;;  %9745 = vrot.lane.b32.xlu0 %v9665_v63, %s13206_s13 }
 0x7b4   : > { %9623 = vst.msk [vmem:[#allocation7 + $0x84] sm:$0xf] %vm6645_vm9, %v9311_v44  ;;  %v9319_v35 = vor.u32 %v9317_v7, %v9316_v51  ;;  %v16853_v5 = vrot.slane %v8411_v57, 11  ;;  %v7705_v3 = vshrl.u32 %v7551_v45, 16  ;;  %v8075_v33 = vld [vmem:[#allocation6 + $0xf4] sm:$0xf] }
 0x7b5   : > { %7514 = vst.msk [vmem:[#allocation7 + $0xc8] sm:$0xf] %vm7503_vm10, %v7428_v12  ;;  %9159 = vst.msk [vmem:[#allocation7 + $0x94] sm:$0xf] %vm7503_vm10, %v9071_v25  ;;  %v7058_v55 = vsel %vm13468_vm6, %v7050_v27, %v7057_v17  ;;  %v16859_v53 = vrot.slane %v8416_v47, 7  ;;  %v7708_v8 = vshll.u32 %v7551_v45, 16  ;;  %8482 = vrot.lane.b32.xlu1 %v8365_v11, %s13206_s13  ;;  %v7430_v45 = vpop.permute.xlu1 %7429 }
 0x7b6   : > { %v7714_v29 = vshll.u32 %v16840_v32, 16  ;;  %v7553_v43 = vld [vmem:[#allocation6 + $0x5c] sm:$0x1]  ;;  %v8574_v42 = vld [vmem:[#allocation6 + $0x84] sm:$0xf]  ;;  %v9320_v27 = vsel %vm13468_vm6, %v9312_v38, %v9319_v35  ;;  %v7707_v37 = vrot.slane %v7705_v3, 4  ;;  %v9726_v7 = vpop.permute.xlu0 %9725 }
 0x7b7   : > { %v13140_v26 = vld [vmem:[%s18044_s5 + $0x110] sm:$0xff]   ;;  %7322 = vst.msk [vmem:[#allocation7 + $0xdc] sm:$0xf] %vm6645_vm9, %v7058_v55  ;;  %v7718_v6 = vshrl.u32 %v16840_v32, 16  ;;  %v8389_v22 = vshrl.u32 %v8074_v24, 16  ;;  %v10349_v14 = vld [vmem:[#allocation7 + $0x50] sm:$0xff]  ;;  %v8421_v1 = vor.u32 %v8419_v56, %v16859_v53 }
 0x7b8   : > { %v16871_v20 = vld [vmem:[#allocation6 + $0x108] sm:$0xf]  ;;  %v6903_v10 = vld [vmem:[#allocation6 + $0x80] sm:$0x8]  ;;  %v16873_v54 = vld [vmem:[#allocation6 + $0x84] sm:$0xf]  ;;  %12913 = vmatprep.subr.bf16.mxu0 %v13140_v26  ;;  %12952 = vmatprep.subr.bf16.mxu1 %v13140_v26 }
 0x7b9   : > { %8606 = vst.msk [vmem:[#allocation7 + $0x120] sm:$0xf] %vm6645_vm9, %v8574_v42  ;;  %v9666_v34 = vld [vmem:[#allocation6 + $0xa8] sm:$0xf]  ;;  %9624 = vst.msk [vmem:[#allocation7 + $0x98] sm:$0xf] %vm6645_vm9, %v9320_v27  ;;  %12914 = vmatpush3.bf16.msra.mxu0 %v13140_v26  ;;  %12956 = vmatpush3.bf16.msra.mxu1 %v13140_v26  ;;  %v8422_v56 = vsel %vm13468_vm6, %v16853_v5, %v8421_v1  ;;  %v9728_v27 = vpop.permute.xlu1 %9727 }
 0x7ba   : > { %v16877_v15 = vld [vmem:[#allocation7 + $0x78] sm:$0xff]  ;;  %v7710_v21 = vrot.slane %v7708_v8, 5  ;;  %v7716_v62 = vrot.slane %v7714_v29, 5  ;;  %v8394_v38 = vshrl.u32 %v8075_v33, 16  ;;  %v10352_v19 = vld [vmem:[#allocation7 + $0x64] sm:$0xff]  ;;  %v16880_v57 = vrot.slane %v8389_v22, 11  ;;  %9747 = vrot.lane.b32.xlu1 %v9666_v34, %s13206_s13  ;;  %v9065_v26 = vpop.permute.xlu0 %9064 }
 0x7bb   : > { %v13103_v51 = vld [vmem:[#allocation7 + $0x54] ss:$20 sps:$4 sm:$0xff]   ;;  %v8397_v32 = vshll.u32 %v8075_v33, 16  ;;  %v8423_v63 = vrot.slane %v16859_v53, 4  ;;  %v12283_v44 = vcombine.low %v16877_v15, %v16851_v4  ;;  %9815 = vst.msk [vmem:[#allocation7 + $0x84] sm:$0xf] %vm7503_vm10, %v9726_v7  ;;  %v12278_v47 = vcombine.low %v10349_v14, %v10352_v19 }
 0x7bc   : > { %7515 = vst.msk [vmem:[#allocation7 + $0xdc] sm:$0xf] %vm7503_vm10, %v7430_v45  ;;  %v7373_v17 = vld [vmem:[#allocation6 + $0xf4] sm:$0xf]  ;;  %v7711_v24 = vor.u32 %v7710_v21, %v7707_v37  ;;  %v16890_v12 = vrot.slane %v8394_v38, 7  ;;  %v8425_v11 = vshrl.u32 %v16871_v20, 16  ;;  %11224 = vmatprep.mubr.bf16.mxu0 %v13103_v51 }
 0x7bd   : > { %v8651_v25 = vld [vmem:[#allocation6 + $0xa4] sm:$0xf]  ;;  %7467 = vrot.lane.b32.xlu0 %v7373_v17, %s13206_s13  ;;  %v8428_v35 = vshll.u32 %v16871_v20, 16  ;;  %v7720_v3 = vrot.slane %v7718_v6, 4  ;;  %v7724_v33 = vshll.u32 %v7553_v43, 16  ;;  %v7104_v29 = vshrl.u32 %v6903_v10, 16  ;;  %11225 = vmatmul.mubr.bf16.gmra.mxu0 %v12278_v47 }
 0x7be   : > { %v16896_v55 = vld [vmem:[#allocation6 + $0xa8] sm:$0xf]  ;;  %v13105_v53 = vld [vmem:[#allocation7 + $0x7c] ss:$20 sps:$4 sm:$0xff]   ;;  %v7712_v8 = vrot.slane %v7711_v24, 4  ;;  %v8399_v5 = vor.u32 %v8397_v32, %v16890_v12  ;;  %v7109_v42 = vshrl.u32 %v16873_v54, 16  ;;  %v8453_v24 = vpop.permute.xlu0 %8452 }
 0x7bf   : > { %v8427_v37 = vrot.slane %v8425_v11, 7  ;;  %v7721_v22 = vor.u32 %v7720_v3, %v7716_v62  ;;  %v7726_v34 = vrot.slane %v7724_v33, 5  ;;  %v7112_v20 = vshll.u32 %v16873_v54, 16  ;;  %v8575_v6 = vld [vmem:[#allocation6 + $0x88] sm:$0xf]  ;;  %11232 = vmatprep.mubr.bf16.mxu0 %v13105_v53 }
 0x7c0   : > { %9156 = vst.msk [vmem:[#allocation7 + $0x58] sm:$0xf] %vm7503_vm10, %v9065_v26  ;;  %9816 = vst.msk [vmem:[#allocation7 + $0x98] sm:$0xf] %vm7503_vm10, %v9728_v27  ;;  %v7374_v43 = vld [vmem:[#allocation6 + $0xf8] sm:$0xf]  ;;  %v7717_v10 = vsel %vm13458_vm5, %v7712_v8, %v7716_v62  ;;  %v8400_v14 = vsel %vm13468_vm6, %v16880_v57, %v8399_v5 }
 0x7c1   : > { %v12227_v1 = vrot.slane %v7104_v29, 11  ;;  %v16908_v21 = vrot.slane %v7109_v42, 7  ;;  %v9203_v38 = vld [vmem:[#allocation6 + $0x80] sm:$0x8]  ;;  %8607 = vst.msk [vmem:[#allocation7 + $0x134] sm:$0xf] %vm6645_vm9, %v8575_v6  ;;  %8492 = vrot.lane.b32.xlu0 %v8422_v56, %s13206_s13  ;;  %7469 = vrot.lane.b32.xlu1 %v7374_v43, %s13206_s13  ;;  %v8430_v54 = vor.u32 %v8428_v35, %v8427_v37  ;;  %v9067_v56 = vpop.permute.xlu1 %9066 }
 0x7c2   : > { %8010 = vst.msk [vmem:[#allocation7 + $0xcc] sm:$0xf] %vm6645_vm9, %v7717_v10  ;;  %v7722_v7 = vrot.slane %v7721_v22, 4  ;;  %v8889_v45 = vshrl.u32 %v8651_v25, 16  ;;  %v8892_v62 = vshll.u32 %v8651_v25, 16  ;;  %v8898_v57 = vshll.u32 %v16896_v55, 16  ;;  %v7440_v43 = vpop.permute.xlu0 %7439 }
 0x7c3   : > { %v8076_v19 = vld [vmem:[#allocation6 + $0xf8] sm:$0xf]  ;;  %v7114_v51 = vor.u32 %v7112_v20, %v16908_v21  ;;  %v8902_v32 = vshrl.u32 %v16896_v55, 16  ;;  %v8401_v17 = vrot.slane %v16890_v12, 4  ;;  %v9204_v47 = vld [vmem:[#allocation6 + $0x84] sm:$0xf]  ;;  %v8431_v11 = vsel %vm13468_vm6, %v8423_v63, %v8430_v54 }
 0x7c4   : > { %v7727_v35 = vsel %vm13458_vm5, %v7722_v7, %v7726_v34  ;;  %v8891_v3 = vrot.slane %v8889_v45, 4  ;;  %v8894_v25 = vrot.slane %v8892_v62, 5  ;;  %v6905_v33 = vld [vmem:[#allocation6 + $0x88] sm:$0xf]  ;;  %8538 = vst.msk [vmem:[#allocation7 + $0xcc] sm:$0xf] %vm7503_vm10, %v8453_v24 }
 0x7c5   : > { %9157 = vst.msk [vmem:[#allocation7 + $0x6c] sm:$0xf] %vm7503_vm10, %v9067_v56  ;;  %v7115_v12 = vsel %vm13468_vm6, %v12227_v1, %v7114_v51  ;;  %v8900_v55 = vrot.slane %v8898_v57, 5  ;;  %v8403_v53 = vshrl.u32 %v8076_v19, 16  ;;  %v8406_v8 = vshll.u32 %v8076_v19, 16  ;;  %8488 = vrot.lane.b32.xlu0 %v8400_v14, %s13206_s13  ;;  %8494 = vrot.lane.b32.xlu1 %v8431_v11, %s13206_s13  ;;  %v8455_v6 = vpop.permute.xlu1 %8454 }
 0x7c6   : > { %8011 = vst.msk [vmem:[#allocation7 + $0xe0] sm:$0xf] %vm6645_vm9, %v7727_v35  ;;  %v8653_v5 = vld [vmem:[#allocation6 + $0xac] sm:$0x1]  ;;  %7327 = vst.msk [vmem:[#allocation7 + $0x140] sm:$0xf] %vm6645_vm9, %v7115_v12  ;;  %v8895_v63 = vor.u32 %v8894_v25, %v8891_v3  ;;  %11233 = vmatmul.mubr.bf16.gmra.mxu0 %v12283_v44  ;;  %v9738_v12 = vpop.permute.xlu0 %9737 }
 0x7c7   : > { %v9366_v29 = vshrl.u32 %v9203_v38, 16  ;;  %v9371_v42 = vshrl.u32 %v9204_v47, 16  ;;  %v9374_v26 = vshll.u32 %v9204_v47, 16  ;;  %v7548_v27 = vld [vmem:[#allocation6 + $0x44] sm:$0xf]  ;;  %v8405_v37 = vrot.slane %v8403_v53, 7 }
 0x7c8   : > { %v7116_v22 = vrot.slane %v16908_v21, 4  ;;  %v7118_v34 = vshrl.u32 %v6905_v33, 16  ;;  %v7121_v20 = vshll.u32 %v6905_v33, 16  ;;  %v8896_v10 = vrot.slane %v8895_v63, 4  ;;  %v7549_v38 = vld [vmem:[#allocation6 + $0x48] sm:$0xf] }
 0x7c9   : > { %v12257_v14 = vrot.slane %v9366_v29, 11  ;;  %v16934_v1 = vrot.slane %v9371_v42, 7  ;;  %v8904_v54 = vrot.slane %v8902_v32, 4  ;;  %8539 = vst.msk [vmem:[#allocation7 + $0xe0] sm:$0xf] %vm7503_vm10, %v8455_v6  ;;  %v8408_v7 = vor.u32 %v8406_v8, %v8405_v37  ;;  %v16940_v4 = vld [vmem:[#allocation7 + $0x94] sm:$0xff] }
 0x7ca   : > { %7520 = vst.msk [vmem:[#allocation7 + $0x140] sm:$0xf] %vm7503_vm10, %v7440_v43  ;;  %v7120_v21 = vrot.slane %v7118_v34, 7  ;;  %v8908_v45 = vshll.u32 %v8653_v5, 16  ;;  %v7681_v62 = vshrl.u32 %v7548_v27, 16  ;;  %v8901_v15 = vsel %vm13458_vm5, %v8896_v10, %v8900_v55  ;;  %v16948_v3 = vld [vmem:[#allocation7 + $0x80] sm:$0xff] }
 0x7cb   : > { %v16938_v19 = vld [vmem:[#allocation6 + $0x88] sm:$0xf]  ;;  %v9376_v44 = vor.u32 %v9374_v26, %v16934_v1  ;;  %v8905_v51 = vor.u32 %v8904_v54, %v8900_v55  ;;  %v7684_v57 = vshll.u32 %v7548_v27, 16  ;;  %v8654_v32 = vld [vmem:[#allocation6 + $0xb4] sm:$0xf]  ;;  %9092 = vrot.lane.b32.xlu0 %v8901_v15, %s13206_s13  ;;  %v8409_v24 = vsel %vm13468_vm6, %v8401_v17, %v8408_v7  ;;  %v7442_v55 = vpop.permute.xlu1 %7441 }
 0x7cc   : > { %v8572_v47 = vld [vmem:[#allocation6 + $0x74] sm:$0xf]  ;;  %v7123_v56 = vor.u32 %v7121_v20, %v7120_v21  ;;  %v8910_v11 = vrot.slane %v8908_v45, 5  ;;  %v7683_v35 = vrot.slane %v7681_v62, 4  ;;  %v8655_v25 = vld [vmem:[#allocation6 + $0xb8] sm:$0xf]  ;;  %8490 = vrot.lane.b32.xlu1 %v8409_v24, %s13206_s13  ;;  %v12285_v17 = vcombine.low %v16948_v3, %v16940_v4  ;;  %v8449_v21 = vpop.permute.xlu0 %8448 }
 0x7cd   : > { %8604 = vst.msk [vmem:[#allocation7 + $0xf8] sm:$0xf] %vm6645_vm9, %v8572_v47  ;;  %v9377_v33 = vsel %vm13468_vm6, %v12257_v14, %v9376_v44  ;;  %v9667_v53 = vld [vmem:[#allocation6 + $0xb4] sm:$0xf]  ;;  %v8906_v8 = vrot.slane %v8905_v51, 4  ;;  %v7686_v42 = vrot.slane %v7684_v57, 5 }
 0x7ce   : > { %v13107_v5 = vld [vmem:[#allocation7 + $0x5c] ss:$20 sps:$4 sm:$0xff]   ;;  %v13109_v63 = vld [vmem:[#allocation7 + $0x58] ss:$20 sps:$4 sm:$0xff]   ;;  %9629 = vst.msk [vmem:[#allocation7 + $0xfc] sm:$0xf] %vm6645_vm9, %v9377_v33  ;;  %v7124_v29 = vsel %vm13468_vm6, %v7116_v22, %v7123_v56 }
 0x7cf   : > { %v7690_v26 = vshll.u32 %v7549_v38, 16  ;;  %v7694_v27 = vshrl.u32 %v7549_v38, 16  ;;  %v7550_v37 = vld [vmem:[#allocation6 + $0x4c] sm:$0x1]  ;;  %9821 = vst.msk [vmem:[#allocation7 + $0xfc] sm:$0xf] %vm7503_vm10, %v9738_v12  ;;  %v8911_v34 = vsel %vm13458_vm5, %v8906_v8, %v8910_v11  ;;  %11385 = vmatprep.mubr.bf16.mxu1 %v13107_v5  ;;  %9749 = vrot.lane.b32.xlu0 %v9667_v53, %s13206_s13  ;;  %v7687_v22 = vor.u32 %v7686_v42, %v7683_v35 }
 0x7d0   : > { %7328 = vst.msk [vmem:[#allocation7 + $0x154] sm:$0xf] %vm6645_vm9, %v7124_v29  ;;  %v9378_v20 = vrot.slane %v16934_v1, 4  ;;  %v9380_v6 = vshrl.u32 %v16938_v19, 16  ;;  %v9383_v43 = vshll.u32 %v16938_v19, 16  ;;  %11386 = vmatmul.mubr.bf16.gmra.mxu1 %v13109_v63  ;;  %v8913_v54 = vshrl.u32 %v8654_v32, 16  ;;  %9094 = vrot.lane.b32.xlu1 %v8911_v34, %s13206_s13  ;;  %v9740_v1 = vpop.permute.xlu1 %9739  ;;  %v9077_v42 = vpop.permute.xlu0 %9076 }
 0x7d1   : > { %v13110_v10 = vld [vmem:[#allocation7 + $0x84] ss:$20 sps:$4 sm:$0xff]   ;;  %7521 = vst.msk [vmem:[#allocation7 + $0x154] sm:$0xf] %vm7503_vm10, %v7442_v55  ;;  %v7692_v14 = vrot.slane %v7690_v26, 5  ;;  %v8916_v38 = vshll.u32 %v8654_v32, 16 }
 0x7d2   : > { %v8573_v7 = vld [vmem:[#allocation6 + $0x78] sm:$0xf]  ;;  %v9382_v45 = vrot.slane %v9380_v6, 7  ;;  %11393 = vmatprep.mubr.bf16.mxu1 %v13110_v10  ;;  %v8922_v62 = vshll.u32 %v8655_v25, 16  ;;  %v8926_v15 = vshrl.u32 %v8655_v25, 16  ;;  %v7696_v19 = vrot.slane %v7694_v27, 4 }
 0x7d3   : > { %v8656_v44 = vld [vmem:[#allocation6 + $0xbc] sm:$0x1]  ;;  %8605 = vst.msk [vmem:[#allocation7 + $0x10c] sm:$0xf] %vm6645_vm9, %v8573_v7  ;;  %v7688_v51 = vrot.slane %v7687_v22, 4  ;;  %v8915_v57 = vrot.slane %v8913_v54, 4 }
 0x7d4   : > { %v8918_v47 = vrot.slane %v8916_v38, 5  ;;  %v7700_v24 = vshll.u32 %v7550_v37, 16  ;;  %v6900_v56 = vld [vmem:[#allocation6 + $0x70] sm:$0x8]  ;;  %v9385_v11 = vor.u32 %v9383_v43, %v9382_v45  ;;  %v8924_v32 = vrot.slane %v8922_v62, 5  ;;  %v8451_v27 = vpop.permute.xlu1 %8450  ;;  %v13157_v4 = vld [vmem:[%s18044_s5 + $0x100] sm:$0xff]  }
 0x7d5   : > { %v7697_v35 = vor.u32 %v7696_v19, %v7692_v14  ;;  %v8928_v33 = vrot.slane %v8926_v15, 4  ;;  %v6901_v12 = vld [vmem:[#allocation6 + $0x74] sm:$0xf]  ;;  %v7693_v55 = vsel %vm13458_vm5, %v7688_v51, %v7692_v14  ;;  %v9668_v8 = vld [vmem:[#allocation6 + $0xb8] sm:$0xf]  ;;  %v8932_v5 = vshll.u32 %v8656_v44, 16 }
 0x7d6   : > { %v8919_v53 = vor.u32 %v8918_v47, %v8915_v57  ;;  %v7702_v25 = vrot.slane %v7700_v24, 5  ;;  %v8657_v63 = vld [vmem:[#allocation6 + $0xc4] sm:$0xf]  ;;  %8008 = vst.msk [vmem:[#allocation7 + $0xa4] sm:$0xf] %vm6645_vm9, %v7693_v55  ;;  %v9386_v29 = vsel %vm13468_vm6, %v9378_v20, %v9385_v11  ;;  %9751 = vrot.lane.b32.xlu1 %v9668_v8, %s13206_s13  ;;  %v7082_v34 = vshrl.u32 %v6900_v56, 16  ;;  %v7436_v47 = vpop.permute.xlu0 %7435 }
 0x7d7   : > { %v7698_v26 = vrot.slane %v7697_v35, 4  ;;  %v8929_v37 = vor.u32 %v8928_v33, %v8924_v32  ;;  %v8658_v6 = vld [vmem:[#allocation6 + $0xc8] sm:$0xf]  ;;  %8536 = vst.msk [vmem:[#allocation7 + $0xa4] sm:$0xf] %vm7503_vm10, %v8449_v21  ;;  %v8934_v10 = vrot.slane %v8932_v5, 5 }
 0x7d8   : > { %9630 = vst.msk [vmem:[#allocation7 + $0x110] sm:$0xf] %vm6645_vm9, %v9386_v29  ;;  %v8920_v43 = vrot.slane %v8919_v53, 4  ;;  %v7087_v22 = vshrl.u32 %v6901_v12, 16  ;;  %v7090_v14 = vshll.u32 %v6901_v12, 16  ;;  %v12226_v7 = vrot.slane %v7082_v34, 11  ;;  %11394 = vmatmul.mubr.bf16.gmra.mxu1 %v12285_v17  ;;  %v9079_v24 = vpop.permute.xlu1 %9078 }
 0x7d9   : > { %9162 = vst.msk [vmem:[#allocation7 + $0xd0] sm:$0xf] %vm7503_vm10, %v9077_v42  ;;  %v9200_v54 = vld [vmem:[#allocation6 + $0x70] sm:$0x8]  ;;  %9822 = vst.msk [vmem:[#allocation7 + $0x110] sm:$0xf] %vm7503_vm10, %v9740_v1  ;;  %v7703_v20 = vsel %vm13458_vm5, %v7698_v26, %v7702_v25 }
 0x7da   : > { %v8930_v38 = vrot.slane %v8929_v37, 4  ;;  %v8937_v45 = vshrl.u32 %v8657_v63, 16  ;;  %v9201_v62 = vld [vmem:[#allocation6 + $0x74] sm:$0xf]  ;;  %v8925_v15 = vsel %vm13458_vm5, %v8920_v43, %v8924_v32  ;;  %8009 = vst.msk [vmem:[#allocation7 + $0xb8] sm:$0xf] %vm6645_vm9, %v7703_v20  ;;  %v9734_v34 = vpop.permute.xlu0 %9733 }
 0x7db   : > { %v13155_v21 = vld [vmem:[%s18044_s5 + $0x108] sm:$0xff]   ;;  %v16991_v1 = vrot.slane %v7087_v22, 7  ;;  %v8940_v19 = vshll.u32 %v8657_v63, 16  ;;  %v8946_v44 = vshll.u32 %v8658_v6, 16  ;;  %v6902_v51 = vld [vmem:[#allocation6 + $0x78] sm:$0xf]  ;;  %9096 = vrot.lane.b32.xlu0 %v8925_v15, %s13206_s13 }
 0x7dc   : > { %8537 = vst.msk [vmem:[#allocation7 + $0xb8] sm:$0xf] %vm7503_vm10, %v8451_v27  ;;  %v8935_v57 = vsel %vm13458_vm5, %v8930_v38, %v8934_v10  ;;  %v8939_v56 = vrot.slane %v8937_v45, 4  ;;  %v8950_v11 = vshrl.u32 %v8658_v6, 16  ;;  %v9344_v32 = vshrl.u32 %v9200_v54, 16  ;;  %12915 = vmatprep.subr.bf16.mxu0 %v13155_v21  ;;  %12953 = vmatprep.subr.bf16.mxu1 %v13155_v21  ;;  %v7438_v6 = vpop.permute.xlu1 %7437 }
 0x7dd   : > { %v8659_v35 = vld [vmem:[#allocation6 + $0xcc] sm:$0x1]  ;;  %9098 = vrot.lane.b32.xlu1 %v8935_v57, %s13206_s13  ;;  %v7092_v3 = vor.u32 %v7090_v14, %v16991_v1  ;;  %9163 = vst.msk [vmem:[#allocation7 + $0xe4] sm:$0xf] %vm7503_vm10, %v9079_v24  ;;  %v8942_v17 = vrot.slane %v8940_v19, 5  ;;  %v8948_v33 = vrot.slane %v8946_v44, 5  ;;  %12916 = vmatpush3.bf16.msra.mxu0 %v13155_v21 }
 0x7de   : > { %v9349_v12 = vshrl.u32 %v9201_v62, 16  ;;  %v9202_v55 = vld [vmem:[#allocation6 + $0x78] sm:$0xf]  ;;  %v12256_v53 = vrot.slane %v9344_v32, 11  ;;  %v9352_v8 = vshll.u32 %v9201_v62, 16  ;;  %v7094_v25 = vrot.slane %v16991_v1, 4  ;;  %12917 = vmatprep.subr.bf16.mxu0 %v13157_v4  ;;  %12957 = vmatpush3.bf16.msra.mxu1 %v13155_v21 }
 0x7df   : > { %v7096_v5 = vshrl.u32 %v6902_v51, 16  ;;  %v9669_v63 = vld [vmem:[#allocation6 + $0xc4] sm:$0xf]  ;;  %v7093_v29 = vsel %vm13468_vm6, %v12226_v7, %v7092_v3  ;;  %v8943_v42 = vor.u32 %v8942_v17, %v8939_v56  ;;  %v9670_v26 = vld [vmem:[#allocation6 + $0xc8] sm:$0xf]  ;;  %v7099_v37 = vshll.u32 %v6902_v51, 16  ;;  %12954 = vmatprep.subr.bf16.mxu1 %v13157_v4 }
 0x7e0   : > { %v9351_v27 = vrot.slane %v9349_v12, 7  ;;  %9753 = vrot.lane.b32.xlu0 %v9669_v63, %s13206_s13  ;;  %7325 = vst.msk [vmem:[#allocation7 + $0x118] sm:$0xf] %vm6645_vm9, %v7093_v29  ;;  %v8952_v10 = vrot.slane %v8950_v11, 4  ;;  %v8956_v22 = vshll.u32 %v8659_v35, 16  ;;  %v9358_v14 = vshrl.u32 %v9202_v55, 16  ;;  %v9073_v12 = vpop.permute.xlu0 %9072 }
 0x7e1   : > { %v7098_v43 = vrot.slane %v7096_v5, 7  ;;  %v8660_v54 = vld [vmem:[#allocation6 + $0xd4] sm:$0xf]  ;;  %7518 = vst.msk [vmem:[#allocation7 + $0x118] sm:$0xf] %vm7503_vm10, %v7436_v47  ;;  %v8944_v20 = vrot.slane %v8943_v42, 4  ;;  %9755 = vrot.lane.b32.xlu1 %v9670_v26, %s13206_s13  ;;  %12918 = vmatpush3.bf16.msra.mxu0 %v13157_v4 }
 0x7e2   : > { %v9354_v38 = vor.u32 %v9352_v8, %v9351_v27  ;;  %v9356_v7 = vrot.slane %v9351_v27, 4  ;;  %v9361_v45 = vshll.u32 %v9202_v55, 16  ;;  %v8661_v62 = vld [vmem:[#allocation6 + $0xd8] sm:$0xf]  ;;  %v8953_v15 = vor.u32 %v8952_v10, %v8948_v33  ;;  %v7557_v44 = vld [vmem:[#allocation6 + $0x74] sm:$0xf]  ;;  %12958 = vmatpush3.bf16.msra.mxu1 %v13157_v4  ;;  %v9736_v8 = vpop.permute.xlu1 %9735 }
 0x7e3   : > { %v7101_v21 = vor.u32 %v7099_v37, %v7098_v43  ;;  %v8958_v1 = vrot.slane %v8956_v22, 5  ;;  %v9360_v19 = vrot.slane %v9358_v14, 7  ;;  %v7558_v51 = vld [vmem:[#allocation6 + $0x78] sm:$0xf]  ;;  %v8949_v57 = vsel %vm13458_vm5, %v8944_v20, %v8948_v33  ;;  %v10361_v24 = vld [vmem:[#allocation7 + $0xa0] sm:$0xff] }
 0x7e4   : > { %v9355_v47 = vsel %vm13468_vm6, %v12256_v53, %v9354_v38  ;;  %v10364_v56 = vld [vmem:[#allocation7 + $0xb4] sm:$0xff]  ;;  %v8961_v32 = vshrl.u32 %v8660_v54, 16  ;;  %v8964_v35 = vshll.u32 %v8660_v54, 16  ;;  %9100 = vrot.lane.b32.xlu0 %v8949_v57, %s13206_s13  ;;  %v8954_v17 = vrot.slane %v8953_v15, 4  ;;  %v13114_v5 = vld [vmem:[#allocation7 + $0xcc] ss:$20 sps:$4 sm:$0xff]   ;;  %v8461_v15 = vpop.permute.xlu0 %8460 }
 0x7e5   : > { %v13112_v11 = vld [vmem:[#allocation7 + $0xa4] ss:$20 sps:$4 sm:$0xff]   ;;  %9627 = vst.msk [vmem:[#allocation7 + $0xd4] sm:$0xf] %vm6645_vm9, %v9355_v47  ;;  %v7102_v3 = vsel %vm13468_vm6, %v7094_v25, %v7101_v21  ;;  %v12288_v55 = vcombine.low %v10361_v24, %v10364_v56  ;;  %v9363_v33 = vor.u32 %v9361_v45, %v9360_v19  ;;  %v8662_v53 = vld [vmem:[#allocation6 + $0xdc] sm:$0x1] }
 0x7e6   : > { %9819 = vst.msk [vmem:[#allocation7 + $0xd4] sm:$0xf] %vm7503_vm10, %v9734_v34  ;;  %v9671_v63 = vld [vmem:[#allocation6 + $0xd4] sm:$0xf]  ;;  %11240 = vmatprep.mubr.bf16.mxu0 %v13112_v11  ;;  %9160 = vst.msk [vmem:[#allocation7 + $0xa8] sm:$0xf] %vm7503_vm10, %v9073_v12  ;;  %v8959_v37 = vsel %vm13458_vm5, %v8954_v17, %v8958_v1  ;;  %v9075_v1 = vpop.permute.xlu1 %9074 }
 0x7e7   : > { %7326 = vst.msk [vmem:[#allocation7 + $0x12c] sm:$0xf] %vm6645_vm9, %v7102_v3  ;;  %v8963_v4 = vrot.slane %v8961_v32, 4  ;;  %v8966_v29 = vrot.slane %v8964_v35, 5  ;;  %v8970_v42 = vshll.u32 %v8661_v62, 16  ;;  %v8974_v26 = vshrl.u32 %v8661_v62, 16  ;;  %11241 = vmatmul.mubr.bf16.gmra.mxu0 %v12288_v55  ;;  %9102 = vrot.lane.b32.xlu1 %v8959_v37, %s13206_s13 }
 0x7e8   : > { %v7559_v25 = vld [vmem:[#allocation6 + $0x7c] sm:$0x1]  ;;  %v8576_v27 = vld [vmem:[#allocation6 + $0x94] sm:$0xf]  ;;  %7519 = vst.msk [vmem:[#allocation7 + $0x12c] sm:$0xf] %vm7503_vm10, %v7438_v6  ;;  %v9364_v34 = vsel %vm13468_vm6, %v9356_v7, %v9363_v33  ;;  %11248 = vmatprep.mubr.bf16.mxu0 %v13114_v5  ;;  %9757 = vrot.lane.b32.xlu0 %v9671_v63, %s13206_s13 }
 0x7e9   : > { %v10370_v43 = vld [vmem:[#allocation7 + $0xdc] sm:$0xff]  ;;  %v7753_v10 = vshrl.u32 %v7557_v44, 16  ;;  %v7756_v22 = vshll.u32 %v7557_v44, 16  ;;  %8608 = vst.msk [vmem:[#allocation7 + $0x148] sm:$0xf] %vm6645_vm9, %v8576_v27  ;;  %v10367_v54 = vld [vmem:[#allocation7 + $0xc8] sm:$0xff]  ;;  %v8967_v6 = vor.u32 %v8966_v29, %v8963_v4 }
 0x7ea   : > { %v6909_v14 = vld [vmem:[#allocation6 + $0xa0] sm:$0x8]  ;;  %9628 = vst.msk [vmem:[#allocation7 + $0xe8] sm:$0xf] %vm6645_vm9, %v9364_v34  ;;  %v8972_v20 = vrot.slane %v8970_v42, 5  ;;  %v7762_v38 = vshll.u32 %v7558_v51, 16  ;;  %v12293_v56 = vcombine.low %v10367_v54, %v10370_v43  ;;  %v8463_v42 = vpop.permute.xlu1 %8462 }
 0x7eb   : > { %v7766_v45 = vshrl.u32 %v7558_v51, 16  ;;  %v6910_v62 = vld [vmem:[#allocation6 + $0xa4] sm:$0xf]  ;;  %9820 = vst.msk [vmem:[#allocation7 + $0xe8] sm:$0xf] %vm7503_vm10, %v9736_v8  ;;  %v7755_v7 = vrot.slane %v7753_v10, 4 }
 0x7ec   : > { %v7758_v21 = vrot.slane %v7756_v22, 5  ;;  %v8976_v19 = vrot.slane %v8974_v26, 4  ;;  %v8980_v44 = vshll.u32 %v8662_v53, 16  ;;  %v8577_v57 = vld [vmem:[#allocation6 + $0x98] sm:$0xf]  ;;  %v8968_v47 = vrot.slane %v8967_v6, 4  ;;  %v7448_v26 = vpop.permute.xlu0 %7447 }
 0x7ed   : > { %v7764_v24 = vrot.slane %v7762_v38, 5  ;;  %9161 = vst.msk [vmem:[#allocation7 + $0xbc] sm:$0xf] %vm7503_vm10, %v9075_v1  ;;  %v7768_v11 = vrot.slane %v7766_v45, 4  ;;  %v9672_v51 = vld [vmem:[#allocation6 + $0xd8] sm:$0xf] }
 0x7ee   : > { %8609 = vst.msk [vmem:[#allocation7 + $0x15c] sm:$0xf] %vm6645_vm9, %v8577_v57  ;;  %v7759_v32 = vor.u32 %v7758_v21, %v7755_v7  ;;  %v8977_v35 = vor.u32 %v8976_v19, %v8972_v20  ;;  %v8982_v3 = vrot.slane %v8980_v44, 5  ;;  %v7772_v17 = vshll.u32 %v7559_v25, 16  ;;  %v8663_v12 = vld [vmem:[#allocation6 + $0xe4] sm:$0xf]  ;;  %9759 = vrot.lane.b32.xlu1 %v9672_v51, %s13206_s13  ;;  %v17053_v51 = vpop.permute.xlu1 %7449 }
 0x7ef   : > { %v8973_v55 = vsel %vm13458_vm5, %v8968_v47, %v8972_v20  ;;  %v7769_v33 = vor.u32 %v7768_v11, %v7764_v24  ;;  %v7148_v8 = vshrl.u32 %v6909_v14, 16  ;;  %v7153_v5 = vshrl.u32 %v6910_v62, 16  ;;  %v8664_v53 = vld [vmem:[#allocation6 + $0xe8] sm:$0xf]  ;;  %v7554_v10 = vld [vmem:[#allocation6 + $0x64] sm:$0xf]  ;;  %11249 = vmatmul.mubr.bf16.gmra.mxu0 %v12293_v56 }
 0x7f0   : > { %9104 = vrot.lane.b32.xlu0 %v8973_v55, %s13206_s13  ;;  %v7760_v63 = vrot.slane %v7759_v32, 4  ;;  %v8978_v4 = vrot.slane %v8977_v35, 4  ;;  %v7774_v29 = vrot.slane %v7772_v17, 5  ;;  %v7156_v27 = vshll.u32 %v6910_v62, 16  ;;  %v9673_v14 = vld [vmem:[#allocation6 + $0xe4] sm:$0xf]  ;;  %v17051_v11 = vpop.permute.xlu0 %8456 }
 0x7f1   : > { %v7770_v37 = vrot.slane %v7769_v33, 4  ;;  %v12229_v25 = vrot.slane %v7148_v8, 11  ;;  %v17037_v34 = vrot.slane %v7153_v5, 7  ;;  %v8985_v43 = vshrl.u32 %v8663_v12, 16  ;;  %v7555_v38 = vld [vmem:[#allocation6 + $0x68] sm:$0xf] }
 0x7f2   : > { %v7765_v22 = vsel %vm13458_vm5, %v7760_v63, %v7764_v24  ;;  %v8983_v54 = vsel %vm13458_vm5, %v8978_v4, %v8982_v3  ;;  %v8988_v6 = vshll.u32 %v8663_v12, 16  ;;  %v8994_v20 = vshll.u32 %v8664_v53, 16  ;;  %v6911_v1 = vld [vmem:[#allocation6 + $0xa8] sm:$0xf]  ;;  %v8665_v19 = vld [vmem:[#allocation6 + $0xec] sm:$0x1] }
 0x7f3   : > { %8014 = vst.msk [vmem:[#allocation7 + $0x11c] sm:$0xf] %vm6645_vm9, %v7765_v22  ;;  %9106 = vrot.lane.b32.xlu1 %v8983_v54, %s13206_s13  ;;  %v7775_v45 = vsel %vm13458_vm5, %v7770_v37, %v7774_v29  ;;  %v7158_v62 = vor.u32 %v7156_v27, %v17037_v34  ;;  %v8987_v7 = vrot.slane %v8985_v43, 4  ;;  %v8998_v21 = vshrl.u32 %v8664_v53, 16  ;;  %v9674_v47 = vld [vmem:[#allocation6 + $0xe8] sm:$0xf] }
 0x7f4   : > { %8542 = vst.msk [vmem:[#allocation7 + $0x11c] sm:$0xf] %vm7503_vm10, %v8461_v15  ;;  %9761 = vrot.lane.b32.xlu0 %v9673_v14, %s13206_s13  ;;  %v8990_v44 = vrot.slane %v8988_v6, 5  ;;  %v8996_v57 = vrot.slane %v8994_v20, 5  ;;  %v7729_v24 = vshrl.u32 %v7554_v10, 16  ;;  %v7732_v56 = vshll.u32 %v7554_v10, 16  ;;  %v9085_v10 = vpop.permute.xlu0 %9084  ;;  %v8459_v14 = vpop.permute.xlu1 %8458 }
 0x7f5   : > { %8015 = vst.msk [vmem:[#allocation7 + $0x130] sm:$0xf] %vm6645_vm9, %v7775_v45  ;;  %v7556_v32 = vld [vmem:[#allocation6 + $0x6c] sm:$0x1]  ;;  %v8666_v35 = vld [vmem:[#allocation6 + $0xf4] sm:$0xf]  ;;  %v7159_v15 = vsel %vm13468_vm6, %v12229_v25, %v7158_v62 }
 0x7f6   : > { %8543 = vst.msk [vmem:[#allocation7 + $0x130] sm:$0xf] %vm7503_vm10, %v8463_v42  ;;  %v7738_v3 = vshll.u32 %v7555_v38, 16  ;;  %v7742_v17 = vshrl.u32 %v7555_v38, 16  ;;  %v7160_v12 = vrot.slane %v17037_v34, 4  ;;  %v8991_v33 = vor.u32 %v8990_v44, %v8987_v7 }
 0x7f7   : > { %v13116_v55 = vld [vmem:[#allocation7 + $0xac] ss:$20 sps:$4 sm:$0xff]   ;;  %7331 = vst.msk [vmem:[#allocation7 + $0x190] sm:$0xf] %vm6645_vm9, %v7159_v15  ;;  %v7731_v8 = vrot.slane %v7729_v24, 4  ;;  %v7734_v5 = vrot.slane %v7732_v56, 5  ;;  %9763 = vrot.lane.b32.xlu1 %v9674_v47, %s13206_s13 }
 0x7f8   : > { %v7162_v53 = vshrl.u32 %v6911_v1, 16  ;;  %v13118_v63 = vld [vmem:[#allocation7 + $0xa8] ss:$20 sps:$4 sm:$0xff]   ;;  %7524 = vst.msk [vmem:[#allocation7 + $0x190] sm:$0xf] %vm7503_vm10, %v7448_v26  ;;  %v7740_v4 = vrot.slane %v7738_v3, 5  ;;  %11401 = vmatprep.mubr.bf16.mxu1 %v13116_v55 }
 0x7f9   : > { %v7165_v29 = vshll.u32 %v6911_v1, 16  ;;  %v9000_v42 = vrot.slane %v8998_v21, 4  ;;  %v9004_v27 = vshll.u32 %v8665_v19, 16  ;;  %v13119_v37 = vld [vmem:[#allocation7 + $0xd4] ss:$20 sps:$4 sm:$0xff]   ;;  %v8992_v25 = vrot.slane %v8991_v33, 4  ;;  %11402 = vmatmul.mubr.bf16.gmra.mxu1 %v13118_v63 }
 0x7fa   : > { %v7735_v34 = vor.u32 %v7734_v5, %v7731_v8  ;;  %v7164_v43 = vrot.slane %v7162_v53, 7  ;;  %v7744_v22 = vrot.slane %v7742_v17, 4  ;;  %9166 = vst.msk [vmem:[#allocation7 + $0x120] sm:$0xf] %vm7503_vm10, %v9085_v10  ;;  %v7748_v26 = vshll.u32 %v7556_v32, 16  ;;  %11409 = vmatprep.mubr.bf16.mxu1 %v13119_v37  ;;  %v10371_v55 = vld [vmem:[#allocation7 + $0xe4] sm:$0xff]  ;;  %v17073_v8 = vpop.permute.xlu0 %7443  ;;  %v9087_v5 = vpop.permute.xlu1 %9086 }
 0x7fb   : > { %v9001_v54 = vor.u32 %v9000_v42, %v8996_v57  ;;  %v9006_v6 = vrot.slane %v9004_v27, 5  ;;  %v17063_v20 = vld [vmem:[#allocation6 + $0xf8] sm:$0xf]  ;;  %v9009_v38 = vshrl.u32 %v8666_v35, 16  ;;  %v8997_v45 = vsel %vm13458_vm5, %v8992_v25, %v8996_v57  ;;  %v6906_v1 = vld [vmem:[#allocation6 + $0x90] sm:$0x8] }
 0x7fc   : > { %v7736_v62 = vrot.slane %v7735_v34, 4  ;;  %v7167_v7 = vor.u32 %v7165_v29, %v7164_v43  ;;  %v7745_v21 = vor.u32 %v7744_v22, %v7740_v4  ;;  %v6907_v19 = vld [vmem:[#allocation6 + $0x94] sm:$0xf]  ;;  %9108 = vrot.lane.b32.xlu0 %v8997_v45, %s13206_s13  ;;  %v7750_v47 = vrot.slane %v7748_v26, 5  ;;  %v9206_v15 = vld [vmem:[#allocation6 + $0x90] sm:$0x8] }
 0x7fd   : > { %v9002_v44 = vrot.slane %v9001_v54, 4  ;;  %v9011_v24 = vrot.slane %v9009_v38, 4  ;;  %v9012_v56 = vshll.u32 %v8666_v35, 16  ;;  %v9675_v17 = vld [vmem:[#allocation6 + $0xf4] sm:$0xf]  ;;  %v9018_v33 = vshll.u32 %v17063_v20, 16 }
 0x7fe   : > { %v7741_v32 = vsel %vm13458_vm5, %v7736_v62, %v7740_v4  ;;  %v7168_v3 = vsel %vm13468_vm6, %v7160_v12, %v7167_v7  ;;  %v7746_v57 = vrot.slane %v7745_v21, 4  ;;  %v9207_v53 = vld [vmem:[#allocation6 + $0x94] sm:$0xf]  ;;  %v9022_v4 = vshrl.u32 %v17063_v20, 16  ;;  %9167 = vst.msk [vmem:[#allocation7 + $0x134] sm:$0xf] %vm7503_vm10, %v9087_v5  ;;  %v9742_v38 = vpop.permute.xlu0 %9741  ;;  %v7446_v45 = vpop.permute.xlu1 %7445 }
 0x7ff   : > { %8012 = vst.msk [vmem:[#allocation7 + $0xf4] sm:$0xf] %vm6645_vm9, %v7741_v32  ;;  %7332 = vst.msk [vmem:[#allocation7 + $0x1a4] sm:$0xf] %vm6645_vm9, %v7168_v3  ;;  %v9007_v35 = vsel %vm13458_vm5, %v9002_v44, %v9006_v6  ;;  %v9014_v63 = vrot.slane %v9012_v56, 5  ;;  %v7126_v12 = vshrl.u32 %v6906_v1, 16 }
 0x800   : > { %v6908_v29 = vld [vmem:[#allocation6 + $0x98] sm:$0xf]  ;;  %8540 = vst.msk [vmem:[#allocation7 + $0xf4] sm:$0xf] %vm7503_vm10, %v17051_v11  ;;  %7525 = vst.msk [vmem:[#allocation7 + $0x1a4] sm:$0xf] %vm7503_vm10, %v17053_v51  ;;  %9110 = vrot.lane.b32.xlu1 %v9007_v35, %s13206_s13  ;;  %v7751_v42 = vsel %vm13458_vm5, %v7746_v57, %v7750_v47  ;;  %9765 = vrot.lane.b32.xlu0 %v9675_v17, %s13206_s13 }
 0x801   : > { %v10368_v27 = vld [vmem:[#allocation7 + $0xd0] sm:$0xff]  ;;  %v17088_v37 = vrot.slane %v9018_v33, 5  ;;  %v7131_v25 = vshrl.u32 %v6907_v19, 16  ;;  %v7134_v34 = vshll.u32 %v6907_v19, 16  ;;  %v8669_v43 = vld [vmem:[#allocation6 + $0x104] sm:$0xf]  ;;  %v9015_v10 = vor.u32 %v9014_v63, %v9011_v24 }
 0x802   : > { %8013 = vst.msk [vmem:[#allocation7 + $0x108] sm:$0xf] %vm6645_vm9, %v7751_v42  ;;  %v9676_v11 = vld [vmem:[#allocation6 + $0xf8] sm:$0xf]  ;;  %v12228_v22 = vrot.slane %v7126_v12, 11  ;;  %v12295_v54 = vcombine.low %v10368_v27, %v10371_v55  ;;  %v9388_v51 = vshrl.u32 %v9206_v15, 16  ;;  %v17104_v42 = vpop.permute.xlu1 %9743 }
 0x803   : > { %8541 = vst.msk [vmem:[#allocation7 + $0x108] sm:$0xf] %vm7503_vm10, %v8459_v14  ;;  %v7133_v6 = vrot.slane %v7131_v25, 7  ;;  %v9393_v26 = vshrl.u32 %v9207_v53, 16  ;;  %v9396_v20 = vshll.u32 %v9207_v53, 16  ;;  %v7140_v62 = vshrl.u32 %v6908_v29, 16 }
 0x804   : > { %v8670_v7 = vld [vmem:[#allocation6 + $0x108] sm:$0xf]  ;;  %v9016_v21 = vrot.slane %v9015_v10, 4  ;;  %11410 = vmatmul.mubr.bf16.gmra.mxu1 %v12295_v54  ;;  %v12258_v1 = vrot.slane %v9388_v51, 11  ;;  %v7143_v19 = vshll.u32 %v6908_v29, 16  ;;  %v9033_v44 = vshrl.u32 %v8669_v43, 16  ;;  %9767 = vrot.lane.b32.xlu1 %v9676_v11, %s13206_s13  ;;  %v9081_v29 = vpop.permute.xlu0 %9080 }
 0x805   : > { %v8578_v47 = vld [vmem:[#allocation6 + $0xa4] sm:$0xf]  ;;  %v7136_v24 = vor.u32 %v7134_v34, %v7133_v6  ;;  %v17094_v56 = vrot.slane %v9393_v26, 7  ;;  %v7138_v15 = vrot.slane %v7133_v6, 4  ;;  %v7142_v14 = vrot.slane %v7140_v62, 7 }
 0x806   : > { %v8668_v32 = vld [vmem:[#allocation6 + $0xfc] sm:$0x1]  ;;  %8610 = vst.msk [vmem:[#allocation7 + $0x170] sm:$0xf] %vm6645_vm9, %v8578_v47  ;;  %v9021_v3 = vsel %vm13458_vm5, %v9016_v21, %v17088_v37  ;;  %v9678_v17 = vld [vmem:[#allocation6 + $0x108] sm:$0xf] }
 0x807   : > { %v9035_v57 = vrot.slane %v9033_v44, 4  ;;  %v9036_v55 = vshll.u32 %v8669_v43, 16  ;;  %v9042_v33 = vshll.u32 %v8670_v7, 16  ;;  %v9208_v5 = vld [vmem:[#allocation6 + $0x98] sm:$0xf]  ;;  %9112 = vrot.lane.b32.xlu0 %v9021_v3, %s13206_s13  ;;  %v7137_v53 = vsel %vm13468_vm6, %v12228_v22, %v7136_v24  ;;  %v9083_v3 = vpop.permute.xlu1 %9082 }
 0x808   : > { %v9398_v35 = vor.u32 %v9396_v20, %v17094_v56  ;;  %v7145_v63 = vor.u32 %v7143_v19, %v7142_v14  ;;  %v9046_v12 = vshrl.u32 %v8670_v7, 16  ;;  %v8671_v27 = vld [vmem:[#allocation6 + $0x10c] sm:$0x1]  ;;  %v8579_v25 = vld [vmem:[#allocation6 + $0xa8] sm:$0xf]  ;;  %v9024_v11 = vrot.slane %v9022_v4, 4  ;;  %9771 = vrot.lane.b32.xlu1 %v9678_v17, %s13206_s13 }
 0x809   : > { %7329 = vst.msk [vmem:[#allocation7 + $0x168] sm:$0xf] %vm6645_vm9, %v7137_v53  ;;  %v9677_v34 = vld [vmem:[#allocation6 + $0x104] sm:$0xf]  ;;  %v9038_v43 = vrot.slane %v9036_v55, 5  ;;  %v17107_v10 = vrot.slane %v9042_v33, 5 }
 0x80a   : > { %v9028_v54 = vshll.u32 %v8668_v32, 16  ;;  %9164 = vst.msk [vmem:[#allocation7 + $0xf8] sm:$0xf] %vm7503_vm10, %v9081_v29  ;;  %v7563_v22 = vld [vmem:[#allocation6 + $0x94] sm:$0xf]  ;;  %v9399_v51 = vsel %vm13468_vm6, %v12258_v1, %v9398_v35  ;;  %v7146_v6 = vsel %vm13468_vm6, %v7138_v15, %v7145_v63  ;;  %v9400_v26 = vrot.slane %v17094_v56, 4 }
 0x80b   : > { %8611 = vst.msk [vmem:[#allocation7 + $0x184] sm:$0xf] %vm6645_vm9, %v8579_v25  ;;  %v9402_v4 = vshrl.u32 %v9208_v5, 16  ;;  %v17119_v20 = vld [vmem:[#allocation6 + $0x98] sm:$0xf]  ;;  %v9039_v7 = vor.u32 %v9038_v43, %v9035_v57  ;;  %v10373_v19 = vld [vmem:[#allocation7 + $0xf0] sm:$0xff]  ;;  %9769 = vrot.lane.b32.xlu0 %v9677_v34, %s13206_s13 }
 0x80c   : > { %7522 = vst.msk [vmem:[#allocation7 + $0x168] sm:$0xf] %vm7503_vm10, %v17073_v8  ;;  %v8580_v62 = vld [vmem:[#allocation6 + $0xb4] sm:$0xf]  ;;  %v9025_v8 = vor.u32 %v9024_v11, %v17088_v37  ;;  %v9030_v21 = vrot.slane %v9028_v54, 5  ;;  %v10376_v44 = vld [vmem:[#allocation7 + $0x104] sm:$0xff]  ;;  %v17130_v37 = vpop.permute.xlu0 %8468 }
 0x80d   : > { %9631 = vst.msk [vmem:[#allocation7 + $0x124] sm:$0xf] %vm6645_vm9, %v9399_v51  ;;  %7330 = vst.msk [vmem:[#allocation7 + $0x17c] sm:$0xf] %vm6645_vm9, %v7146_v6  ;;  %v13121_v1 = vld [vmem:[#allocation7 + $0xf4] ss:$20 sps:$4 sm:$0xff]   ;;  %v12298_v24 = vcombine.low %v10373_v19, %v10376_v44 }
 0x80e   : > { %v9405_v47 = vshll.u32 %v9208_v5, 16  ;;  %8612 = vst.msk [vmem:[#allocation7 + $0x198] sm:$0xf] %vm6645_vm9, %v8580_v62  ;;  %v9404_v56 = vrot.slane %v9402_v4, 7  ;;  %v17128_v15 = vld [vmem:[#allocation7 + $0x12c] sm:$0xff]  ;;  %v9048_v14 = vrot.slane %v9046_v12, 4  ;;  %11256 = vmatprep.mubr.bf16.mxu0 %v13121_v1 }
 0x80f   : > { %9823 = vst.msk [vmem:[#allocation7 + $0x124] sm:$0xf] %vm7503_vm10, %v9742_v38  ;;  %7523 = vst.msk [vmem:[#allocation7 + $0x17c] sm:$0xf] %vm7503_vm10, %v7446_v45  ;;  %v9052_v32 = vshll.u32 %v8671_v27, 16  ;;  %v9040_v55 = vrot.slane %v9039_v7, 4  ;;  %11257 = vmatmul.mubr.bf16.gmra.mxu0 %v12298_v24 }
 0x810   : > { %v7565_v17 = vld [vmem:[#allocation6 + $0x9c] sm:$0x1]  ;;  %v6915_v57 = vld [vmem:[#allocation6 + $0xc0] sm:$0x8]  ;;  %v9026_v33 = vrot.slane %v9025_v8, 4  ;;  %v7801_v53 = vshrl.u32 %v7563_v22, 16  ;;  %v9407_v45 = vor.u32 %v9405_v47, %v9404_v56  ;;  %v9049_v63 = vor.u32 %v9048_v14, %v17107_v10  ;;  %v17153_v19 = vpop.permute.xlu0 %7455 }
 0x811   : > { %v13123_v5 = vld [vmem:[#allocation7 + $0x11c] ss:$20 sps:$4 sm:$0xff]   ;;  %v7804_v35 = vshll.u32 %v7563_v22, 16  ;;  %9165 = vst.msk [vmem:[#allocation7 + $0x10c] sm:$0xf] %vm7503_vm10, %v9083_v3  ;;  %v9054_v12 = vrot.slane %v9052_v32, 5  ;;  %v9045_v34 = vsel %vm13458_vm5, %v9040_v55, %v17107_v10 }
 0x812   : > { %v17133_v38 = vld [vmem:[#allocation6 + $0xc4] sm:$0xf]  ;;  %v7810_v29 = vshll.u32 %v17119_v20, 16  ;;  %v8581_v27 = vld [vmem:[#allocation6 + $0xb8] sm:$0xf]  ;;  %v9031_v43 = vsel %vm13458_vm5, %v9026_v33, %v9030_v21  ;;  %11264 = vmatprep.mubr.bf16.mxu0 %v13123_v5  ;;  %v7803_v54 = vrot.slane %v7801_v53, 4  ;;  %9116 = vrot.lane.b32.xlu0 %v9045_v34, %s13206_s13  ;;  %v9408_v10 = vsel %vm13468_vm6, %v9400_v26, %v9407_v45  ;;  %v17151_v21 = vpop.permute.xlu1 %8470 }
 0x813   : > { %v8582_v25 = vld [vmem:[#allocation6 + $0xc4] sm:$0xf]  ;;  %v9679_v11 = vld [vmem:[#allocation6 + $0x114] sm:$0xf]  ;;  %v7806_v22 = vrot.slane %v7804_v35, 5  ;;  %9114 = vrot.lane.b32.xlu1 %v9031_v43, %s13206_s13  ;;  %v10379_v4 = vld [vmem:[#allocation7 + $0x118] sm:$0xff] }
 0x814   : > { %v7560_v51 = vld [vmem:[#allocation6 + $0x84] sm:$0xf]  ;;  %v17142_v6 = vld [vmem:[#allocation6 + $0x88] sm:$0xf]  ;;  %8613 = vst.msk [vmem:[#allocation7 + $0x1ac] sm:$0xf] %vm6645_vm9, %v8581_v27  ;;  %v12303_v1 = vcombine.low %v10379_v4, %v17128_v15 }
 0x815   : > { %8614 = vst.msk [vmem:[#allocation7 + $0x1c0] sm:$0xf] %vm6645_vm9, %v8582_v25  ;;  %v9050_v62 = vrot.slane %v9049_v63, 4  ;;  %v7812_v7 = vrot.slane %v7810_v29, 5  ;;  %v7814_v8 = vshrl.u32 %v17119_v20, 16  ;;  %v7807_v44 = vor.u32 %v7806_v22, %v7803_v54 }
 0x816   : > { %9632 = vst.msk [vmem:[#allocation7 + $0x138] sm:$0xf] %vm6645_vm9, %v9408_v10  ;;  %v7820_v47 = vshll.u32 %v7565_v17, 16  ;;  %v7192_v24 = vshrl.u32 %v6915_v57, 16  ;;  %v6917_v56 = vld [vmem:[#allocation6 + $0xc8] sm:$0xf]  ;;  %9773 = vrot.lane.b32.xlu0 %v9679_v11, %s13206_s13 }
 0x817   : > { %v8583_v14 = vld [vmem:[#allocation6 + $0xc8] sm:$0xf]  ;;  %9824 = vst.msk [vmem:[#allocation7 + $0x138] sm:$0xf] %vm7503_vm10, %v17104_v42  ;;  %v9055_v26 = vsel %vm13458_vm5, %v9050_v62, %v9054_v12  ;;  %v7816_v20 = vrot.slane %v7814_v8, 4  ;;  %v7197_v32 = vshrl.u32 %v17133_v38, 16  ;;  %v17171_v12 = vpop.permute.xlu1 %7457  ;;  %11265 = vmatmul.mubr.bf16.gmra.mxu0 %v12303_v1 }
 0x818   : > { %v7200_v3 = vshll.u32 %v17133_v38, 16  ;;  %v6912_v55 = vld [vmem:[#allocation6 + $0xb0] sm:$0x8]  ;;  %8615 = vst.msk [vmem:[#allocation7 + $0x1d4] sm:$0xf] %vm6645_vm9, %v8583_v14  ;;  %v7808_v33 = vrot.slane %v7807_v44, 4  ;;  %9118 = vrot.lane.b32.xlu1 %v9055_v26, %s13206_s13  ;;  %v17169_v38 = vpop.permute.xlu0 %8464 }
 0x819   : > { %v9680_v15 = vld [vmem:[#allocation6 + $0x118] sm:$0xf]  ;;  %v7822_v17 = vrot.slane %v7820_v47, 5  ;;  %v12231_v57 = vrot.slane %v7192_v24, 11  ;;  %v7777_v5 = vshrl.u32 %v7560_v51, 16  ;;  %v7817_v42 = vor.u32 %v7816_v20, %v7812_v7 }
 0x81a   : > { %v17164_v53 = vld [vmem:[#allocation6 + $0xb4] sm:$0xf]  ;;  %v7199_v35 = vrot.slane %v7197_v32, 7  ;;  %v7780_v45 = vshll.u32 %v7560_v51, 16  ;;  %v7786_v63 = vshll.u32 %v17142_v6, 16  ;;  %v7813_v27 = vsel %vm13458_vm5, %v7808_v33, %v7812_v7 }
 0x81b   : > { %v13125_v29 = vld [vmem:[#allocation7 + $0xfc] ss:$20 sps:$4 sm:$0xff]   ;;  %v7779_v25 = vrot.slane %v7777_v5, 4  ;;  %v7790_v34 = vshrl.u32 %v17142_v6, 16  ;;  %v7206_v43 = vshrl.u32 %v6917_v56, 16  ;;  %v7818_v22 = vrot.slane %v7817_v42, 4  ;;  %v17186_v20 = vpop.permute.xlu1 %8466 }
 0x81c   : > { %v13127_v11 = vld [vmem:[#allocation7 + $0xf8] ss:$20 sps:$4 sm:$0xff]   ;;  %8018 = vst.msk [vmem:[#allocation7 + $0x16c] sm:$0xf] %vm6645_vm9, %v7813_v27  ;;  %v7202_v51 = vor.u32 %v7200_v3, %v7199_v35  ;;  %v7782_v10 = vrot.slane %v7780_v45, 5  ;;  %v7788_v4 = vrot.slane %v7786_v63, 5  ;;  %11417 = vmatprep.mubr.bf16.mxu1 %v13125_v29  ;;  %9775 = vrot.lane.b32.xlu1 %v9680_v15, %s13206_s13  ;;  %v7452_v26 = vpop.permute.xlu0 %7451 }
 0x81d   : > { %v7562_v54 = vld [vmem:[#allocation6 + $0x8c] sm:$0x1]  ;;  %v8584_v62 = vld [vmem:[#allocation6 + $0xd4] sm:$0xf]  ;;  %8546 = vst.msk [vmem:[#allocation7 + $0x16c] sm:$0xf] %vm7503_vm10, %v17130_v37  ;;  %11418 = vmatmul.mubr.bf16.gmra.mxu1 %v13127_v11  ;;  %v7823_v1 = vsel %vm13458_vm5, %v7818_v22, %v7822_v17 }
 0x81e   : > { %v7204_v8 = vrot.slane %v7199_v35, 4  ;;  %v7208_v7 = vrot.slane %v7206_v43, 7  ;;  %v7209_v44 = vshll.u32 %v6917_v56, 16  ;;  %v7170_v6 = vshrl.u32 %v6912_v55, 16  ;;  %v7569_v47 = vld [vmem:[#allocation6 + $0xb4] sm:$0xf] }
 0x81f   : > { %8616 = vst.msk [vmem:[#allocation7 + $0x1e8] sm:$0xf] %vm6645_vm9, %v8584_v62  ;;  %v7203_v24 = vsel %vm13468_vm6, %v12231_v57, %v7202_v51  ;;  %v7783_v14 = vor.u32 %v7782_v10, %v7779_v25  ;;  %v7175_v37 = vshrl.u32 %v17164_v53, 16  ;;  %v7570_v56 = vld [vmem:[#allocation6 + $0xb8] sm:$0xf]  ;;  %v7178_v55 = vshll.u32 %v17164_v53, 16  ;;  %v17206_v51 = vpop.permute.xlu1 %7453 }
 0x820   : > { %8019 = vst.msk [vmem:[#allocation7 + $0x180] sm:$0xf] %vm6645_vm9, %v7823_v1  ;;  %7335 = vst.msk [vmem:[#allocation7 + $0x1e0] sm:$0xf] %vm6645_vm9, %v7203_v24  ;;  %v7211_v32 = vor.u32 %v7209_v44, %v7208_v7  ;;  %v12230_v3 = vrot.slane %v7170_v6, 11  ;;  %v7792_v33 = vrot.slane %v7790_v34, 4  ;;  %v8477_v22 = vpop.permute.xlu0 %8476 }
 0x821   : > { %v13128_v15 = vld [vmem:[#allocation7 + $0x124] ss:$20 sps:$4 sm:$0xff]   ;;  %8547 = vst.msk [vmem:[#allocation7 + $0x180] sm:$0xf] %vm7503_vm10, %v17151_v21  ;;  %7528 = vst.msk [vmem:[#allocation7 + $0x1e0] sm:$0xf] %vm7503_vm10, %v17153_v19 }
 0x822   : > { %v17191_v17 = vld [vmem:[#allocation6 + $0xb8] sm:$0xf]  ;;  %v7784_v57 = vrot.slane %v7783_v14, 4  ;;  %v17197_v5 = vrot.slane %v7175_v37, 7  ;;  %v7796_v42 = vshll.u32 %v7562_v54, 16  ;;  %v7849_v35 = vshrl.u32 %v7569_v47, 16  ;;  %11425 = vmatprep.mubr.bf16.mxu1 %v13128_v15 }
 0x823   : > { %v8585_v45 = vld [vmem:[#allocation6 + $0xd8] sm:$0xf]  ;;  %v7212_v63 = vsel %vm13468_vm6, %v7204_v8, %v7211_v32  ;;  %v7793_v53 = vor.u32 %v7792_v33, %v7788_v4  ;;  %v7852_v29 = vshll.u32 %v7569_v47, 16  ;;  %v7858_v27 = vshll.u32 %v7570_v56, 16  ;;  %v7571_v25 = vld [vmem:[#allocation6 + $0xbc] sm:$0x1]  ;;  %v8479_v15 = vpop.permute.xlu1 %8478 }
 0x824   : > { %v6921_v34 = vld [vmem:[#allocation6 + $0xe0] sm:$0x8]  ;;  %8617 = vst.msk [vmem:[#allocation7 + $0x1fc] sm:$0xf] %vm6645_vm9, %v8585_v45  ;;  %v7789_v21 = vsel %vm13458_vm5, %v7784_v57, %v7788_v4  ;;  %7336 = vst.msk [vmem:[#allocation7 + $0x1f4] sm:$0xf] %vm6645_vm9, %v7212_v63  ;;  %v7180_v19 = vor.u32 %v7178_v55, %v17197_v5 }
 0x825   : > { %v7798_v43 = vrot.slane %v7796_v42, 5  ;;  %v10383_v11 = vld [vmem:[#allocation7 + $0x134] sm:$0xff]  ;;  %v7851_v54 = vrot.slane %v7849_v35, 4  ;;  %v8586_v10 = vld [vmem:[#allocation6 + $0xe4] sm:$0xf]  ;;  %v7794_v62 = vrot.slane %v7793_v53, 4 }
 0x826   : > { %8016 = vst.msk [vmem:[#allocation7 + $0x144] sm:$0xf] %vm6645_vm9, %v7789_v21  ;;  %v7854_v8 = vrot.slane %v7852_v29, 5  ;;  %v7860_v7 = vrot.slane %v7858_v27, 5  ;;  %v7862_v4 = vshrl.u32 %v7570_v56, 16  ;;  %v7181_v6 = vsel %vm13468_vm6, %v12230_v3, %v7180_v19  ;;  %v10380_v47 = vld [vmem:[#allocation7 + $0x120] sm:$0xff] }
 0x827   : > { %7529 = vst.msk [vmem:[#allocation7 + $0x1f4] sm:$0xf] %vm7503_vm10, %v17171_v12  ;;  %v6922_v44 = vld [vmem:[#allocation6 + $0xe4] sm:$0xf]  ;;  %8544 = vst.msk [vmem:[#allocation7 + $0x144] sm:$0xf] %vm7503_vm10, %v17169_v38  ;;  %v7799_v37 = vsel %vm13458_vm5, %v7794_v62, %v7798_v43  ;;  %v12305_v32 = vcombine.low %v10380_v47, %v10383_v11 }
 0x828   : > { %8618 = vst.msk [vmem:[#allocation7 + $0x210] sm:$0xf] %vm6645_vm9, %v8586_v10  ;;  %v7182_v1 = vrot.slane %v17197_v5, 4  ;;  %v7184_v24 = vshrl.u32 %v17191_v17, 16  ;;  %v7187_v12 = vshll.u32 %v17191_v17, 16  ;;  %v7855_v56 = vor.u32 %v7854_v8, %v7851_v54  ;;  %v7464_v5 = vpop.permute.xlu0 %7463 }
 0x829   : > { %v7566_v14 = vld [vmem:[#allocation6 + $0xa4] sm:$0xf]  ;;  %7333 = vst.msk [vmem:[#allocation7 + $0x1b8] sm:$0xf] %vm6645_vm9, %v7181_v6  ;;  %v7864_v55 = vrot.slane %v7862_v4, 4  ;;  %v7868_v33 = vshll.u32 %v7571_v25, 16  ;;  %11426 = vmatmul.mubr.bf16.gmra.mxu1 %v12305_v32 }
 0x82a   : > { %v8587_v38 = vld [vmem:[#allocation6 + $0xe8] sm:$0xf]  ;;  %7526 = vst.msk [vmem:[#allocation7 + $0x1b8] sm:$0xf] %vm7503_vm10, %v7452_v26  ;;  %v7186_v3 = vrot.slane %v7184_v24, 7  ;;  %v7236_v57 = vshrl.u32 %v6921_v34, 16 }
 0x82b   : > { %8017 = vst.msk [vmem:[#allocation7 + $0x158] sm:$0xf] %vm6645_vm9, %v7799_v37  ;;  %v7241_v17 = vshrl.u32 %v6922_v44, 16  ;;  %8619 = vst.msk [vmem:[#allocation7 + $0x224] sm:$0xf] %vm6645_vm9, %v8587_v38  ;;  %v7856_v42 = vrot.slane %v7855_v56, 4  ;;  %v7865_v35 = vor.u32 %v7864_v55, %v7860_v7 }
 0x82c   : > { %8545 = vst.msk [vmem:[#allocation7 + $0x158] sm:$0xf] %vm7503_vm10, %v17186_v20  ;;  %v7244_v45 = vshll.u32 %v6922_v44, 16  ;;  %v7567_v63 = vld [vmem:[#allocation6 + $0xa8] sm:$0xf]  ;;  %v7825_v53 = vshrl.u32 %v7566_v14, 16  ;;  %v7189_v26 = vor.u32 %v7187_v12, %v7186_v3  ;;  %v17235_v4 = vpop.permute.xlu0 %8472  ;;  %v17237_v44 = vpop.permute.xlu1 %7465 }
 0x82d   : > { %v7870_v29 = vrot.slane %v7868_v33, 5  ;;  %v12233_v27 = vrot.slane %v7236_v57, 11  ;;  %v17227_v21 = vrot.slane %v7241_v17, 7  ;;  %v6923_v25 = vld [vmem:[#allocation6 + $0xe8] sm:$0xf]  ;;  %v7861_v34 = vsel %vm13458_vm5, %v7856_v42, %v7860_v7  ;;  %v17239_v6 = vld [vmem:[#allocation7 + $0x17c] sm:$0xff] }
 0x82e   : > { %v7866_v19 = vrot.slane %v7865_v35, 4  ;;  %v7827_v43 = vrot.slane %v7825_v53, 4  ;;  %v7828_v11 = vshll.u32 %v7566_v14, 16  ;;  %v7568_v54 = vld [vmem:[#allocation6 + $0xac] sm:$0x1]  ;;  %v7190_v20 = vsel %vm13468_vm6, %v7182_v1, %v7189_v26 }
 0x82f   : > { %8022 = vst.msk [vmem:[#allocation7 + $0x1bc] sm:$0xf] %vm6645_vm9, %v7861_v34  ;;  %v7246_v10 = vor.u32 %v7244_v45, %v17227_v21  ;;  %v7834_v62 = vshll.u32 %v7567_v63, 16  ;;  %v7838_v8 = vshrl.u32 %v7567_v63, 16  ;;  %v8588_v7 = vld [vmem:[#allocation6 + $0xf4] sm:$0xf] }
 0x830   : > { %8550 = vst.msk [vmem:[#allocation7 + $0x1bc] sm:$0xf] %vm7503_vm10, %v8477_v22  ;;  %v7871_v47 = vsel %vm13458_vm5, %v7866_v19, %v7870_v29  ;;  %v7830_v24 = vrot.slane %v7828_v11, 5  ;;  %v7248_v1 = vrot.slane %v17227_v21, 4  ;;  %v7250_v12 = vshrl.u32 %v6923_v25, 16  ;;  %v17252_v32 = vld [vmem:[#allocation7 + $0x168] sm:$0xff]  ;;  %v9089_v63 = vpop.permute.xlu0 %9088  ;;  %v8475_v26 = vpop.permute.xlu1 %8474 }
 0x831   : > { %7334 = vst.msk [vmem:[#allocation7 + $0x1cc] sm:$0xf] %vm6645_vm9, %v7190_v20  ;;  %v6918_v14 = vld [vmem:[#allocation6 + $0xd0] sm:$0x8]  ;;  %8620 = vst.msk [vmem:[#allocation7 + $0x238] sm:$0xf] %vm6645_vm9, %v8588_v7  ;;  %v7247_v22 = vsel %vm13468_vm6, %v12233_v27, %v7246_v10  ;;  %v9950_v27 = vsel %vm13458_vm5, %v15834_v60, %v15813_v23  ;;  %v9974_v21 = vsel %vm13458_vm5, %v15973_v52, %v15969_v36 }
 0x832   : > { %7527 = vst.msk [vmem:[#allocation7 + $0x1cc] sm:$0xf] %vm7503_vm10, %v17206_v51  ;;  %v7836_v37 = vrot.slane %v7834_v62, 5  ;;  %v7253_v56 = vshll.u32 %v6923_v25, 16  ;;  %v7840_v55 = vrot.slane %v7838_v8, 4  ;;  %v7831_v3 = vor.u32 %v7830_v24, %v7827_v43 }
 0x833   : > { %8023 = vst.msk [vmem:[#allocation7 + $0x1d0] sm:$0xf] %vm6645_vm9, %v7871_v47  ;;  %v6919_v38 = vld [vmem:[#allocation6 + $0xd4] sm:$0xf]  ;;  %7339 = vst.msk [vmem:[#allocation7 + $0x230] sm:$0xf] %vm6645_vm9, %v7247_v22  ;;  %v12313_v51 = vcombine.low %v17252_v32, %v17239_v6 }
 0x834   : > { %8551 = vst.msk [vmem:[#allocation7 + $0x1d0] sm:$0xf] %vm7503_vm10, %v8479_v15  ;;  %v7252_v33 = vrot.slane %v7250_v12, 7  ;;  %v7844_v57 = vshll.u32 %v7568_v54, 16  ;;  %v7575_v17 = vld [vmem:[#allocation6 + $0xd4] sm:$0xf]  ;;  %v7841_v53 = vor.u32 %v7840_v55, %v7836_v37  ;;  %v7460_v24 = vpop.permute.xlu0 %7459  ;;  %v9091_v12 = vpop.permute.xlu1 %9090 }
 0x835   : > { %v17258_v42 = vld [vmem:[#allocation6 + $0xd8] sm:$0xf]  ;;  %7532 = vst.msk [vmem:[#allocation7 + $0x230] sm:$0xf] %vm7503_vm10, %v7464_v5  ;;  %v13133_v45 = vld [vmem:[#allocation7 + $0x140] ss:$20 sps:$4 sm:$0xff]  }
 0x836   : > { %v13131_v35 = vld [vmem:[#allocation7 + $0x144] ss:$20 sps:$4 sm:$0xff]   ;;  %v7214_v29 = vshrl.u32 %v6918_v14, 16  ;;  %v7832_v25 = vrot.slane %v7831_v3, 4  ;;  %v7255_v5 = vor.u32 %v7253_v56, %v7252_v33  ;;  %9168 = vst.msk [vmem:[#allocation7 + $0x148] sm:$0xf] %vm7503_vm10, %v9089_v63 }
 0x837   : > { %v17261_v15 = vld [vmem:[#allocation6 + $0xd8] sm:$0xf]  ;;  %v7846_v34 = vrot.slane %v7844_v57, 5  ;;  %v7219_v19 = vshrl.u32 %v6919_v38, 16  ;;  %v7572_v43 = vld [vmem:[#allocation6 + $0xc4] sm:$0xf]  ;;  %11272 = vmatprep.mubr.bf16.mxu0 %v13131_v35 }
 0x838   : > { %10309 = vst.msk [vmem:[#allocation7 + $0x60] sm:$0xf] %vm6645_vm9, %v9950_v27  ;;  %10311 = vst.msk [vmem:[#allocation7 + $0x88] sm:$0xf] %vm6645_vm9, %v9974_v21  ;;  %v13134_v11 = vld [vmem:[#allocation7 + $0x16c] ss:$20 sps:$4 sm:$0xff]   ;;  %11273 = vmatmul.mubr.bf16.gmra.mxu0 %v13133_v45  ;;  %v7837_v36 = vsel %vm13458_vm5, %v7832_v25, %v7836_v37  ;;  %v7256_v52 = vsel %vm13468_vm6, %v7248_v1, %v7255_v5  ;;  %v8485_v21 = vpop.permute.xlu0 %8484  ;;  %v7462_v25 = vpop.permute.xlu1 %7461 }
 0x839   : > { %v7842_v54 = vrot.slane %v7841_v53, 4  ;;  %v12232_v23 = vrot.slane %v7214_v29, 11  ;;  %v7222_v60 = vshll.u32 %v6919_v38, 16  ;;  %v7897_v20 = vshrl.u32 %v7575_v17, 16  ;;  %v8590_v8 = vld [vmem:[#allocation6 + $0x104] sm:$0xf]  ;;  %11280 = vmatprep.mubr.bf16.mxu0 %v13134_v11 }
 0x83a   : > { %v7221_v10 = vrot.slane %v7219_v19, 7  ;;  %v7900_v62 = vshll.u32 %v7575_v17, 16  ;;  %v8589_v7 = vld [vmem:[#allocation6 + $0xf8] sm:$0xf]  ;;  %8020 = vst.msk [vmem:[#allocation7 + $0x194] sm:$0xf] %vm6645_vm9, %v7837_v36 }
 0x83b   : > { %7340 = vst.msk [vmem:[#allocation7 + $0x244] sm:$0xf] %vm6645_vm9, %v7256_v52  ;;  %v7847_v47 = vsel %vm13458_vm5, %v7842_v54, %v7846_v34  ;;  %v7899_v14 = vrot.slane %v7897_v20, 4  ;;  %v7906_v22 = vshll.u32 %v17258_v42, 16  ;;  %v7910_v37 = vshrl.u32 %v17258_v42, 16  ;;  %v17306_v52 = vld [vmem:[#allocation7 + $0x1cc] sm:$0xff] }
 0x83c   : > { %v17284_v1 = vld [vmem:[#allocation6 + $0xc8] sm:$0xf]  ;;  %8622 = vst.msk [vmem:[#allocation7 + $0x260] sm:$0xf] %vm6645_vm9, %v8590_v8  ;;  %8621 = vst.msk [vmem:[#allocation7 + $0x24c] sm:$0xf] %vm6645_vm9, %v8589_v7  ;;  %v7224_v56 = vor.u32 %v7222_v60, %v7221_v10  ;;  %v8487_v32 = vpop.permute.xlu1 %8486 }
 0x83d   : > { %8548 = vst.msk [vmem:[#allocation7 + $0x194] sm:$0xf] %vm7503_vm10, %v17235_v4  ;;  %7533 = vst.msk [vmem:[#allocation7 + $0x244] sm:$0xf] %vm7503_vm10, %v17237_v44  ;;  %v7902_v55 = vrot.slane %v7900_v62, 5  ;;  %v7226_v38 = vrot.slane %v7221_v10, 4 }
 0x83e   : > { %8021 = vst.msk [vmem:[#allocation7 + $0x1a8] sm:$0xf] %vm6645_vm9, %v7847_v47  ;;  %v7228_v3 = vshrl.u32 %v17261_v15, 16  ;;  %v7577_v33 = vld [vmem:[#allocation6 + $0xdc] sm:$0x1]  ;;  %v7908_v57 = vrot.slane %v7906_v22, 5  ;;  %v7225_v44 = vsel %vm13468_vm6, %v12232_v23, %v7224_v56 }
 0x83f   : > { %9169 = vst.msk [vmem:[#allocation7 + $0x15c] sm:$0xf] %vm7503_vm10, %v9091_v12  ;;  %8549 = vst.msk [vmem:[#allocation7 + $0x1a8] sm:$0xf] %vm7503_vm10, %v8475_v26  ;;  %v7231_v17 = vshll.u32 %v17261_v15, 16  ;;  %v7873_v42 = vshrl.u32 %v7572_v43, 16  ;;  %v7903_v45 = vor.u32 %v7902_v55, %v7899_v14 }
 0x840   : > { %v7876_v4 = vshll.u32 %v7572_v43, 16  ;;  %v9209_v35 = vld [vmem:[#allocation6 + $0xa0] sm:$0x8]  ;;  %v7230_v63 = vrot.slane %v7228_v3, 7  ;;  %v7882_v53 = vshll.u32 %v17284_v1, 16  ;;  %v7886_v15 = vshrl.u32 %v17284_v1, 16  ;;  %11281 = vmatmul.mubr.bf16.gmra.mxu0 %v12313_v51  ;;  %v8481_v1 = vpop.permute.xlu0 %8480 }
 0x841   : > { %v9210_v29 = vld [vmem:[#allocation6 + $0xa4] sm:$0xf]  ;;  %v8591_v27 = vld [vmem:[#allocation6 + $0x108] sm:$0xf]  ;;  %7337 = vst.msk [vmem:[#allocation7 + $0x208] sm:$0xf] %vm6645_vm9, %v7225_v44 }
 0x842   : > { %v7875_v26 = vrot.slane %v7873_v42, 4  ;;  %v7878_v5 = vrot.slane %v7876_v4, 5  ;;  %v7912_v34 = vrot.slane %v7910_v37, 4  ;;  %v7574_v19 = vld [vmem:[#allocation6 + $0xcc] sm:$0x1]  ;;  %v7904_v11 = vrot.slane %v7903_v45, 4 }
 0x843   : > { %v17302_v43 = vld [vmem:[#allocation6 + $0xa8] sm:$0xf]  ;;  %8623 = vst.msk [vmem:[#allocation7 + $0x274] sm:$0xf] %vm6645_vm9, %v8591_v27  ;;  %v7233_v54 = vor.u32 %v7231_v17, %v7230_v63  ;;  %v7884_v23 = vrot.slane %v7882_v53, 5  ;;  %v7916_v60 = vshll.u32 %v7577_v33, 16 }
 0x844   : > { %7530 = vst.msk [vmem:[#allocation7 + $0x208] sm:$0xf] %vm7503_vm10, %v7460_v24  ;;  %v7879_v20 = vor.u32 %v7878_v5, %v7875_v26  ;;  %v7913_v36 = vor.u32 %v7912_v34, %v7908_v57  ;;  %v9410_v10 = vshrl.u32 %v9209_v35, 16  ;;  %v9415_v62 = vshrl.u32 %v9210_v29, 16  ;;  %v6924_v12 = vld [vmem:[#allocation6 + $0xf0] sm:$0x8]  ;;  %v9746_v5 = vpop.permute.xlu0 %9745 }
 0x845   : > { %v7909_v8 = vsel %vm13458_vm5, %v7904_v11, %v7908_v57  ;;  %v7234_v7 = vsel %vm13468_vm6, %v7226_v38, %v7233_v54  ;;  %v7918_v47 = vrot.slane %v7916_v60, 5  ;;  %v9418_v24 = vshll.u32 %v9210_v29, 16  ;;  %v17315_v14 = vld [vmem:[#allocation6 + $0xf4] sm:$0xf]  ;;  %v17319_v51 = vld [vmem:[#allocation7 + $0x1b8] sm:$0xff] }
 0x846   : > { %8026 = vst.msk [vmem:[#allocation7 + $0x20c] sm:$0xf] %vm6645_vm9, %v7909_v8  ;;  %7338 = vst.msk [vmem:[#allocation7 + $0x21c] sm:$0xf] %vm6645_vm9, %v7234_v7  ;;  %v10397_v22 = vld [vmem:[#allocation7 + $0x190] sm:$0xff]  ;;  %v7880_v37 = vrot.slane %v7879_v20, 4  ;;  %v12323_v17 = vcombine.low %v17319_v51, %v17306_v52 }
 0x847   : > { %v7914_v6 = vrot.slane %v7913_v36, 4  ;;  %v12259_v56 = vrot.slane %v9410_v10, 11  ;;  %v9417_v55 = vrot.slane %v9415_v62, 7  ;;  %8554 = vst.msk [vmem:[#allocation7 + $0x20c] sm:$0xf] %vm7503_vm10, %v8485_v21  ;;  %v10400_v38 = vld [vmem:[#allocation7 + $0x1a4] sm:$0xff] }
 0x848   : > { %7531 = vst.msk [vmem:[#allocation7 + $0x21c] sm:$0xf] %vm7503_vm10, %v7462_v25  ;;  %v13136_v3 = vld [vmem:[#allocation7 + $0x194] ss:$20 sps:$4 sm:$0xff]   ;;  %v7888_v33 = vrot.slane %v7886_v15, 4  ;;  %v7892_v57 = vshll.u32 %v7574_v19, 16  ;;  %v7885_v4 = vsel %vm13458_vm5, %v7880_v37, %v7884_v23  ;;  %v12318_v35 = vcombine.low %v10397_v22, %v10400_v38  ;;  %v8483_v15 = vpop.permute.xlu1 %8482 }
 0x849   : > { %v9424_v42 = vshrl.u32 %v17302_v43, 16  ;;  %v7919_v44 = vsel %vm13458_vm5, %v7914_v6, %v7918_v47  ;;  %v9420_v45 = vor.u32 %v9418_v24, %v9417_v55  ;;  %v7581_v63 = vld [vmem:[#allocation6 + $0xf4] sm:$0xf]  ;;  %11288 = vmatprep.mubr.bf16.mxu0 %v13136_v3  ;;  %8024 = vst.msk [vmem:[#allocation7 + $0x1e4] sm:$0xf] %vm6645_vm9, %v7885_v4  ;;  %v9422_v27 = vrot.slane %v9417_v55, 4 }
 0x84a   : > { %8027 = vst.msk [vmem:[#allocation7 + $0x220] sm:$0xf] %vm6645_vm9, %v7919_v44  ;;  %v7889_v53 = vor.u32 %v7888_v33, %v7884_v23  ;;  %v7894_v29 = vrot.slane %v7892_v57, 5  ;;  %v7582_v25 = vld [vmem:[#allocation6 + $0xf8] sm:$0xf]  ;;  %v9427_v34 = vshll.u32 %v17302_v43, 16  ;;  %11289 = vmatmul.mubr.bf16.gmra.mxu0 %v12318_v35 }
 0x84b   : > { %v9426_v21 = vrot.slane %v9424_v42, 7  ;;  %8552 = vst.msk [vmem:[#allocation7 + $0x1e4] sm:$0xf] %vm7503_vm10, %v8481_v1  ;;  %8555 = vst.msk [vmem:[#allocation7 + $0x220] sm:$0xf] %vm7503_vm10, %v8487_v32  ;;  %v9421_v26 = vsel %vm13468_vm6, %v12259_v56, %v9420_v45  ;;  %v7258_v19 = vshrl.u32 %v6924_v12, 16  ;;  %v7468_v32 = vpop.permute.xlu0 %7467 }
 0x84c   : > { %v7263_v11 = vshrl.u32 %v17315_v14, 16  ;;  %v6926_v54 = vld [vmem:[#allocation6 + $0xf8] sm:$0xf]  ;;  %9633 = vst.msk [vmem:[#allocation7 + $0x14c] sm:$0xf] %vm6645_vm9, %v9421_v26  ;;  %v7890_v23 = vrot.slane %v7889_v53, 4  ;;  %v9748_v6 = vpop.permute.xlu1 %9747 }
 0x84d   : > { %v7266_v60 = vshll.u32 %v17315_v14, 16  ;;  %v7945_v20 = vshrl.u32 %v7581_v63, 16  ;;  %v7948_v36 = vshll.u32 %v7581_v63, 16  ;;  %v7578_v10 = vld [vmem:[#allocation6 + $0xe4] sm:$0xf]  ;;  %v9429_v8 = vor.u32 %v9427_v34, %v9426_v21 }
 0x84e   : > { %v13138_v62 = vld [vmem:[#allocation7 + $0x1bc] ss:$20 sps:$4 sm:$0xff]   ;;  %9825 = vst.msk [vmem:[#allocation7 + $0x14c] sm:$0xf] %vm7503_vm10, %v9746_v5  ;;  %v12234_v7 = vrot.slane %v7258_v19, 11  ;;  %v7265_v47 = vrot.slane %v7263_v11, 7  ;;  %v7895_v43 = vsel %vm13458_vm5, %v7890_v23, %v7894_v29 }
 0x84f   : > { %v7954_v24 = vshll.u32 %v7582_v25, 16  ;;  %v7947_v12 = vrot.slane %v7945_v20, 4  ;;  %v7950_v22 = vrot.slane %v7948_v36, 5  ;;  %v7958_v37 = vshrl.u32 %v7582_v25, 16  ;;  %v7579_v1 = vld [vmem:[#allocation6 + $0xe8] sm:$0xf]  ;;  %11296 = vmatprep.mubr.bf16.mxu0 %v13138_v62  ;;  %v8493_v26 = vpop.permute.xlu0 %8492 }
 0x850   : > { %8025 = vst.msk [vmem:[#allocation7 + $0x1f8] sm:$0xf] %vm6645_vm9, %v7895_v43  ;;  %v9430_v14 = vsel %vm13468_vm6, %v9422_v27, %v9429_v8  ;;  %v7268_v56 = vor.u32 %v7266_v60, %v7265_v47  ;;  %v7270_v38 = vrot.slane %v7265_v47, 4  ;;  %v7272_v33 = vshrl.u32 %v6926_v54, 16  ;;  %v7583_v4 = vld [vmem:[#allocation6 + $0xfc] sm:$0x1]  ;;  %v7470_v5 = vpop.permute.xlu1 %7469 }
 0x851   : > { %v7956_v55 = vrot.slane %v7954_v24, 5  ;;  %8553 = vst.msk [vmem:[#allocation7 + $0x1f8] sm:$0xf] %vm7503_vm10, %v8483_v15  ;;  %v7951_v3 = vor.u32 %v7950_v22, %v7947_v12  ;;  %v7275_v57 = vshll.u32 %v6926_v54, 16  ;;  %v7921_v42 = vshrl.u32 %v7578_v10, 16  ;;  %v18088_v51 = vld [vmem:[#allocation13_spill] sm:$0xff] }
 0x852   : > { %9634 = vst.msk [vmem:[#allocation7 + $0x160] sm:$0xf] %vm6645_vm9, %v9430_v14  ;;  %v7269_v35 = vsel %vm13468_vm6, %v12234_v7, %v7268_v56  ;;  %v7924_v44 = vshll.u32 %v7578_v10, 16  ;;  %v7930_v45 = vshll.u32 %v7579_v1, 16  ;;  %v7934_v63 = vshrl.u32 %v7579_v1, 16  ;;  %11297 = vmatmul.mubr.bf16.gmra.mxu0 %v12323_v17  ;;  %v18089_v17 = vld [vmem:[#allocation12_spill] sm:$0xff] }
 0x853   : > { %9826 = vst.msk [vmem:[#allocation7 + $0x160] sm:$0xf] %vm7503_vm10, %v9748_v6  ;;  %v7580_v53 = vld [vmem:[#allocation6 + $0xec] sm:$0x1]  ;;  %v7952_v29 = vrot.slane %v7951_v3, 4  ;;  %v7274_v27 = vrot.slane %v7272_v33, 7  ;;  %v10242_v62 = vor.u32 %v16794_v46, %v16772_v59  ;;  %v9998_v33 = vsel %vm13458_vm5, %v18089_v17, %v18088_v51 }
 0x854   : > { %7341 = vst.msk [vmem:[#allocation7 + $0x258] sm:$0xf] %vm6645_vm9, %v7269_v35  ;;  %v7923_v21 = vrot.slane %v7921_v42, 4  ;;  %v7960_v25 = vrot.slane %v7958_v37, 4  ;;  %v7926_v15 = vrot.slane %v7924_v44, 5  ;;  %v7932_v34 = vrot.slane %v7930_v45, 5  ;;  %v8495_v3 = vpop.permute.xlu1 %8494 }
 0x855   : > { %7534 = vst.msk [vmem:[#allocation7 + $0x258] sm:$0xf] %vm7503_vm10, %v7468_v32  ;;  %v7964_v19 = vshll.u32 %v7583_v4, 16  ;;  %v7936_v11 = vrot.slane %v7934_v63, 4  ;;  %v9212_v54 = vld [vmem:[#allocation6 + $0xb0] sm:$0x8]  ;;  %v7957_v23 = vsel %vm13458_vm5, %v7952_v29, %v7956_v55  ;;  %v7277_v60 = vor.u32 %v7275_v57, %v7274_v27 }
 0x856   : > { %v7961_v20 = vor.u32 %v7960_v25, %v7956_v55  ;;  %v7940_v36 = vshll.u32 %v7580_v53, 16  ;;  %v17355_v10 = vld [vmem:[#allocation6 + $0xb4] sm:$0xf]  ;;  %8030 = vst.msk [vmem:[#allocation7 + $0x25c] sm:$0xf] %vm6645_vm9, %v7957_v23  ;;  %v7927_v8 = vor.u32 %v7926_v15, %v7923_v21  ;;  %v9432_v1 = vshrl.u32 %v9212_v54, 16  ;;  %v8489_v55 = vpop.permute.xlu0 %8488 }
 0x857   : > { %v7966_v7 = vrot.slane %v7964_v19, 5  ;;  %v7937_v47 = vor.u32 %v7936_v11, %v7932_v34  ;;  %v17360_v24 = vld [vmem:[#allocation6 + $0xb8] sm:$0xf]  ;;  %v9215_v43 = vld [vmem:[#allocation6 + $0xc0] sm:$0x8]  ;;  %v7278_v12 = vsel %vm13468_vm6, %v7270_v38, %v7277_v60  ;;  %v10142_v29 = vsel %vm13458_vm5, %v16335_v39, %v16381_v30 }
 0x858   : > { %8558 = vst.msk [vmem:[#allocation7 + $0x25c] sm:$0xf] %vm7503_vm10, %v8493_v26  ;;  %v7962_v22 = vrot.slane %v7961_v20, 4  ;;  %v7942_v37 = vrot.slane %v7940_v36, 5  ;;  %v17368_v14 = vld [vmem:[#allocation6 + $0xc4] sm:$0xf] }
 0x859   : > { %v17370_v6 = vld [vmem:[#allocation6 + $0xc8] sm:$0xf]  ;;  %7342 = vst.msk [vmem:[#allocation7 + $0x26c] sm:$0xf] %vm6645_vm9, %v7278_v12  ;;  %v13141_v32 = vld [vmem:[#allocation7 + $0x1e4] ss:$20 sps:$4 sm:$0xff]  }
 0x85a   : > { %v7928_v56 = vrot.slane %v7927_v8, 4  ;;  %v9218_v52 = vld [vmem:[#allocation6 + $0xd0] sm:$0x8]  ;;  %v18090_v38 = vld [vmem:[#allocation17_spill] sm:$0xff]  ;;  %v18091_v57 = vld [vmem:[#allocation16_spill] sm:$0xff]  ;;  %v7967_v44 = vsel %vm13458_vm5, %v7962_v22, %v7966_v7  ;;  %v7938_v53 = vrot.slane %v7937_v47, 4  ;;  %11304 = vmatprep.mubr.bf16.mxu0 %v13141_v32  ;;  %v9093_v20 = vpop.permute.xlu0 %9092 }
 0x85b   : > { %v10046_v42 = vsel %vm13458_vm5, %v18091_v57, %v18090_v38  ;;  %v18092_v4 = vld [vmem:[#allocation20_spill] sm:$0xff]  ;;  %7535 = vst.msk [vmem:[#allocation7 + $0x26c] sm:$0xf] %vm7503_vm10, %v7470_v5  ;;  %v12260_v21 = vrot.slane %v9432_v1, 11  ;;  %v9437_v25 = vshrl.u32 %v17355_v10, 16  ;;  %v9440_v26 = vshll.u32 %v17355_v10, 16 }
 0x85c   : > { %v10094_v35 = vsel %vm13458_vm5, %v18092_v4, %v16192_v0  ;;  %v13146_v45 = vld [vmem:[#allocation7 + $0x14c] ss:$20 sps:$4 sm:$0xff]   ;;  %v13148_v63 = vld [vmem:[#allocation7 + $0x148] ss:$20 sps:$4 sm:$0xff]   ;;  %10313 = vst.msk [vmem:[#allocation7 + $0xb0] sm:$0xf] %vm6645_vm9, %v9998_v33  ;;  %v10190_v0 = vsel %vm13458_vm5, %v16619_v9, %v16513_v41  ;;  %v7933_v27 = vsel %vm13458_vm5, %v7928_v56, %v7932_v34  ;;  %v7943_v30 = vsel %vm13458_vm5, %v7938_v53, %v7942_v37 }
 0x85d   : > { %10317 = vst.msk [vmem:[#allocation7 + $0x100] sm:$0xf] %vm6645_vm9, %v10046_v42  ;;  %10321 = vst.msk [vmem:[#allocation7 + $0x150] sm:$0xf] %vm6645_vm9, %v10094_v35  ;;  %v17404_v5 = vld [vmem:[#allocation6 + $0xd4] sm:$0xf]  ;;  %11433 = vmatprep.mubr.bf16.mxu1 %v13146_v45 }
 0x85e   : > { %8031 = vst.msk [vmem:[#allocation7 + $0x270] sm:$0xf] %vm6645_vm9, %v7967_v44  ;;  %10325 = vst.msk [vmem:[#allocation7 + $0x1a0] sm:$0xf] %vm6645_vm9, %v10142_v29  ;;  %v13143_v39 = vld [vmem:[#allocation7 + $0x1e0] ss:$20 sps:$4 sm:$0xff]   ;;  %11434 = vmatmul.mubr.bf16.gmra.mxu1 %v13148_v63  ;;  %v9750_v42 = vpop.permute.xlu0 %9749 }
 0x85f   : > { %10329 = vst.msk [vmem:[#allocation7 + $0x1f0] sm:$0xf] %vm6645_vm9, %v10190_v0  ;;  %8028 = vst.msk [vmem:[#allocation7 + $0x234] sm:$0xf] %vm6645_vm9, %v7933_v27  ;;  %v9446_v41 = vshrl.u32 %v17360_v24, 16  ;;  %v9449_v9 = vshll.u32 %v17360_v24, 16  ;;  %11305 = vmatmul.mubr.bf16.gmra.mxu0 %v13143_v39 }
 0x860   : > { %8559 = vst.msk [vmem:[#allocation7 + $0x270] sm:$0xf] %vm7503_vm10, %v8495_v3  ;;  %v9454_v15 = vshrl.u32 %v9215_v43, 16  ;;  %8556 = vst.msk [vmem:[#allocation7 + $0x234] sm:$0xf] %vm7503_vm10, %v8489_v55  ;;  %v9439_v34 = vrot.slane %v9437_v25, 7  ;;  %v8491_v43 = vpop.permute.xlu1 %8490 }
 0x861   : > { %8029 = vst.msk [vmem:[#allocation7 + $0x248] sm:$0xf] %vm6645_vm9, %v7943_v30  ;;  %v9459_v19 = vshrl.u32 %v17368_v14, 16  ;;  %v9462_v11 = vshll.u32 %v17368_v14, 16  ;;  %v9468_v54 = vshrl.u32 %v17370_v6, 16  ;;  %v9448_v36 = vrot.slane %v9446_v41, 7 }
 0x862   : > { %v9843_v23 = vld [vmem:[#allocation6 + $0x2c] sm:$0x1]  ;;  %v17419_v60 = vld [vmem:[#allocation6 + $0xd8] sm:$0xf]  ;;  %v12261_v10 = vrot.slane %v9454_v15, 11  ;;  %v9471_v8 = vshll.u32 %v17370_v6, 16  ;;  %v9442_v12 = vor.u32 %v9440_v26, %v9439_v34 }
 0x863   : > { %v9476_v7 = vshrl.u32 %v9218_v52, 16  ;;  %v9221_v47 = vld [vmem:[#allocation6 + $0xe0] sm:$0x8]  ;;  %9170 = vst.msk [vmem:[#allocation7 + $0x170] sm:$0xf] %vm7503_vm10, %v9093_v20  ;;  %v9444_v22 = vrot.slane %v9439_v34, 4  ;;  %v9451_v14 = vor.u32 %v9449_v9, %v9448_v36 }
 0x864   : > { %v13144_v24 = vld [vmem:[#allocation7 + $0x20c] ss:$20 sps:$4 sm:$0xff]   ;;  %v9461_v37 = vrot.slane %v9459_v19, 7  ;;  %v9470_v1 = vrot.slane %v9468_v54, 7  ;;  %8557 = vst.msk [vmem:[#allocation7 + $0x248] sm:$0xf] %vm7503_vm10, %v8491_v43  ;;  %v9443_v52 = vsel %vm13468_vm6, %v12260_v21, %v9442_v12  ;;  %v9095_v53 = vpop.permute.xlu1 %9094 }
 0x865   : > { %v12262_v32 = vrot.slane %v9476_v7, 11  ;;  %v9481_v56 = vshrl.u32 %v17404_v5, 16  ;;  %v9484_v55 = vshll.u32 %v17404_v5, 16  ;;  %v9222_v6 = vld [vmem:[#allocation6 + $0xe4] sm:$0xf]  ;;  %v10418_v3 = vld [vmem:[#allocation7 + $0x21c] sm:$0xff]  ;;  %11312 = vmatprep.mubr.bf16.mxu0 %v13144_v24  ;;  %v9452_v4 = vsel %vm13468_vm6, %v9444_v22, %v9451_v14 }
 0x866   : > { %v9464_v51 = vor.u32 %v9462_v11, %v9461_v37  ;;  %v9466_v17 = vrot.slane %v9461_v37, 4  ;;  %v9473_v33 = vor.u32 %v9471_v8, %v9470_v1  ;;  %v9846_v38 = vld [vmem:[#allocation6 + $0x3c] sm:$0x1]  ;;  %v9849_v57 = vld [vmem:[#allocation6 + $0x4c] sm:$0x1]  ;;  %v9909_v44 = vshll.u32 %v9843_v23, 16 }
 0x867   : > { %9635 = vst.msk [vmem:[#allocation7 + $0x174] sm:$0xf] %vm6645_vm9, %v9443_v52  ;;  %v9483_v35 = vrot.slane %v9481_v56, 7  ;;  %v9490_v45 = vshrl.u32 %v17419_v60, 16  ;;  %v10415_v63 = vld [vmem:[#allocation7 + $0x208] sm:$0xff]  ;;  %v9493_v27 = vshll.u32 %v17419_v60, 16 }
 0x868   : > { %9827 = vst.msk [vmem:[#allocation7 + $0x174] sm:$0xf] %vm7503_vm10, %v9750_v42  ;;  %v9465_v29 = vsel %vm13468_vm6, %v12261_v10, %v9464_v51  ;;  %v9474_v0 = vsel %vm13468_vm6, %v9466_v17, %v9473_v33  ;;  %v9498_v21 = vshrl.u32 %v9221_v47, 16  ;;  %v9223_v25 = vld [vmem:[#allocation6 + $0xe8] sm:$0xf]  ;;  %v12333_v26 = vcombine.low %v10415_v63, %v10418_v3  ;;  %v17442_v11 = vld [vmem:[#allocation7 + $0x230] sm:$0xff]  ;;  %v9752_v8 = vpop.permute.xlu1 %9751  ;;  %v9097_v63 = vpop.permute.xlu0 %9096 }
 0x869   : > { %9636 = vst.msk [vmem:[#allocation7 + $0x188] sm:$0xf] %vm6645_vm9, %v9452_v4  ;;  %9637 = vst.msk [vmem:[#allocation7 + $0x19c] sm:$0xf] %vm6645_vm9, %v9465_v29  ;;  %v9486_v5 = vor.u32 %v9484_v55, %v9483_v35  ;;  %v9911_v39 = vrot.slane %v9909_v44, 5  ;;  %v9488_v30 = vrot.slane %v9483_v35, 4 }
 0x86a   : > { %9171 = vst.msk [vmem:[#allocation7 + $0x184] sm:$0xf] %vm7503_vm10, %v9095_v53  ;;  %v9224_v41 = vld [vmem:[#allocation6 + $0xf0] sm:$0x8]  ;;  %v9492_v9 = vrot.slane %v9490_v45, 7  ;;  %v12263_v15 = vrot.slane %v9498_v21, 11  ;;  %11313 = vmatmul.mubr.bf16.gmra.mxu0 %v12333_v26 }
 0x86b   : > { %9638 = vst.msk [vmem:[#allocation7 + $0x1b0] sm:$0xf] %vm6645_vm9, %v9474_v0  ;;  %v9503_v34 = vshrl.u32 %v9222_v6, 16  ;;  %v9506_v19 = vshll.u32 %v9222_v6, 16  ;;  %v9487_v54 = vsel %vm13468_vm6, %v12262_v32, %v9486_v5  ;;  %v18093_v23 = vld [vmem:[#allocation9_spill] sm:$0xff]  ;;  %v9933_v20 = vshll.u32 %v9846_v38, 16 }
 0x86c   : > { %v9912_v60 = vsel %vm13458_vm5, %v18093_v23, %v9911_v39  ;;  %v9957_v36 = vshll.u32 %v9849_v57, 16  ;;  %v9225_v10 = vld [vmem:[#allocation6 + $0xf4] sm:$0xf]  ;;  %v17449_v7 = vld [vmem:[#allocation7 + $0x244] sm:$0xff]  ;;  %9639 = vst.msk [vmem:[#allocation7 + $0x1c4] sm:$0xf] %vm6645_vm9, %v9487_v54  ;;  %v9495_v24 = vor.u32 %v9493_v27, %v9492_v9  ;;  %v9099_v21 = vpop.permute.xlu1 %9098 }
 0x86d   : > { %v13149_v47 = vld [vmem:[#allocation7 + $0x234] ss:$20 sps:$4 sm:$0xff]   ;;  %10306 = vst.msk [vmem:[#allocation7 + $0x24] sm:$0xf] %vm6645_vm9, %v9912_v60  ;;  %v9505_v43 = vrot.slane %v9503_v34, 7  ;;  %v9512_v12 = vshrl.u32 %v9223_v25, 16  ;;  %v12338_v37 = vcombine.low %v17442_v11, %v17449_v7  ;;  %v9754_v7 = vpop.permute.xlu0 %9753 }
 0x86e   : > { %v9515_v22 = vshll.u32 %v9223_v25, 16  ;;  %9828 = vst.msk [vmem:[#allocation7 + $0x188] sm:$0xf] %vm7503_vm10, %v9752_v8  ;;  %v9935_v1 = vrot.slane %v9933_v20, 5  ;;  %v9959_v14 = vrot.slane %v9957_v36, 5  ;;  %v9520_v32 = vshrl.u32 %v9224_v41, 16  ;;  %11320 = vmatprep.mubr.bf16.mxu0 %v13149_v47 }
 0x86f   : > { %v9852_v56 = vld [vmem:[#allocation6 + $0x5c] sm:$0x1]  ;;  %v9496_v55 = vsel %vm13468_vm6, %v9488_v30, %v9495_v24  ;;  %v9508_v6 = vor.u32 %v9506_v19, %v9505_v43  ;;  %v9510_v3 = vrot.slane %v9505_v43, 4  ;;  %v9514_v52 = vrot.slane %v9512_v12, 7  ;;  %v9855_v51 = vld [vmem:[#allocation6 + $0x6c] sm:$0x1] }
 0x870   : > { %v17458_v17 = vld [vmem:[#allocation6 + $0xf8] sm:$0xf]  ;;  %9640 = vst.msk [vmem:[#allocation7 + $0x1d8] sm:$0xf] %vm6645_vm9, %v9496_v55  ;;  %v18095_v57 = vld [vmem:[#allocation10_spill] sm:$0xff]  ;;  %v12264_v4 = vrot.slane %v9520_v32, 11  ;;  %v10238_v8 = vsel %vm13458_vm5, %v16761_v61, %v16772_v59 }
 0x871   : > { %v18094_v33 = vld [vmem:[#allocation11_spill] sm:$0xff]  ;;  %v9960_v42 = vsel %vm13458_vm5, %v18095_v57, %v9959_v14  ;;  %v9525_v35 = vshrl.u32 %v9225_v10, 16  ;;  %v9227_v44 = vld [vmem:[#allocation6 + $0x100] sm:$0x8]  ;;  %v17467_v45 = vld [vmem:[#allocation6 + $0x104] sm:$0xf]  ;;  %v9509_v53 = vsel %vm13468_vm6, %v12263_v15, %v9508_v6  ;;  %v9517_v29 = vor.u32 %v9515_v22, %v9514_v52 }
 0x872   : > { %v9936_v38 = vsel %vm13458_vm5, %v18094_v33, %v9935_v1  ;;  %10310 = vst.msk [vmem:[#allocation7 + $0x74] sm:$0xf] %vm6645_vm9, %v9960_v42  ;;  %v9528_v0 = vshll.u32 %v9225_v10, 16  ;;  %v9981_v27 = vshll.u32 %v9852_v56, 16  ;;  %9641 = vst.msk [vmem:[#allocation7 + $0x1ec] sm:$0xf] %vm6645_vm9, %v9509_v53  ;;  %11321 = vmatmul.mubr.bf16.gmra.mxu0 %v12338_v37  ;;  %v9756_v56 = vpop.permute.xlu1 %9755 }
 0x873   : > { %10308 = vst.msk [vmem:[#allocation7 + $0x4c] sm:$0xf] %vm6645_vm9, %v9936_v38  ;;  %v9527_v25 = vrot.slane %v9525_v35, 7  ;;  %v10005_v26 = vshll.u32 %v9855_v51, 16  ;;  %v9534_v5 = vshrl.u32 %v17458_v17, 16  ;;  %v9537_v39 = vshll.u32 %v17458_v17, 16 }
 0x874   : > { %9172 = vst.msk [vmem:[#allocation7 + $0x198] sm:$0xf] %vm7503_vm10, %v9097_v63  ;;  %v17477_v30 = vld [vmem:[#allocation6 + $0x108] sm:$0xf]  ;;  %9173 = vst.msk [vmem:[#allocation7 + $0x1ac] sm:$0xf] %vm7503_vm10, %v9099_v21  ;;  %v9518_v9 = vsel %vm13468_vm6, %v9510_v3, %v9517_v29 }
 0x875   : > { %v13151_v41 = vld [vmem:[#allocation7 + $0x25c] ss:$20 sps:$4 sm:$0xff]   ;;  %v9983_v15 = vrot.slane %v9981_v27, 5  ;;  %v9542_v34 = vshrl.u32 %v9227_v44, 16  ;;  %v9547_v19 = vshrl.u32 %v17467_v45, 16  ;;  %v9530_v23 = vor.u32 %v9528_v0, %v9527_v25  ;;  %v10395_v47 = vld [vmem:[#allocation7 + $0x184] sm:$0xff]  ;;  %v9101_v44 = vpop.permute.xlu0 %9100 }
 0x876   : > { %v17483_v11 = vld [vmem:[#allocation7 + $0x26c] sm:$0xff]  ;;  %9642 = vst.msk [vmem:[#allocation7 + $0x200] sm:$0xf] %vm6645_vm9, %v9518_v9  ;;  %v10007_v60 = vrot.slane %v10005_v26, 5  ;;  %v9532_v20 = vrot.slane %v9527_v25, 4  ;;  %v9536_v22 = vrot.slane %v9534_v5, 7  ;;  %11328 = vmatprep.mubr.bf16.mxu0 %v13151_v41 }
 0x877   : > { %v10392_v54 = vld [vmem:[#allocation7 + $0x170] sm:$0xff]  ;;  %v9858_v36 = vld [vmem:[#allocation6 + $0x7c] sm:$0x1]  ;;  %v9861_v10 = vld [vmem:[#allocation6 + $0x8c] sm:$0x1]  ;;  %v12265_v1 = vrot.slane %v9542_v34, 11  ;;  %v9531_v61 = vsel %vm13468_vm6, %v12264_v4, %v9530_v23 }
 0x878   : > { %v13153_v24 = vld [vmem:[#allocation7 + $0x174] ss:$20 sps:$4 sm:$0xff]   ;;  %v9549_v14 = vrot.slane %v9547_v19, 7  ;;  %v9230_v32 = vld [vmem:[#allocation6 + $0x110] sm:$0x8]  ;;  %v12315_v55 = vcombine.low %v10392_v54, %v10395_v47  ;;  %v9550_v52 = vshll.u32 %v17467_v45, 16  ;;  %v9539_v38 = vor.u32 %v9537_v39, %v9536_v22 }
 0x879   : > { %v18096_v43 = vld [vmem:[#allocation15_spill] sm:$0xff]  ;;  %10333 = vst.msk [vmem:[#allocation7 + $0x240] sm:$0xf] %vm6645_vm9, %v10238_v8  ;;  %v18097_v6 = vld [vmem:[#allocation14_spill] sm:$0xff]  ;;  %v9864_v17 = vld [vmem:[#allocation6 + $0x9c] sm:$0x1]  ;;  %11441 = vmatprep.mubr.bf16.mxu1 %v13153_v24 }
 0x87a   : > { %v9984_v12 = vsel %vm13458_vm5, %v18096_v43, %v9983_v15  ;;  %9829 = vst.msk [vmem:[#allocation7 + $0x19c] sm:$0xf] %vm7503_vm10, %v9754_v7  ;;  %v10008_v3 = vsel %vm13458_vm5, %v18097_v6, %v10007_v60  ;;  %v9231_v51 = vld [vmem:[#allocation6 + $0x114] sm:$0xf]  ;;  %v17505_v33 = vrot.slane %v10242_v62, 4  ;;  %v10427_v37 = vld [vmem:[#allocation7 + $0x258] sm:$0xff]  ;;  %11442 = vmatmul.mubr.bf16.gmra.mxu1 %v12315_v55  ;;  %v9552_v62 = vor.u32 %v9550_v52, %v9549_v14  ;;  %v9758_v60 = vpop.permute.xlu0 %9757 }
 0x87b   : > { %10312 = vst.msk [vmem:[#allocation7 + $0x9c] sm:$0xf] %vm6645_vm9, %v9984_v12  ;;  %9643 = vst.msk [vmem:[#allocation7 + $0x214] sm:$0xf] %vm6645_vm9, %v9531_v61  ;;  %v9556_v57 = vshrl.u32 %v17477_v30, 16  ;;  %v9559_v42 = vshll.u32 %v17477_v30, 16  ;;  %v12343_v46 = vcombine.low %v10427_v37, %v17483_v11  ;;  %v9540_v45 = vsel %vm13468_vm6, %v9532_v20, %v9539_v38  ;;  %v9103_v30 = vpop.permute.xlu1 %9102 }
 0x87c   : > { %9830 = vst.msk [vmem:[#allocation7 + $0x1b0] sm:$0xf] %vm7503_vm10, %v9756_v56  ;;  %v9867_v4 = vld [vmem:[#allocation6 + $0xac] sm:$0x1]  ;;  %v17515_v59 = vrot.slane %v10218_v18, 4  ;;  %v9554_v35 = vrot.slane %v9549_v14, 4  ;;  %v9553_v58 = vsel %vm13468_vm6, %v12265_v1, %v9552_v62 }
 0x87d   : > { %10314 = vst.msk [vmem:[#allocation7 + $0xc4] sm:$0xf] %vm6645_vm9, %v10008_v3  ;;  %v9558_v63 = vrot.slane %v9556_v57, 7  ;;  %v10029_v53 = vshll.u32 %v9858_v36, 16  ;;  %v10053_v29 = vshll.u32 %v9861_v10, 16  ;;  %v9564_v28 = vshrl.u32 %v9230_v32, 16  ;;  %11329 = vmatmul.mubr.bf16.gmra.mxu0 %v12343_v46 }
 0x87e   : > { %v17520_v0 = vld [vmem:[#allocation6 + $0x118] sm:$0xf]  ;;  %9174 = vst.msk [vmem:[#allocation7 + $0x1c0] sm:$0xf] %vm7503_vm10, %v9101_v44  ;;  %v9569_v18 = vshrl.u32 %v9231_v51, 16  ;;  %v9572_v27 = vshll.u32 %v9231_v51, 16  ;;  %v9105_v57 = vpop.permute.xlu0 %9104 }
 0x87f   : > { %9644 = vst.msk [vmem:[#allocation7 + $0x228] sm:$0xf] %vm6645_vm9, %v9540_v45  ;;  %9645 = vst.msk [vmem:[#allocation7 + $0x23c] sm:$0xf] %vm6645_vm9, %v9553_v58  ;;  %v9561_v21 = vor.u32 %v9559_v42, %v9558_v63  ;;  %v10031_v25 = vrot.slane %v10029_v53, 5  ;;  %v10055_v26 = vrot.slane %v10053_v29, 5  ;;  %v9760_v52 = vpop.permute.xlu1 %9759 }
 0x880   : > { %v10077_v5 = vshll.u32 %v9864_v17, 16  ;;  %v9870_v39 = vld [vmem:[#allocation6 + $0xbc] sm:$0x1]  ;;  %v12266_v41 = vrot.slane %v9564_v28, 11  ;;  %v9571_v9 = vrot.slane %v9569_v18, 7  ;;  %v10101_v15 = vshll.u32 %v9867_v4, 16 }
 0x881   : > { %v9578_v34 = vshrl.u32 %v17520_v0, 16  ;;  %v9873_v19 = vld [vmem:[#allocation6 + $0xcc] sm:$0x1]  ;;  %v9876_v11 = vld [vmem:[#allocation6 + $0xdc] sm:$0x1]  ;;  %v9562_v10 = vsel %vm13468_vm6, %v9554_v35, %v9561_v21  ;;  %v18098_v8 = vld [vmem:[#allocation19_spill] sm:$0xff] }
 0x882   : > { %v9879_v54 = vld [vmem:[#allocation6 + $0xec] sm:$0x1]  ;;  %9175 = vst.msk [vmem:[#allocation7 + $0x1d4] sm:$0xf] %vm7503_vm10, %v9103_v30  ;;  %v13156_v20 = vld [vmem:[#allocation7 + $0x10] ss:$20 sps:$4 sm:$0xff]   ;;  %v10032_v7 = vsel %vm13458_vm5, %v18098_v8, %v10031_v25  ;;  %v9574_v1 = vor.u32 %v9572_v27, %v9571_v9 }
 0x883   : > { %v9885_v23 = vld [vmem:[#allocation6 + $0x10c] sm:$0x1]  ;;  %v10398_v36 = vld [vmem:[#allocation7 + $0x198] sm:$0xff]  ;;  %v10079_v43 = vrot.slane %v10077_v5, 5  ;;  %9831 = vst.msk [vmem:[#allocation7 + $0x1c4] sm:$0xf] %vm7503_vm10, %v9758_v60  ;;  %12919 = vmatprep.mubr.msk.bf16.mxu0 %vm6435_vm8, %v13156_v20  ;;  %v9107_v58 = vpop.permute.xlu1 %9106 }
 0x884   : > { %v18099_v47 = vld [vmem:[#allocation18_spill] sm:$0xff]  ;;  %9646 = vst.msk [vmem:[#allocation7 + $0x250] sm:$0xf] %vm6645_vm9, %v9562_v10  ;;  %10316 = vst.msk [vmem:[#allocation7 + $0xec] sm:$0xf] %vm6645_vm9, %v10032_v7  ;;  %v10103_v14 = vrot.slane %v10101_v15, 5  ;;  %v9575_v51 = vsel %vm13468_vm6, %v12266_v41, %v9574_v1 }
 0x885   : > { %v10056_v24 = vsel %vm13458_vm5, %v18099_v47, %v10055_v26  ;;  %v10401_v12 = vld [vmem:[#allocation7 + $0x1ac] sm:$0xff]  ;;  %v10080_v56 = vsel %vm13458_vm5, %v16267_v50, %v10079_v43  ;;  %v9576_v55 = vrot.slane %v9571_v9, 4  ;;  %v9580_v61 = vrot.slane %v9578_v34, 7  ;;  %v9882_v6 = vld [vmem:[#allocation6 + $0xfc] sm:$0x1]  ;;  %v9762_v26 = vpop.permute.xlu0 %9761  ;;  %v12589_v9 = vpop.f32.mrf.mxu0 }
 0x886   : > { %v13158_v22 = vld [vmem:[#allocation7 + $0x19c] ss:$20 sps:$4 sm:$0xff]   ;;  %10318 = vst.msk [vmem:[#allocation7 + $0x114] sm:$0xf] %vm6645_vm9, %v10056_v24  ;;  %v12320_v32 = vcombine.low %v10398_v36, %v10401_v12  ;;  %v9886_v3 = vld [vmem:[#allocation6 + $0x114] sm:$0xf]  ;;  %v10104_v17 = vsel %vm13458_vm5, %v16247_v48, %v10103_v14 }
 0x887   : > { %11449 = vmatprep.mubr.bf16.mxu1 %v13158_v22  ;;  %10320 = vst.msk [vmem:[#allocation7 + $0x13c] sm:$0xf] %vm6645_vm9, %v10080_v56  ;;  %v9581_v37 = vshll.u32 %v17520_v0, 16  ;;  %v10125_v38 = vshll.u32 %v9870_v39, 16  ;;  %9647 = vst.msk [vmem:[#allocation7 + $0x264] sm:$0xf] %vm6645_vm9, %v9575_v51  ;;  %v12590_v20 = vpop.f32.mrf.mxu0 }
 0x888   : > { %9832 = vst.msk [vmem:[#allocation7 + $0x1d8] sm:$0xf] %vm7503_vm10, %v9760_v52  ;;  %11450 = vmatmul.mubr.bf16.gmra.mxu1 %v12320_v32  ;;  %v10149_v50 = vshll.u32 %v9873_v19, 16  ;;  %v10173_v42 = vshll.u32 %v9876_v11, 16  ;;  %v10197_v4 = vshll.u32 %v9879_v54, 16  ;;  %v10245_v46 = vshll.u32 %v9885_v23, 16  ;;  %v9764_v19 = vpop.permute.xlu1 %9763 }
 0x889   : > { %10322 = vst.msk [vmem:[#allocation7 + $0x164] sm:$0xf] %vm6645_vm9, %v10104_v17  ;;  %v9583_v62 = vor.u32 %v9581_v37, %v9580_v61  ;;  %v10127_v35 = vrot.slane %v10125_v38, 5  ;;  %v10221_v48 = vshll.u32 %v9882_v6, 16  ;;  %v10250_v44 = vshrl.u32 %v9886_v3, 16  ;;  %v12592_v7 = vpop.f32.mrf.mxu0  ;;  %v9109_v43 = vpop.permute.xlu0 %9108 }
 0x88a   : > { %9176 = vst.msk [vmem:[#allocation7 + $0x1e8] sm:$0xf] %vm7503_vm10, %v9105_v57  ;;  %v10151_v45 = vrot.slane %v10149_v50, 5  ;;  %v10175_v63 = vrot.slane %v10173_v42, 5  ;;  %v10199_v53 = vrot.slane %v10197_v4, 5  ;;  %v10247_v29 = vrot.slane %v10245_v46, 5 }
 0x88b   : > { %v9887_v0 = vld [vmem:[#allocation6 + $0x118] sm:$0xf]  ;;  %v9584_v18 = vsel %vm13468_vm6, %v9576_v55, %v9583_v62  ;;  %v10128_v27 = vsel %vm13458_vm5, %v16498_v16, %v10127_v35  ;;  %v10223_v21 = vrot.slane %v10221_v48, 5  ;;  %v9888_v25 = vld [vmem:[#allocation6 + $0x11c] sm:$0x1]  ;;  %v17588_v10 = vadd.f32 %v12590_v20, %v12589_v9  ;;  %v12593_v14 = vpop.f32.mrf.mxu0  ;;  %v12701_v48 = vpop.f32.mrf.mxu1 }
 0x88c   : > { %v13160_v28 = vld [vmem:[#allocation7 + $0x38] ss:$20 sps:$4 sm:$0xff]   ;;  %9177 = vst.msk [vmem:[#allocation7 + $0x1fc] sm:$0xf] %vm7503_vm10, %v9107_v58  ;;  %v13161_v5 = vld [vmem:[#allocation7 + $0x60] ss:$20 sps:$4 sm:$0xff]   ;;  %v10152_v39 = vsel %vm13458_vm5, %v16413_v13, %v10151_v45  ;;  %v10176_v49 = vsel %vm13458_vm5, %v16743_v40, %v10175_v63  ;;  %v10200_v16 = vsel %vm13458_vm5, %v16651_v2, %v10199_v53  ;;  %v10248_v30 = vsel %vm13458_vm5, %v17505_v33, %v10247_v29  ;;  %v9111_v61 = vpop.permute.xlu1 %9110 }
 0x88d   : > { %9648 = vst.msk [vmem:[#allocation7 + $0x278] sm:$0xf] %vm6645_vm9, %v9584_v18  ;;  %10324 = vst.msk [vmem:[#allocation7 + $0x18c] sm:$0xf] %vm6645_vm9, %v10128_v27  ;;  %12920 = vmatmul.mubr.msk.bf16.vlgmr.msra.gmra.mxu0 %vm6435_vm8, %v13160_v28  ;;  %v10224_v13 = vsel %vm13458_vm5, %v17515_v59, %v10223_v21  ;;  %v10252_v2 = vrot.slane %v10250_v44, 4  ;;  %v10253_v40 = vshll.u32 %v9886_v3, 16  ;;  %v17592_v56 = vadd.f32 %v12593_v14, %v12592_v7  ;;  %v12595_v6 = vpop.f32.mrf.mxu0  ;;  %v9766_v52 = vpop.permute.xlu0 %9765 }
 0x88e   : > { %9833 = vst.msk [vmem:[#allocation7 + $0x1ec] sm:$0xf] %vm7503_vm10, %v9762_v26  ;;  %v10259_v41 = vshll.u32 %v9887_v0, 16  ;;  %12923 = vmatprep.mubr.msk.bf16.mxu0 %vm6435_vm8, %v13161_v5  ;;  %v10404_v33 = vld [vmem:[#allocation7 + $0x1c0] sm:$0xff]  ;;  %v10263_v15 = vshrl.u32 %v9887_v0, 16  ;;  %v10269_v34 = vshll.u32 %v9888_v25, 16  ;;  %v12702_v45 = vpop.f32.mrf.mxu1 }
 0x88f   : > { %10326 = vst.msk [vmem:[#allocation7 + $0x1b4] sm:$0xf] %vm6645_vm9, %v10152_v39  ;;  %10328 = vst.msk [vmem:[#allocation7 + $0x1dc] sm:$0xf] %vm6645_vm9, %v10176_v49  ;;  %v10407_v11 = vld [vmem:[#allocation7 + $0x1d4] sm:$0xff]  ;;  %v10255_v23 = vrot.slane %v10253_v40, 5  ;;  %v12596_v37 = vpop.f32.mrf.mxu0  ;;  %v17613_v63 = vadd.f32 %v12702_v45, %v12701_v48 }
 0x890   : > { %10330 = vst.msk [vmem:[#allocation7 + $0x204] sm:$0xf] %vm6645_vm9, %v10200_v16  ;;  %10334 = vst.msk [vmem:[#allocation7 + $0x254] sm:$0xf] %vm6645_vm9, %v10248_v30  ;;  %v13162_v54 = vld [vmem:[#allocation7 + $0x1c4] ss:$20 sps:$4 sm:$0xff]   ;;  %v12325_v60 = vcombine.low %v10404_v33, %v10407_v11  ;;  %v17603_v38 = vadd.f32 %v12596_v37, %v12595_v6  ;;  %v9768_v57 = vpop.permute.xlu1 %9767  ;;  %v12704_v0 = vpop.f32.mrf.mxu1 }
 0x891   : > { %10332 = vst.msk [vmem:[#allocation7 + $0x22c] sm:$0xf] %vm6645_vm9, %v10224_v13  ;;  %v10261_v59 = vrot.slane %v10259_v41, 5  ;;  %v10265_v36 = vrot.slane %v10263_v15, 4  ;;  %11457 = vmatprep.mubr.bf16.mxu1 %v13162_v54  ;;  %v10256_v8 = vor.u32 %v10255_v23, %v10252_v2  ;;  %v10271_v24 = vrot.slane %v10269_v34, 5  ;;  %v12598_v50 = vpop.f32.mrf.mxu0  ;;  %v9113_v42 = vpop.permute.xlu0 %9112 }
 0x892   : > { %9834 = vst.msk [vmem:[#allocation7 + $0x200] sm:$0xf] %vm7503_vm10, %v9764_v19  ;;  %11458 = vmatmul.mubr.bf16.gmra.mxu1 %v12325_v60  ;;  %v13164_v12 = vld [vmem:[#allocation7 + $0x88] ss:$20 sps:$4 sm:$0xff]   ;;  %9178 = vst.msk [vmem:[#allocation7 + $0x210] sm:$0xf] %vm7503_vm10, %v9109_v43  ;;  %v12705_v21 = vpop.f32.mrf.mxu1 }
 0x893   : > { %v10266_v47 = vor.u32 %v10265_v36, %v10261_v59  ;;  %v10257_v22 = vrot.slane %v10256_v8, 4  ;;  %v13165_v1 = vld [vmem:[#allocation7 + $0xb0] ss:$20 sps:$4 sm:$0xff]   ;;  %9179 = vst.msk [vmem:[#allocation7 + $0x224] sm:$0xf] %vm7503_vm10, %v9111_v61  ;;  %v12599_v46 = vpop.f32.mrf.mxu0  ;;  %v17619_v25 = vadd.f32 %v12705_v21, %v12704_v0 }
 0x894   : > { %v13166_v51 = vld [vmem:[#allocation7 + $0x1e8] ss:$20 sps:$4 sm:$0xff]   ;;  %9835 = vst.msk [vmem:[#allocation7 + $0x214] sm:$0xf] %vm7503_vm10, %v9766_v52  ;;  %9836 = vst.msk [vmem:[#allocation7 + $0x228] sm:$0xf] %vm7503_vm10, %v9768_v57  ;;  %v17608_v62 = vadd.f32 %v12599_v46, %v12598_v50  ;;  %v9772_v35 = vpop.permute.xlu1 %9771  ;;  %v12707_v26 = vpop.f32.mrf.mxu1 }
 0x895   : > { %v10267_v32 = vrot.slane %v10266_v47, 4  ;;  %12924 = vmatmul.mubr.msk.bf16.gmra.mxu0 %vm6435_vm8, %v13164_v12  ;;  %v10262_v55 = vsel %vm13458_vm5, %v10257_v22, %v10261_v59  ;;  %v13169_v31 = vld [vmem:[#allocation7 + $0xd8] ss:$20 sps:$4 sm:$0xff]   ;;  %v13170_v4 = vld [vmem:[#allocation7 + $0x100] ss:$20 sps:$4 sm:$0xff]   ;;  %v9770_v44 = vpop.permute.xlu0 %9769  ;;  %v12601_v34 = vpop.f32.mrf.mxu0 }
 0x896   : > { %12927 = vmatprep.mubr.msk.bf16.mxu0 %vm6435_vm8, %v13165_v1  ;;  %10335 = vst.msk [vmem:[#allocation7 + $0x268] sm:$0xf] %vm6645_vm9, %v10262_v55  ;;  %v13174_v58 = vld [vmem:[#allocation7 + $0x128] ss:$20 sps:$4 sm:$0xff]   ;;  %v13175_v27 = vld [vmem:[#allocation7 + $0x150] ss:$20 sps:$4 sm:$0xff]   ;;  %v12708_v49 = vpop.f32.mrf.mxu1 }
 0x897   : > { %v10272_v3 = vsel %vm13458_vm5, %v10267_v32, %v10271_v24  ;;  %9180 = vst.msk [vmem:[#allocation7 + $0x238] sm:$0xf] %vm7503_vm10, %v9113_v42  ;;  %9838 = vst.msk [vmem:[#allocation7 + $0x250] sm:$0xf] %vm7503_vm10, %v9772_v35  ;;  %v12709_v16 = vadd.f32 %v12708_v49, %v12707_v26  ;;  %v13179_v30 = vld [vmem:[#allocation7 + $0x178] ss:$20 sps:$4 sm:$0xff]   ;;  %v12602_v19 = vpop.f32.mrf.mxu0 }
 0x898   : > { %10336 = vst.msk [vmem:[#allocation7 + $0x27c] sm:$0xf] %vm6645_vm9, %v10272_v3  ;;  %v9115_v18 = vpop.permute.xlu1 %9114  ;;  %v13180_v13 = vld [vmem:[#allocation7 + $0x1a0] ss:$20 sps:$4 sm:$0xff]   ;;  %v12710_v2 = vpop.f32.mrf.mxu1  ;;  %v12603_v11 = vadd.f32 %v12602_v19, %v12601_v34  ;;  %v13184_v23 = vld [vmem:[#allocation7 + $0x1c8] ss:$20 sps:$4 sm:$0xff]  }
 0x899   : > { %v13168_v17 = vld [vmem:[#allocation7 + $0x1ec] ss:$20 sps:$4 sm:$0xff]   ;;  %9837 = vst.msk [vmem:[#allocation7 + $0x23c] sm:$0xf] %vm7503_vm10, %v9770_v44  ;;  %v9117_v28 = vpop.permute.xlu0 %9116  ;;  %9181 = vst.msk [vmem:[#allocation7 + $0x24c] sm:$0xf] %vm7503_vm10, %v9115_v18  ;;  %v12604_v54 = vpop.f32.mrf.mxu0 }
 0x89a   : > { %11465 = vmatprep.mubr.bf16.mxu1 %v13168_v17  ;;  %v13171_v53 = vld [vmem:[#allocation7 + $0x210] ss:$20 sps:$4 sm:$0xff]   ;;  %9182 = vst.msk [vmem:[#allocation7 + $0x260] sm:$0xf] %vm7503_vm10, %v9117_v28  ;;  %v12711_v9 = vpop.f32.mrf.mxu1  ;;  %v13186_v7 = vld [vmem:[#allocation7 + $0x240] ss:$20 sps:$4 sm:$0xff]  }
 0x89b   : > { %11466 = vmatmul.mubr.bf16.gmra.mxu1 %v13166_v51  ;;  %v13173_v29 = vld [vmem:[#allocation7 + $0x214] ss:$20 sps:$4 sm:$0xff]   ;;  %v12712_v15 = vadd.f32 %v12711_v9, %v12710_v2  ;;  %v13185_v60 = vld [vmem:[#allocation7 + $0x1f0] ss:$20 sps:$4 sm:$0xff]   ;;  %v12605_v36 = vpop.f32.mrf.mxu0  ;;  %v13187_v22 = vld [vmem:[#allocation7 + $0x218] ss:$20 sps:$4 sm:$0xff]  }
 0x89c   : > { %11473 = vmatprep.mubr.bf16.mxu1 %v13173_v29  ;;  %v9119_v39 = vpop.permute.xlu1 %9118  ;;  %v12606_v8 = vadd.f32 %v12605_v36, %v12604_v54  ;;  %v12713_v55 = vpop.f32.mrf.mxu1  ;;  %vm11897_vm5 = vcmask 7168  }
 0x89d   : > { %12928 = vmatmul.mubr.msk.bf16.gmra.mxu0 %vm6435_vm8, %v13169_v31  ;;  %v9774_v5 = vpop.permute.xlu0 %9773  ;;  %9183 = vst.msk [vmem:[#allocation7 + $0x274] sm:$0xf] %vm7503_vm10, %v9119_v39  ;;  %v12607_v47 = vpop.f32.mrf.mxu0  ;;  %v17634_v31 = vld [vmem:[%s18045_s6] ss:$0 sm:$0xff] }
 0x89e   : > { %12931 = vmatprep.mubr.msk.bf16.mxu0 %vm6435_vm8, %v13170_v4  ;;  %9839 = vst.msk [vmem:[#allocation7 + $0x264] sm:$0xf] %vm7503_vm10, %v9774_v5  ;;  %v12714_v61 = vpop.f32.mrf.mxu1  ;;  %v11219_v4 = vadd.f32 %v17603_v38, %v17634_v31  ;;  %v11211_v48 = vadd.f32 %v17588_v10, %v17634_v31  ;;  %v11222_v45 = vadd.f32 %v17608_v62, %v17634_v31 }
 0x89f   : > { %v12608_v24 = vpop.f32.mrf.mxu0  ;;  %v13188_v1 = vld [vmem:[#allocation7 + $0x268] ss:$20 sps:$4 sm:$0xff]   ;;  %v12715_v6 = vadd.f32 %v12714_v61, %v12713_v55  ;;  %v11227_v62 = vadd.f32 %v12603_v11, %v17634_v31 }
 0x8a0   : > { %v9776_v40 = vpop.permute.xlu1 %9775  ;;  %v13176_v41 = vld [vmem:[#allocation7 + $0x238] ss:$20 sps:$4 sm:$0xff]   ;;  %v13178_v33 = vld [vmem:[#allocation7 + $0x23c] ss:$20 sps:$4 sm:$0xff]   ;;  %v12609_v43 = vadd.f32 %v12608_v24, %v12607_v47  ;;  %v12716_v3 = vpop.f32.mrf.mxu1  ;;  %v17638_v35 = vadd.f32 %v12709_v16, %v11219_v4  ;;  %v17645_v29 = vadd.f32 %v17613_v63, %v11211_v48  ;;  %v17649_v38 = vadd.f32 %v12712_v15, %v11222_v45 }
 0x8a1   : > { %9840 = vst.msk [vmem:[#allocation7 + $0x278] sm:$0xf] %vm7503_vm10, %v9776_v40  ;;  %v12610_v12 = vpop.f32.mrf.mxu0  ;;  %v17659_v49 = vadd.f32 %v12715_v6, %v11227_v62  ;;  %v11230_v16 = vadd.f32 %v12606_v8, %v17634_v31 }
 0x8a2   : > { %v12717_v52 = vpop.f32.mrf.mxu1  ;;  %v11235_v18 = vadd.f32 %v12609_v43, %v17634_v31 }
 0x8a3   : > { %11474 = vmatmul.mubr.bf16.gmra.mxu1 %v13171_v53  ;;  %v12611_v14 = vpop.f32.mrf.mxu0  ;;  %v12718_v51 = vadd.f32 %v12717_v52, %v12716_v3 }
 0x8a4   : > { %11481 = vmatprep.mubr.bf16.mxu1 %v13178_v33  ;;  %v13181_v20 = vld [vmem:[#allocation7 + $0x260] ss:$20 sps:$4 sm:$0xff]   ;;  %v12612_v32 = vadd.f32 %v12611_v14, %v12610_v12  ;;  %v12719_v17 = vpop.f32.mrf.mxu1 }
 0x8a5   : > { %12932 = vmatmul.mubr.msk.bf16.gmra.mxu0 %vm6435_vm8, %v13174_v58  ;;  %v11214_v58 = vadd.f32 %v17592_v56, %v17634_v31  ;;  %v17664_v40 = vadd.f32 %v12718_v51, %v11230_v16 }
 0x8a6   : > { %12935 = vmatprep.mubr.msk.bf16.mxu0 %vm6435_vm8, %v13175_v27  ;;  %v12720_v37 = vpop.f32.mrf.mxu1  ;;  %v11238_v63 = vadd.f32 %v12612_v32, %v17634_v31 }
 0x8a7   : > { %v12721_v57 = vadd.f32 %v12720_v37, %v12719_v17  ;;  %v12613_v44 = vpop.f32.mrf.mxu0  ;;  %v17653_v10 = vadd.f32 %v17619_v25, %v11214_v58 }
 0x8a8   : > { %v13183_v59 = vld [vmem:[#allocation7 + $0x264] ss:$20 sps:$4 sm:$0xff]   ;;  %v12722_v50 = vpop.f32.mrf.mxu1 }
 0x8a9   : > { %v12614_v53 = vpop.f32.mrf.mxu0  ;;  %v17656_v5 = vadd.f32 %v12721_v57, %v11235_v18 }
 0x8aa   : > { %v12723_v42 = vpop.f32.mrf.mxu1  ;;  %v12615_v0 = vadd.f32 %v12614_v53, %v12613_v44 }
 0x8ab   : > { %11482 = vmatmul.mubr.bf16.gmra.mxu1 %v13176_v41  ;;  %v12724_v46 = vadd.f32 %v12723_v42, %v12722_v50  ;;  %v12616_v28 = vpop.f32.mrf.mxu0 }
 0x8ac   : > { %11489 = vmatprep.mubr.bf16.mxu1 %v13183_v59  ;;  %v11243_v9 = vadd.f32 %v12615_v0, %v17634_v31 }
 0x8ad   : > { %12936 = vmatmul.mubr.msk.bf16.gmra.mxu0 %vm6435_vm8, %v13179_v30  ;;  %v12617_v27 = vpop.f32.mrf.mxu0 }
 0x8ae   : > { %12939 = vmatprep.mubr.msk.bf16.mxu0 %vm6435_vm8, %v13180_v13  ;;  %v12618_v21 = vadd.f32 %v12617_v27, %v12616_v28  ;;  %v17662_v13 = vadd.f32 %v12724_v46, %v11238_v63 }
 0x8af   : > { %v12619_v26 = vpop.f32.mrf.mxu0 }
 0x8b0   : > { %v11246_v54 = vadd.f32 %v12618_v21, %v17634_v31 }
 0x8b1   : > { %v12620_v39 = vpop.f32.mrf.mxu0 }
 0x8b2   : > { %v12621_v56 = vadd.f32 %v12620_v39, %v12619_v26 }
 0x8b3   : > { %11490 = vmatmul.mubr.bf16.gmra.mxu1 %v13181_v20  ;;  %v12622_v30 = vpop.f32.mrf.mxu0 }
 0x8b4   : > { %12947 = vmatprep.mubr.msk.bf16.mxu1 %vm6435_vm8, %v13186_v7  ;;  %v11251_v36 = vadd.f32 %v12621_v56, %v17634_v31 }
 0x8b5   : > { %12940 = vmatmul.mubr.msk.bf16.gmra.mxu0 %vm6435_vm8, %v13184_v23  ;;  %v12623_v2 = vpop.f32.mrf.mxu0 }
 0x8b6   : > { %12943 = vmatprep.mubr.msk.bf16.mxu0 %vm6435_vm8, %v13185_v60  ;;  %v12624_v41 = vadd.f32 %v12623_v2, %v12622_v30 }
 0x8b8   : > { %v11254_v43 = vadd.f32 %v12624_v41, %v17634_v31 }
 0x8b9   : > { %v12725_v25 = vpop.f32.mrf.mxu1 }
 0x8bb   : > { %12948 = vmatmul.mubr.msk.bf16.vlgmr.msra.gmra.mxu1 %vm6435_vm8, %v13188_v1  ;;  %v12726_v33 = vpop.f32.mrf.mxu1 }
 0x8bc   : > { %v12727_v15 = vadd.f32 %v12726_v33, %v12725_v25 }
 0x8bd   : > { %12944 = vmatmul.mubr.msk.bf16.gmra.mxu0 %vm6435_vm8, %v13187_v22  ;;  %v12728_v34 = vpop.f32.mrf.mxu1 }
 0x8be   : > { %v17667_v19 = vadd.f32 %v12727_v15, %v11243_v9 }
 0x8bf   : > { %v12729_v11 = vpop.f32.mrf.mxu1 }
 0x8c0   : > { %v12730_v23 = vadd.f32 %v12729_v11, %v12728_v34 }
 0x8c2   : > { %v17670_v20 = vadd.f32 %v12730_v23, %v11246_v54 }
 0x8c4   : > { %v12731_v60 = vpop.f32.mrf.mxu1 }
 0x8c6   : > { %v12732_v59 = vpop.f32.mrf.mxu1 }
 0x8c7   : > { %v12733_v8 = vadd.f32 %v12732_v59, %v12731_v60 }
 0x8c8   : > { %v12734_v7 = vpop.f32.mrf.mxu1 }
 0x8c9   : > { %v17673_v47 = vadd.f32 %v12733_v8, %v11251_v36 }
 0x8ca   : > { %v12735_v24 = vpop.f32.mrf.mxu1 }
 0x8cb   : > { %v12736_v12 = vadd.f32 %v12735_v24, %v12734_v7 }
 0x8cd   : > { %v17676_v1 = vadd.f32 %v12736_v12, %v11254_v43 }
 0x8cf   : > { %v12625_v22 = vpop.f32.mrf.mxu0 }
 0x8d1   : > { %v12626_v14 = vpop.f32.mrf.mxu0 }
 0x8d2   : > { %v12627_v32 = vadd.f32 %v12626_v14, %v12625_v22 }
 0x8d3   : > { %v12628_v55 = vpop.f32.mrf.mxu0 }
 0x8d4   : > { %v11259_v57 = vadd.f32 %v12627_v32, %v17634_v31 }
 0x8d5   : > { %v12629_v61 = vpop.f32.mrf.mxu0 }
 0x8d6   : > { %v12630_v6 = vadd.f32 %v12629_v61, %v12628_v55 }
 0x8d7   : > { %v12631_v3 = vpop.f32.mrf.mxu0 }
 0x8d8   : > { %v11262_v53 = vadd.f32 %v12630_v6, %v17634_v31 }
 0x8d9   : > { %v12632_v51 = vpop.f32.mrf.mxu0 }
 0x8da   : > { %v12633_v17 = vadd.f32 %v12632_v51, %v12631_v3 }
 0x8db   : > { %v12634_v50 = vpop.f32.mrf.mxu0 }
 0x8dc   : > { %v11267_v27 = vadd.f32 %v12633_v17, %v17634_v31 }
 0x8dd   : > { %v12737_v52 = vpop.f32.mrf.mxu1  ;;  %v12635_v46 = vpop.f32.mrf.mxu0 }
 0x8de   : > { %v12636_v44 = vadd.f32 %v12635_v46, %v12634_v50 }
 0x8df   : > { %v12738_v37 = vpop.f32.mrf.mxu1 }
 0x8e0   : > { %v12739_v42 = vadd.f32 %v12738_v37, %v12737_v52  ;;  %v11270_v39 = vadd.f32 %v12636_v44, %v17634_v31 }
 0x8e1   : > { %v12740_v4 = vpop.f32.mrf.mxu1 }
 0x8e2   : > { %v17679_v48 = vadd.f32 %v12739_v42, %v11259_v57 }
 0x8e3   : > { %v12741_v45 = vpop.f32.mrf.mxu1 }
 0x8e4   : > { %v12742_v0 = vadd.f32 %v12741_v45, %v12740_v4 }
 0x8e6   : > { %v17682_v58 = vadd.f32 %v12742_v0, %v11262_v53 }
 0x8e9   : > { %v12743_v28 = vpop.f32.mrf.mxu1 }
 0x8eb   : > { %v12744_v18 = vpop.f32.mrf.mxu1 }
 0x8ec   : > { %v12745_v21 = vadd.f32 %v12744_v18, %v12743_v28 }
 0x8ed   : > { %v12746_v62 = vpop.f32.mrf.mxu1 }
 0x8ee   : > { %v17685_v26 = vadd.f32 %v12745_v21, %v11267_v27 }
 0x8ef   : > { %v12747_v63 = vpop.f32.mrf.mxu1 }
 0x8f0   : > { %v12748_v56 = vadd.f32 %v12747_v63, %v12746_v62 }
 0x8f2   : > { %v17688_v16 = vadd.f32 %v12748_v56, %v11270_v39 }
 0x8f8   : > { %v12637_v30 = vpop.f32.mrf.mxu0 }
 0x8fa   : > { %v12638_v2 = vpop.f32.mrf.mxu0 }
 0x8fb   : > { %v12639_v25 = vadd.f32 %v12638_v2, %v12637_v30 }
 0x8fc   : > { %v12640_v41 = vpop.f32.mrf.mxu0 }
 0x8fd   : > { %v11275_v52 = vadd.f32 %v12639_v25, %v17634_v31 }
 0x8fe   : > { %v12641_v33 = vpop.f32.mrf.mxu0 }
 0x8ff   : > { %v12642_v9 = vadd.f32 %v12641_v33, %v12640_v41 }
 0x900   : > { %v12643_v15 = vpop.f32.mrf.mxu0 }
 0x901   : > { %v11278_v46 = vadd.f32 %v12642_v9, %v17634_v31 }
 0x902   : > { %v12644_v34 = vpop.f32.mrf.mxu0 }
 0x903   : > { %v12645_v11 = vadd.f32 %v12644_v34, %v12643_v15 }
 0x904   : > { %v12646_v54 = vpop.f32.mrf.mxu0 }
 0x905   : > { %v11283_v33 = vadd.f32 %v12645_v11, %v17634_v31 }
 0x906   : > { %v12647_v23 = vpop.f32.mrf.mxu0 }
 0x907   : > { %v12648_v60 = vadd.f32 %v12647_v23, %v12646_v54 }
 0x90a   : > { %v12649_v59 = vpop.f32.mrf.mxu0 }
 0x90c   : > { %v12650_v36 = vpop.f32.mrf.mxu0 }
 0x90d   : > { %v12651_v8 = vadd.f32 %v12650_v36, %v12649_v59  ;;  %v11286_v36 = vadd.f32 %v12648_v60, %v17634_v31 }
 0x90e   : > { %v12652_v7 = vpop.f32.mrf.mxu0 }
 0x90f   : > { %v11291_v11 = vadd.f32 %v12651_v8, %v17634_v31 }
 0x910   : > { %v12653_v24 = vpop.f32.mrf.mxu0 }
 0x911   : > { %v12654_v43 = vadd.f32 %v12653_v24, %v12652_v7 }
 0x912   : > { %v12655_v12 = vpop.f32.mrf.mxu0 }
 0x914   : > { %v12656_v22 = vpop.f32.mrf.mxu0 }
 0x915   : > { %v17690_v14 = vadd.f32 %v12656_v22, %v12655_v12 }
 0x916   : > { %v12658_v32 = vpop.f32.mrf.mxu0 }
 0x918   : > { %v12659_v61 = vpop.f32.mrf.mxu0 }
 0x919   : > { %v17692_v6 = vadd.f32 %v12659_v61, %v12658_v32 }
 0x91e   : > { %v12749_v55 = vpop.f32.mrf.mxu1 }
 0x91f   : > { %v12661_v51 = vpop.f32.mrf.mxu0 }
 0x920   : > { %v12750_v3 = vpop.f32.mrf.mxu1 }
 0x921   : > { %v12751_v17 = vadd.f32 %v12750_v3, %v12749_v55  ;;  %v12662_v57 = vpop.f32.mrf.mxu0 }
 0x922   : > { %v12752_v37 = vpop.f32.mrf.mxu1  ;;  %v17697_v42 = vadd.f32 %v12662_v57, %v12661_v51 }
 0x923   : > { %v17695_v50 = vadd.f32 %v12751_v17, %v11275_v52  ;;  %v12664_v44 = vpop.f32.mrf.mxu0 }
 0x924   : > { %v12753_v4 = vpop.f32.mrf.mxu1 }
 0x925   : > { %v12754_v45 = vadd.f32 %v12753_v4, %v12752_v37  ;;  %v12665_v53 = vpop.f32.mrf.mxu0 }
 0x926   : > { %v17702_v28 = vadd.f32 %v12665_v53, %v12664_v44  ;;  %v17734_v44 = vld [vmem:[%s18046_s7] ss:$0 sm:$0xff] }
 0x927   : > { %v17700_v0 = vadd.f32 %v12754_v45, %v11278_v46  ;;  %v11294_v46 = vadd.f32 %v12654_v43, %v17634_v31 }
 0x92a   : > { %v12667_v18 = vpop.f32.mrf.mxu0 }
 0x92c   : > { %v12668_v27 = vpop.f32.mrf.mxu0 }
 0x92d   : > { %v17704_v21 = vadd.f32 %v12668_v27, %v12667_v18 }
 0x92e   : > { %v12670_v62 = vpop.f32.mrf.mxu0 }
 0x930   : > { %v12671_v63 = vpop.f32.mrf.mxu0 }
 0x931   : > { %v17706_v39 = vadd.f32 %v12671_v63, %v12670_v62 }
 0x932   : > { %v17708_v56 = vpop.f32.mrf.mxu0 }
 0x934   : > { %v17710_v30 = vpop.f32.mrf.mxu0 }
 0x936   : > { %v17712_v25 = vpop.f32.mrf.mxu0 }
 0x938   : > { %v17715_v15 = vpop.f32.mrf.mxu0 }
 0x93a   : > { %v12755_v2 = vpop.f32.mrf.mxu1 }
 0x93c   : > { %v12756_v41 = vpop.f32.mrf.mxu1 }
 0x93d   : > { %v12757_v9 = vadd.f32 %v12756_v41, %v12755_v2  ;;  %v12679_v23 = vpop.f32.mrf.mxu0 }
 0x93e   : > { %v12758_v34 = vpop.f32.mrf.mxu1 }
 0x93f   : > { %v17717_v54 = vadd.f32 %v12757_v9, %v11283_v33  ;;  %v12680_v24 = vpop.f32.mrf.mxu0 }
 0x940   : > { %v12759_v59 = vpop.f32.mrf.mxu1  ;;  %v17720_v12 = vadd.f32 %v12680_v24, %v12679_v23 }
 0x941   : > { %v12760_v7 = vadd.f32 %v12759_v59, %v12758_v34  ;;  %v12682_v55 = vpop.f32.mrf.mxu0 }
 0x943   : > { %v17722_v32 = vadd.f32 %v12760_v7, %v11286_v36  ;;  %v12683_v3 = vpop.f32.mrf.mxu0 }
 0x944   : > { %v17725_v51 = vadd.f32 %v12683_v3, %v12682_v55  ;;  %v11302_v3 = vadd.f32 %v17692_v6, %v17634_v31  ;;  %v11307_v6 = vadd.f32 %v17697_v42, %v17634_v31  ;;  %v11310_v42 = vadd.f32 %v17702_v28, %v17634_v31 }
 0x948   : > { %v12761_v22 = vpop.f32.mrf.mxu1 }
 0x94a   : > { %v12762_v61 = vpop.f32.mrf.mxu1 }
 0x94b   : > { %v12763_v52 = vadd.f32 %v12762_v61, %v12761_v22 }
 0x94c   : > { %v12764_v17 = vpop.f32.mrf.mxu1 }
 0x94d   : > { %v12921_v37 = vpop.f32.mrf.mxu0  ;;  %v17727_v57 = vadd.f32 %v12763_v52, %v11291_v11 }
 0x94e   : > { %v11541_v60 = vadd.f32 %v12921_v37, %v17638_v35  ;;  %v12765_v4 = vpop.f32.mrf.mxu1 }
 0x94f   : > { %v11532_v45 = vpop.f32.mrf.mxu0  ;;  %v12766_v8 = vadd.f32 %v12765_v4, %v12764_v17 }
 0x950   : > { %v11661_v53 = vmax.f32 %v11541_v60, 0.0  ;;  %v11533_v18 = vadd.f32 %v11532_v45, %v17645_v29  ;;  %v11299_v29 = vadd.f32 %v17690_v14, %v17634_v31 }
 0x951   : > { %v12922_v27 = vpop.f32.mrf.mxu0  ;;  %v17737_v62 = vadd.f32 %v12766_v8, %v11294_v46 }
 0x952   : > { %v11700_v63 = vmul.f32 %v17734_v44, %v11661_v53  ;;  %v11659_v2 = vmax.f32 %v11533_v18, 0.0  ;;  %v11544_v35 = vadd.f32 %v12922_v27, %v17649_v38  ;;  %v12767_v41 = vpop.f32.mrf.mxu1 }
 0x953   : > { %v17741_v43 = vpop.f32.mrf.mxu0 }
 0x954   : > { %v11698_v33 = vmul.f32 %v17734_v44, %v11659_v2  ;;  %v11662_v9 = vmax.f32 %v11544_v35, 0.0  ;;  %v11736_v34 = vsel %vm6168_vm4, %v11700_v63, 0.0  ;;  %v12768_v23 = vpop.f32.mrf.mxu1 }
 0x955   : > { %11737 = vadd.xlane.f32.xlu0 %v11736_v34  ;;  %v17747_v59 = vpop.f32.mrf.mxu0  ;;  %v12769_v36 = vadd.f32 %v12768_v23, %v12767_v41 }
 0x956   : > { %v12770_v7 = vpop.f32.mrf.mxu1  ;;  %v11701_v38 = vmul.f32 %v17734_v44, %v11662_v9  ;;  %v11730_v61 = vsel %vm6168_vm4, %v11698_v33, 0.0 }
 0x957   : > { %v11548_v24 = vpop.f32.mrf.mxu0  ;;  %v17749_v22 = vadd.f32 %v12769_v36, %v11299_v29 }
 0x958   : > { %v11549_v55 = vadd.f32 %v11548_v24, %v17659_v49  ;;  %v12771_v11 = vpop.f32.mrf.mxu1  ;;  %v11739_v45 = vsel %vm6168_vm4, %v11701_v38, 0.0 }
 0x959   : > { %v17756_v52 = vpop.f32.mrf.mxu0  ;;  %11731 = vadd.xlane.f32.xlu0 %v11730_v61  ;;  %v12772_v14 = vadd.f32 %v12771_v11, %v12770_v7 }
 0x95a   : > { %v11663_v17 = vmax.f32 %v11549_v55, 0.0 }
 0x95b   : > { %v12773_v37 = vpop.f32.mrf.mxu1  ;;  %v11551_v60 = vpop.f32.mrf.mxu0  ;;  %v17758_v4 = vadd.f32 %v12772_v14, %v11302_v3 }
 0x95c   : > { %v17761_v46 = vmul.f32 %v17734_v44, %v11663_v17  ;;  %v11552_v49 = vadd.f32 %v11551_v60, %v17664_v40 }
 0x95d   : > { %v12774_v8 = vpop.f32.mrf.mxu1  ;;  %v12929_v53 = vpop.f32.mrf.mxu0  ;;  %11740 = vadd.xlane.f32.xlu0 %v11739_v45 }
 0x95e   : > { %v12775_v18 = vadd.f32 %v12774_v8, %v12773_v37  ;;  %v11664_v27 = vmax.f32 %v11552_v49, 0.0  ;;  %v11573_v63 = vadd.f32 %v12929_v53, %v17673_v47 }
 0x95f   : > { %v12776_v2 = vpop.f32.mrf.mxu1  ;;  %v11564_v35 = vpop.f32.mrf.mxu0 }
 0x960   : > { %v17768_v41 = vadd.f32 %v12775_v18, %v11307_v6  ;;  %v17771_v33 = vmul.f32 %v17734_v44, %v11664_v27  ;;  %v11669_v40 = vmax.f32 %v11573_v63, 0.0  ;;  %v11565_v9 = vadd.f32 %v11564_v35, %v17667_v19 }
 0x961   : > { %v12777_v34 = vpop.f32.mrf.mxu1  ;;  %v12930_v23 = vpop.f32.mrf.mxu0 }
 0x962   : > { %v12778_v29 = vadd.f32 %v12777_v34, %v12776_v2  ;;  %v17777_v36 = vmul.f32 %v17734_v44, %v11669_v40  ;;  %v11667_v47 = vmax.f32 %v11565_v9, 0.0  ;;  %v11576_v7 = vadd.f32 %v12930_v23, %v17676_v1 }
 0x963   : > { %v11567_v24 = vpop.f32.mrf.mxu0  ;;  %v12779_v11 = vpop.f32.mrf.mxu1  ;;  %v11315_v1 = vadd.f32 %v17704_v21, %v17634_v31  ;;  %v11318_v21 = vadd.f32 %v17706_v39, %v17634_v31 }
 0x964   : > { %v17780_v38 = vadd.f32 %v12778_v29, %v11310_v42  ;;  %v17783_v55 = vmul.f32 %v17734_v44, %v11667_v47  ;;  %v11670_v61 = vmax.f32 %v11576_v7, 0.0  ;;  %v11568_v19 = vadd.f32 %v11567_v24, %v17670_v20 }
 0x965   : > { %v12933_v3 = vpop.f32.mrf.mxu0  ;;  %v12780_v37 = vpop.f32.mrf.mxu1 }
 0x966   : > { %v17787_v28 = vmul.f32 %v17734_v44, %v11670_v61  ;;  %v11668_v14 = vmax.f32 %v11568_v19, 0.0  ;;  %v11589_v17 = vadd.f32 %v12933_v3, %v17685_v26  ;;  %v12781_v8 = vadd.f32 %v12780_v37, %v12779_v11 }
 0x967   : > { %v11580_v60 = vpop.f32.mrf.mxu0  ;;  %v12782_v6 = vpop.f32.mrf.mxu1 }
 0x968   : > { %v17793_v49 = vmul.f32 %v17734_v44, %v11668_v14  ;;  %v11673_v45 = vmax.f32 %v11589_v17, 0.0  ;;  %v11581_v20 = vadd.f32 %v11580_v60, %v17679_v48  ;;  %v11476_v63 = vadd.f32 %v12781_v8, %v11315_v1 }
 0x969   : > { %v12934_v53 = vpop.f32.mrf.mxu0  ;;  %v12783_v2 = vpop.f32.mrf.mxu1 }
 0x96a   : > { %v17797_v18 = vmul.f32 %v17734_v44, %v11673_v45  ;;  %v11671_v27 = vmax.f32 %v11581_v20, 0.0  ;;  %v11592_v26 = vadd.f32 %v12934_v53, %v17688_v16  ;;  %v12784_v34 = vadd.f32 %v12783_v2, %v12782_v6 }
 0x96b   : > { %v11583_v35 = vpop.f32.mrf.mxu0  ;;  %v12785_v7 = vpop.f32.mrf.mxu1 }
 0x96c   : > { %v17803_v40 = vmul.f32 %v17734_v44, %v11671_v27  ;;  %v11674_v9 = vmax.f32 %v11592_v26, 0.0  ;;  %v11584_v48 = vadd.f32 %v11583_v35, %v17682_v58  ;;  %v17810_v47 = vadd.f32 %v12784_v34, %v11318_v21 }
 0x96d   : > { %v12937_v42 = vpop.f32.mrf.mxu0  ;;  %v12786_v11 = vpop.f32.mrf.mxu1  ;;  %v12675_v35 = vadd.f32 %v17710_v30, %v17708_v56 }
 0x96e   : > { %v17807_v23 = vmul.f32 %v17734_v44, %v11674_v9  ;;  %v11672_v29 = vmax.f32 %v11584_v48, 0.0  ;;  %v11605_v16 = vadd.f32 %v12937_v42, %v17717_v54 }
 0x96f   : > { %v11596_v39 = vpop.f32.mrf.mxu0  ;;  %v12788_v1 = vpop.f32.mrf.mxu1  ;;  %v11323_v30 = vadd.f32 %v12675_v35, %v17634_v31 }
 0x970   : > { %v17813_v24 = vmul.f32 %v17734_v44, %v11672_v29  ;;  %v11677_v61 = vmax.f32 %v11605_v16, 0.0  ;;  %v11597_v19 = vadd.f32 %v11596_v39, %v17695_v50  ;;  %v11331_v29 = vadd.f32 %v17720_v12, %v17634_v31 }
 0x971   : > { %v12938_v3 = vpop.f32.mrf.mxu0  ;;  %v12789_v8 = vpop.f32.mrf.mxu1  ;;  %v12787_v16 = vadd.f32 %v12786_v11, %v12785_v7 }
 0x972   : > { %v17817_v58 = vmul.f32 %v17734_v44, %v11677_v61  ;;  %v11675_v14 = vmax.f32 %v11597_v19, 0.0  ;;  %v11608_v17 = vadd.f32 %v12938_v3, %v17722_v32  ;;  %v12678_v3 = vadd.f32 %v17715_v15, %v17712_v25 }
 0x973   : > { %v11599_v54 = vpop.f32.mrf.mxu0  ;;  %v12791_v27 = vpop.f32.mrf.mxu1 }
 0x974   : > { %v17821_v37 = vmul.f32 %v17734_v44, %v11675_v14  ;;  %v11678_v60 = vmax.f32 %v11608_v17, 0.0  ;;  %v11600_v45 = vadd.f32 %v11599_v54, %v17700_v0 }
 0x975   : > { %v12941_v20 = vpop.f32.mrf.mxu0  ;;  %v12792_v0 = vpop.f32.mrf.mxu1 }
 0x976   : > { %v17825_v50 = vmul.f32 %v17734_v44, %v11678_v60  ;;  %v11676_v6 = vmax.f32 %v11600_v45, 0.0  ;;  %v11621_v53 = vadd.f32 %v12941_v20, %v17749_v22  ;;  %v12793_v48 = vadd.f32 %v12792_v0, %v12791_v27 }
 0x977   : > { %v11612_v26 = vpop.f32.mrf.mxu0  ;;  %v12794_v39 = vpop.f32.mrf.mxu1  ;;  %v12790_v45 = vadd.f32 %v12789_v8, %v12788_v1  ;;  %v11326_v27 = vadd.f32 %v12678_v3, %v17634_v31  ;;  %v11557_v0 = vadd.f32 %v17747_v59, %v17656_v5 }
 0x978   : > { %v17829_v32 = vmul.f32 %v17734_v44, %v11676_v6  ;;  %v11681_v21 = vmax.f32 %v11621_v53, 0.0  ;;  %v11613_v2 = vadd.f32 %v11612_v26, %v17727_v57  ;;  %v11492_v12 = vadd.f32 %v12793_v48, %v11331_v29 }
 0x979   : > { %v12942_v9 = vpop.f32.mrf.mxu0  ;;  %v12795_v14 = vpop.f32.mrf.mxu1  ;;  %v11484_v53 = vadd.f32 %v12787_v16, %v11323_v30 }
 0x97a   : > { %v17835_v34 = vmul.f32 %v17734_v44, %v11681_v21  ;;  %v11679_v42 = vmax.f32 %v11613_v2, 0.0  ;;  %v11624_v22 = vadd.f32 %v12942_v9, %v17758_v4  ;;  %v11536_v4 = vadd.f32 %v17741_v43, %v17653_v10 }
 0x97b   : > { %v11615_v61 = vpop.f32.mrf.mxu0  ;;  %v12796_v11 = vadd.f32 %v12795_v14, %v12794_v39  ;;  %v12949_v20 = vpop.f32.mrf.mxu1  ;;  %v11560_v9 = vadd.f32 %v17756_v52, %v17662_v13 }
 0x97c   : > { %v17841_v57 = vmul.f32 %v17734_v44, %v11679_v42  ;;  %v11682_v19 = vmax.f32 %v11624_v22, 0.0  ;;  %v11616_v56 = vadd.f32 %v11615_v61, %v17737_v62  ;;  %v11334_v62 = vadd.f32 %v17725_v51, %v17634_v31 }
 0x97d   : > { %v12945_v17 = vpop.f32.mrf.mxu0  ;;  %v11653_v15 = vadd.f32 %v12949_v20, %v11492_v12  ;;  %v11660_v26 = vmax.f32 %v11536_v4, 0.0  ;;  %v11644_v21 = vpop.f32.mrf.mxu1  ;;  %v11487_v42 = vadd.f32 %v12790_v45, %v11326_v27  ;;  %v11666_v4 = vmax.f32 %v11560_v9, 0.0 }
 0x97e   : > { %v17850_v7 = vmul.f32 %v17734_v44, %v11682_v19  ;;  %v11680_v54 = vmax.f32 %v11616_v56, 0.0  ;;  %v11637_v60 = vadd.f32 %v12945_v17, %v11476_v63  ;;  %v11495_v63 = vadd.f32 %v12796_v11, %v11334_v62 }
 0x97f   : > { %v11628_v6 = vpop.f32.mrf.mxu0  ;;  %v11689_v51 = vmax.f32 %v11653_v15, 0.0  ;;  %v11645_v8 = vadd.f32 %v11644_v21, %v11484_v53  ;;  %v12950_v48 = vpop.f32.mrf.mxu1  ;;  %v11665_v56 = vmax.f32 %v11557_v0, 0.0  ;;  %v11742_v53 = vsel %vm6168_vm4, %v17761_v46, 0.0 }
 0x980   : > { %v17855_v25 = vmul.f32 %v17734_v44, %v11680_v54  ;;  %v11685_v10 = vmax.f32 %v11637_v60, 0.0  ;;  %v11629_v43 = vadd.f32 %v11628_v6, %v17768_v41  ;;  %v11656_v39 = vadd.f32 %v12950_v48, %v11495_v63 }
 0x981   : > { %v12946_v2 = vpop.f32.mrf.mxu0  ;;  %v17868_v22 = vmul.f32 %v17734_v44, %v11689_v51  ;;  %v11687_v16 = vmax.f32 %v11645_v8, 0.0  ;;  %v11647_v5 = vpop.f32.mrf.mxu1  ;;  %v11704_v54 = vmul.f32 %v17734_v44, %v11665_v56  ;;  %v11705_v60 = vmul.f32 %v17734_v44, %v11666_v4 }
 0x982   : > { %v17860_v35 = vmul.f32 %v17734_v44, %v11685_v10  ;;  %v11683_v1 = vmax.f32 %v11629_v43, 0.0  ;;  %v11640_v41 = vadd.f32 %v12946_v2, %v17810_v47  ;;  %v11690_v13 = vmax.f32 %v11656_v39, 0.0 }
 0x983   : > { %v11631_v31 = vpop.f32.mrf.mxu0  ;;  %v11726_v59 = vmul.f32 %v17734_v44, %v11687_v16  ;;  %v11648_v52 = vadd.f32 %v11647_v5, %v11487_v42  ;;  %v11699_v47 = vmul.f32 %v17734_v44, %v11660_v26  ;;  %v11748_v20 = vsel %vm6168_vm4, %v11704_v54, 0.0  ;;  %v17932_v26 = vld [vmem:[#allocation8] ss:$0 sm:$0xff] }
 0x984   : > { %v17871_v29 = vmul.f32 %v17734_v44, %v11683_v1  ;;  %v11686_v61 = vmax.f32 %v11640_v41, 0.0  ;;  %v11632_v19 = vadd.f32 %v11631_v31, %v17780_v38  ;;  %v11729_v14 = vmul.f32 %v17734_v44, %v11690_v13 }
 0x985   : > { %v11688_v17 = vmax.f32 %v11648_v52, 0.0  ;;  %v11814_v12 = vsel %vm6168_vm4, %v11726_v59, 0.0  ;;  %v11733_v62 = vsel %vm6168_vm4, %v11699_v47, 0.0  ;;  %v11751_v6 = vsel %vm6168_vm4, %v11705_v60, 0.0 }
 0x986   : > { %v11725_v30 = vmul.f32 %v17734_v44, %v11686_v61  ;;  %v11684_v3 = vmax.f32 %v11632_v19, 0.0  ;;  %11815 = vadd.xlane.f32.xlu1 %v11814_v12  ;;  %v11745_v10 = vsel %vm6168_vm4, %v17771_v33, 0.0  ;;  %v11763_v15 = vsel %vm6168_vm4, %v17787_v28, 0.0 }
 0x987   : > { %v11727_v38 = vmul.f32 %v17734_v44, %v11688_v17  ;;  %v11754_v43 = vsel %vm6168_vm4, %v17783_v55, 0.0  ;;  %v11757_v27 = vsel %vm6168_vm4, %v17793_v49, 0.0  ;;  %v11772_v46 = vsel %vm6168_vm4, %v17797_v18, 0.0 }
 0x988   : > { %v11723_v11 = vmul.f32 %v17734_v44, %v11684_v3  ;;  %v11760_v44 = vsel %vm6168_vm4, %v17777_v36, 0.0  ;;  %v11775_v33 = vsel %vm6168_vm4, %v17807_v23, 0.0  ;;  %v11766_v36 = vsel %vm6168_vm4, %v17803_v40, 0.0 }
 0x989   : > { %v11817_v45 = vsel %vm6168_vm4, %v11727_v38, 0.0  ;;  %v11769_v28 = vsel %vm6168_vm4, %v17813_v24, 0.0  ;;  %v11784_v55 = vsel %vm6168_vm4, %v17817_v58, 0.0  ;;  %v11787_v49 = vsel %vm6168_vm4, %v17825_v50, 0.0 }
 0x98a   : > { %11734 = vadd.xlane.f32.xlu1 %v11733_v62  ;;  %11818 = vadd.xlane.f32.xlu0 %v11817_v45  ;;  %v11778_v18 = vsel %vm6168_vm4, %v17821_v37, 0.0  ;;  %v11781_v23 = vsel %vm6168_vm4, %v17829_v32, 0.0  ;;  %v11796_v40 = vsel %vm6168_vm4, %v17835_v34, 0.0  ;;  %v11799_v24 = vsel %vm6168_vm4, %v17850_v7, 0.0 }
 0x98b   : > { %v11790_v58 = vsel %vm6168_vm4, %v17841_v57, 0.0  ;;  %v11793_v50 = vsel %vm6168_vm4, %v17855_v25, 0.0  ;;  %v11808_v37 = vsel %vm6168_vm4, %v17860_v35, 0.0  ;;  %v11811_v32 = vsel %vm6168_vm4, %v11725_v30, 0.0 }
 0x98c   : > { %v11802_v34 = vsel %vm6168_vm4, %v17871_v29, 0.0  ;;  %v11805_v7 = vsel %vm6168_vm4, %v11723_v11, 0.0  ;;  %v11823_v57 = vsel %vm6168_vm4, %v11729_v14, 0.0  ;;  %v11820_v25 = vsel %vm6168_vm4, %v17868_v22, 0.0 }
 0x98e   : > { %11749 = vadd.xlane.f32.xlu1 %v11748_v20  ;;  %11752 = vadd.xlane.f32.xlu0 %v11751_v6 }
 0x992   : > { %11743 = vadd.xlane.f32.xlu1 %v11742_v53  ;;  %11746 = vadd.xlane.f32.xlu0 %v11745_v10 }
 0x996   : > { %11761 = vadd.xlane.f32.xlu1 %v11760_v44  ;;  %11764 = vadd.xlane.f32.xlu0 %v11763_v15 }
 0x99a   : > { %11755 = vadd.xlane.f32.xlu1 %v11754_v43  ;;  %11758 = vadd.xlane.f32.xlu0 %v11757_v27 }
 0x99e   : > { %11773 = vadd.xlane.f32.xlu1 %v11772_v46  ;;  %11776 = vadd.xlane.f32.xlu0 %v11775_v33 }
 0x9a2   : > { %11767 = vadd.xlane.f32.xlu1 %v11766_v36  ;;  %11770 = vadd.xlane.f32.xlu0 %v11769_v28 }
 0x9a6   : > { %11785 = vadd.xlane.f32.xlu1 %v11784_v55  ;;  %11788 = vadd.xlane.f32.xlu0 %v11787_v49 }
 0x9aa   : > { %11779 = vadd.xlane.f32.xlu1 %v11778_v18  ;;  %11782 = vadd.xlane.f32.xlu0 %v11781_v23 }
 0x9ae   : > { %11797 = vadd.xlane.f32.xlu1 %v11796_v40  ;;  %11800 = vadd.xlane.f32.xlu0 %v11799_v24 }
 0x9b2   : > { %11791 = vadd.xlane.f32.xlu1 %v11790_v58  ;;  %11794 = vadd.xlane.f32.xlu0 %v11793_v50 }
 0x9b6   : > { %11809 = vadd.xlane.f32.xlu1 %v11808_v37  ;;  %11812 = vadd.xlane.f32.xlu0 %v11811_v32 }
 0x9ba   : > { %11803 = vadd.xlane.f32.xlu1 %v11802_v34  ;;  %11806 = vadd.xlane.f32.xlu0 %v11805_v7 }
 0x9be   : > { %11824 = vadd.xlane.f32.xlu0 %v11823_v57  ;;  %11821 = vadd.xlane.f32.xlu1 %v11820_v25 }
 0x9de   : > { %v11738_v21 = vpop.xlane.xlu0 %11737 }
 0x9df   : > { %v11835_v2 = vadd.f32 %v17932_v26, %v11738_v21 }
 0x9e1   : > { %v11867_v63 = vmax.f32 %v11835_v2, 0.0 }
 0x9e2   : > { %v11732_v35 = vpop.xlane.xlu0 %11731 }
 0x9e3   : > { %11900 = vst.msk [vmem:[%s17939_s27 + $0x10] sm:$0xff] %vm11897_vm5, %v11867_v63  ;;  %v11833_v51 = vadd.f32 %v17932_v26, %v11732_v35 }
 0x9e5   : > { %v11865_v1 = vmax.f32 %v11833_v51, 0.0 }
 0x9e6   : > { %v11741_v8 = vpop.xlane.xlu0 %11740 }
 0x9e7   : > { %11898 = vst.msk [vmem:[%s17939_s27] sm:$0xff] %vm11897_vm5, %v11865_v1  ;;  %v11836_v0 = vadd.f32 %v17932_v26, %v11741_v8 }
 0x9e9   : > { %v11868_v9 = vmax.f32 %v11836_v0, 0.0 }
 0x9eb   : > { %11901 = vst.msk [vmem:[%s17939_s27 + $0x18] sm:$0xff] %vm11897_vm5, %v11868_v9 }
 0xa0f   : > { %v11816_v41 = vpop.xlane.xlu1 %11815 }
 0xa10   : > { %v11861_v48 = vadd.f32 %v17932_v26, %v11816_v41 }
 0xa12   : > { %v11893_v31 = vmax.f32 %v11861_v48, 0.0 }
 0xa13   : > { %v11735_v42 = vpop.xlane.xlu1 %11734  ;;  %v11819_v22 = vpop.xlane.xlu0 %11818 }
 0xa14   : > { %11926 = vst.msk [vmem:[%s17939_s27 + $0xe0] sm:$0xff] %vm11897_vm5, %v11893_v31  ;;  %v11834_v29 = vadd.f32 %v17932_v26, %v11735_v42  ;;  %v11862_v16 = vadd.f32 %v17932_v26, %v11819_v22 }
 0xa16   : > { %v11866_v39 = vmax.f32 %v11834_v29, 0.0  ;;  %v11894_v61 = vmax.f32 %v11862_v16, 0.0 }
 0xa17   : > { %v11750_v19 = vpop.xlane.xlu1 %11749  ;;  %v11753_v5 = vpop.xlane.xlu0 %11752 }
 0xa18   : > { %11899 = vst.msk [vmem:[%s17939_s27 + $0x8] sm:$0xff] %vm11897_vm5, %v11866_v39  ;;  %11927 = vst.msk [vmem:[%s17939_s27 + $0xe8] sm:$0xff] %vm11897_vm5, %v11894_v61  ;;  %v11839_v59 = vadd.f32 %v17932_v26, %v11750_v19  ;;  %v11840_v13 = vadd.f32 %v17932_v26, %v11753_v5 }
 0xa1a   : > { %v11871_v52 = vmax.f32 %v11839_v59, 0.0  ;;  %v11872_v47 = vmax.f32 %v11840_v13, 0.0 }
 0xa1b   : > { %v11744_v56 = vpop.xlane.xlu1 %11743  ;;  %v11747_v30 = vpop.xlane.xlu0 %11746 }
 0xa1c   : > { %11904 = vst.msk [vmem:[%s17939_s27 + $0x30] sm:$0xff] %vm11897_vm5, %v11871_v52  ;;  %11905 = vst.msk [vmem:[%s17939_s27 + $0x38] sm:$0xff] %vm11897_vm5, %v11872_v47  ;;  %v11837_v3 = vadd.f32 %v17932_v26, %v11744_v56  ;;  %v11838_v4 = vadd.f32 %v17932_v26, %v11747_v30 }
 0xa1e   : > { %v11869_v14 = vmax.f32 %v11837_v3, 0.0  ;;  %v11870_v17 = vmax.f32 %v11838_v4, 0.0 }
 0xa1f   : > { %v11762_v12 = vpop.xlane.xlu1 %11761  ;;  %v11765_v11 = vpop.xlane.xlu0 %11764 }
 0xa20   : > { %11902 = vst.msk [vmem:[%s17939_s27 + $0x20] sm:$0xff] %vm11897_vm5, %v11869_v14  ;;  %11903 = vst.msk [vmem:[%s17939_s27 + $0x28] sm:$0xff] %vm11897_vm5, %v11870_v17  ;;  %v11843_v38 = vadd.f32 %v17932_v26, %v11762_v12  ;;  %v11844_v54 = vadd.f32 %v17932_v26, %v11765_v11 }
 0xa22   : > { %v11875_v60 = vmax.f32 %v11843_v38, 0.0  ;;  %v11876_v62 = vmax.f32 %v11844_v54, 0.0 }
 0xa23   : > { %v11756_v45 = vpop.xlane.xlu1 %11755  ;;  %v11759_v20 = vpop.xlane.xlu0 %11758 }
 0xa24   : > { %11908 = vst.msk [vmem:[%s17939_s27 + $0x50] sm:$0xff] %vm11897_vm5, %v11875_v60  ;;  %11909 = vst.msk [vmem:[%s17939_s27 + $0x58] sm:$0xff] %vm11897_vm5, %v11876_v62  ;;  %v11841_v6 = vadd.f32 %v17932_v26, %v11756_v45  ;;  %v11842_v53 = vadd.f32 %v17932_v26, %v11759_v20 }
 0xa26   : > { %v11873_v10 = vmax.f32 %v11841_v6, 0.0  ;;  %v11874_v44 = vmax.f32 %v11842_v53, 0.0 }
 0xa27   : > { %v11774_v15 = vpop.xlane.xlu1 %11773  ;;  %v11777_v43 = vpop.xlane.xlu0 %11776 }
 0xa28   : > { %11906 = vst.msk [vmem:[%s17939_s27 + $0x40] sm:$0xff] %vm11897_vm5, %v11873_v10  ;;  %11907 = vst.msk [vmem:[%s17939_s27 + $0x48] sm:$0xff] %vm11897_vm5, %v11874_v44  ;;  %v11847_v27 = vadd.f32 %v17932_v26, %v11774_v15  ;;  %v11848_v46 = vadd.f32 %v17932_v26, %v11777_v43 }
 0xa2a   : > { %v11879_v33 = vmax.f32 %v11847_v27, 0.0  ;;  %v11880_v36 = vmax.f32 %v11848_v46, 0.0 }
 0xa2b   : > { %v11768_v28 = vpop.xlane.xlu1 %11767  ;;  %v11771_v55 = vpop.xlane.xlu0 %11770 }
 0xa2c   : > { %11912 = vst.msk [vmem:[%s17939_s27 + $0x70] sm:$0xff] %vm11897_vm5, %v11879_v33  ;;  %11913 = vst.msk [vmem:[%s17939_s27 + $0x78] sm:$0xff] %vm11897_vm5, %v11880_v36  ;;  %v11845_v49 = vadd.f32 %v17932_v26, %v11768_v28  ;;  %v11846_v18 = vadd.f32 %v17932_v26, %v11771_v55 }
 0xa2e   : > { %v11877_v23 = vmax.f32 %v11845_v49, 0.0  ;;  %v11878_v40 = vmax.f32 %v11846_v18, 0.0 }
 0xa2f   : > { %v11786_v24 = vpop.xlane.xlu1 %11785  ;;  %v11789_v58 = vpop.xlane.xlu0 %11788 }
 0xa30   : > { %11910 = vst.msk [vmem:[%s17939_s27 + $0x60] sm:$0xff] %vm11897_vm5, %v11877_v23  ;;  %11911 = vst.msk [vmem:[%s17939_s27 + $0x68] sm:$0xff] %vm11897_vm5, %v11878_v40  ;;  %v11851_v50 = vadd.f32 %v17932_v26, %v11786_v24  ;;  %v11852_v37 = vadd.f32 %v17932_v26, %v11789_v58 }
 0xa32   : > { %v11883_v32 = vmax.f32 %v11851_v50, 0.0  ;;  %v11884_v34 = vmax.f32 %v11852_v37, 0.0 }
 0xa33   : > { %v11780_v7 = vpop.xlane.xlu1 %11779  ;;  %v11783_v57 = vpop.xlane.xlu0 %11782 }
 0xa34   : > { %11916 = vst.msk [vmem:[%s17939_s27 + $0x90] sm:$0xff] %vm11897_vm5, %v11883_v32  ;;  %11917 = vst.msk [vmem:[%s17939_s27 + $0x98] sm:$0xff] %vm11897_vm5, %v11884_v34  ;;  %v11849_v25 = vadd.f32 %v17932_v26, %v11780_v7  ;;  %v11850_v21 = vadd.f32 %v17932_v26, %v11783_v57 }
 0xa36   : > { %v11881_v2 = vmax.f32 %v11849_v25, 0.0  ;;  %v11882_v63 = vmax.f32 %v11850_v21, 0.0 }
 0xa37   : > { %v11798_v35 = vpop.xlane.xlu1 %11797  ;;  %v11801_v51 = vpop.xlane.xlu0 %11800 }
 0xa38   : > { %11914 = vst.msk [vmem:[%s17939_s27 + $0x80] sm:$0xff] %vm11897_vm5, %v11881_v2  ;;  %11915 = vst.msk [vmem:[%s17939_s27 + $0x88] sm:$0xff] %vm11897_vm5, %v11882_v63  ;;  %v11855_v1 = vadd.f32 %v17932_v26, %v11798_v35  ;;  %v11856_v8 = vadd.f32 %v17932_v26, %v11801_v51 }
 0xa3a   : > { %v11887_v0 = vmax.f32 %v11855_v1, 0.0  ;;  %v11888_v9 = vmax.f32 %v11856_v8, 0.0 }
 0xa3b   : > { %v11792_v41 = vpop.xlane.xlu1 %11791  ;;  %v11795_v48 = vpop.xlane.xlu0 %11794 }
 0xa3c   : > { %11920 = vst.msk [vmem:[%s17939_s27 + $0xb0] sm:$0xff] %vm11897_vm5, %v11887_v0  ;;  %11921 = vst.msk [vmem:[%s17939_s27 + $0xb8] sm:$0xff] %vm11897_vm5, %v11888_v9  ;;  %v11853_v31 = vadd.f32 %v17932_v26, %v11792_v41  ;;  %v11854_v42 = vadd.f32 %v17932_v26, %v11795_v48 }
 0xa3e   : > { %v11885_v22 = vmax.f32 %v11853_v31, 0.0  ;;  %v11886_v29 = vmax.f32 %v11854_v42, 0.0 }
 0xa3f   : > { %v11810_v16 = vpop.xlane.xlu1 %11809  ;;  %v11813_v39 = vpop.xlane.xlu0 %11812 }
 0xa40   : > { %11918 = vst.msk [vmem:[%s17939_s27 + $0xa0] sm:$0xff] %vm11897_vm5, %v11885_v22  ;;  %11919 = vst.msk [vmem:[%s17939_s27 + $0xa8] sm:$0xff] %vm11897_vm5, %v11886_v29  ;;  %v11859_v61 = vadd.f32 %v17932_v26, %v11810_v16  ;;  %v11860_v19 = vadd.f32 %v17932_v26, %v11813_v39 }
 0xa42   : > { %v11891_v5 = vmax.f32 %v11859_v61, 0.0  ;;  %v11892_v59 = vmax.f32 %v11860_v19, 0.0 }
 0xa43   : > { %v11804_v13 = vpop.xlane.xlu1 %11803  ;;  %v11807_v52 = vpop.xlane.xlu0 %11806 }
 0xa44   : > { %11924 = vst.msk [vmem:[%s17939_s27 + $0xd0] sm:$0xff] %vm11897_vm5, %v11891_v5  ;;  %11925 = vst.msk [vmem:[%s17939_s27 + $0xd8] sm:$0xff] %vm11897_vm5, %v11892_v59  ;;  %v11857_v47 = vadd.f32 %v17932_v26, %v11804_v13  ;;  %v11858_v56 = vadd.f32 %v17932_v26, %v11807_v52 }
 0xa46   : > { %v11889_v30 = vmax.f32 %v11857_v47, 0.0  ;;  %v11890_v3 = vmax.f32 %v11858_v56, 0.0 }
 0xa47   : > { %v11825_v4 = vpop.xlane.xlu0 %11824  ;;  %v11822_v14 = vpop.xlane.xlu1 %11821 }
 0xa48   : > { %11922 = vst.msk [vmem:[%s17939_s27 + $0xc0] sm:$0xff] %vm11897_vm5, %v11889_v30  ;;  %11923 = vst.msk [vmem:[%s17939_s27 + $0xc8] sm:$0xff] %vm11897_vm5, %v11890_v3  ;;  %v11864_v17 = vadd.f32 %v17932_v26, %v11825_v4  ;;  %v11863_v12 = vadd.f32 %v17932_v26, %v11822_v14 }
 0xa4a   : > { %v11896_v11 = vmax.f32 %v11864_v17, 0.0  ;;  %v11895_v38 = vmax.f32 %v11863_v12, 0.0 }
 0xa4c   : > { %11929 = vst.msk [vmem:[%s17939_s27 + $0xf8] sm:$0xff] %vm11897_vm5, %v11896_v11  ;;  %11928 = vst.msk [vmem:[%s17939_s27 + $0xf0] sm:$0xff] %vm11897_vm5, %v11895_v38 }
 0xa4d PF: > { %s23_s19 = sadd.s32 1, %s13196_s19  }
 0xa4e   : > { %p20_p4 = scmp.ge.s32.totalorder %s23_s19, 4  }
 0xa50   :  { %22 = sbr.rel (!%p20_p4) target bundleno = 3 (0x3), region = 100 }

</bundles_post_ra>
